<compile_context>
chip_gen: v7x
topology: tpu7x:2x2x1
jax: 0.10.0
libtpu: 0.0.40
codegen_flags: <defaults>
</compile_context>

<pallas_src>
import functools

import jax
import jax.numpy as jnp
from jax.experimental import pallas as pl
from jax.experimental.pallas import tpu as pltpu

EPS = 1e-5          # PyTorch BatchNorm2d default eps
NEG_SLOPE = 0.2     # LeakyReLU slope

# VMEM budgets (bytes).  The fused single-call path must fit under the
# smallest default scoped-VMEM across generations (v5e: 16 MiB); the tiled
# fallback requests vmem_limit_bytes = 32 MiB (== v7x's default scoped limit).
_FUSED_VMEM_BUDGET = 10 * 1024 * 1024
_TILED_VMEM_BUDGET = 24 * 1024 * 1024
_TILED_VMEM_LIMIT = 32 * 1024 * 1024


# ---------------------------------------------------------------------------
# Pallas kernels
# ---------------------------------------------------------------------------
def _fused_conv_bn_lrelu_kernel(p_ref, w_ref, g_ref, b_ref, o_ref):
    """Conv (im2col matmul) + BatchNorm (batch stats) + LeakyReLU, one C-tile.

    The kernel sees ALL M = N*Ho*Wo rows of the layer, so the per-channel
    batch statistics computed from the f32 MXU accumulator are exact.
    """
    inv_m = 1.0 / p_ref.shape[0]
    acc = jnp.dot(p_ref[...], w_ref[...], preferred_element_type=jnp.float32)
    mean = jnp.sum(acc, axis=0, keepdims=True) * inv_m              # (1, tc)
    ex2 = jnp.sum(acc * acc, axis=0, keepdims=True) * inv_m
    var = jnp.maximum(ex2 - mean * mean, 0.0)                       # biased
    scale = g_ref[...] * jax.lax.rsqrt(var + EPS)
    shift = b_ref[...] - mean * scale
    z = acc * scale + shift
    o_ref[...] = jnp.maximum(z, NEG_SLOPE * z).astype(o_ref.dtype)


def _matmul_stats_kernel(p_ref, w_ref, y_ref, st_ref):
    """M-tiled matmul that also emits per-tile partial sum / sum-of-squares."""
    acc = jnp.dot(p_ref[...], w_ref[...], preferred_element_type=jnp.float32)
    y_ref[...] = acc.astype(y_ref.dtype)
    s = jnp.sum(acc, axis=0, keepdims=True)                         # (1, C)
    sq = jnp.sum(acc * acc, axis=0, keepdims=True)
    st_ref[0] = jnp.concatenate(
        [s, sq, jnp.zeros((6, s.shape[1]), jnp.float32)], axis=0)   # (8, C)


def _bn_lrelu_kernel(y_ref, s_ref, t_ref, o_ref):
    """Folded BatchNorm scale/shift + LeakyReLU; bf16 in/out, f32 compute."""
    z = y_ref[...].astype(jnp.float32) * s_ref[...] + t_ref[...]
    o_ref[...] = jnp.maximum(z, NEG_SLOPE * z).astype(o_ref.dtype)


def _conv_sigmoid_kernel(p_ref, w_ref, b_ref, o_ref):
    y = jnp.dot(p_ref[...], w_ref[...],
                preferred_element_type=jnp.float32) + b_ref[...]
    # Exact sigmoid (exp on the EUP + exact divide): keeps the output strictly
    # inside [0, 1] (review: approx reciprocal risks values outside [0, 1]).
    o_ref[...] = 1.0 / (1.0 + jnp.exp(-y))


# ---------------------------------------------------------------------------
# pallas_call wrappers
# ---------------------------------------------------------------------------
def _round_up(x, m):
    return ((x + m - 1) // m) * m


def _fused_conv_bn_lrelu(patches, w, gamma, beta, tc):
    """Whole Conv+BN+LeakyReLU layer as one pallas_call, tiled over Cout."""
    M, K = patches.shape
    C = w.shape[1]
    return pl.pallas_call(
        _fused_conv_bn_lrelu_kernel,
        out_shape=jax.ShapeDtypeStruct((M, C), jnp.bfloat16),
        grid=(C // tc,),
        in_specs=[pl.BlockSpec((M, K), lambda c: (0, 0)),   # constant block
                  pl.BlockSpec((K, tc), lambda c: (0, c)),
                  pl.BlockSpec((1, tc), lambda c: (0, c)),
                  pl.BlockSpec((1, tc), lambda c: (0, c))],
        out_specs=pl.BlockSpec((M, tc), lambda c: (0, c)),
        compiler_params=pltpu.CompilerParams(
            dimension_semantics=("parallel",)),
    )(patches, w, gamma.reshape(1, C), beta.reshape(1, C))


def _conv_matmul_stats(patches, w):
    """Large-M path: tiled matmul + in-kernel partial batch statistics."""
    M, K = patches.shape
    C = w.shape[1]
    fixed = 2 * K * C * 2                   # weight, double-buffered, bf16
    per_row = 2 * (K + C) * 2               # patch row in + y row out, bf16 x2
    m_cap = _round_up(M, 8)
    tm = 8
    for t in (512, 256, 128, 64, 32, 16, 8):
        if t <= m_cap and fixed + t * per_row <= _TILED_VMEM_BUDGET:
            tm = t
            break
    mp = _round_up(M, tm)
    if mp != M:
        # Zero rows contribute 0 to sum and sum-of-squares (no conv bias),
        # so padding is exact; padded rows are sliced off by the caller.
        patches = jnp.pad(patches, ((0, mp - M), (0, 0)))
    nt = mp // tm
    y, stats = pl.pallas_call(
        _matmul_stats_kernel,
        out_shape=(jax.ShapeDtypeStruct((mp, C), jnp.bfloat16),
                   jax.ShapeDtypeStruct((nt, 8, C), jnp.float32)),
        grid=(nt,),
        in_specs=[pl.BlockSpec((tm, K), lambda m: (m, 0)),
                  pl.BlockSpec((K, C), lambda m: (0, 0))],
        out_specs=(pl.BlockSpec((tm, C), lambda m: (m, 0)),
                   pl.BlockSpec((1, 8, C), lambda m: (m, 0, 0))),
        compiler_params=pltpu.CompilerParams(
            dimension_semantics=("parallel",),
            vmem_limit_bytes=_TILED_VMEM_LIMIT),
    )(patches, w)
    return y, stats


def _bn_lrelu(y, scale, shift):
    """Large-M path: per-channel scale/shift + LeakyReLU, bf16 in/out."""
    M, C = y.shape                      # M is already a multiple of 8 here
    per_row = 2 * (C * 2 + C * 2)       # bf16 in + bf16 out, double-buffered
    tm = 8
    for t in (1024, 512, 256, 128, 64, 32, 16, 8):
        if M % t == 0 and t * per_row <= _TILED_VMEM_BUDGET:
            tm = t
            break
    return pl.pallas_call(
        _bn_lrelu_kernel,
        out_shape=jax.ShapeDtypeStruct((M, C), jnp.bfloat16),
        grid=(M // tm,),
        in_specs=[pl.BlockSpec((tm, C), lambda m: (m, 0)),
                  pl.BlockSpec((1, C), lambda m: (0, 0)),
                  pl.BlockSpec((1, C), lambda m: (0, 0))],
        out_specs=pl.BlockSpec((tm, C), lambda m: (m, 0)),
        compiler_params=pltpu.CompilerParams(
            dimension_semantics=("parallel",)),
    )(y, scale.reshape(1, C), shift.reshape(1, C))


def _conv_bn_lrelu(patches, w, gamma, beta):
    """Conv + train-mode BatchNorm + LeakyReLU(0.2); returns bf16 (M, C)."""
    M, K = patches.shape
    C = w.shape[1]
    # Cout tile: 128 when the layer is wide enough -> >=2 "parallel" grid
    # steps for v7x dual-TC sharding at negligible per-step cost for these
    # small-M fused layers (C is always a multiple of 128 here).
    tc = C if C <= 128 else 128
    fused_bytes = 2 * (M * K * 2 + K * tc * 2 + M * tc * 2) + M * tc * 4
    if fused_bytes <= _FUSED_VMEM_BUDGET:
        return _fused_conv_bn_lrelu(patches, w, gamma, beta, tc)

    # Fallback for large M: tiled matmul with fused in-kernel partial batch
    # statistics, a tiny JAX reduction to folded scale/shift, then a bf16
    # normalize + LeakyReLU kernel.
    y, stats = _conv_matmul_stats(patches, w)
    s_tot = jnp.sum(stats[:, 0, :], axis=0)
    sq_tot = jnp.sum(stats[:, 1, :], axis=0)
    mean = s_tot / M
    var = jnp.maximum(sq_tot / M - mean * mean, 0.0)   # biased, as BN uses
    scale = gamma * jax.lax.rsqrt(var + EPS)
    shift = beta - mean * scale
    return _bn_lrelu(y, scale, shift)[:M]


def _conv_sigmoid(patches, w, b):
    """Head conv: matmul + bias + exact sigmoid (tiny M, single block)."""
    M, K = patches.shape
    C = w.shape[1]
    # TODO(synk): pad Cout 1 -> 128 (zero columns) for lane-dense stores if
    # the head output ever grows spatially; at M = batch it is irrelevant.
    return pl.pallas_call(
        _conv_sigmoid_kernel,
        out_shape=jax.ShapeDtypeStruct((M, C), jnp.float32),
        grid=(1,),
        in_specs=[pl.BlockSpec((M, K), lambda m: (0, 0)),
                  pl.BlockSpec((K, C), lambda m: (0, 0)),
                  pl.BlockSpec((1, C), lambda m: (0, 0))],
        out_specs=pl.BlockSpec((M, C), lambda m: (0, 0)),
        compiler_params=pltpu.CompilerParams(
            dimension_semantics=("arbitrary",)),
    )(patches, w, b)


# ---------------------------------------------------------------------------
# JAX glue: im2col patch extraction (reshape/slice only, bf16)
# ---------------------------------------------------------------------------
def _im2col(x_nhwc, k, stride, pad):
    N, H, W, C = x_nhwc.shape
    xp = jnp.pad(x_nhwc, ((0, 0), (pad, pad), (pad, pad), (0, 0)))
    Hp, Wp = H + 2 * pad, W + 2 * pad
    Ho = (Hp - k) // stride + 1
    Wo = (Wp - k) // stride + 1
    cols = []
    for kh in range(k):
        for kw in range(k):
            cols.append(xp[:, kh:kh + stride * (Ho - 1) + 1:stride,
                              kw:kw + stride * (Wo - 1) + 1:stride, :])
    patches = jnp.stack(cols, axis=3)                    # (N, Ho, Wo, k*k, C)
    return patches.reshape(N * Ho * Wo, k * k * C), (N, Ho, Wo)


# ---------------------------------------------------------------------------
# Parameters (deterministic synthetic init matching weights_init_normal)
# ---------------------------------------------------------------------------
def make_params(key):
    def conv_w(kk, cout, cin, pad_cin=0, pad_cout=0):
        # conv weight ~ N(0, 0.02) in (Cout, Cin, kh, kw); zero-pad channels
        # for lane/MXU alignment (exact), relay to (K = kh*kw*Cin_p, Cout_p).
        w = 0.02 * jax.random.normal(kk, (cout, cin, 4, 4), jnp.float32)
        if pad_cin or pad_cout:
            w = jnp.pad(w, ((0, pad_cout), (0, pad_cin), (0, 0), (0, 0)))
        cin_p, cout_p = cin + pad_cin, cout + pad_cout
        w = jnp.transpose(w, (2, 3, 1, 0)).reshape(16 * cin_p, cout_p)
        return w.astype(jnp.bfloat16)

    params = {}
    k = key

    # conv1: Cin 4 -> 8, Cout 64 -> 128 (padded channels: zero weight/gamma).
    k, k1, k2 = jax.random.split(k, 3)
    w1 = conv_w(k1, 64, 4, pad_cin=4, pad_cout=64)
    g1 = jnp.pad(1.0 + 0.02 * jax.random.normal(k2, (64,), jnp.float32), (0, 64))
    params["conv1"] = (w1, g1, jnp.zeros((128,), jnp.float32))

    # conv2 consumes the 128 (64 real + 64 zero) channels of conv1's output.
    k, k1, k2 = jax.random.split(k, 3)
    w2 = conv_w(k1, 128, 64, pad_cin=64)
    g2 = 1.0 + 0.02 * jax.random.normal(k2, (128,), jnp.float32)
    params["conv2"] = (w2, g2, jnp.zeros((128,), jnp.float32))

    for i, (cin, cout) in zip((3, 4), [(128, 256), (256, 512)]):
        k, k1, k2 = jax.random.split(k, 3)
        w = conv_w(k1, cout, cin)
        g = 1.0 + 0.02 * jax.random.normal(k2, (cout,), jnp.float32)
        params[f"conv{i}"] = (w, g, jnp.zeros((cout,), jnp.float32))

    # Conv biases of the BN blocks are omitted: exactly absorbed by BN's mean
    # subtraction (and initialized to zero in the PyTorch reference anyway).
    k, k1 = jax.random.split(k)
    params["conv_out"] = (conv_w(k1, 1, 512), jnp.zeros((1, 1), jnp.float32))
    return params


# ---------------------------------------------------------------------------
# Forward pass
# ---------------------------------------------------------------------------
def discriminator_forward(params, x_nchw, cond_nchw):
    x = jnp.concatenate([x_nchw, cond_nchw], axis=1)      # cat on channel dim
    x = jnp.transpose(x, (0, 2, 3, 1))                    # -> NHWC
    # Zero-pad input channels 4 -> 8 (conv1 weight rows for them are zero);
    # intermediates stay bf16 end to end from here on.
    x = jnp.pad(x, ((0, 0), (0, 0), (0, 0), (0, 4))).astype(jnp.bfloat16)

    for i in range(1, 5):
        w, gamma, beta = params[f"conv{i}"]
        C = w.shape[1]
        patches, (N, Ho, Wo) = _im2col(x, k=4, stride=2, pad=1)
        x = _conv_bn_lrelu(patches, w, gamma, beta).reshape(N, Ho, Wo, C)

    w, b = params["conv_out"]
    patches, (N, Ho, Wo) = _im2col(x, k=4, stride=1, pad=1)
    out = _conv_sigmoid(patches, w, b)                     # (M, 1) f32
    return jnp.transpose(out.reshape(N, Ho, Wo, 1), (0, 3, 1, 2))  # -> NCHW


if __name__ == "__main__":
    key = jax.random.PRNGKey(0)
    kx, kc, kp = jax.random.split(key, 3)
    # x and condition each carry 2 channels -> concat gives conv1's 4 inputs.
    # Spatial 32 so the 4 stride-2 convs + final k4/s1/p1 conv give 1x1 output.
    x = jax.random.normal(kx, (2, 2, 32, 32), jnp.float32)
    cond = jax.random.normal(kc, (2, 2, 32, 32), jnp.float32)
    params = make_params(kp)

    fwd = jax.jit(functools.partial(discriminator_forward, params))
    out = fwd(x, cond)
    jax.block_until_ready(out)
    assert out.shape == (2, 1, 1, 1), out.shape
    assert bool(jnp.all(jnp.isfinite(out)))
    assert bool(jnp.all((out >= 0.0) & (out <= 1.0)))   # exact sigmoid bounds
    print("KERNEL_OK")
</pallas_src>

<mosaic_0001>
module attributes {stable_mosaic.version = 11 : i64} {
  func.func @_fused_conv_bn_lrelu_kernel(%arg0: i32, %arg1: memref<512x128xbf16, #tpu.memory_space<vmem>>, %arg2: memref<128x128xbf16, #tpu.memory_space<vmem>>, %arg3: memref<1x128xf32, #tpu.memory_space<vmem>>, %arg4: memref<1x128xf32, #tpu.memory_space<vmem>>, %arg5: memref<512x128xbf16, #tpu.memory_space<vmem>>) attributes {dimension_semantics = [#tpu.dimension_semantics<parallel>], iteration_bounds = array<i64: 1>, scalar_prefetch = 0 : i64, scratch_operands = 0 : i64, tpu.core_type = #tpu.core_type<tc>, window_params = [{pipeline_mode = #tpu.pipeline_mode<synchronous>, transform_indices = @transform_0, window_bounds = array<i64: 512, 128>}, {transform_indices = @transform_1, window_bounds = array<i64: 128, 128>}, {transform_indices = @transform_2, window_bounds = array<i64: 1, 128>}, {transform_indices = @transform_3, window_bounds = array<i64: 1, 128>}, {transform_indices = @transform_4, window_bounds = array<i64: 512, 128>}]} {
    %c0 = arith.constant 0 : index
    %c0_0 = arith.constant 0 : index
    %0 = vector.load %arg1[%c0, %c0_0] : memref<512x128xbf16, #tpu.memory_space<vmem>>, vector<512x128xbf16>
    %c0_1 = arith.constant 0 : index
    %c0_2 = arith.constant 0 : index
    %1 = vector.load %arg2[%c0_1, %c0_2] : memref<128x128xbf16, #tpu.memory_space<vmem>>, vector<128x128xbf16>
    %cst = arith.constant dense<0.000000e+00> : vector<512x128xf32>
    %2 = tpu.matmul %0, %1, %cst {dimension_numbers = #tpu.dot_dimension_numbers<[1], [0], [0], [1], [0, 0, 1, 1], [], []>} : vector<512x128xbf16>, vector<128x128xbf16>, vector<512x128xf32> -> vector<512x128xf32>
    %cst_3 = arith.constant dense<0.000000e+00> : vector<128xf32>
    %3 = vector.multi_reduction <add>, %2, %cst_3 [0] : vector<512x128xf32> to vector<128xf32>
    %4 = vector.shape_cast %3 : vector<128xf32> to vector<1x128xf32>
    %cst_4 = arith.constant 0.001953125 : f32
    %5 = vector.broadcast %cst_4 : f32 to vector<1x128xf32>
    %6 = arith.mulf %4, %5 : vector<1x128xf32>
    %7 = arith.mulf %2, %2 : vector<512x128xf32>
    %cst_5 = arith.constant dense<0.000000e+00> : vector<128xf32>
    %8 = vector.multi_reduction <add>, %7, %cst_5 [0] : vector<512x128xf32> to vector<128xf32>
    %9 = vector.shape_cast %8 : vector<128xf32> to vector<1x128xf32>
    %cst_6 = arith.constant 0.001953125 : f32
    %10 = vector.broadcast %cst_6 : f32 to vector<1x128xf32>
    %11 = arith.mulf %9, %10 : vector<1x128xf32>
    %12 = arith.mulf %6, %6 : vector<1x128xf32>
    %13 = arith.subf %11, %12 : vector<1x128xf32>
    %cst_7 = arith.constant 0.000000e+00 : f32
    %14 = vector.broadcast %cst_7 : f32 to vector<1x128xf32>
    %15 = arith.maximumf %13, %14 : vector<1x128xf32>
    %c0_8 = arith.constant 0 : index
    %c0_9 = arith.constant 0 : index
    %16 = vector.load %arg3[%c0_8, %c0_9] : memref<1x128xf32, #tpu.memory_space<vmem>>, vector<1x128xf32>
    %cst_10 = arith.constant 9.99999974E-6 : f32
    %17 = vector.broadcast %cst_10 : f32 to vector<1x128xf32>
    %18 = arith.addf %15, %17 : vector<1x128xf32>
    %19 = math.rsqrt %18 : vector<1x128xf32>
    %20 = arith.mulf %16, %19 : vector<1x128xf32>
    %c0_11 = arith.constant 0 : index
    %c0_12 = arith.constant 0 : index
    %21 = vector.load %arg4[%c0_11, %c0_12] : memref<1x128xf32, #tpu.memory_space<vmem>>, vector<1x128xf32>
    %22 = arith.mulf %6, %20 : vector<1x128xf32>
    %23 = arith.subf %21, %22 : vector<1x128xf32>
    %24 = vector.broadcast %20 : vector<1x128xf32> to vector<512x128xf32>
    %25 = arith.mulf %2, %24 : vector<512x128xf32>
    %26 = vector.broadcast %23 : vector<1x128xf32> to vector<512x128xf32>
    %27 = arith.addf %25, %26 : vector<512x128xf32>
    %cst_13 = arith.constant 2.000000e-01 : f32
    %28 = vector.broadcast %cst_13 : f32 to vector<512x128xf32>
    %29 = arith.mulf %28, %27 : vector<512x128xf32>
    %30 = arith.maximumf %27, %29 : vector<512x128xf32>
    %31 = arith.truncf %30 : vector<512x128xf32> to vector<512x128xbf16>
    %c0_14 = arith.constant 0 : index
    %c0_15 = arith.constant 0 : index
    %32 = vector.load %arg5[%c0_14, %c0_15] : memref<512x128xbf16, #tpu.memory_space<vmem>>, vector<512x128xbf16>
    tpu.vector_store %arg5[%c0_14, %c0_15], %31 {strides = array<i32>} : memref<512x128xbf16, #tpu.memory_space<vmem>>, vector<512x128xbf16>,
    return
  }
  func.func @transform_0(%arg0: i32) -> (i32, i32) {
    %c0_i32 = arith.constant 0 : i32
    %c0_i32_0 = arith.constant 0 : i32
    %c0_i32_1 = arith.constant 0 : i32
    return %c0_i32, %c0_i32_0 : i32, i32
  }
  func.func @transform_1(%arg0: i32) -> (i32, i32) {
    %c0_i32 = arith.constant 0 : i32
    %c0_i32_0 = arith.constant 0 : i32
    return %c0_i32, %arg0 : i32, i32
  }
  func.func @transform_2(%arg0: i32) -> (i32, i32) {
    %c0_i32 = arith.constant 0 : i32
    %c0_i32_0 = arith.constant 0 : i32
    return %c0_i32, %arg0 : i32, i32
  }
  func.func @transform_3(%arg0: i32) -> (i32, i32) {
    %c0_i32 = arith.constant 0 : i32
    %c0_i32_0 = arith.constant 0 : i32
    return %c0_i32, %arg0 : i32, i32
  }
  func.func @transform_4(%arg0: i32) -> (i32, i32) {
    %c0_i32 = arith.constant 0 : i32
    %c0_i32_0 = arith.constant 0 : i32
    return %c0_i32, %arg0 : i32, i32
  }
}

module attributes {stable_mosaic.version = 11 : i64} {
  func.func @_fused_conv_bn_lrelu_kernel(%arg0: i32, %arg1: memref<128x2048xbf16, #tpu.memory_space<vmem>>, %arg2: memref<2048x128xbf16, #tpu.memory_space<vmem>>, %arg3: memref<1x128xf32, #tpu.memory_space<vmem>>, %arg4: memref<1x128xf32, #tpu.memory_space<vmem>>, %arg5: memref<128x128xbf16, #tpu.memory_space<vmem>>) attributes {dimension_semantics = [#tpu.dimension_semantics<parallel>], iteration_bounds = array<i64: 1>, scalar_prefetch = 0 : i64, scratch_operands = 0 : i64, tpu.core_type = #tpu.core_type<tc>, window_params = [{pipeline_mode = #tpu.pipeline_mode<synchronous>, transform_indices = @transform_0, window_bounds = array<i64: 128, 2048>}, {transform_indices = @transform_1, window_bounds = array<i64: 2048, 128>}, {transform_indices = @transform_2, window_bounds = array<i64: 1, 128>}, {transform_indices = @transform_3, window_bounds = array<i64: 1, 128>}, {transform_indices = @transform_4, window_bounds = array<i64: 128, 128>}]} {
    %c0 = arith.constant 0 : index
    %c0_0 = arith.constant 0 : index
    %0 = vector.load %arg1[%c0, %c0_0] : memref<128x2048xbf16, #tpu.memory_space<vmem>>, vector<128x2048xbf16>
    %c0_1 = arith.constant 0 : index
    %c0_2 = arith.constant 0 : index
    %1 = vector.load %arg2[%c0_1, %c0_2] : memref<2048x128xbf16, #tpu.memory_space<vmem>>, vector<2048x128xbf16>
    %cst = arith.constant dense<0.000000e+00> : vector<128x128xf32>
    %2 = tpu.matmul %0, %1, %cst {dimension_numbers = #tpu.dot_dimension_numbers<[1], [0], [0], [1], [0, 0, 1, 1], [], []>} : vector<128x2048xbf16>, vector<2048x128xbf16>, vector<128x128xf32> -> vector<128x128xf32>
    %cst_3 = arith.constant dense<0.000000e+00> : vector<128xf32>
    %3 = vector.multi_reduction <add>, %2, %cst_3 [0] : vector<128x128xf32> to vector<128xf32>
    %4 = vector.shape_cast %3 : vector<128xf32> to vector<1x128xf32>
    %cst_4 = arith.constant 7.812500e-03 : f32
    %5 = vector.broadcast %cst_4 : f32 to vector<1x128xf32>
    %6 = arith.mulf %4, %5 : vector<1x128xf32>
    %7 = arith.mulf %2, %2 : vector<128x128xf32>
    %cst_5 = arith.constant dense<0.000000e+00> : vector<128xf32>
    %8 = vector.multi_reduction <add>, %7, %cst_5 [0] : vector<128x128xf32> to vector<128xf32>
    %9 = vector.shape_cast %8 : vector<128xf32> to vector<1x128xf32>
    %cst_6 = arith.constant 7.812500e-03 : f32
    %10 = vector.broadcast %cst_6 : f32 to vector<1x128xf32>
    %11 = arith.mulf %9, %10 : vector<1x128xf32>
    %12 = arith.mulf %6, %6 : vector<1x128xf32>
    %13 = arith.subf %11, %12 : vector<1x128xf32>
    %cst_7 = arith.constant 0.000000e+00 : f32
    %14 = vector.broadcast %cst_7 : f32 to vector<1x128xf32>
    %15 = arith.maximumf %13, %14 : vector<1x128xf32>
    %c0_8 = arith.constant 0 : index
    %c0_9 = arith.constant 0 : index
    %16 = vector.load %arg3[%c0_8, %c0_9] : memref<1x128xf32, #tpu.memory_space<vmem>>, vector<1x128xf32>
    %cst_10 = arith.constant 9.99999974E-6 : f32
    %17 = vector.broadcast %cst_10 : f32 to vector<1x128xf32>
    %18 = arith.addf %15, %17 : vector<1x128xf32>
    %19 = math.rsqrt %18 : vector<1x128xf32>
    %20 = arith.mulf %16, %19 : vector<1x128xf32>
    %c0_11 = arith.constant 0 : index
    %c0_12 = arith.constant 0 : index
    %21 = vector.load %arg4[%c0_11, %c0_12] : memref<1x128xf32, #tpu.memory_space<vmem>>, vector<1x128xf32>
    %22 = arith.mulf %6, %20 : vector<1x128xf32>
    %23 = arith.subf %21, %22 : vector<1x128xf32>
    %24 = vector.broadcast %20 : vector<1x128xf32> to vector<128x128xf32>
    %25 = arith.mulf %2, %24 : vector<128x128xf32>
    %26 = vector.broadcast %23 : vector<1x128xf32> to vector<128x128xf32>
    %27 = arith.addf %25, %26 : vector<128x128xf32>
    %cst_13 = arith.constant 2.000000e-01 : f32
    %28 = vector.broadcast %cst_13 : f32 to vector<128x128xf32>
    %29 = arith.mulf %28, %27 : vector<128x128xf32>
    %30 = arith.maximumf %27, %29 : vector<128x128xf32>
    %31 = arith.truncf %30 : vector<128x128xf32> to vector<128x128xbf16>
    %c0_14 = arith.constant 0 : index
    %c0_15 = arith.constant 0 : index
    %32 = vector.load %arg5[%c0_14, %c0_15] : memref<128x128xbf16, #tpu.memory_space<vmem>>, vector<128x128xbf16>
    tpu.vector_store %arg5[%c0_14, %c0_15], %31 {strides = array<i32>} : memref<128x128xbf16, #tpu.memory_space<vmem>>, vector<128x128xbf16>,
    return
  }
  func.func @transform_0(%arg0: i32) -> (i32, i32) {
    %c0_i32 = arith.constant 0 : i32
    %c0_i32_0 = arith.constant 0 : i32
    %c0_i32_1 = arith.constant 0 : i32
    return %c0_i32, %c0_i32_0 : i32, i32
  }
  func.func @transform_1(%arg0: i32) -> (i32, i32) {
    %c0_i32 = arith.constant 0 : i32
    %c0_i32_0 = arith.constant 0 : i32
    return %c0_i32, %arg0 : i32, i32
  }
  func.func @transform_2(%arg0: i32) -> (i32, i32) {
    %c0_i32 = arith.constant 0 : i32
    %c0_i32_0 = arith.constant 0 : i32
    return %c0_i32, %arg0 : i32, i32
  }
  func.func @transform_3(%arg0: i32) -> (i32, i32) {
    %c0_i32 = arith.constant 0 : i32
    %c0_i32_0 = arith.constant 0 : i32
    return %c0_i32, %arg0 : i32, i32
  }
  func.func @transform_4(%arg0: i32) -> (i32, i32) {
    %c0_i32 = arith.constant 0 : i32
    %c0_i32_0 = arith.constant 0 : i32
    return %c0_i32, %arg0 : i32, i32
  }
}

module attributes {stable_mosaic.version = 11 : i64} {
  func.func @_fused_conv_bn_lrelu_kernel(%arg0: i32, %arg1: memref<32x2048xbf16, #tpu.memory_space<vmem>>, %arg2: memref<2048x128xbf16, #tpu.memory_space<vmem>>, %arg3: memref<1x128xf32, #tpu.memory_space<vmem>>, %arg4: memref<1x128xf32, #tpu.memory_space<vmem>>, %arg5: memref<32x128xbf16, #tpu.memory_space<vmem>>) attributes {dimension_semantics = [#tpu.dimension_semantics<parallel>], iteration_bounds = array<i64: 2>, scalar_prefetch = 0 : i64, scratch_operands = 0 : i64, tpu.core_type = #tpu.core_type<tc>, window_params = [{pipeline_mode = #tpu.pipeline_mode<synchronous>, transform_indices = @transform_0, window_bounds = array<i64: 32, 2048>}, {transform_indices = @transform_1, window_bounds = array<i64: 2048, 128>}, {transform_indices = @transform_2, window_bounds = array<i64: 1, 128>}, {transform_indices = @transform_3, window_bounds = array<i64: 1, 128>}, {transform_indices = @transform_4, window_bounds = array<i64: 32, 128>}]} {
    %c0 = arith.constant 0 : index
    %c0_0 = arith.constant 0 : index
    %0 = vector.load %arg1[%c0, %c0_0] : memref<32x2048xbf16, #tpu.memory_space<vmem>>, vector<32x2048xbf16>
    %c0_1 = arith.constant 0 : index
    %c0_2 = arith.constant 0 : index
    %1 = vector.load %arg2[%c0_1, %c0_2] : memref<2048x128xbf16, #tpu.memory_space<vmem>>, vector<2048x128xbf16>
    %cst = arith.constant dense<0.000000e+00> : vector<32x128xf32>
    %2 = tpu.matmul %0, %1, %cst {dimension_numbers = #tpu.dot_dimension_numbers<[1], [0], [0], [1], [0, 0, 1, 1], [], []>} : vector<32x2048xbf16>, vector<2048x128xbf16>, vector<32x128xf32> -> vector<32x128xf32>
    %cst_3 = arith.constant dense<0.000000e+00> : vector<128xf32>
    %3 = vector.multi_reduction <add>, %2, %cst_3 [0] : vector<32x128xf32> to vector<128xf32>
    %4 = vector.shape_cast %3 : vector<128xf32> to vector<1x128xf32>
    %cst_4 = arith.constant 3.125000e-02 : f32
    %5 = vector.broadcast %cst_4 : f32 to vector<1x128xf32>
    %6 = arith.mulf %4, %5 : vector<1x128xf32>
    %7 = arith.mulf %2, %2 : vector<32x128xf32>
    %cst_5 = arith.constant dense<0.000000e+00> : vector<128xf32>
    %8 = vector.multi_reduction <add>, %7, %cst_5 [0] : vector<32x128xf32> to vector<128xf32>
    %9 = vector.shape_cast %8 : vector<128xf32> to vector<1x128xf32>
    %cst_6 = arith.constant 3.125000e-02 : f32
    %10 = vector.broadcast %cst_6 : f32 to vector<1x128xf32>
    %11 = arith.mulf %9, %10 : vector<1x128xf32>
    %12 = arith.mulf %6, %6 : vector<1x128xf32>
    %13 = arith.subf %11, %12 : vector<1x128xf32>
    %cst_7 = arith.constant 0.000000e+00 : f32
    %14 = vector.broadcast %cst_7 : f32 to vector<1x128xf32>
    %15 = arith.maximumf %13, %14 : vector<1x128xf32>
    %c0_8 = arith.constant 0 : index
    %c0_9 = arith.constant 0 : index
    %16 = vector.load %arg3[%c0_8, %c0_9] : memref<1x128xf32, #tpu.memory_space<vmem>>, vector<1x128xf32>
    %cst_10 = arith.constant 9.99999974E-6 : f32
    %17 = vector.broadcast %cst_10 : f32 to vector<1x128xf32>
    %18 = arith.addf %15, %17 : vector<1x128xf32>
    %19 = math.rsqrt %18 : vector<1x128xf32>
    %20 = arith.mulf %16, %19 : vector<1x128xf32>
    %c0_11 = arith.constant 0 : index
    %c0_12 = arith.constant 0 : index
    %21 = vector.load %arg4[%c0_11, %c0_12] : memref<1x128xf32, #tpu.memory_space<vmem>>, vector<1x128xf32>
    %22 = arith.mulf %6, %20 : vector<1x128xf32>
    %23 = arith.subf %21, %22 : vector<1x128xf32>
    %24 = vector.broadcast %20 : vector<1x128xf32> to vector<32x128xf32>
    %25 = arith.mulf %2, %24 : vector<32x128xf32>
    %26 = vector.broadcast %23 : vector<1x128xf32> to vector<32x128xf32>
    %27 = arith.addf %25, %26 : vector<32x128xf32>
    %cst_13 = arith.constant 2.000000e-01 : f32
    %28 = vector.broadcast %cst_13 : f32 to vector<32x128xf32>
    %29 = arith.mulf %28, %27 : vector<32x128xf32>
    %30 = arith.maximumf %27, %29 : vector<32x128xf32>
    %31 = arith.truncf %30 : vector<32x128xf32> to vector<32x128xbf16>
    %c0_14 = arith.constant 0 : index
    %c0_15 = arith.constant 0 : index
    %32 = vector.load %arg5[%c0_14, %c0_15] : memref<32x128xbf16, #tpu.memory_space<vmem>>, vector<32x128xbf16>
    tpu.vector_store %arg5[%c0_14, %c0_15], %31 {strides = array<i32>} : memref<32x128xbf16, #tpu.memory_space<vmem>>, vector<32x128xbf16>,
    return
  }
  func.func @transform_0(%arg0: i32) -> (i32, i32) {
    %c0_i32 = arith.constant 0 : i32
    %c0_i32_0 = arith.constant 0 : i32
    %c0_i32_1 = arith.constant 0 : i32
    return %c0_i32, %c0_i32_0 : i32, i32
  }
  func.func @transform_1(%arg0: i32) -> (i32, i32) {
    %c0_i32 = arith.constant 0 : i32
    %c0_i32_0 = arith.constant 0 : i32
    return %c0_i32, %arg0 : i32, i32
  }
  func.func @transform_2(%arg0: i32) -> (i32, i32) {
    %c0_i32 = arith.constant 0 : i32
    %c0_i32_0 = arith.constant 0 : i32
    return %c0_i32, %arg0 : i32, i32
  }
  func.func @transform_3(%arg0: i32) -> (i32, i32) {
    %c0_i32 = arith.constant 0 : i32
    %c0_i32_0 = arith.constant 0 : i32
    return %c0_i32, %arg0 : i32, i32
  }
  func.func @transform_4(%arg0: i32) -> (i32, i32) {
    %c0_i32 = arith.constant 0 : i32
    %c0_i32_0 = arith.constant 0 : i32
    return %c0_i32, %arg0 : i32, i32
  }
}

module attributes {stable_mosaic.version = 11 : i64} {
  func.func @_fused_conv_bn_lrelu_kernel(%arg0: i32, %arg1: memref<8x4096xbf16, #tpu.memory_space<vmem>>, %arg2: memref<4096x128xbf16, #tpu.memory_space<vmem>>, %arg3: memref<1x128xf32, #tpu.memory_space<vmem>>, %arg4: memref<1x128xf32, #tpu.memory_space<vmem>>, %arg5: memref<8x128xbf16, #tpu.memory_space<vmem>>) attributes {dimension_semantics = [#tpu.dimension_semantics<parallel>], iteration_bounds = array<i64: 4>, scalar_prefetch = 0 : i64, scratch_operands = 0 : i64, tpu.core_type = #tpu.core_type<tc>, window_params = [{pipeline_mode = #tpu.pipeline_mode<synchronous>, transform_indices = @transform_0, window_bounds = array<i64: 8, 4096>}, {transform_indices = @transform_1, window_bounds = array<i64: 4096, 128>}, {transform_indices = @transform_2, window_bounds = array<i64: 1, 128>}, {transform_indices = @transform_3, window_bounds = array<i64: 1, 128>}, {transform_indices = @transform_4, window_bounds = array<i64: 8, 128>}]} {
    %c0 = arith.constant 0 : index
    %c0_0 = arith.constant 0 : index
    %0 = vector.load %arg1[%c0, %c0_0] : memref<8x4096xbf16, #tpu.memory_space<vmem>>, vector<8x4096xbf16>
    %c0_1 = arith.constant 0 : index
    %c0_2 = arith.constant 0 : index
    %1 = vector.load %arg2[%c0_1, %c0_2] : memref<4096x128xbf16, #tpu.memory_space<vmem>>, vector<4096x128xbf16>
    %cst = arith.constant dense<0.000000e+00> : vector<8x128xf32>
    %2 = tpu.matmul %0, %1, %cst {dimension_numbers = #tpu.dot_dimension_numbers<[1], [0], [0], [1], [0, 0, 1, 1], [], []>} : vector<8x4096xbf16>, vector<4096x128xbf16>, vector<8x128xf32> -> vector<8x128xf32>
    %cst_3 = arith.constant dense<0.000000e+00> : vector<128xf32>
    %3 = vector.multi_reduction <add>, %2, %cst_3 [0] : vector<8x128xf32> to vector<128xf32>
    %4 = vector.shape_cast %3 : vector<128xf32> to vector<1x128xf32>
    %cst_4 = arith.constant 1.250000e-01 : f32
    %5 = vector.broadcast %cst_4 : f32 to vector<1x128xf32>
    %6 = arith.mulf %4, %5 : vector<1x128xf32>
    %7 = arith.mulf %2, %2 : vector<8x128xf32>
    %cst_5 = arith.constant dense<0.000000e+00> : vector<128xf32>
    %8 = vector.multi_reduction <add>, %7, %cst_5 [0] : vector<8x128xf32> to vector<128xf32>
    %9 = vector.shape_cast %8 : vector<128xf32> to vector<1x128xf32>
    %cst_6 = arith.constant 1.250000e-01 : f32
    %10 = vector.broadcast %cst_6 : f32 to vector<1x128xf32>
    %11 = arith.mulf %9, %10 : vector<1x128xf32>
    %12 = arith.mulf %6, %6 : vector<1x128xf32>
    %13 = arith.subf %11, %12 : vector<1x128xf32>
    %cst_7 = arith.constant 0.000000e+00 : f32
    %14 = vector.broadcast %cst_7 : f32 to vector<1x128xf32>
    %15 = arith.maximumf %13, %14 : vector<1x128xf32>
    %c0_8 = arith.constant 0 : index
    %c0_9 = arith.constant 0 : index
    %16 = vector.load %arg3[%c0_8, %c0_9] : memref<1x128xf32, #tpu.memory_space<vmem>>, vector<1x128xf32>
    %cst_10 = arith.constant 9.99999974E-6 : f32
    %17 = vector.broadcast %cst_10 : f32 to vector<1x128xf32>
    %18 = arith.addf %15, %17 : vector<1x128xf32>
    %19 = math.rsqrt %18 : vector<1x128xf32>
    %20 = arith.mulf %16, %19 : vector<1x128xf32>
    %c0_11 = arith.constant 0 : index
    %c0_12 = arith.constant 0 : index
    %21 = vector.load %arg4[%c0_11, %c0_12] : memref<1x128xf32, #tpu.memory_space<vmem>>, vector<1x128xf32>
    %22 = arith.mulf %6, %20 : vector<1x128xf32>
    %23 = arith.subf %21, %22 : vector<1x128xf32>
    %24 = vector.broadcast %20 : vector<1x128xf32> to vector<8x128xf32>
    %25 = arith.mulf %2, %24 : vector<8x128xf32>
    %26 = vector.broadcast %23 : vector<1x128xf32> to vector<8x128xf32>
    %27 = arith.addf %25, %26 : vector<8x128xf32>
    %cst_13 = arith.constant 2.000000e-01 : f32
    %28 = vector.broadcast %cst_13 : f32 to vector<8x128xf32>
    %29 = arith.mulf %28, %27 : vector<8x128xf32>
    %30 = arith.maximumf %27, %29 : vector<8x128xf32>
    %31 = arith.truncf %30 : vector<8x128xf32> to vector<8x128xbf16>
    %c0_14 = arith.constant 0 : index
    %c0_15 = arith.constant 0 : index
    %32 = vector.load %arg5[%c0_14, %c0_15] : memref<8x128xbf16, #tpu.memory_space<vmem>>, vector<8x128xbf16>
    tpu.vector_store %arg5[%c0_14, %c0_15], %31 {strides = array<i32>} : memref<8x128xbf16, #tpu.memory_space<vmem>>, vector<8x128xbf16>,
    return
  }
  func.func @transform_0(%arg0: i32) -> (i32, i32) {
    %c0_i32 = arith.constant 0 : i32
    %c0_i32_0 = arith.constant 0 : i32
    %c0_i32_1 = arith.constant 0 : i32
    return %c0_i32, %c0_i32_0 : i32, i32
  }
  func.func @transform_1(%arg0: i32) -> (i32, i32) {
    %c0_i32 = arith.constant 0 : i32
    %c0_i32_0 = arith.constant 0 : i32
    return %c0_i32, %arg0 : i32, i32
  }
  func.func @transform_2(%arg0: i32) -> (i32, i32) {
    %c0_i32 = arith.constant 0 : i32
    %c0_i32_0 = arith.constant 0 : i32
    return %c0_i32, %arg0 : i32, i32
  }
  func.func @transform_3(%arg0: i32) -> (i32, i32) {
    %c0_i32 = arith.constant 0 : i32
    %c0_i32_0 = arith.constant 0 : i32
    return %c0_i32, %arg0 : i32, i32
  }
  func.func @transform_4(%arg0: i32) -> (i32, i32) {
    %c0_i32 = arith.constant 0 : i32
    %c0_i32_0 = arith.constant 0 : i32
    return %c0_i32, %arg0 : i32, i32
  }
}

module attributes {stable_mosaic.version = 11 : i64} {
  func.func @_conv_sigmoid_kernel(%arg0: i32, %arg1: memref<2x8192xbf16, #tpu.memory_space<vmem>>, %arg2: memref<8192x1xbf16, #tpu.memory_space<vmem>>, %arg3: memref<1x1xf32, #tpu.memory_space<vmem>>, %arg4: memref<2x1xf32, #tpu.memory_space<vmem>>) attributes {dimension_semantics = [#tpu.dimension_semantics<arbitrary>], iteration_bounds = array<i64: 1>, scalar_prefetch = 0 : i64, scratch_operands = 0 : i64, tpu.core_type = #tpu.core_type<tc>, window_params = [{pipeline_mode = #tpu.pipeline_mode<synchronous>, transform_indices = @transform_0, window_bounds = array<i64: 2, 8192>}, {pipeline_mode = #tpu.pipeline_mode<synchronous>, transform_indices = @transform_1, window_bounds = array<i64: 8192, 1>}, {pipeline_mode = #tpu.pipeline_mode<synchronous>, transform_indices = @transform_2, window_bounds = array<i64: 1, 1>}, {pipeline_mode = #tpu.pipeline_mode<synchronous>, transform_indices = @transform_3, window_bounds = array<i64: 2, 1>}]} {
    %c0 = arith.constant 0 : index
    %c0_0 = arith.constant 0 : index
    %0 = vector.load %arg1[%c0, %c0_0] : memref<2x8192xbf16, #tpu.memory_space<vmem>>, vector<2x8192xbf16>
    %c0_1 = arith.constant 0 : index
    %c0_2 = arith.constant 0 : index
    %1 = vector.load %arg2[%c0_1, %c0_2] : memref<8192x1xbf16, #tpu.memory_space<vmem>>, vector<8192x1xbf16>
    %cst = arith.constant dense<0.000000e+00> : vector<2x1xf32>
    %2 = tpu.matmul %0, %1, %cst {dimension_numbers = #tpu.dot_dimension_numbers<[1], [0], [0], [1], [0, 0, 1, 1], [], []>} : vector<2x8192xbf16>, vector<8192x1xbf16>, vector<2x1xf32> -> vector<2x1xf32>
    %c0_3 = arith.constant 0 : index
    %c0_4 = arith.constant 0 : index
    %3 = vector.load %arg3[%c0_3, %c0_4] : memref<1x1xf32, #tpu.memory_space<vmem>>, vector<1x1xf32>
    %4 = vector.broadcast %3 : vector<1x1xf32> to vector<2x1xf32>
    %5 = arith.addf %2, %4 : vector<2x1xf32>
    %cst_5 = arith.constant 0.000000e+00 : f32
    %6 = vector.broadcast %cst_5 : f32 to vector<2x1xf32>
    %7 = arith.subf %6, %5 : vector<2x1xf32>
    %8 = math.exp %7 : vector<2x1xf32>
    %cst_6 = arith.constant 1.000000e+00 : f32
    %9 = vector.broadcast %cst_6 : f32 to vector<2x1xf32>
    %10 = arith.addf %9, %8 : vector<2x1xf32>
    %cst_7 = arith.constant 1.000000e+00 : f32
    %11 = vector.broadcast %cst_7 : f32 to vector<2x1xf32>
    %12 = arith.divf %11, %10 : vector<2x1xf32>
    %c0_8 = arith.constant 0 : index
    %c0_9 = arith.constant 0 : index
    %13 = vector.load %arg4[%c0_8, %c0_9] : memref<2x1xf32, #tpu.memory_space<vmem>>, vector<2x1xf32>
    tpu.vector_store %arg4[%c0_8, %c0_9], %12 {strides = array<i32>} : memref<2x1xf32, #tpu.memory_space<vmem>>, vector<2x1xf32>,
    return
  }
  func.func @transform_0(%arg0: i32) -> (i32, i32) {
    %c0_i32 = arith.constant 0 : i32
    %c0_i32_0 = arith.constant 0 : i32
    %c0_i32_1 = arith.constant 0 : i32
    return %c0_i32, %c0_i32_0 : i32, i32
  }
  func.func @transform_1(%arg0: i32) -> (i32, i32) {
    %c0_i32 = arith.constant 0 : i32
    %c0_i32_0 = arith.constant 0 : i32
    %c0_i32_1 = arith.constant 0 : i32
    return %c0_i32, %c0_i32_0 : i32, i32
  }
  func.func @transform_2(%arg0: i32) -> (i32, i32) {
    %c0_i32 = arith.constant 0 : i32
    %c0_i32_0 = arith.constant 0 : i32
    %c0_i32_1 = arith.constant 0 : i32
    return %c0_i32, %c0_i32_0 : i32, i32
  }
  func.func @transform_3(%arg0: i32) -> (i32, i32) {
    %c0_i32 = arith.constant 0 : i32
    %c0_i32_0 = arith.constant 0 : i32
    %c0_i32_1 = arith.constant 0 : i32
    return %c0_i32, %c0_i32_0 : i32, i32
  }
}

</mosaic_0001>

<bundles_post_ra>
// kernel: discriminator_forward.5
= control target key start
LH: loop header
LB: loop body
LE: loop exit
PB: predicated region body
PF: predicated region fallthrough
CT: control target
= control target key end

     0   :  { %s3440_s1 = inlined_call_operand.vmem [shape: bf16[128,128], index: 1, kind: input, shape index: {}]   ;;  %s3441_s0 = inlined_call_operand.vmem [shape: bf16[512,128], index: 0, kind: input, shape index: {}]   ;;  %s3442_s2 = inlined_call_operand.vmem [shape: f32[1,128], index: 2, kind: input, shape index: {}]   ;;  %s3443_s3 = inlined_call_operand.vmem [shape: f32[1,128], index: 3, kind: input, shape index: {}]   ;;  %s3444_s4 = inlined_call_operand.vmem [shape: bf16[512,128], index: 4, kind: output, shape index: {}]  }
   0x1   :  { %v1928_v0 = vld [vmem:[%s3440_s1] sm:$0xff]   ;;  %v1929_v1 = vld [vmem:[%s3440_s1 + $0x8] sm:$0xff]   ;;  %v1930_v2 = vld [vmem:[%s3440_s1 + $0x10] sm:$0xff]  }
   0x2   :  { %1832 = vmatprep.subr.bf16.mxu0 %v1928_v0  ;;  %1912 = vmatprep.subr.bf16.mxu1 %v1928_v0  ;;  %v1931_v3 = vld [vmem:[%s3440_s1 + $0x18] sm:$0xff]   ;;  %v1936_v4 = vld [vmem:[%s3441_s0] sm:$0xff]   ;;  %v1933_v6 = vld [vmem:[%s3440_s1 + $0x28] sm:$0xff]  }
   0x3   :  { %1833 = vmatpush3.bf16.msra.mxu0 %v1928_v0  ;;  %1920 = vmatpush3.bf16.msra.mxu1 %v1928_v0  ;;  %v1932_v5 = vld [vmem:[%s3440_s1 + $0x20] sm:$0xff]   ;;  %v1934_v7 = vld [vmem:[%s3440_s1 + $0x30] sm:$0xff]   ;;  %v1935_v8 = vld [vmem:[%s3440_s1 + $0x38] sm:$0xff]  }
   0x4   :  { %1834 = vmatprep.subr.bf16.mxu0 %v1929_v1  ;;  %1913 = vmatprep.subr.bf16.mxu1 %v1929_v1  ;;  %v1952_v9 = vld [vmem:[%s3441_s0 + $0x80] sm:$0xff]   ;;  %v1937_v10 = vld [vmem:[%s3441_s0 + $0x8] sm:$0xff]   ;;  %v1938_v11 = vld [vmem:[%s3441_s0 + $0x10] sm:$0xff]  }
   0x5   :  { %1848 = vmatprep.mubr.bf16.mxu0 %v1936_v4  ;;  %1880 = vmatprep.mubr.bf16.mxu1 %v1952_v9  ;;  %v1953_v12 = vld [vmem:[%s3441_s0 + $0x88] sm:$0xff]   ;;  %v1954_v13 = vld [vmem:[%s3441_s0 + $0x90] sm:$0xff]   ;;  %v1939_v14 = vld [vmem:[%s3441_s0 + $0x18] sm:$0xff]  }
   0x6   :  { %v1940_v15 = vld [vmem:[%s3441_s0 + $0x20] sm:$0xff]   ;;  %v1955_v16 = vld [vmem:[%s3441_s0 + $0x98] sm:$0xff]   ;;  %v1941_v18 = vld [vmem:[%s3441_s0 + $0x28] sm:$0xff]  }
   0x7   :  { %1835 = vmatpush3.bf16.msra.mxu0 %v1929_v1  ;;  %1921 = vmatpush3.bf16.msra.mxu1 %v1929_v1  ;;  %v1956_v17 = vld [vmem:[%s3441_s0 + $0xa0] sm:$0xff]   ;;  %v1957_v19 = vld [vmem:[%s3441_s0 + $0xa8] sm:$0xff]   ;;  %v1942_v20 = vld [vmem:[%s3441_s0 + $0x30] sm:$0xff]  }
   0x8   :  { %1836 = vmatprep.subr.bf16.mxu0 %v1930_v2  ;;  %1914 = vmatprep.subr.bf16.mxu1 %v1930_v2  ;;  %v1958_v21 = vld [vmem:[%s3441_s0 + $0xb0] sm:$0xff]   ;;  %v1943_v22 = vld [vmem:[%s3441_s0 + $0x38] sm:$0xff]   ;;  %v1944_v24 = vld [vmem:[%s3441_s0 + $0x40] sm:$0xff]  }
   0x9   :  { %v1959_v23 = vld [vmem:[%s3441_s0 + $0xb8] sm:$0xff]   ;;  %v1960_v25 = vld [vmem:[%s3441_s0 + $0xc0] sm:$0xff]   ;;  %v1945_v26 = vld [vmem:[%s3441_s0 + $0x48] sm:$0xff]  }
   0xa   :  { %v1961_v27 = vld [vmem:[%s3441_s0 + $0xc8] sm:$0xff]   ;;  %v1946_v28 = vld [vmem:[%s3441_s0 + $0x50] sm:$0xff]   ;;  %v1947_v30 = vld [vmem:[%s3441_s0 + $0x58] sm:$0xff]  }
   0xb   :  { %1837 = vmatpush3.bf16.msra.mxu0 %v1930_v2  ;;  %1922 = vmatpush3.bf16.msra.mxu1 %v1930_v2  ;;  %v1962_v29 = vld [vmem:[%s3441_s0 + $0xd0] sm:$0xff]   ;;  %v1963_v31 = vld [vmem:[%s3441_s0 + $0xd8] sm:$0xff]   ;;  %v1948_v32 = vld [vmem:[%s3441_s0 + $0x60] sm:$0xff]  }
   0xc   :  { %1838 = vmatprep.subr.bf16.mxu0 %v1931_v3  ;;  %1915 = vmatprep.subr.bf16.mxu1 %v1931_v3  ;;  %v1964_v33 = vld [vmem:[%s3441_s0 + $0xe0] sm:$0xff]   ;;  %v1949_v34 = vld [vmem:[%s3441_s0 + $0x68] sm:$0xff]   ;;  %v1950_v36 = vld [vmem:[%s3441_s0 + $0x70] sm:$0xff]  }
   0xd   :  { %v1965_v35 = vld [vmem:[%s3441_s0 + $0xe8] sm:$0xff]   ;;  %v1966_v37 = vld [vmem:[%s3441_s0 + $0xf0] sm:$0xff]   ;;  %v1951_v38 = vld [vmem:[%s3441_s0 + $0x78] sm:$0xff]  }
   0xe   :  { %v1967_v39 = vld [vmem:[%s3441_s0 + $0xf8] sm:$0xff]  }
   0xf   :  { %1839 = vmatpush3.bf16.msra.mxu0 %v1931_v3  ;;  %1923 = vmatpush3.bf16.msra.mxu1 %v1931_v3 }
  0x10   :  { %1840 = vmatprep.subr.bf16.mxu0 %v1932_v5  ;;  %1916 = vmatprep.subr.bf16.mxu1 %v1932_v5 }
  0x13   :  { %1841 = vmatpush3.bf16.msra.mxu0 %v1932_v5  ;;  %1924 = vmatpush3.bf16.msra.mxu1 %v1932_v5 }
  0x14   :  { %1842 = vmatprep.subr.bf16.mxu0 %v1933_v6  ;;  %1917 = vmatprep.subr.bf16.mxu1 %v1933_v6 }
  0x17   :  { %1843 = vmatpush3.bf16.msra.mxu0 %v1933_v6  ;;  %1925 = vmatpush3.bf16.msra.mxu1 %v1933_v6 }
  0x18   :  { %1844 = vmatprep.subr.bf16.mxu0 %v1934_v7  ;;  %1918 = vmatprep.subr.bf16.mxu1 %v1934_v7 }
  0x1b   :  { %1845 = vmatpush3.bf16.msra.mxu0 %v1934_v7  ;;  %1926 = vmatpush3.bf16.msra.mxu1 %v1934_v7 }
  0x1c   :  { %1846 = vmatprep.subr.bf16.mxu0 %v1935_v8  ;;  %1919 = vmatprep.subr.bf16.mxu1 %v1935_v8 }
  0x1f   :  { %1847 = vmatpush3.bf16.msra.mxu0 %v1935_v8  ;;  %1927 = vmatpush3.bf16.msra.mxu1 %v1935_v8 }
  0x22   :  { %1849 = vmatmul.mubr.bf16.vlgmr.msra.gmra.mrb[0].mxu0 %v1937_v10  ;;  %1881 = vmatmul.mubr.bf16.vlgmr.msra.gmra.mrb[0].mxu1 %v1953_v12 }
  0x23   :  { %1852 = vmatprep.mubr.bf16.mxu0 %v1938_v11  ;;  %1884 = vmatprep.mubr.bf16.mxu1 %v1954_v13 }
  0x2a   :  { %1853 = vmatmul.mubr.bf16.gmra.mrb[4].mxu0 %v1939_v14  ;;  %1885 = vmatmul.mubr.bf16.gmra.mrb[4].mxu1 %v1955_v16 }
  0x2b   :  { %1856 = vmatprep.mubr.bf16.mxu0 %v1940_v15  ;;  %1888 = vmatprep.mubr.bf16.mxu1 %v1956_v17 }
  0x32   :  { %1857 = vmatmul.mubr.bf16.gmra.mrb[8].mxu0 %v1941_v18  ;;  %1889 = vmatmul.mubr.bf16.gmra.mrb[8].mxu1 %v1957_v19 }
  0x33   :  { %1860 = vmatprep.mubr.bf16.mxu0 %v1942_v20  ;;  %1892 = vmatprep.mubr.bf16.mxu1 %v1958_v21 }
  0x3a   :  { %1861 = vmatmul.mubr.bf16.gmra.mrb[12].mxu0 %v1943_v22  ;;  %1893 = vmatmul.mubr.bf16.gmra.mrb[12].mxu1 %v1959_v23 }
  0x3b   :  { %1864 = vmatprep.mubr.bf16.mxu0 %v1944_v24  ;;  %1896 = vmatprep.mubr.bf16.mxu1 %v1960_v25 }
  0x42   :  { %1865 = vmatmul.mubr.bf16.gmra.mrb[16].mxu0 %v1945_v26  ;;  %1897 = vmatmul.mubr.bf16.gmra.mrb[16].mxu1 %v1961_v27 }
  0x43   :  { %1868 = vmatprep.mubr.bf16.mxu0 %v1946_v28  ;;  %1900 = vmatprep.mubr.bf16.mxu1 %v1962_v29 }
  0x4a   :  { %1869 = vmatmul.mubr.bf16.gmra.mrb[20].mxu0 %v1947_v30  ;;  %1901 = vmatmul.mubr.bf16.gmra.mrb[20].mxu1 %v1963_v31 }
  0x4b   :  { %1872 = vmatprep.mubr.bf16.mxu0 %v1948_v32  ;;  %1904 = vmatprep.mubr.bf16.mxu1 %v1964_v33 }
  0x52   :  { %1873 = vmatmul.mubr.bf16.gmra.mrb[24].mxu0 %v1949_v34  ;;  %1905 = vmatmul.mubr.bf16.gmra.mrb[24].mxu1 %v1965_v35 }
  0x53   :  { %1876 = vmatprep.mubr.bf16.mxu0 %v1950_v36  ;;  %1908 = vmatprep.mubr.bf16.mxu1 %v1966_v37 }
  0x5a   :  { %1877 = vmatmul.mubr.bf16.gmra.mrb[28].mxu0 %v1951_v38  ;;  %1909 = vmatmul.mubr.bf16.gmra.mrb[28].mxu1 %v1967_v39 }
  0xf5   :  { %v2115_v40 = vpop.f32.mrb[0].mxu0  ;;  %v2117_v41 = vpop.f32.mrb[0].mxu1 }
  0xf6   :  { %v2119_v42 = vpop.f32.mrb[1].mxu0  ;;  %v2121_v43 = vpop.f32.mrb[1].mxu1  ;;  %v699_v51 = vmul.f32 %v2115_v40, %v2115_v40 }
  0xf7   :  { %v2123_v44 = vpop.f32.mrb[2].mxu0  ;;  %v2125_v45 = vpop.f32.mrb[2].mxu1  ;;  %v697_v48 = vmul.f32 %v2119_v42, %v2119_v42 }
  0xf8   :  { %v2127_v46 = vpop.f32.mrb[3].mxu0  ;;  %v2129_v47 = vpop.f32.mrb[3].mxu1  ;;  %v700_v54 = vmul.f32 %v2123_v44, %v2123_v44 }
  0xf9   :  { %v627_v49 = vadd.f32 %v2127_v46, %v2119_v42  ;;  %v698_v50 = vmul.f32 %v2127_v46, %v2127_v46 }
  0xfb   :  { %v628_v52 = vadd.f32 %v2115_v40, %v627_v49  ;;  %v761_v53 = vadd.f32 %v698_v50, %v697_v48 }
  0xfd   :  { %v762_v55 = vadd.f32 %v761_v53, %v699_v51  ;;  %v2142_v56 = vpop.f32.mrb[4].mxu0  ;;  %v629_v57 = vadd.f32 %v2123_v44, %v628_v52  ;;  %v2145_v58 = vpop.f32.mrb[4].mxu1 }
  0xfe   :  { %v2147_v59 = vpop.f32.mrb[5].mxu0  ;;  %v2149_v60 = vpop.f32.mrb[5].mxu1  ;;  %v703_v7 = vmul.f32 %v2142_v56, %v2142_v56 }
  0xff   :  { %v630_v61 = vadd.f32 %v629_v57, %v2147_v59  ;;  %v701_v62 = vmul.f32 %v2147_v59, %v2147_v59  ;;  %v763_v63 = vadd.f32 %v762_v55, %v700_v54  ;;  %v2154_v0 = vpop.f32.mrb[6].mxu0  ;;  %v2156_v1 = vpop.f32.mrb[6].mxu1 }
 0x100   :  { %v2158_v2 = vpop.f32.mrb[7].mxu0  ;;  %v2160_v3 = vpop.f32.mrb[7].mxu1  ;;  %v704_v10 = vmul.f32 %v2154_v0, %v2154_v0 }
 0x101   :  { %v764_v4 = vadd.f32 %v763_v63, %v701_v62  ;;  %v631_v5 = vadd.f32 %v630_v61, %v2158_v2  ;;  %v702_v6 = vmul.f32 %v2158_v2, %v2158_v2 }
 0x103   :  { %v632_v8 = vadd.f32 %v2142_v56, %v631_v5  ;;  %v765_v9 = vadd.f32 %v764_v4, %v702_v6 }
 0x105   :  { %v766_v11 = vadd.f32 %v765_v9, %v703_v7  ;;  %v2170_v12 = vpop.f32.mrb[8].mxu0  ;;  %v633_v13 = vadd.f32 %v2154_v0, %v632_v8  ;;  %v2173_v14 = vpop.f32.mrb[8].mxu1 }
 0x106   :  { %v2175_v15 = vpop.f32.mrb[9].mxu0  ;;  %v2177_v16 = vpop.f32.mrb[9].mxu1  ;;  %v707_v27 = vmul.f32 %v2170_v12, %v2170_v12 }
 0x107   :  { %v634_v17 = vadd.f32 %v633_v13, %v2175_v15  ;;  %v705_v18 = vmul.f32 %v2175_v15, %v2175_v15  ;;  %v767_v19 = vadd.f32 %v766_v11, %v704_v10  ;;  %v2182_v20 = vpop.f32.mrb[10].mxu0  ;;  %v2184_v21 = vpop.f32.mrb[10].mxu1 }
 0x108   :  { %v2186_v22 = vpop.f32.mrb[11].mxu0  ;;  %v2188_v23 = vpop.f32.mrb[11].mxu1  ;;  %v708_v30 = vmul.f32 %v2182_v20, %v2182_v20 }
 0x109   :  { %v768_v24 = vadd.f32 %v767_v19, %v705_v18  ;;  %v635_v25 = vadd.f32 %v634_v17, %v2186_v22  ;;  %v706_v26 = vmul.f32 %v2186_v22, %v2186_v22 }
 0x10b   :  { %v636_v28 = vadd.f32 %v2170_v12, %v635_v25  ;;  %v769_v29 = vadd.f32 %v768_v24, %v706_v26 }
 0x10d   :  { %v770_v31 = vadd.f32 %v769_v29, %v707_v27  ;;  %v2198_v32 = vpop.f32.mrb[12].mxu0  ;;  %v637_v33 = vadd.f32 %v2182_v20, %v636_v28  ;;  %v2201_v34 = vpop.f32.mrb[12].mxu1 }
 0x10e   :  { %v2203_v35 = vpop.f32.mrb[13].mxu0  ;;  %v2205_v36 = vpop.f32.mrb[13].mxu1  ;;  %v711_v55 = vmul.f32 %v2198_v32, %v2198_v32 }
 0x10f   :  { %v638_v37 = vadd.f32 %v637_v33, %v2203_v35  ;;  %v709_v38 = vmul.f32 %v2203_v35, %v2203_v35  ;;  %v771_v39 = vadd.f32 %v770_v31, %v708_v30  ;;  %v2210_v48 = vpop.f32.mrb[14].mxu0  ;;  %v2212_v49 = vpop.f32.mrb[14].mxu1 }
 0x110   :  { %3535 = vst [vmem:[#allocation2_spill] sm:$0xff] %v2210_v48  ;;  %v2214_v50 = vpop.f32.mrb[15].mxu0  ;;  %v2216_v51 = vpop.f32.mrb[15].mxu1  ;;  %v712_v62 = vmul.f32 %v2210_v48, %v2210_v48 }
 0x111   :  { %v772_v52 = vadd.f32 %v771_v39, %v709_v38  ;;  %v639_v53 = vadd.f32 %v638_v37, %v2214_v50  ;;  %v710_v54 = vmul.f32 %v2214_v50, %v2214_v50 }
 0x113   :  { %v640_v57 = vadd.f32 %v2198_v32, %v639_v53  ;;  %v773_v61 = vadd.f32 %v772_v52, %v710_v54 }
 0x115   :  { %v774_v63 = vadd.f32 %v773_v61, %v711_v55  ;;  %v2226_v4 = vpop.f32.mrb[16].mxu0  ;;  %v641_v5 = vadd.f32 %v2210_v48, %v640_v57  ;;  %v2229_v6 = vpop.f32.mrb[16].mxu1  ;;  %v730_v48 = vmul.f32 %v2129_v47, %v2129_v47 }
 0x116   :  { %3536 = vst [vmem:[#allocation3_spill] sm:$0xff] %v2226_v4  ;;  %v2231_v7 = vpop.f32.mrb[17].mxu0  ;;  %v2233_v8 = vpop.f32.mrb[17].mxu1  ;;  %v715_v27 = vmul.f32 %v2226_v4, %v2226_v4 }
 0x117   :  { %3537 = vst [vmem:[#allocation4_spill] sm:$0xff] %v2231_v7  ;;  %v642_v9 = vadd.f32 %v641_v5, %v2231_v7  ;;  %v713_v10 = vmul.f32 %v2231_v7, %v2231_v7  ;;  %v775_v11 = vadd.f32 %v774_v63, %v712_v62  ;;  %v2238_v13 = vpop.f32.mrb[18].mxu0  ;;  %v2240_v17 = vpop.f32.mrb[18].mxu1 }
 0x118   :  { %3538 = vst [vmem:[#allocation5_spill] sm:$0xff] %v2238_v13  ;;  %v2242_v18 = vpop.f32.mrb[19].mxu0  ;;  %v2244_v19 = vpop.f32.mrb[19].mxu1  ;;  %v716_v30 = vmul.f32 %v2238_v13, %v2238_v13 }
 0x119   :  { %3539 = vst [vmem:[#allocation6_spill] sm:$0xff] %v2242_v18  ;;  %v776_v24 = vadd.f32 %v775_v11, %v713_v10  ;;  %v643_v25 = vadd.f32 %v642_v9, %v2242_v18  ;;  %v714_v26 = vmul.f32 %v2242_v18, %v2242_v18 }
 0x11b   :  { %v644_v28 = vadd.f32 %v2226_v4, %v643_v25  ;;  %v777_v29 = vadd.f32 %v776_v24, %v714_v26 }
 0x11d   :  { %v778_v31 = vadd.f32 %v777_v29, %v715_v27  ;;  %v2254_v33 = vpop.f32.mrb[20].mxu0  ;;  %v645_v37 = vadd.f32 %v2238_v13, %v644_v28  ;;  %v2257_v38 = vpop.f32.mrb[20].mxu1 }
 0x11e   :  { %3540 = vst [vmem:[#allocation7_spill] sm:$0xff] %v2254_v33  ;;  %3541 = vst [vmem:[#allocation8_spill] sm:$0xff] %v2257_v38  ;;  %v2259_v39 = vpop.f32.mrb[21].mxu0  ;;  %v2261_v52 = vpop.f32.mrb[21].mxu1  ;;  %v719_v11 = vmul.f32 %v2254_v33, %v2254_v33 }
 0x11f   :  { %3542 = vst [vmem:[#allocation9_spill] sm:$0xff] %v2259_v39  ;;  %v646_v53 = vadd.f32 %v645_v37, %v2259_v39  ;;  %v717_v54 = vmul.f32 %v2259_v39, %v2259_v39  ;;  %v779_v55 = vadd.f32 %v778_v31, %v716_v30  ;;  %v2266_v57 = vpop.f32.mrb[22].mxu0  ;;  %v2268_v61 = vpop.f32.mrb[22].mxu1 }
 0x120   :  { %3543 = vst [vmem:[#allocation10_spill] sm:$0xff] %v2266_v57  ;;  %3544 = vst [vmem:[#allocation11_spill] sm:$0xff] %v2268_v61  ;;  %v2270_v62 = vpop.f32.mrb[23].mxu0  ;;  %v2272_v63 = vpop.f32.mrb[23].mxu1  ;;  %v720_v26 = vmul.f32 %v2266_v57, %v2266_v57 }
 0x121   :  { %3545 = vst [vmem:[#allocation12_spill] sm:$0xff] %v2270_v62  ;;  %v780_v5 = vadd.f32 %v779_v55, %v717_v54  ;;  %v647_v9 = vadd.f32 %v646_v53, %v2270_v62  ;;  %v718_v10 = vmul.f32 %v2270_v62, %v2270_v62 }
 0x123   :  { %v648_v24 = vadd.f32 %v2254_v33, %v647_v9  ;;  %v781_v25 = vadd.f32 %v780_v5, %v718_v10 }
 0x125   :  { %v782_v27 = vadd.f32 %v781_v25, %v719_v11  ;;  %v2282_v28 = vpop.f32.mrb[24].mxu0  ;;  %v649_v29 = vadd.f32 %v2266_v57, %v648_v24  ;;  %v2285_v30 = vpop.f32.mrb[24].mxu1 }
 0x126   :  { %3546 = vst [vmem:[#allocation13_spill] sm:$0xff] %v2282_v28  ;;  %3547 = vst [vmem:[#allocation14_spill] sm:$0xff] %v2285_v30  ;;  %v2287_v31 = vpop.f32.mrb[25].mxu0  ;;  %v2289_v37 = vpop.f32.mrb[25].mxu1 }
 0x127   :  { %3548 = vst [vmem:[#allocation15_spill] sm:$0xff] %v2287_v31  ;;  %3549 = vst [vmem:[#allocation16_spill] sm:$0xff] %v2289_v37  ;;  %v650_v53 = vadd.f32 %v649_v29, %v2287_v31  ;;  %v721_v54 = vmul.f32 %v2287_v31, %v2287_v31  ;;  %v783_v55 = vadd.f32 %v782_v27, %v720_v26  ;;  %v2294_v5 = vpop.f32.mrb[26].mxu0  ;;  %v2296_v9 = vpop.f32.mrb[26].mxu1 }
 0x128   :  { %3550 = vst [vmem:[#allocation17_spill] sm:$0xff] %v2294_v5  ;;  %3551 = vst [vmem:[#allocation18_spill] sm:$0xff] %v2296_v9  ;;  %v2298_v10 = vpop.f32.mrb[27].mxu0  ;;  %v2300_v11 = vpop.f32.mrb[27].mxu1  ;;  %v723_v29 = vmul.f32 %v2282_v28, %v2282_v28  ;;  %v724_v27 = vmul.f32 %v2294_v5, %v2294_v5 }
 0x129   :  { %3552 = vst [vmem:[#allocation19_spill] sm:$0xff] %v2298_v10  ;;  %3553 = vst [vmem:[#allocation20_spill] sm:$0xff] %v2300_v11  ;;  %v784_v24 = vadd.f32 %v783_v55, %v721_v54  ;;  %v651_v25 = vadd.f32 %v650_v53, %v2298_v10  ;;  %v722_v57 = vmul.f32 %v2298_v10, %v2298_v10 }
 0x12b   :  { %v652_v31 = vadd.f32 %v2282_v28, %v651_v25  ;;  %v785_v26 = vadd.f32 %v784_v24, %v722_v57 }
 0x12d   :  { %v786_v33 = vadd.f32 %v785_v26, %v723_v29  ;;  %v2310_v62 = vpop.f32.mrb[28].mxu0  ;;  %v653_v39 = vadd.f32 %v2294_v5, %v652_v31  ;;  %v2313_v54 = vpop.f32.mrb[28].mxu1 }
 0x12e   :  { %3554 = vst [vmem:[#allocation21_spill] sm:$0xff] %v2313_v54  ;;  %v2315_v53 = vpop.f32.mrb[29].mxu0  ;;  %v2317_v55 = vpop.f32.mrb[29].mxu1 }
 0x12f   :  { %3555 = vst [vmem:[#allocation22_spill] sm:$0xff] %v2315_v53  ;;  %3556 = vst [vmem:[#allocation23_spill] sm:$0xff] %v2317_v55  ;;  %v654_v10 = vadd.f32 %v653_v39, %v2315_v53  ;;  %v725_v25 = vmul.f32 %v2315_v53, %v2315_v53  ;;  %v787_v57 = vadd.f32 %v786_v33, %v724_v27  ;;  %v2322_v24 = vpop.f32.mrb[30].mxu0  ;;  %v2324_v28 = vpop.f32.mrb[30].mxu1 }
 0x130   :  { %v2326_v29 = vpop.f32.mrb[31].mxu0  ;;  %v2328_v26 = vpop.f32.mrb[31].mxu1  ;;  %v727_v39 = vmul.f32 %v2310_v62, %v2310_v62  ;;  %v728_v27 = vmul.f32 %v2322_v24, %v2322_v24 }
 0x131   :  { %3557 = vst [vmem:[#allocation24_spill] sm:$0xff] %v2326_v29  ;;  %3558 = vst [vmem:[#allocation25_spill] sm:$0xff] %v2328_v26  ;;  %v788_v31 = vadd.f32 %v787_v57, %v725_v25  ;;  %v655_v5 = vadd.f32 %v654_v10, %v2326_v29  ;;  %v726_v13 = vmul.f32 %v2326_v29, %v2326_v29 }
 0x132   :  { %v729_v25 = vmul.f32 %v2121_v43, %v2121_v43 }
 0x133   :  { %v656_v53 = vadd.f32 %v2310_v62, %v655_v5  ;;  %v789_v33 = vadd.f32 %v788_v31, %v726_v13  ;;  %v731_v13 = vmul.f32 %v2117_v41, %v2117_v41 }
 0x135   :  { %v790_v4 = vadd.f32 %v789_v33, %v727_v39  ;;  %v657_v18 = vadd.f32 %v2322_v24, %v656_v53  ;;  %v732_v53 = vmul.f32 %v2125_v45, %v2125_v45 }
 0x137   :  { %v658_v10 = vadd.f32 %v657_v18, %v2121_v43  ;;  %v791_v57 = vadd.f32 %v790_v4, %v728_v27  ;;  %v733_v4 = vmul.f32 %v2149_v60, %v2149_v60 }
 0x139   :  { %v792_v7 = vadd.f32 %v791_v57, %v729_v25  ;;  %v659_v29 = vadd.f32 %v658_v10, %v2129_v47  ;;  %v734_v57 = vmul.f32 %v2160_v3, %v2160_v3 }
 0x13b   :  { %v660_v5 = vadd.f32 %v2117_v41, %v659_v29  ;;  %v793_v31 = vadd.f32 %v792_v7, %v730_v48  ;;  %v735_v48 = vmul.f32 %v2145_v58, %v2145_v58 }
 0x13d   :  { %v794_v39 = vadd.f32 %v793_v31, %v731_v13  ;;  %v661_v33 = vadd.f32 %v2125_v45, %v660_v5  ;;  %v736_v13 = vmul.f32 %v2156_v1, %v2156_v1 }
 0x13f   :  { %v662_v18 = vadd.f32 %v661_v33, %v2149_v60  ;;  %v795_v27 = vadd.f32 %v794_v39, %v732_v53  ;;  %v737_v53 = vmul.f32 %v2177_v16, %v2177_v16 }
 0x141   :  { %v796_v25 = vadd.f32 %v795_v27, %v733_v4  ;;  %v663_v10 = vadd.f32 %v662_v18, %v2160_v3  ;;  %v738_v27 = vmul.f32 %v2188_v23, %v2188_v23 }
 0x143   :  { %v664_v7 = vadd.f32 %v2145_v58, %v663_v10  ;;  %v797_v29 = vadd.f32 %v796_v25, %v734_v57  ;;  %v739_v25 = vmul.f32 %v2173_v14, %v2173_v14 }
 0x145   :  { %v798_v5 = vadd.f32 %v797_v29, %v735_v48  ;;  %v665_v31 = vadd.f32 %v2156_v1, %v664_v7  ;;  %v740_v48 = vmul.f32 %v2184_v21, %v2184_v21 }
 0x147   :  { %v666_v39 = vadd.f32 %v665_v31, %v2177_v16  ;;  %v799_v33 = vadd.f32 %v798_v5, %v736_v13  ;;  %v741_v13 = vmul.f32 %v2205_v36, %v2205_v36 }
 0x149   :  { %v800_v4 = vadd.f32 %v799_v33, %v737_v53  ;;  %v667_v18 = vadd.f32 %v666_v39, %v2188_v23  ;;  %v742_v33 = vmul.f32 %v2216_v51, %v2216_v51 }
 0x14b   :  { %v668_v10 = vadd.f32 %v2173_v14, %v667_v18  ;;  %v801_v57 = vadd.f32 %v800_v4, %v738_v27  ;;  %v743_v4 = vmul.f32 %v2201_v34, %v2201_v34 }
 0x14d   :  { %v802_v7 = vadd.f32 %v801_v57, %v739_v25  ;;  %v669_v29 = vadd.f32 %v2184_v21, %v668_v10  ;;  %v744_v25 = vmul.f32 %v2212_v49, %v2212_v49 }
 0x14f   :  { %v670_v5 = vadd.f32 %v669_v29, %v2205_v36  ;;  %v803_v31 = vadd.f32 %v802_v7, %v740_v48  ;;  %v745_v48 = vmul.f32 %v2233_v8, %v2233_v8 }
 0x151   :  { %v804_v53 = vadd.f32 %v803_v31, %v741_v13  ;;  %v671_v39 = vadd.f32 %v670_v5, %v2216_v51  ;;  %v746_v31 = vmul.f32 %v2244_v19, %v2244_v19 }
 0x153   :  { %v672_v18 = vadd.f32 %v2201_v34, %v671_v39  ;;  %v805_v27 = vadd.f32 %v804_v53, %v742_v33  ;;  %v747_v53 = vmul.f32 %v2229_v6, %v2229_v6 }
 0x155   :  { %v806_v10 = vadd.f32 %v805_v27, %v743_v4  ;;  %v673_v57 = vadd.f32 %v2212_v49, %v672_v18  ;;  %v748_v4 = vmul.f32 %v2240_v17, %v2240_v17 }
 0x157   :  { %v674_v7 = vadd.f32 %v673_v57, %v2233_v8  ;;  %v807_v29 = vadd.f32 %v806_v10, %v744_v25  ;;  %v749_v25 = vmul.f32 %v2261_v52, %v2261_v52 }
 0x159   :  { %v808_v13 = vadd.f32 %v807_v29, %v745_v48  ;;  %v675_v5 = vadd.f32 %v674_v7, %v2244_v19  ;;  %v750_v29 = vmul.f32 %v2272_v63, %v2272_v63 }
 0x15b   :  { %v676_v39 = vadd.f32 %v2229_v6, %v675_v5  ;;  %v809_v33 = vadd.f32 %v808_v13, %v746_v31  ;;  %v751_v13 = vmul.f32 %v2257_v38, %v2257_v38 }
 0x15d   :  { %v810_v18 = vadd.f32 %v809_v33, %v747_v53  ;;  %v677_v27 = vadd.f32 %v2240_v17, %v676_v39  ;;  %v752_v53 = vmul.f32 %v2268_v61, %v2268_v61 }
 0x15f   :  { %v678_v10 = vadd.f32 %v677_v27, %v2261_v52  ;;  %v811_v57 = vadd.f32 %v810_v18, %v748_v4  ;;  %v753_v4 = vmul.f32 %v2289_v37, %v2289_v37 }
 0x161   :  { %v812_v48 = vadd.f32 %v811_v57, %v749_v25  ;;  %v679_v7 = vadd.f32 %v678_v10, %v2272_v63  ;;  %v754_v57 = vmul.f32 %v2300_v11, %v2300_v11 }
 0x163   :  { %v680_v5 = vadd.f32 %v2257_v38, %v679_v7  ;;  %v813_v31 = vadd.f32 %v812_v48, %v750_v29  ;;  %v755_v48 = vmul.f32 %v2285_v30, %v2285_v30 }
 0x165   :  { %v814_v39 = vadd.f32 %v813_v31, %v751_v13  ;;  %v681_v33 = vadd.f32 %v2268_v61, %v680_v5  ;;  %v756_v13 = vmul.f32 %v2296_v9, %v2296_v9 }
 0x167   :  { %v682_v18 = vadd.f32 %v681_v33, %v2289_v37  ;;  %v815_v27 = vadd.f32 %v814_v39, %v752_v53  ;;  %v757_v53 = vmul.f32 %v2317_v55, %v2317_v55 }
 0x169   :  { %v816_v25 = vadd.f32 %v815_v27, %v753_v4  ;;  %v683_v10 = vadd.f32 %v682_v18, %v2300_v11  ;;  %v758_v27 = vmul.f32 %v2328_v26, %v2328_v26 }
 0x16b   :  { %v684_v7 = vadd.f32 %v2285_v30, %v683_v10  ;;  %v817_v29 = vadd.f32 %v816_v25, %v754_v57  ;;  %v759_v25 = vmul.f32 %v2313_v54, %v2313_v54 }
 0x16d   :  { %v818_v5 = vadd.f32 %v817_v29, %v755_v48  ;;  %v685_v31 = vadd.f32 %v2296_v9, %v684_v7  ;;  %v760_v48 = vmul.f32 %v2324_v28, %v2324_v28 }
 0x16f   :  { %v686_v39 = vadd.f32 %v685_v31, %v2317_v55  ;;  %v819_v33 = vadd.f32 %v818_v5, %v756_v13 }
 0x171   :  { %v820_v4 = vadd.f32 %v819_v33, %v757_v53  ;;  %v687_v18 = vadd.f32 %v686_v39, %v2328_v26 }
 0x173   :  { %v688_v10 = vadd.f32 %v2313_v54, %v687_v18  ;;  %v821_v57 = vadd.f32 %v820_v4, %v758_v27 }
 0x175   :  { %v689_v7 = vadd.f32 %v2324_v28, %v688_v10  ;;  %v822_v29 = vadd.f32 %v821_v57, %v759_v25  ;;  %v842_v25 = vlaneseq }
 0x177   :  { %v690_v31 = vrot.slane %v689_v7, 4  ;;  %v823_v13 = vadd.f32 %v822_v29, %v760_v48  ;;  %v2435_v57 = vshrl.u32 %v842_v25, 7  ;;  %v834_v48 = vld [vmem:[%s3442_s2] sm:$0x1]  ;;  %v3566_v25 = vld [vmem:[#allocation7_spill] sm:$0xff] }
 0x179   :  { %v691_v5 = vadd.f32 %v690_v31, %v689_v7  ;;  %v824_v53 = vrot.slane %v823_v13, 4  ;;  %v3469_v7 = vsub.s32 0, %v2435_v57 }
 0x17b   :  { %v692_v39 = vrot.slane %v691_v5, 2  ;;  %v825_v33 = vadd.f32 %v824_v53, %v823_v13  ;;  %v3559_v13 = vld [vmem:[#allocation2_spill] sm:$0xff] }
 0x17c   :  { %v3561_v53 = vld [vmem:[#allocation6_spill] sm:$0xff] }
 0x17d   :  { %v693_v55 = vadd.f32 %v692_v39, %v691_v5  ;;  %v826_v26 = vrot.slane %v825_v33, 2  ;;  %v3560_v5 = vld [vmem:[#allocation4_spill] sm:$0xff]  ;;  %v3562_v39 = vld [vmem:[#allocation3_spill] sm:$0xff] }
 0x17f   :  { %v694_v9 = vrot.slane %v693_v55, 1  ;;  %v827_v30 = vadd.f32 %v826_v26, %v825_v33  ;;  %v3563_v33 = vld [vmem:[#allocation5_spill] sm:$0xff] }
 0x181   :  { %v695_v11 = vadd.f32 %v694_v9, %v693_v55  ;;  %v828_v37 = vrot.slane %v827_v30, 1 }
 0x183   :  { %v696_v18 = vmul.f32 0.001953125, %v695_v11  ;;  %v829_v4 = vadd.f32 %v828_v37, %v827_v30  ;;  %v2444_v30 = vld [vmem:[%s3443_s3] sm:$0x1] }
 0x185   :  { %v830_v27 = vmul.f32 0.001953125, %v829_v4  ;;  %v831_v54 = vmul.f32 %v696_v18, %v696_v18 }
 0x187   :  { %v832_v61 = vsub.f32 %v830_v27, %v831_v54  ;;  %v3565_v27 = vld [vmem:[#allocation12_spill] sm:$0xff] }
 0x189   :  { %v833_v38 = vmax.f32 %v832_v61, 0.0  ;;  %v3572_v61 = vld [vmem:[#allocation22_spill] sm:$0xff] }
 0x18b   :  { %v835_v10 = vadd.f32 1e-05, %v833_v38 }
 0x18d   :  { %1968 = vrsqrt.f32 %v835_v10 }
 0x197   :  { %v1969_v26 = vpop.eup %1968 }
 0x198   :  { %v837_v9 = vmul.f32 %v1969_v26, %v834_v48  ;;  %v3567_v26 = vld [vmem:[#allocation10_spill] sm:$0xff] }
 0x19a   :  { %v2446_v37 = vmul.f32 %v837_v9, %v696_v18  ;;  %v2450_v38 = vrot.slane %v837_v9, %v3469_v7  ;;  %v3564_v18 = vld [vmem:[#allocation9_spill] sm:$0xff]  ;;  %v3573_v7 = vld [vmem:[#allocation24_spill] sm:$0xff] }
 0x19c   :  { %v2456_v11 = vmul.f32 %v2450_v38, %v2119_v42  ;;  %v2460_v54 = vmul.f32 %v2450_v38, %v2127_v46  ;;  %v2464_v55 = vmul.f32 %v2115_v40, %v2450_v38  ;;  %v2468_v29 = vmul.f32 %v2123_v44, %v2450_v38 }
 0x19d   :  { %v2472_v31 = vmul.f32 %v2450_v38, %v2147_v59  ;;  %v2476_v42 = vmul.f32 %v2450_v38, %v2158_v2  ;;  %v2480_v46 = vmul.f32 %v2142_v56, %v2450_v38  ;;  %v2484_v40 = vmul.f32 %v2154_v0, %v2450_v38 }
 0x19e   :  { %v2488_v44 = vmul.f32 %v2450_v38, %v2175_v15  ;;  %v2492_v59 = vmul.f32 %v2450_v38, %v2186_v22  ;;  %v2496_v2 = vmul.f32 %v2170_v12, %v2450_v38  ;;  %v2500_v56 = vmul.f32 %v2182_v20, %v2450_v38 }
 0x19f   :  { %v2504_v0 = vmul.f32 %v2450_v38, %v2203_v35  ;;  %v2508_v15 = vmul.f32 %v2450_v38, %v2214_v50  ;;  %v2512_v22 = vmul.f32 %v2198_v32, %v2450_v38  ;;  %v2516_v12 = vmul.f32 %v3559_v13, %v2450_v38  ;;  %v3568_v13 = vld [vmem:[#allocation15_spill] sm:$0xff] }
 0x1a0   :  { %v2520_v20 = vmul.f32 %v2450_v38, %v3560_v5  ;;  %v2524_v35 = vmul.f32 %v2450_v38, %v3561_v53  ;;  %v2528_v50 = vmul.f32 %v3562_v39, %v2450_v38  ;;  %v2532_v32 = vmul.f32 %v3563_v33, %v2450_v38  ;;  %v3569_v53 = vld [vmem:[#allocation19_spill] sm:$0xff]  ;;  %v3570_v33 = vld [vmem:[#allocation13_spill] sm:$0xff] }
 0x1a1   :  { %v2536_v4 = vmul.f32 %v2450_v38, %v3564_v18  ;;  %v2540_v10 = vmul.f32 %v2450_v38, %v3565_v27  ;;  %v2544_v48 = vmul.f32 %v3566_v25, %v2450_v38  ;;  %v2548_v9 = vmul.f32 %v3567_v26, %v2450_v38  ;;  %v3571_v27 = vld [vmem:[#allocation17_spill] sm:$0xff] }
 0x1a2   :  { %v2552_v5 = vmul.f32 %v2450_v38, %v3568_v13  ;;  %v2556_v39 = vmul.f32 %v2450_v38, %v3569_v53  ;;  %v2560_v18 = vmul.f32 %v3570_v33, %v2450_v38  ;;  %v2564_v25 = vmul.f32 %v3571_v27, %v2450_v38 }
 0x1a3   :  { %v2568_v26 = vmul.f32 %v2450_v38, %v3572_v61  ;;  %v2572_v13 = vmul.f32 %v2450_v38, %v3573_v7  ;;  %v2576_v53 = vmul.f32 %v2310_v62, %v2450_v38  ;;  %v2580_v33 = vmul.f32 %v2322_v24, %v2450_v38 }
 0x1a4   :  { %v2584_v27 = vmul.f32 %v2450_v38, %v2121_v43  ;;  %v2588_v61 = vmul.f32 %v2450_v38, %v2129_v47  ;;  %v2592_v7 = vmul.f32 %v2117_v41, %v2450_v38  ;;  %v2596_v62 = vmul.f32 %v2125_v45, %v2450_v38 }
 0x1a5   :  { %v2600_v24 = vmul.f32 %v2450_v38, %v2149_v60  ;;  %v2604_v43 = vmul.f32 %v2450_v38, %v2160_v3  ;;  %v2608_v47 = vmul.f32 %v2145_v58, %v2450_v38  ;;  %v2612_v41 = vmul.f32 %v2156_v1, %v2450_v38 }
 0x1a6   :  { %v2616_v45 = vmul.f32 %v2450_v38, %v2177_v16  ;;  %v2620_v60 = vmul.f32 %v2450_v38, %v2188_v23  ;;  %v2624_v3 = vmul.f32 %v2173_v14, %v2450_v38  ;;  %v2628_v58 = vmul.f32 %v2184_v21, %v2450_v38 }
 0x1a7   :  { %v2632_v1 = vmul.f32 %v2450_v38, %v2205_v36  ;;  %v2636_v16 = vmul.f32 %v2450_v38, %v2216_v51  ;;  %v2640_v23 = vmul.f32 %v2201_v34, %v2450_v38  ;;  %v2644_v14 = vmul.f32 %v2212_v49, %v2450_v38 }
 0x1a8   :  { %v2648_v21 = vmul.f32 %v2450_v38, %v2233_v8  ;;  %v2652_v36 = vmul.f32 %v2450_v38, %v2244_v19  ;;  %v2656_v51 = vmul.f32 %v2229_v6, %v2450_v38  ;;  %v2660_v34 = vmul.f32 %v2240_v17, %v2450_v38 }
 0x1a9   :  { %v2664_v49 = vmul.f32 %v2450_v38, %v2261_v52  ;;  %v2668_v8 = vmul.f32 %v2450_v38, %v2272_v63 }
 0x1aa   :  { %3574 = vst [vmem:[#allocation2_spill] sm:$0xff] %v2648_v21  ;;  %3575 = vst [vmem:[#allocation4_spill] sm:$0xff] %v2652_v36  ;;  %v3580_v21 = vld [vmem:[#allocation8_spill] sm:$0xff]  ;;  %v3582_v36 = vld [vmem:[#allocation11_spill] sm:$0xff] }
 0x1ab   :  { %3576 = vst [vmem:[#allocation6_spill] sm:$0xff] %v2656_v51  ;;  %3577 = vst [vmem:[#allocation3_spill] sm:$0xff] %v2660_v34  ;;  %v2672_v19 = vmul.f32 %v3580_v21, %v2450_v38  ;;  %v2676_v6 = vmul.f32 %v3582_v36, %v2450_v38  ;;  %v3584_v51 = vld [vmem:[#allocation16_spill] sm:$0xff] }
 0x1ac   :  { %3578 = vst [vmem:[#allocation5_spill] sm:$0xff] %v2664_v49  ;;  %3579 = vst [vmem:[#allocation9_spill] sm:$0xff] %v2668_v8  ;;  %v2680_v17 = vmul.f32 %v2450_v38, %v3584_v51  ;;  %v3586_v34 = vld [vmem:[#allocation20_spill] sm:$0xff]  ;;  %v3587_v49 = vld [vmem:[#allocation14_spill] sm:$0xff] }
 0x1ad   :  { %3581 = vst [vmem:[#allocation12_spill] sm:$0xff] %v2672_v19  ;;  %3583 = vst [vmem:[#allocation7_spill] sm:$0xff] %v2676_v6  ;;  %v2684_v52 = vmul.f32 %v2450_v38, %v3586_v34  ;;  %v2688_v63 = vmul.f32 %v3587_v49, %v2450_v38  ;;  %v3589_v8 = vld [vmem:[#allocation18_spill] sm:$0xff]  ;;  %v3591_v19 = vld [vmem:[#allocation23_spill] sm:$0xff]  ;;  %v2708_v49 = vmul.f32 %v2324_v28, %v2450_v38 }
 0x1ae   :  { %3585 = vst [vmem:[#allocation10_spill] sm:$0xff] %v2680_v17  ;;  %v2692_v21 = vmul.f32 %v3589_v8, %v2450_v38  ;;  %v2696_v36 = vmul.f32 %v2450_v38, %v3591_v19  ;;  %v3592_v6 = vld [vmem:[#allocation25_spill] sm:$0xff]  ;;  %v3595_v8 = vsub.f32 %v2444_v30, %v2446_v37 }
 0x1af   :  { %3588 = vst [vmem:[#allocation15_spill] sm:$0xff] %v2688_v63  ;;  %v2700_v51 = vmul.f32 %v2450_v38, %v3592_v6  ;;  %v3593_v17 = vld [vmem:[#allocation21_spill] sm:$0xff]  ;;  %v3594_v63 = vsub.s32 0, %v2435_v57 }
 0x1b0   :  { %3590 = vst [vmem:[#allocation19_spill] sm:$0xff] %v2692_v21  ;;  %v2704_v34 = vmul.f32 %v3593_v17, %v2450_v38 }
 0x1b1   :  { %v2715_v21 = vrot.slane %v3595_v8, %v3594_v63 }
 0x1b2   :  { %v3633_v63 = vld [vmem:[#allocation3_spill] sm:$0xff] }
 0x1b3   :  { %v2719_v19 = vadd.f32 %v2715_v21, %v2456_v11  ;;  %v2723_v6 = vadd.f32 %v2715_v21, %v2460_v54  ;;  %v2727_v17 = vadd.f32 %v2715_v21, %v2464_v55  ;;  %v2731_v28 = vadd.f32 %v2715_v21, %v2468_v29  ;;  %v3635_v8 = vld [vmem:[#allocation5_spill] sm:$0xff] }
 0x1b4   :  { %v2735_v57 = vadd.f32 %v2715_v21, %v2472_v31  ;;  %v2739_v30 = vadd.f32 %v2715_v21, %v2476_v42  ;;  %v2743_v37 = vadd.f32 %v2715_v21, %v2480_v46  ;;  %v2747_v38 = vadd.f32 %v2715_v21, %v2484_v40 }
 0x1b5   :  { %3596 = vst [vmem:[#allocation13_spill] sm:$0xff] %v2719_v19  ;;  %3597 = vst [vmem:[#allocation17_spill] sm:$0xff] %v2723_v6  ;;  %v2751_v11 = vadd.f32 %v2715_v21, %v2488_v44  ;;  %v2755_v54 = vadd.f32 %v2715_v21, %v2492_v59  ;;  %v2759_v55 = vadd.f32 %v2715_v21, %v2496_v2 }
 0x1b6   :  { %3598 = vst [vmem:[#allocation22_spill] sm:$0xff] %v2727_v17  ;;  %3599 = vst [vmem:[#allocation24_spill] sm:$0xff] %v2731_v28  ;;  %v2763_v29 = vadd.f32 %v2715_v21, %v2500_v56  ;;  %v2767_v31 = vadd.f32 %v2715_v21, %v2504_v0  ;;  %v2771_v42 = vadd.f32 %v2715_v21, %v2508_v15 }
 0x1b7   :  { %3600 = vst [vmem:[#allocation8_spill] sm:$0xff] %v2735_v57  ;;  %3601 = vst [vmem:[#allocation11_spill] sm:$0xff] %v2739_v30  ;;  %v2775_v46 = vadd.f32 %v2715_v21, %v2512_v22  ;;  %v2779_v40 = vadd.f32 %v2715_v21, %v2516_v12  ;;  %v2783_v44 = vadd.f32 %v2715_v21, %v2520_v20 }
 0x1b8   :  { %3602 = vst [vmem:[#allocation16_spill] sm:$0xff] %v2743_v37  ;;  %3603 = vst [vmem:[#allocation20_spill] sm:$0xff] %v2747_v38  ;;  %v2787_v59 = vadd.f32 %v2715_v21, %v2524_v35  ;;  %v2791_v2 = vadd.f32 %v2715_v21, %v2528_v50  ;;  %v2795_v56 = vadd.f32 %v2715_v21, %v2532_v32 }
 0x1b9   :  { %3604 = vst [vmem:[#allocation14_spill] sm:$0xff] %v2751_v11  ;;  %3605 = vst [vmem:[#allocation18_spill] sm:$0xff] %v2755_v54  ;;  %v2799_v0 = vadd.f32 %v2715_v21, %v2536_v4  ;;  %v2803_v15 = vadd.f32 %v2715_v21, %v2540_v10  ;;  %v2807_v22 = vadd.f32 %v2715_v21, %v2544_v48 }
 0x1ba   :  { %3606 = vst [vmem:[#allocation23_spill] sm:$0xff] %v2759_v55  ;;  %3607 = vst [vmem:[#allocation25_spill] sm:$0xff] %v2763_v29  ;;  %v2811_v12 = vadd.f32 %v2715_v21, %v2548_v9  ;;  %v2815_v20 = vadd.f32 %v2715_v21, %v2552_v5  ;;  %v2819_v35 = vadd.f32 %v2715_v21, %v2556_v39 }
 0x1bb   :  { %3608 = vst [vmem:[#allocation21_spill] sm:$0xff] %v2767_v31  ;;  %3609 = vst [vmem:[#allocation26_spill] sm:$0xff] %v2771_v42  ;;  %v2823_v50 = vadd.f32 %v2715_v21, %v2560_v18  ;;  %v2827_v32 = vadd.f32 %v2715_v21, %v2564_v25  ;;  %v2831_v4 = vadd.f32 %v2715_v21, %v2568_v26 }
 0x1bc   :  { %3610 = vst [vmem:[#allocation27_spill] sm:$0xff] %v2775_v46  ;;  %3611 = vst [vmem:[#allocation28_spill] sm:$0xff] %v2779_v40  ;;  %v2835_v10 = vadd.f32 %v2715_v21, %v2572_v13  ;;  %v2839_v48 = vadd.f32 %v2715_v21, %v2576_v53  ;;  %v2843_v9 = vadd.f32 %v2715_v21, %v2580_v33 }
 0x1bd   :  { %3612 = vst [vmem:[#allocation29_spill] sm:$0xff] %v2783_v44  ;;  %3613 = vst [vmem:[#allocation30_spill] sm:$0xff] %v2787_v59  ;;  %v2847_v5 = vadd.f32 %v2715_v21, %v2584_v27  ;;  %v2851_v39 = vadd.f32 %v2715_v21, %v2588_v61  ;;  %v2855_v18 = vadd.f32 %v2715_v21, %v2592_v7 }
 0x1be   :  { %3614 = vst [vmem:[#allocation31_spill] sm:$0xff] %v2799_v0  ;;  %3615 = vst [vmem:[#allocation32_spill] sm:$0xff] %v2811_v12  ;;  %v2859_v25 = vadd.f32 %v2715_v21, %v2596_v62  ;;  %v2863_v26 = vadd.f32 %v2715_v21, %v2600_v24  ;;  %v2867_v13 = vadd.f32 %v2715_v21, %v2604_v43 }
 0x1bf   :  { %3616 = vst [vmem:[#allocation33_spill] sm:$0xff] %v2823_v50  ;;  %3617 = vst [vmem:[#allocation34_spill] sm:$0xff] %v2835_v10  ;;  %v2871_v53 = vadd.f32 %v2715_v21, %v2608_v47  ;;  %v2875_v33 = vadd.f32 %v2715_v21, %v2612_v41  ;;  %v2879_v27 = vadd.f32 %v2715_v21, %v2616_v45  ;;  %v3627_v45 = vld [vmem:[#allocation2_spill] sm:$0xff] }
 0x1c0   :  { %3618 = vst [vmem:[#allocation35_spill] sm:$0xff] %v2847_v5  ;;  %3619 = vst [vmem:[#allocation36_spill] sm:$0xff] %v2859_v25  ;;  %v2883_v61 = vadd.f32 %v2715_v21, %v2620_v60  ;;  %v2887_v7 = vadd.f32 %v2715_v21, %v2624_v3  ;;  %v2891_v62 = vadd.f32 %v2715_v21, %v2628_v58  ;;  %v3629_v3 = vld [vmem:[#allocation4_spill] sm:$0xff] }
 0x1c1   :  { %3620 = vst [vmem:[#allocation37_spill] sm:$0xff] %v2871_v53  ;;  %v2895_v24 = vadd.f32 %v2715_v21, %v2632_v1  ;;  %v2899_v43 = vadd.f32 %v2715_v21, %v2636_v16  ;;  %v2903_v47 = vadd.f32 %v2715_v21, %v2640_v23  ;;  %v2907_v41 = vadd.f32 %v2715_v21, %v2644_v14  ;;  %v3631_v1 = vld [vmem:[#allocation6_spill] sm:$0xff] }
 0x1c2   :  { %3621 = vst [vmem:[#allocation38_spill] sm:$0xff] %v2883_v61  ;;  %3622 = vst [vmem:[#allocation39_spill] sm:$0xff] %v2891_v62  ;;  %v2911_v60 = vadd.f32 %v2715_v21, %v3627_v45  ;;  %v2915_v58 = vadd.f32 %v2715_v21, %v3629_v3  ;;  %v2919_v16 = vadd.f32 %v2715_v21, %v3631_v1 }
 0x1c3   :  { %3623 = vst [vmem:[#allocation40_spill] sm:$0xff] %v2895_v24  ;;  %3624 = vst [vmem:[#allocation41_spill] sm:$0xff] %v2899_v43  ;;  %v2923_v23 = vadd.f32 %v2715_v21, %v3633_v63  ;;  %v2927_v14 = vadd.f32 %v2715_v21, %v3635_v8  ;;  %v2947_v8 = vadd.f32 %v2715_v21, %v2684_v52 }
 0x1c4   :  { %3625 = vst [vmem:[#allocation42_spill] sm:$0xff] %v2903_v47  ;;  %3626 = vst [vmem:[#allocation43_spill] sm:$0xff] %v2907_v41  ;;  %v3637_v41 = vld [vmem:[#allocation9_spill] sm:$0xff]  ;;  %v2967_v52 = vadd.f32 %v2715_v21, %v2704_v34  ;;  %v2989_v34 = vmul.f32 0.2, %v2739_v30 }
 0x1c5   :  { %3628 = vst [vmem:[#allocation2_spill] sm:$0xff] %v2911_v60  ;;  %3630 = vst [vmem:[#allocation4_spill] sm:$0xff] %v2915_v58  ;;  %v2931_v45 = vadd.f32 %v2715_v21, %v3637_v41  ;;  %v3639_v60 = vld [vmem:[#allocation12_spill] sm:$0xff]  ;;  %v3641_v58 = vld [vmem:[#allocation7_spill] sm:$0xff]  ;;  %v3080_v30 = vmul.f32 0.2, %v2839_v48 }
 0x1c6   :  { %3632 = vst [vmem:[#allocation6_spill] sm:$0xff] %v2919_v16  ;;  %3634 = vst [vmem:[#allocation3_spill] sm:$0xff] %v2923_v23  ;;  %v2935_v3 = vadd.f32 %v2715_v21, %v3639_v60  ;;  %v2939_v1 = vadd.f32 %v2715_v21, %v3641_v58  ;;  %v3643_v16 = vld [vmem:[#allocation10_spill] sm:$0xff]  ;;  %v2959_v58 = vadd.f32 %v2715_v21, %v2696_v36  ;;  %v2980_v36 = vmul.f32 0.2, %v2727_v17 }
 0x1c7   :  { %3636 = vst [vmem:[#allocation5_spill] sm:$0xff] %v2927_v14  ;;  %3638 = vst [vmem:[#allocation9_spill] sm:$0xff] %v2931_v45  ;;  %v2943_v63 = vadd.f32 %v2715_v21, %v3643_v16  ;;  %v3646_v14 = vld [vmem:[#allocation15_spill] sm:$0xff]  ;;  %v2963_v16 = vadd.f32 %v2715_v21, %v2700_v51  ;;  %v2983_v51 = vmul.f32 0.2, %v2731_v28 }
 0x1c8   :  { %3640 = vst [vmem:[#allocation12_spill] sm:$0xff] %v2935_v3  ;;  %3642 = vst [vmem:[#allocation7_spill] sm:$0xff] %v2939_v1  ;;  %v2951_v41 = vadd.f32 %v2715_v21, %v3646_v14  ;;  %v3648_v45 = vld [vmem:[#allocation19_spill] sm:$0xff]  ;;  %v2971_v14 = vadd.f32 %v2715_v21, %v2708_v49  ;;  %v2995_v49 = vmul.f32 0.2, %v2747_v38 }
 0x1c9   :  { %3644 = vst [vmem:[#allocation10_spill] sm:$0xff] %v2943_v63  ;;  %3645 = vst [vmem:[#allocation44_spill] sm:$0xff] %v2947_v8  ;;  %v2955_v60 = vadd.f32 %v2715_v21, %v3648_v45  ;;  %v2977_v45 = vmul.f32 0.2, %v2723_v6  ;;  %v2992_v21 = vmul.f32 0.2, %v2743_v37 }
 0x1ca   :  { %3647 = vst [vmem:[#allocation15_spill] sm:$0xff] %v2951_v41  ;;  %3650 = vst [vmem:[#allocation45_spill] sm:$0xff] %v2959_v58  ;;  %v2974_v41 = vmul.f32 0.2, %v2719_v19  ;;  %v3003_v58 = vmul.f32 0.2, %v2755_v54 }
 0x1cb   :  { %3649 = vst [vmem:[#allocation19_spill] sm:$0xff] %v2955_v60  ;;  %3651 = vst [vmem:[#allocation46_spill] sm:$0xff] %v2963_v16  ;;  %v2986_v16 = vmul.f32 0.2, %v2735_v57  ;;  %v3006_v60 = vmul.f32 0.2, %v2759_v55 }
 0x1cc   :  { %3652 = vst [vmem:[#allocation47_spill] sm:$0xff] %v2967_v52  ;;  %3653 = vst [vmem:[#allocation48_spill] sm:$0xff] %v2971_v14  ;;  %v2998_v14 = vmul.f32 0.2, %v2751_v11  ;;  %v3009_v8 = vmul.f32 0.2, %v2763_v29 }
 0x1cd   :  { %3654 = vst [vmem:[#allocation49_spill] sm:$0xff] %v2974_v41  ;;  %3655 = vst [vmem:[#allocation50_spill] sm:$0xff] %v2977_v45  ;;  %v3014_v1 = vmul.f32 0.2, %v2767_v31  ;;  %v3017_v3 = vmul.f32 0.2, %v2771_v42 }
 0x1ce   :  { %3656 = vst [vmem:[#allocation51_spill] sm:$0xff] %v2980_v36  ;;  %3657 = vst [vmem:[#allocation52_spill] sm:$0xff] %v2983_v51  ;;  %v3020_v52 = vmul.f32 0.2, %v2775_v46  ;;  %v3025_v19 = vmul.f32 0.2, %v2779_v40 }
 0x1cf   :  { %3658 = vst [vmem:[#allocation53_spill] sm:$0xff] %v2986_v16  ;;  %3659 = vst [vmem:[#allocation54_spill] sm:$0xff] %v2989_v34  ;;  %v3028_v23 = vmul.f32 0.2, %v2783_v44  ;;  %v3031_v63 = vmul.f32 0.2, %v2787_v59 }
 0x1d0   :  { %3660 = vst [vmem:[#allocation55_spill] sm:$0xff] %v2992_v21  ;;  %3661 = vst [vmem:[#allocation56_spill] sm:$0xff] %v2995_v49  ;;  %v3036_v6 = vmul.f32 0.2, %v2791_v2  ;;  %v3039_v46 = vmul.f32 0.2, %v2795_v56 }
 0x1d1   :  { %3662 = vst [vmem:[#allocation57_spill] sm:$0xff] %v2998_v14  ;;  %3663 = vst [vmem:[#allocation58_spill] sm:$0xff] %v3003_v58  ;;  %v3042_v41 = vmul.f32 0.2, %v2799_v0  ;;  %v3047_v17 = vmul.f32 0.2, %v2803_v15 }
 0x1d2   :  { %3664 = vst [vmem:[#allocation59_spill] sm:$0xff] %v3006_v60  ;;  %3665 = vst [vmem:[#allocation60_spill] sm:$0xff] %v3009_v8  ;;  %v3050_v59 = vmul.f32 0.2, %v2807_v22  ;;  %v3053_v45 = vmul.f32 0.2, %v2811_v12 }
 0x1d3   :  { %3666 = vst [vmem:[#allocation61_spill] sm:$0xff] %v3014_v1  ;;  %3667 = vst [vmem:[#allocation62_spill] sm:$0xff] %v3017_v3  ;;  %v3058_v28 = vmul.f32 0.2, %v2815_v20  ;;  %v3061_v0 = vmul.f32 0.2, %v2819_v35 }
 0x1d4   :  { %3668 = vst [vmem:[#allocation63_spill] sm:$0xff] %v3020_v52  ;;  %3669 = vst [vmem:[#allocation64_spill] sm:$0xff] %v3025_v19  ;;  %v3064_v36 = vmul.f32 0.2, %v2823_v50  ;;  %v3069_v57 = vmul.f32 0.2, %v2827_v32 }
 0x1d5   :  { %3670 = vst [vmem:[#allocation65_spill] sm:$0xff] %v3028_v23  ;;  %v3072_v12 = vmul.f32 0.2, %v2831_v4  ;;  %v3075_v51 = vmul.f32 0.2, %v2835_v10  ;;  %v3677_v29 = vld [vmem:[#allocation2_spill] sm:$0xff]  ;;  %v1063_v23 = vmax.f32 %v2791_v2, %v3036_v6  ;;  %v1069_v6 = vmax.f32 %v2815_v20, %v3058_v28 }
 0x1d6   :  { %v3083_v50 = vmul.f32 0.2, %v2843_v9  ;;  %v3086_v16 = vmul.f32 0.2, %v2847_v5  ;;  %v3091_v37 = vmul.f32 0.2, %v2851_v39  ;;  %v1070_v2 = vmax.f32 %v2819_v35, %v3061_v0 }
 0x1d7   :  { %v3094_v10 = vmul.f32 0.2, %v2855_v18  ;;  %v3097_v34 = vmul.f32 0.2, %v2859_v25  ;;  %v3102_v38 = vmul.f32 0.2, %v2863_v26 }
 0x1d8   :  { %v3105_v5 = vmul.f32 0.2, %v2867_v13  ;;  %v3108_v21 = vmul.f32 0.2, %v2871_v53  ;;  %v3113_v11 = vmul.f32 0.2, %v2875_v33  ;;  %v1076_v28 = vmax.f32 %v2843_v9, %v3083_v50 }
 0x1d9   :  { %v3116_v25 = vmul.f32 0.2, %v2879_v27  ;;  %v3119_v49 = vmul.f32 0.2, %v2883_v61  ;;  %v3124_v54 = vmul.f32 0.2, %v2887_v7  ;;  %v1078_v20 = vmax.f32 %v2851_v39, %v3091_v37 }
 0x1da   :  { %v3127_v53 = vmul.f32 0.2, %v2891_v62  ;;  %v3130_v14 = vmul.f32 0.2, %v2895_v24  ;;  %v3135_v55 = vmul.f32 0.2, %v2899_v43 }
 0x1db   :  { %3671 = vst [vmem:[#allocation66_spill] sm:$0xff] %v3119_v49  ;;  %v3138_v61 = vmul.f32 0.2, %v2903_v47  ;;  %v3675_v49 = vld [vmem:[#allocation43_spill] sm:$0xff]  ;;  %v3146_v62 = vmul.f32 0.2, %v3677_v29  ;;  %v1085_v37 = vmax.f32 %v2879_v27, %v3116_v25 }
 0x1dc   :  { %3672 = vst [vmem:[#allocation67_spill] sm:$0xff] %v3127_v53  ;;  %3673 = vst [vmem:[#allocation68_spill] sm:$0xff] %v3130_v14  ;;  %v3141_v58 = vmul.f32 0.2, %v3675_v49  ;;  %v3678_v24 = vld [vmem:[#allocation4_spill] sm:$0xff]  ;;  %v3680_v53 = vld [vmem:[#allocation6_spill] sm:$0xff] }
 0x1dd   :  { %3674 = vst [vmem:[#allocation69_spill] sm:$0xff] %v3138_v61  ;;  %v3149_v14 = vmul.f32 0.2, %v3678_v24  ;;  %v3152_v60 = vmul.f32 0.2, %v3680_v53  ;;  %v3683_v47 = vld [vmem:[#allocation3_spill] sm:$0xff] }
 0x1de   :  { %3676 = vst [vmem:[#allocation70_spill] sm:$0xff] %v3141_v58  ;;  %v3157_v61 = vmul.f32 0.2, %v3683_v47  ;;  %v3684_v49 = vld [vmem:[#allocation5_spill] sm:$0xff]  ;;  %v3688_v42 = vld [vmem:[#allocation12_spill] sm:$0xff]  ;;  %v3689_v53 = vld [vmem:[#allocation7_spill] sm:$0xff] }
 0x1df   :  { %3679 = vst [vmem:[#allocation2_spill] sm:$0xff] %v3149_v14  ;;  %3681 = vst [vmem:[#allocation71_spill] sm:$0xff] %v3152_v60  ;;  %v3160_v58 = vmul.f32 0.2, %v3684_v49  ;;  %v3686_v43 = vld [vmem:[#allocation9_spill] sm:$0xff]  ;;  %v3691_v14 = vld [vmem:[#allocation10_spill] sm:$0xff] }
 0x1e0   :  { %v3163_v8 = vmul.f32 0.2, %v3686_v43  ;;  %v3168_v24 = vmul.f32 0.2, %v3688_v42  ;;  %v3171_v60 = vmul.f32 0.2, %v3689_v53 }
 0x1e1   :  { %3685 = vst [vmem:[#allocation3_spill] sm:$0xff] %v3160_v58  ;;  %v3174_v31 = vmul.f32 0.2, %v3691_v14  ;;  %v3693_v1 = vld [vmem:[#allocation44_spill] sm:$0xff]  ;;  %v3694_v43 = vld [vmem:[#allocation15_spill] sm:$0xff]  ;;  %v3696_v19 = vld [vmem:[#allocation30_spill] sm:$0xff] }
 0x1e2   :  { %3687 = vst [vmem:[#allocation72_spill] sm:$0xff] %v3163_v8  ;;  %3690 = vst [vmem:[#allocation73_spill] sm:$0xff] %v3171_v60  ;;  %v3179_v49 = vmul.f32 0.2, %v3693_v1  ;;  %v3182_v8 = vmul.f32 0.2, %v3694_v43  ;;  %v1062_v40 = vmax.f32 %v3696_v19, %v3031_v63 }
 0x1e3   :  { %3692 = vst [vmem:[#allocation74_spill] sm:$0xff] %v3174_v31  ;;  %v3695_v58 = vld [vmem:[#allocation19_spill] sm:$0xff]  ;;  %v3697_v53 = vld [vmem:[#allocation45_spill] sm:$0xff]  ;;  %v3698_v14 = vld [vmem:[#allocation46_spill] sm:$0xff] }
 0x1e4   :  { %v3185_v3 = vmul.f32 0.2, %v3695_v58  ;;  %v3190_v60 = vmul.f32 0.2, %v3697_v53  ;;  %v3193_v31 = vmul.f32 0.2, %v3698_v14  ;;  %v1064_v58 = vmax.f32 %v2795_v56, %v3039_v46 }
 0x1e5   :  { %v3699_v42 = vld [vmem:[#allocation47_spill] sm:$0xff]  ;;  %v3701_v44 = vld [vmem:[#allocation48_spill] sm:$0xff]  ;;  %v1066_v53 = vmax.f32 %v2803_v15, %v3047_v17  ;;  %v1067_v14 = vmax.f32 %v2807_v22, %v3050_v59  ;;  %v3704_v46 = vld [vmem:[#allocation33_spill] sm:$0xff]  ;;  %v1073_v17 = vmax.f32 %v2831_v4, %v3072_v12 }
 0x1e6   :  { %v3196_v52 = vmul.f32 0.2, %v3699_v42  ;;  %v3201_v43 = vmul.f32 0.2, %v3701_v44  ;;  %v3702_v19 = vld [vmem:[#allocation31_spill] sm:$0xff]  ;;  %v3703_v42 = vld [vmem:[#allocation32_spill] sm:$0xff]  ;;  %v1071_v56 = vmax.f32 %v3704_v46, %v3064_v36 }
 0x1e7   :  { %v1065_v63 = vmax.f32 %v3702_v19, %v3042_v41  ;;  %v1072_v41 = vmax.f32 %v2827_v32, %v3069_v57  ;;  %v3705_v59 = vld [vmem:[#allocation34_spill] sm:$0xff]  ;;  %v3706_v0 = vld [vmem:[#allocation35_spill] sm:$0xff]  ;;  %v1079_v57 = vmax.f32 %v2855_v18, %v3094_v10  ;;  %v3707_v12 = vld [vmem:[#allocation36_spill] sm:$0xff]  ;;  %v1081_v32 = vmax.f32 %v2863_v26, %v3102_v38 }
 0x1e8   :  { %3700 = vst [vmem:[#allocation44_spill] sm:$0xff] %v3196_v52  ;;  %v1068_v52 = vmax.f32 %v3703_v42, %v3053_v45  ;;  %v1074_v15 = vmax.f32 %v3705_v59, %v3075_v51  ;;  %v1075_v42 = vmax.f32 %v2839_v48, %v3080_v30  ;;  %v1077_v22 = vmax.f32 %v3706_v0, %v3086_v16  ;;  %v3708_v50 = vld [vmem:[#allocation37_spill] sm:$0xff]  ;;  %v3709_v9 = vld [vmem:[#allocation66_spill] sm:$0xff]  ;;  %v3711_v16 = vld [vmem:[#allocation67_spill] sm:$0xff] }
 0x1e9   :  { %v1080_v35 = vmax.f32 %v3707_v12, %v3097_v34  ;;  %v1082_v30 = vmax.f32 %v2867_v13, %v3105_v5  ;;  %v1083_v4 = vmax.f32 %v3708_v50, %v3108_v21  ;;  %v1084_v48 = vmax.f32 %v2875_v33, %v3113_v11  ;;  %v3710_v10 = vld [vmem:[#allocation38_spill] sm:$0xff]  ;;  %v3712_v38 = vld [vmem:[#allocation39_spill] sm:$0xff]  ;;  %v3713_v45 = vld [vmem:[#allocation68_spill] sm:$0xff] }
 0x1ea   :  { %v1086_v39 = vmax.f32 %v3710_v10, %v3709_v9  ;;  %v1087_v18 = vmax.f32 %v2887_v7, %v3124_v54  ;;  %v1088_v26 = vmax.f32 %v3712_v38, %v3711_v16  ;;  %v3714_v5 = vld [vmem:[#allocation40_spill] sm:$0xff]  ;;  %v3715_v36 = vld [vmem:[#allocation41_spill] sm:$0xff]  ;;  %v3717_v11 = vld [vmem:[#allocation42_spill] sm:$0xff]  ;;  %v1093_v19 = vmax.f32 %v3677_v29, %v3146_v62 }
 0x1eb   :  { %v1089_v13 = vmax.f32 %v3714_v5, %v3713_v45  ;;  %v1090_v51 = vmax.f32 %v3715_v36, %v3135_v55  ;;  %v3716_v34 = vld [vmem:[#allocation69_spill] sm:$0xff]  ;;  %v3718_v21 = vld [vmem:[#allocation70_spill] sm:$0xff]  ;;  %v3719_v25 = vld [vmem:[#allocation43_spill] sm:$0xff]  ;;  %v1096_v50 = vmax.f32 %v3683_v47, %v3157_v61 }
 0x1ec   :  { %v1091_v33 = vmax.f32 %v3717_v11, %v3716_v34  ;;  %v1092_v27 = vmax.f32 %v3719_v25, %v3718_v21  ;;  %v3720_v46 = vld [vmem:[#allocation2_spill] sm:$0xff]  ;;  %v3721_v54 = vld [vmem:[#allocation4_spill] sm:$0xff]  ;;  %v3722_v59 = vld [vmem:[#allocation71_spill] sm:$0xff] }
 0x1ed   :  { %v1094_v7 = vmax.f32 %v3721_v54, %v3720_v46  ;;  %v3723_v0 = vld [vmem:[#allocation6_spill] sm:$0xff]  ;;  %v3724_v9 = vld [vmem:[#allocation3_spill] sm:$0xff]  ;;  %v3725_v55 = vld [vmem:[#allocation5_spill] sm:$0xff]  ;;  %v1102_v46 = vmax.f32 %v3693_v1, %v3179_v49 }
 0x1ee   :  { %v1095_v12 = vmax.f32 %v3723_v0, %v3722_v59  ;;  %v1097_v10 = vmax.f32 %v3725_v55, %v3724_v9  ;;  %v3726_v16 = vld [vmem:[#allocation72_spill] sm:$0xff]  ;;  %v3727_v38 = vld [vmem:[#allocation9_spill] sm:$0xff]  ;;  %v3730_v29 = vld [vmem:[#allocation7_spill] sm:$0xff] }
 0x1ef   :  { %v1098_v45 = vmax.f32 %v3727_v38, %v3726_v16  ;;  %v3728_v5 = vld [vmem:[#allocation12_spill] sm:$0xff]  ;;  %v3729_v34 = vld [vmem:[#allocation73_spill] sm:$0xff]  ;;  %v3731_v11 = vld [vmem:[#allocation74_spill] sm:$0xff] }
 0x1f0   :  { %v1099_v36 = vmax.f32 %v3728_v5, %v3168_v24  ;;  %v1100_v62 = vmax.f32 %v3730_v29, %v3729_v34  ;;  %v3732_v21 = vld [vmem:[#allocation10_spill] sm:$0xff]  ;;  %v3733_v61 = vld [vmem:[#allocation15_spill] sm:$0xff]  ;;  %v3735_v0 = vld [vmem:[#allocation45_spill] sm:$0xff]  ;;  %v1108_v34 = vmax.f32 %v3701_v44, %v3201_v43 }
 0x1f1   :  { %v1101_v25 = vmax.f32 %v3732_v21, %v3731_v11  ;;  %v1103_v47 = vmax.f32 %v3733_v61, %v3182_v8  ;;  %v3734_v54 = vld [vmem:[#allocation19_spill] sm:$0xff]  ;;  %v1105_v9 = vmax.f32 %v3735_v0, %v3190_v60  ;;  %v3736_v24 = vld [vmem:[#allocation46_spill] sm:$0xff]  ;;  %v3737_v16 = vld [vmem:[#allocation44_spill] sm:$0xff] }
 0x1f2   :  { %v1104_v59 = vmax.f32 %v3734_v54, %v3185_v3  ;;  %v1106_v55 = vmax.f32 %v3736_v24, %v3193_v31  ;;  %v3738_v38 = vld [vmem:[#allocation47_spill] sm:$0xff]  ;;  %v3739_v29 = vld [vmem:[#allocation13_spill] sm:$0xff]  ;;  %v3743_v8 = vld [vmem:[#allocation50_spill] sm:$0xff] }
 0x1f3   :  { %v1107_v5 = vmax.f32 %v3738_v38, %v3737_v16  ;;  %v3740_v1 = vld [vmem:[#allocation49_spill] sm:$0xff]  ;;  %v3745_v3 = vld [vmem:[#allocation22_spill] sm:$0xff]  ;;  %v3746_v54 = vld [vmem:[#allocation51_spill] sm:$0xff] }
 0x1f4   :  { %v3741_v49 = vmax.f32 %v3739_v29, %v3740_v1  ;;  %v3742_v11 = vld [vmem:[#allocation17_spill] sm:$0xff]  ;;  %v3747_v0 = vmax.f32 %v3745_v3, %v3746_v54  ;;  %v3748_v60 = vld [vmem:[#allocation24_spill] sm:$0xff]  ;;  %v3754_v1 = vld [vmem:[#allocation11_spill] sm:$0xff] }
 0x1f5   :  { %v3744_v21 = vmax.f32 %v3742_v11, %v3743_v8  ;;  %v3749_v24 = vld [vmem:[#allocation52_spill] sm:$0xff]  ;;  %v3752_v43 = vld [vmem:[#allocation53_spill] sm:$0xff]  ;;  %v3755_v29 = vld [vmem:[#allocation54_spill] sm:$0xff] }
 0x1f6   :  { %v3750_v31 = vmax.f32 %v3748_v60, %v3749_v24  ;;  %v3751_v38 = vld [vmem:[#allocation8_spill] sm:$0xff]  ;;  %v3756_v8 = vmax.f32 %v3754_v1, %v3755_v29  ;;  %v3766_v1 = vld [vmem:[#allocation18_spill] sm:$0xff] }
 0x1f7   :  { %v1604_v61 = vpack.c.bf16 %v3744_v21, %v3741_v49  ;;  %v3753_v44 = vmax.f32 %v3751_v38, %v3752_v43  ;;  %v3757_v21 = vld [vmem:[#allocation16_spill] sm:$0xff]  ;;  %v3758_v49 = vld [vmem:[#allocation55_spill] sm:$0xff]  ;;  %v3764_v38 = vld [vmem:[#allocation57_spill] sm:$0xff] }
 0x1f8   :  { %v1609_v16 = vpack.c.bf16 %v3750_v31, %v3747_v0  ;;  %v3759_v3 = vmax.f32 %v3757_v21, %v3758_v49  ;;  %v3760_v54 = vld [vmem:[#allocation20_spill] sm:$0xff]  ;;  %v3763_v31 = vld [vmem:[#allocation14_spill] sm:$0xff]  ;;  %v3769_v21 = vld [vmem:[#allocation23_spill] sm:$0xff] }
 0x1f9   :  { %v1614_v11 = vpack.c.bf16 %v3756_v8, %v3753_v44  ;;  %v3761_v24 = vld [vmem:[#allocation56_spill] sm:$0xff]  ;;  %v3765_v43 = vmax.f32 %v3763_v31, %v3764_v38  ;;  %v3767_v29 = vld [vmem:[#allocation58_spill] sm:$0xff]  ;;  %v3770_v49 = vld [vmem:[#allocation59_spill] sm:$0xff]  ;;  %1605 = vst [vmem:[%s3444_s4] sm:$0xff] %v1604_v61  }
 0x1fa   :  { %v3762_v60 = vmax.f32 %v3760_v54, %v3761_v24  ;;  %v3768_v8 = vmax.f32 %v3766_v1, %v3767_v29  ;;  %v3771_v24 = vmax.f32 %v3769_v21, %v3770_v49  ;;  %v3772_v54 = vld [vmem:[#allocation25_spill] sm:$0xff]  ;;  %1761 = vst [vmem:[%s3444_s4 + $0x8] sm:$0xff] %v1609_v16   ;;  %v3785_v61 = vld [vmem:[#allocation64_spill] sm:$0xff] }
 0x1fb   :  { %v3775_v38 = vld [vmem:[#allocation21_spill] sm:$0xff]  ;;  %1762 = vst [vmem:[%s3444_s4 + $0x10] sm:$0xff] %v1614_v11  }
 0x1fc   :  { %v1619_v0 = vpack.c.bf16 %v3762_v60, %v3759_v3  ;;  %v1624_v44 = vpack.c.bf16 %v3768_v8, %v3765_v43  ;;  %v3773_v3 = vld [vmem:[#allocation60_spill] sm:$0xff]  ;;  %v3776_v1 = vld [vmem:[#allocation61_spill] sm:$0xff]  ;;  %v3778_v8 = vld [vmem:[#allocation26_spill] sm:$0xff] }
 0x1fd   :  { %v3774_v60 = vmax.f32 %v3772_v54, %v3773_v3  ;;  %v3777_v29 = vmax.f32 %v3775_v38, %v3776_v1  ;;  %v3779_v43 = vld [vmem:[#allocation62_spill] sm:$0xff]  ;;  %v3781_v3 = vld [vmem:[#allocation27_spill] sm:$0xff]  ;;  %v3787_v38 = vld [vmem:[#allocation29_spill] sm:$0xff] }
 0x1fe   :  { %v3780_v21 = vmax.f32 %v3778_v8, %v3779_v43  ;;  %v3782_v54 = vld [vmem:[#allocation63_spill] sm:$0xff]  ;;  %v3788_v8 = vld [vmem:[#allocation65_spill] sm:$0xff]  ;;  %1763 = vst [vmem:[%s3444_s4 + $0x18] sm:$0xff] %v1619_v0   ;;  %1764 = vst [vmem:[%s3444_s4 + $0x20] sm:$0xff] %v1624_v44  }
 0x1ff   :  { %v1629_v31 = vpack.c.bf16 %v3774_v60, %v3771_v24  ;;  %v3783_v24 = vmax.f32 %v3781_v3, %v3782_v54  ;;  %v3784_v60 = vld [vmem:[#allocation28_spill] sm:$0xff]  ;;  %v3789_v43 = vmax.f32 %v3787_v38, %v3788_v8  ;;  %v1654_v3 = vpack.c.bf16 %v1066_v53, %v1065_v63 }
 0x200   :  { %v1634_v49 = vpack.c.bf16 %v3780_v21, %v3777_v29  ;;  %v3786_v16 = vmax.f32 %v3784_v60, %v3785_v61  ;;  %v1649_v29 = vpack.c.bf16 %v1064_v58, %v1063_v23  ;;  %v1659_v54 = vpack.c.bf16 %v1068_v52, %v1067_v14 }
 0x201   :  { %v1644_v21 = vpack.c.bf16 %v1062_v40, %v3789_v43  ;;  %1765 = vst [vmem:[%s3444_s4 + $0x28] sm:$0xff] %v1629_v31   ;;  %v1664_v40 = vpack.c.bf16 %v1070_v2, %v1069_v6  ;;  %v1669_v23 = vpack.c.bf16 %v1072_v41, %v1071_v56  ;;  %v1674_v53 = vpack.c.bf16 %v1074_v15, %v1073_v17 }
 0x202   :  { %v1639_v1 = vpack.c.bf16 %v3786_v16, %v3783_v24  ;;  %1766 = vst [vmem:[%s3444_s4 + $0x30] sm:$0xff] %v1634_v49   ;;  %1769 = vst [vmem:[%s3444_s4 + $0x48] sm:$0xff] %v1649_v29   ;;  %v1679_v58 = vpack.c.bf16 %v1076_v28, %v1075_v42  ;;  %v1684_v52 = vpack.c.bf16 %v1078_v20, %v1077_v22 }
 0x203   :  { %1768 = vst [vmem:[%s3444_s4 + $0x40] sm:$0xff] %v1644_v21   ;;  %v1689_v14 = vpack.c.bf16 %v1080_v35, %v1079_v57  ;;  %1770 = vst [vmem:[%s3444_s4 + $0x50] sm:$0xff] %v1654_v3   ;;  %v1694_v63 = vpack.c.bf16 %v1082_v30, %v1081_v32  ;;  %v1699_v6 = vpack.c.bf16 %v1084_v48, %v1083_v4 }
 0x204   :  { %1767 = vst [vmem:[%s3444_s4 + $0x38] sm:$0xff] %v1639_v1   ;;  %1771 = vst [vmem:[%s3444_s4 + $0x58] sm:$0xff] %v1659_v54   ;;  %v1704_v2 = vpack.c.bf16 %v1086_v39, %v1085_v37  ;;  %v1709_v56 = vpack.c.bf16 %v1088_v26, %v1087_v18  ;;  %v1714_v41 = vpack.c.bf16 %v1090_v51, %v1089_v13 }
 0x205   :  { %1772 = vst [vmem:[%s3444_s4 + $0x60] sm:$0xff] %v1664_v40   ;;  %1773 = vst [vmem:[%s3444_s4 + $0x68] sm:$0xff] %v1669_v23   ;;  %v1719_v17 = vpack.c.bf16 %v1092_v27, %v1091_v33  ;;  %v1724_v15 = vpack.c.bf16 %v1094_v7, %v1093_v19  ;;  %v1729_v42 = vpack.c.bf16 %v1096_v50, %v1095_v12 }
 0x206   :  { %1774 = vst [vmem:[%s3444_s4 + $0x70] sm:$0xff] %v1674_v53   ;;  %1775 = vst [vmem:[%s3444_s4 + $0x78] sm:$0xff] %v1679_v58   ;;  %v1734_v28 = vpack.c.bf16 %v1098_v45, %v1097_v10  ;;  %v1739_v22 = vpack.c.bf16 %v1100_v62, %v1099_v36  ;;  %v1744_v20 = vpack.c.bf16 %v1102_v46, %v1101_v25 }
 0x207   :  { %1776 = vst [vmem:[%s3444_s4 + $0x80] sm:$0xff] %v1684_v52   ;;  %1777 = vst [vmem:[%s3444_s4 + $0x88] sm:$0xff] %v1689_v14   ;;  %v1749_v57 = vpack.c.bf16 %v1104_v59, %v1103_v47  ;;  %v1754_v35 = vpack.c.bf16 %v1106_v55, %v1105_v9  ;;  %v1759_v32 = vpack.c.bf16 %v1108_v34, %v1107_v5 }
 0x208   :  { %1778 = vst [vmem:[%s3444_s4 + $0x90] sm:$0xff] %v1694_v63   ;;  %1779 = vst [vmem:[%s3444_s4 + $0x98] sm:$0xff] %v1699_v6  }
 0x209   :  { %1780 = vst [vmem:[%s3444_s4 + $0xa0] sm:$0xff] %v1704_v2   ;;  %1781 = vst [vmem:[%s3444_s4 + $0xa8] sm:$0xff] %v1709_v56  }
 0x20a   :  { %1782 = vst [vmem:[%s3444_s4 + $0xb0] sm:$0xff] %v1714_v41   ;;  %1783 = vst [vmem:[%s3444_s4 + $0xb8] sm:$0xff] %v1719_v17  }
 0x20b   :  { %1784 = vst [vmem:[%s3444_s4 + $0xc0] sm:$0xff] %v1724_v15   ;;  %1785 = vst [vmem:[%s3444_s4 + $0xc8] sm:$0xff] %v1729_v42  }
 0x20c   :  { %1786 = vst [vmem:[%s3444_s4 + $0xd0] sm:$0xff] %v1734_v28   ;;  %1787 = vst [vmem:[%s3444_s4 + $0xd8] sm:$0xff] %v1739_v22  }
 0x20d   :  { %1788 = vst [vmem:[%s3444_s4 + $0xe0] sm:$0xff] %v1744_v20   ;;  %1789 = vst [vmem:[%s3444_s4 + $0xe8] sm:$0xff] %v1749_v57  }
 0x20e   :  { %1790 = vst [vmem:[%s3444_s4 + $0xf0] sm:$0xff] %v1754_v35   ;;  %1791 = vst [vmem:[%s3444_s4 + $0xf8] sm:$0xff] %v1759_v32  }

// kernel: discriminator_forward.6
= control target key start
LH: loop header
LB: loop body
LE: loop exit
PB: predicated region body
PF: predicated region fallthrough
CT: control target
= control target key end

     0   :  { %s4844_s1 = inlined_call_operand.vmem [shape: bf16[2048,128], index: 1, kind: input, shape index: {}]   ;;  %s4845_s0 = inlined_call_operand.vmem [shape: bf16[128,2048], index: 0, kind: input, shape index: {}]   ;;  %s4846_s2 = inlined_call_operand.vmem [shape: f32[1,128], index: 2, kind: input, shape index: {}]   ;;  %s4847_s3 = inlined_call_operand.vmem [shape: f32[1,128], index: 3, kind: input, shape index: {}]   ;;  %s4848_s4 = inlined_call_operand.vmem [shape: bf16[128,128], index: 4, kind: output, shape index: {}]  }
   0x1   :  { %v3663_v0 = vld [vmem:[%s4844_s1 + $0x40] sm:$0xff]   ;;  %v3667_v4 = vld [vmem:[%s4844_s1 + $0x48] sm:$0xff]   ;;  %v3671_v8 = vld [vmem:[%s4844_s1 + $0x50] sm:$0xff]  }
   0x2   :  { %v3664_v1 = vld [vmem:[%s4844_s1 + $0xc0] sm:$0xff]   ;;  %3151 = vmatprep.subr.bf16.mxu0 %v3663_v0  ;;  %v3668_v5 = vld [vmem:[%s4844_s1 + $0xc8] sm:$0xff]   ;;  %v3672_v9 = vld [vmem:[%s4844_s1 + $0xd0] sm:$0xff]  }
   0x3   :  { %v3665_v2 = vld [vmem:[%s4844_s1] sm:$0xff]   ;;  %3215 = vmatprep.subr.bf16.mxu1 %v3664_v1  ;;  %v3669_v6 = vld [vmem:[%s4844_s1 + $0x8] sm:$0xff]   ;;  %v3673_v10 = vld [vmem:[%s4844_s1 + $0x10] sm:$0xff]  }
   0x4   :  { %v3666_v3 = vld [vmem:[%s4844_s1 + $0x80] sm:$0xff]   ;;  %3152 = vmatpush3.bf16.msra.mxu0 %v3665_v2  ;;  %v3670_v7 = vld [vmem:[%s4844_s1 + $0x88] sm:$0xff]   ;;  %v3674_v11 = vld [vmem:[%s4844_s1 + $0x90] sm:$0xff]  }
   0x5   :  { %3216 = vmatpush3.bf16.msra.mxu1 %v3666_v3  ;;  %3153 = vmatprep.subr.bf16.mxu0 %v3667_v4  ;;  %v3675_v12 = vld [vmem:[%s4844_s1 + $0x58] sm:$0xff]   ;;  %v3679_v16 = vld [vmem:[%s4844_s1 + $0x60] sm:$0xff]   ;;  %v3683_v20 = vld [vmem:[%s4844_s1 + $0x68] sm:$0xff]  }
   0x6   :  { %3217 = vmatprep.subr.bf16.mxu1 %v3668_v5  ;;  %v3676_v13 = vld [vmem:[%s4844_s1 + $0xd8] sm:$0xff]   ;;  %v3680_v17 = vld [vmem:[%s4844_s1 + $0xe0] sm:$0xff]   ;;  %v3684_v21 = vld [vmem:[%s4844_s1 + $0xe8] sm:$0xff]  }
   0x7   :  { %v3677_v14 = vld [vmem:[%s4844_s1 + $0x18] sm:$0xff]   ;;  %v3681_v18 = vld [vmem:[%s4844_s1 + $0x20] sm:$0xff]   ;;  %v3685_v22 = vld [vmem:[%s4844_s1 + $0x28] sm:$0xff]  }
   0x8   :  { %3154 = vmatpush3.bf16.msra.mxu0 %v3669_v6  ;;  %v3678_v15 = vld [vmem:[%s4844_s1 + $0x98] sm:$0xff]   ;;  %v3682_v19 = vld [vmem:[%s4844_s1 + $0xa0] sm:$0xff]   ;;  %v3686_v23 = vld [vmem:[%s4844_s1 + $0xa8] sm:$0xff]  }
   0x9   :  { %3218 = vmatpush3.bf16.msra.mxu1 %v3670_v7  ;;  %3155 = vmatprep.subr.bf16.mxu0 %v3671_v8  ;;  %v3687_v24 = vld [vmem:[%s4844_s1 + $0x70] sm:$0xff]   ;;  %v3691_v28 = vld [vmem:[%s4844_s1 + $0x78] sm:$0xff]   ;;  %v18_v32 = vld [vmem:[%s4845_s0] sm:$0xff] }
   0xa   :  { %3219 = vmatprep.subr.bf16.mxu1 %v3672_v9  ;;  %v3688_v25 = vld [vmem:[%s4844_s1 + $0xf0] sm:$0xff]   ;;  %v3692_v29 = vld [vmem:[%s4844_s1 + $0xf8] sm:$0xff]   ;;  %v26_v33 = vld [vmem:[%s4845_s0 + $0x40] sm:$0xff] }
   0xb   :  { %v3689_v26 = vld [vmem:[%s4844_s1 + $0x30] sm:$0xff]   ;;  %v3693_v30 = vld [vmem:[%s4844_s1 + $0x38] sm:$0xff]   ;;  %v19_v34 = vld [vmem:[%s4845_s0 + $0x8] sm:$0xff]  ;;  %v2816_v35 = vcombine.low %v18_v32, %v26_v33  ;;  %v2817_v36 = vcombine.high %v18_v32, %v26_v33 }
   0xc   :  { %3156 = vmatpush3.bf16.msra.mxu0 %v3673_v10  ;;  %v3690_v27 = vld [vmem:[%s4844_s1 + $0xb0] sm:$0xff]   ;;  %v3694_v31 = vld [vmem:[%s4844_s1 + $0xb8] sm:$0xff]   ;;  %v27_v37 = vld [vmem:[%s4845_s0 + $0x48] sm:$0xff] }
   0xd   :  { %3220 = vmatpush3.bf16.msra.mxu1 %v3674_v11  ;;  %3157 = vmatprep.subr.bf16.mxu0 %v3675_v12  ;;  %v2818_v38 = vcombine.low %v19_v34, %v27_v37  ;;  %v2819_v39 = vcombine.high %v19_v34, %v27_v37  ;;  %v3695_v40 = vld [vmem:[%s4844_s1 + $0x140] sm:$0xff]   ;;  %v35_v47 = vld [vmem:[%s4845_s0 + $0x88] sm:$0xff]  ;;  %v3703_v62 = vld [vmem:[%s4844_s1 + $0x150] sm:$0xff]  }
   0xe   :  { %3221 = vmatprep.subr.bf16.mxu1 %v3676_v13  ;;  %1842 = vmatprep.mubr.bf16.mxu0 %v2817_v36  ;;  %v3696_v41 = vld [vmem:[%s4844_s1 + $0x100] sm:$0xff]   ;;  %v43_v48 = vld [vmem:[%s4845_s0 + $0xc8] sm:$0xff]  ;;  %v3704_v63 = vld [vmem:[%s4844_s1 + $0x110] sm:$0xff]  }
   0xf   :  { %1939 = vmatprep.mubr.bf16.mxu1 %v2819_v39  ;;  %v3697_v42 = vld [vmem:[%s4844_s1 + $0x1c0] sm:$0xff]   ;;  %v2835_v49 = vcombine.high %v35_v47, %v43_v48  ;;  %v3699_v50 = vld [vmem:[%s4844_s1 + $0x148] sm:$0xff]   ;;  %v2834_v53 = vcombine.low %v35_v47, %v43_v48  ;;  %v3705_v0 = vld [vmem:[%s4844_s1 + $0x1d0] sm:$0xff]  }
  0x10   :  { %3158 = vmatpush3.bf16.msra.mxu0 %v3677_v14  ;;  %v3698_v43 = vld [vmem:[%s4844_s1 + $0x180] sm:$0xff]   ;;  %v3700_v52 = vld [vmem:[%s4844_s1 + $0x108] sm:$0xff]   ;;  %v3706_v1 = vld [vmem:[%s4844_s1 + $0x190] sm:$0xff]  }
  0x11   :  { %3222 = vmatpush3.bf16.msra.mxu1 %v3678_v15  ;;  %3159 = vmatprep.subr.bf16.mxu0 %v3679_v16  ;;  %v34_v44 = vld [vmem:[%s4845_s0 + $0x80] sm:$0xff]  ;;  %v3701_v54 = vld [vmem:[%s4844_s1 + $0x1c8] sm:$0xff]   ;;  %v3707_v10 = vld [vmem:[%s4844_s1 + $0x158] sm:$0xff]  }
  0x12   :  { %3223 = vmatprep.subr.bf16.mxu1 %v3680_v17  ;;  %v42_v45 = vld [vmem:[%s4845_s0 + $0xc0] sm:$0xff]  ;;  %v3702_v55 = vld [vmem:[%s4844_s1 + $0x188] sm:$0xff]   ;;  %v3708_v11 = vld [vmem:[%s4844_s1 + $0x118] sm:$0xff]  }
  0x13   :  { %v2833_v46 = vcombine.high %v34_v44, %v42_v45  ;;  %v2832_v51 = vcombine.low %v34_v44, %v42_v45  ;;  %v50_v56 = vld [vmem:[%s4845_s0 + $0x100] sm:$0xff]  ;;  %v51_v58 = vld [vmem:[%s4845_s0 + $0x108] sm:$0xff]  ;;  %v3709_v12 = vld [vmem:[%s4844_s1 + $0x1d8] sm:$0xff]  }
  0x14   :  { %3160 = vmatpush3.bf16.msra.mxu0 %v3681_v18  ;;  %v58_v57 = vld [vmem:[%s4845_s0 + $0x140] sm:$0xff]  ;;  %v59_v59 = vld [vmem:[%s4845_s0 + $0x148] sm:$0xff]  ;;  %v3710_v13 = vld [vmem:[%s4844_s1 + $0x198] sm:$0xff]  }
  0x15   :  { %3224 = vmatpush3.bf16.msra.mxu1 %v3682_v19  ;;  %3161 = vmatprep.subr.bf16.mxu0 %v3683_v20  ;;  %v2849_v60 = vcombine.high %v50_v56, %v58_v57  ;;  %v2851_v61 = vcombine.high %v51_v58, %v59_v59  ;;  %v2848_v2 = vcombine.low %v50_v56, %v58_v57  ;;  %v66_v3 = vld [vmem:[%s4845_s0 + $0x180] sm:$0xff]  ;;  %v67_v5 = vld [vmem:[%s4845_s0 + $0x188] sm:$0xff]  ;;  %v3720_v39 = vld [vmem:[%s4844_s1 + $0x130] sm:$0xff]  }
  0x16   :  { %3225 = vmatprep.subr.bf16.mxu1 %v3684_v21  ;;  %v74_v4 = vld [vmem:[%s4845_s0 + $0x1c0] sm:$0xff]  ;;  %v2850_v6 = vcombine.low %v51_v58, %v59_v59  ;;  %v75_v8 = vld [vmem:[%s4845_s0 + $0x1c8] sm:$0xff]  ;;  %v3724_v48 = vld [vmem:[%s4844_s1 + $0x138] sm:$0xff]  }
  0x17   :  { %v2865_v7 = vcombine.high %v66_v3, %v74_v4  ;;  %v2867_v9 = vcombine.high %v67_v5, %v75_v8  ;;  %v82_v14 = vld [vmem:[%s4845_s0 + $0x200] sm:$0xff]  ;;  %v83_v16 = vld [vmem:[%s4845_s0 + $0x208] sm:$0xff]  ;;  %v2864_v19 = vcombine.low %v66_v3, %v74_v4  ;;  %v2866_v21 = vcombine.low %v67_v5, %v75_v8  ;;  %v29_v3 = vld [vmem:[%s4845_s0 + $0x58] sm:$0xff] }
  0x18   :  { %3162 = vmatpush3.bf16.msra.mxu0 %v3685_v22  ;;  %v90_v15 = vld [vmem:[%s4845_s0 + $0x240] sm:$0xff]  ;;  %v91_v17 = vld [vmem:[%s4845_s0 + $0x248] sm:$0xff]  ;;  %v36_v8 = vld [vmem:[%s4845_s0 + $0x90] sm:$0xff] }
  0x19   :  { %3226 = vmatpush3.bf16.msra.mxu1 %v3686_v23  ;;  %3163 = vmatprep.subr.bf16.mxu0 %v3687_v24  ;;  %v3711_v18 = vld [vmem:[%s4844_s1 + $0x160] sm:$0xff]   ;;  %v2881_v22 = vcombine.high %v82_v14, %v90_v15  ;;  %v2883_v24 = vcombine.high %v83_v16, %v91_v17  ;;  %v3717_v32 = vld [vmem:[%s4844_s1 + $0x1e8] sm:$0xff]   ;;  %v2880_v34 = vcombine.low %v82_v14, %v90_v15 }
  0x1a   :  { %3227 = vmatprep.subr.bf16.mxu1 %v3688_v25  ;;  %v3712_v20 = vld [vmem:[%s4844_s1 + $0x120] sm:$0xff]   ;;  %v3718_v33 = vld [vmem:[%s4844_s1 + $0x1a8] sm:$0xff]  }
  0x1b   :  { %v3713_v23 = vld [vmem:[%s4844_s1 + $0x1e0] sm:$0xff]   ;;  %v115_v44 = vld [vmem:[%s4845_s0 + $0x308] sm:$0xff] }
  0x1c   :  { %3164 = vmatpush3.bf16.msra.mxu0 %v3689_v26  ;;  %v3714_v25 = vld [vmem:[%s4844_s1 + $0x1a0] sm:$0xff]   ;;  %v123_v45 = vld [vmem:[%s4845_s0 + $0x348] sm:$0xff] }
  0x1d   :  { %3228 = vmatpush3.bf16.msra.mxu1 %v3690_v27  ;;  %3165 = vmatprep.subr.bf16.mxu0 %v3691_v28  ;;  %v98_v26 = vld [vmem:[%s4845_s0 + $0x280] sm:$0xff]  ;;  %v3715_v28 = vld [vmem:[%s4844_s1 + $0x168] sm:$0xff]  }
  0x1e   :  { %3229 = vmatprep.subr.bf16.mxu1 %v3692_v29  ;;  %v106_v27 = vld [vmem:[%s4845_s0 + $0x2c0] sm:$0xff]  ;;  %v99_v29 = vld [vmem:[%s4845_s0 + $0x288] sm:$0xff] }
  0x1f   :  { %v2897_v36 = vcombine.high %v98_v26, %v106_v27  ;;  %v2896_v47 = vcombine.low %v98_v26, %v106_v27  ;;  %v3727_v56 = vld [vmem:[%s4844_s1 + $0x240] sm:$0xff]   ;;  %v131_v57 = vld [vmem:[%s4845_s0 + $0x388] sm:$0xff]  ;;  %v3735_v26 = vld [vmem:[%s4844_s1 + $0x250] sm:$0xff]  }
  0x20   :  { %3166 = vmatpush3.bf16.msra.mxu0 %v3693_v30  ;;  %v107_v30 = vld [vmem:[%s4845_s0 + $0x2c8] sm:$0xff]  ;;  %v3729_v58 = vld [vmem:[%s4844_s1 + $0x2c0] sm:$0xff]   ;;  %v3737_v27 = vld [vmem:[%s4844_s1 + $0x2d0] sm:$0xff]  }
  0x21   :  { %3230 = vmatpush3.bf16.msra.mxu1 %v3694_v31  ;;  %3279 = vmatprep.subr.bf16.mxu0 %v3695_v40  ;;  %v3716_v31 = vld [vmem:[%s4844_s1 + $0x128] sm:$0xff]   ;;  %v2899_v37 = vcombine.high %v99_v29, %v107_v30  ;;  %v3721_v40 = vld [vmem:[%s4844_s1 + $0x1f0] sm:$0xff]   ;;  %v3730_v15 = vld [vmem:[%s4844_s1 + $0x280] sm:$0xff]  }
  0x22   :  { %3343 = vmatprep.subr.bf16.mxu1 %v3697_v42  ;;  %v122_v42 = vld [vmem:[%s4845_s0 + $0x340] sm:$0xff]  ;;  %v139_v59 = vld [vmem:[%s4845_s0 + $0x3c8] sm:$0xff] }
  0x23   :  { %1843 = vmatmul.mubr.bf16.vlgmr.msra.gmra.mrb[0].mxu0 %v2816_v35  ;;  %v2882_v35 = vcombine.low %v83_v16, %v91_v17  ;;  %v2930_v5 = vcombine.low %v131_v57, %v139_v59  ;;  %v3731_v17 = vld [vmem:[%s4844_s1 + $0x248] sm:$0xff]  }
  0x24   :  { %1940 = vmatmul.mubr.bf16.vlgmr.msra.gmra.mrb[0].mxu1 %v2818_v38  ;;  %3280 = vmatpush3.bf16.msra.mxu0 %v3696_v41  ;;  %v3719_v38 = vld [vmem:[%s4844_s1 + $0x170] sm:$0xff]   ;;  %v114_v41 = vld [vmem:[%s4845_s0 + $0x300] sm:$0xff] }
  0x25   :  { %3344 = vmatpush3.bf16.msra.mxu1 %v3698_v43  ;;  %1850 = vmatprep.mubr.bf16.mxu0 %v2833_v46  ;;  %v3722_v43 = vld [vmem:[%s4844_s1 + $0x1b0] sm:$0xff]   ;;  %v3723_v46 = vld [vmem:[%s4844_s1 + $0x178] sm:$0xff]  }
  0x26   :  { %1947 = vmatprep.mubr.bf16.mxu1 %v2835_v49  ;;  %3281 = vmatprep.subr.bf16.mxu0 %v3699_v50  ;;  %v2898_v49 = vcombine.low %v99_v29, %v107_v30  ;;  %v2913_v50 = vcombine.high %v114_v41, %v122_v42 }
  0x27   :  { %3345 = vmatprep.subr.bf16.mxu1 %v3701_v54  ;;  %v130_v54 = vld [vmem:[%s4845_s0 + $0x380] sm:$0xff] }
  0x28   :  { %3282 = vmatpush3.bf16.msra.mxu0 %v3700_v52  ;;  %v2915_v52 = vcombine.high %v115_v44, %v123_v45 }
  0x29   :  { %3346 = vmatpush3.bf16.msra.mxu1 %v3702_v55  ;;  %3283 = vmatprep.subr.bf16.mxu0 %v3703_v62  ;;  %v138_v55 = vld [vmem:[%s4845_s0 + $0x3c0] sm:$0xff] }
  0x2a   :  { %3347 = vmatprep.subr.bf16.mxu1 %v3705_v0  ;;  %v2929_v62 = vcombine.high %v130_v54, %v138_v55  ;;  %v20_v0 = vld [vmem:[%s4845_s0 + $0x10] sm:$0xff]  ;;  %v2928_v4 = vcombine.low %v130_v54, %v138_v55  ;;  %v85_v54 = vld [vmem:[%s4845_s0 + $0x218] sm:$0xff] }
  0x2b   :  { %1851 = vmatmul.mubr.bf16.gmra.mrb[4].mxu0 %v2832_v51  ;;  %v3725_v51 = vld [vmem:[%s4844_s1 + $0x1f8] sm:$0xff]  }
  0x2c   :  { %1948 = vmatmul.mubr.bf16.gmra.mrb[4].mxu1 %v2834_v53  ;;  %1858 = vmatprep.mubr.bf16.mxu0 %v2849_v60  ;;  %v3726_v53 = vld [vmem:[%s4844_s1 + $0x1b8] sm:$0xff]   ;;  %v2912_v60 = vcombine.low %v114_v41, %v122_v42  ;;  %v3743_v42 = vld [vmem:[%s4844_s1 + $0x260] sm:$0xff]  }
  0x2d   :  { %1955 = vmatprep.mubr.bf16.mxu1 %v2851_v61  ;;  %3284 = vmatpush3.bf16.msra.mxu0 %v3704_v63  ;;  %v2914_v61 = vcombine.low %v115_v44, %v123_v45  ;;  %v2931_v63 = vcombine.high %v131_v57, %v139_v59  ;;  %v3742_v41 = vld [vmem:[%s4844_s1 + $0x298] sm:$0xff]   ;;  %v3745_v44 = vld [vmem:[%s4844_s1 + $0x2e0] sm:$0xff]   ;;  %v3750_v57 = vld [vmem:[%s4844_s1 + $0x2a8] sm:$0xff]  }
  0x2e   :  { %3348 = vmatpush3.bf16.msra.mxu1 %v3706_v1  ;;  %3285 = vmatprep.subr.bf16.mxu0 %v3707_v10  ;;  %v28_v1 = vld [vmem:[%s4845_s0 + $0x50] sm:$0xff]  ;;  %v93_v55 = vld [vmem:[%s4845_s0 + $0x258] sm:$0xff] }
  0x2f   :  { %3349 = vmatprep.subr.bf16.mxu1 %v3709_v12  ;;  %v2820_v10 = vcombine.low %v20_v0, %v28_v1  ;;  %v37_v12 = vld [vmem:[%s4845_s0 + $0x98] sm:$0xff] }
  0x31   :  { %3286 = vmatpush3.bf16.msra.mxu0 %v3708_v11  ;;  %v3728_v11 = vld [vmem:[%s4844_s1 + $0x200] sm:$0xff]  }
  0x32   :  { %3350 = vmatpush3.bf16.msra.mxu1 %v3710_v13  ;;  %3287 = vmatprep.subr.bf16.mxu0 %v3711_v18  ;;  %v45_v13 = vld [vmem:[%s4845_s0 + $0xd8] sm:$0xff] }
  0x33   :  { %1859 = vmatmul.mubr.bf16.gmra.mrb[8].mxu0 %v2848_v2  ;;  %3351 = vmatprep.subr.bf16.mxu1 %v3713_v23  ;;  %v21_v2 = vld [vmem:[%s4845_s0 + $0x18] sm:$0xff]  ;;  %v2839_v18 = vcombine.high %v37_v12, %v45_v13  ;;  %v60_v23 = vld [vmem:[%s4845_s0 + $0x150] sm:$0xff]  ;;  %v2838_v29 = vcombine.low %v37_v12, %v45_v13  ;;  %v3761_v12 = vld [vmem:[%s4844_s1 + $0x3c0] sm:$0xff]   ;;  %v2886_v13 = vcombine.low %v85_v54, %v93_v55 }
  0x34   :  { %1956 = vmatmul.mubr.bf16.gmra.mrb[8].mxu1 %v2850_v6  ;;  %1866 = vmatprep.mubr.bf16.mxu0 %v2865_v7  ;;  %v2821_v6 = vcombine.high %v20_v0, %v28_v1  ;;  %v2823_v7 = vcombine.high %v21_v2, %v29_v3  ;;  %v2822_v14 = vcombine.low %v21_v2, %v29_v3  ;;  %v3752_v0 = vld [vmem:[%s4844_s1 + $0x230] sm:$0xff]   ;;  %v3755_v2 = vld [vmem:[%s4844_s1 + $0x278] sm:$0xff]  }
  0x35   :  { %1963 = vmatprep.mubr.bf16.mxu1 %v2867_v9  ;;  %3288 = vmatpush3.bf16.msra.mxu0 %v3712_v20  ;;  %v44_v9 = vld [vmem:[%s4845_s0 + $0xd0] sm:$0xff]  ;;  %v3733_v20 = vld [vmem:[%s4844_s1 + $0x2c8] sm:$0xff]  }
  0x36   :  { %3352 = vmatpush3.bf16.msra.mxu1 %v3714_v25  ;;  %3289 = vmatprep.subr.bf16.mxu0 %v3715_v28  ;;  %v2837_v16 = vcombine.high %v36_v8, %v44_v9  ;;  %v61_v25 = vld [vmem:[%s4845_s0 + $0x158] sm:$0xff]  ;;  %v2836_v28 = vcombine.low %v36_v8, %v44_v9  ;;  %v3754_v1 = vld [vmem:[%s4844_s1 + $0x2b0] sm:$0xff]  }
  0x37   :  { %3353 = vmatprep.subr.bf16.mxu1 %v3717_v32  ;;  %v3736_v32 = vld [vmem:[%s4844_s1 + $0x210] sm:$0xff]   ;;  %v3756_v8 = vld [vmem:[%s4844_s1 + $0x238] sm:$0xff]  }
  0x38   :  { %v100_v3 = vld [vmem:[%s4845_s0 + $0x290] sm:$0xff]  ;;  %v3758_v9 = vld [vmem:[%s4844_s1 + $0x2b8] sm:$0xff]  }
  0x39   :  { %3290 = vmatpush3.bf16.msra.mxu0 %v3716_v31 }
  0x3a   :  { %3354 = vmatpush3.bf16.msra.mxu1 %v3718_v33  ;;  %3291 = vmatprep.subr.bf16.mxu0 %v3719_v38  ;;  %v3738_v33 = vld [vmem:[%s4844_s1 + $0x290] sm:$0xff]   ;;  %v69_v38 = vld [vmem:[%s4845_s0 + $0x198] sm:$0xff] }
  0x3b   :  { %1867 = vmatmul.mubr.bf16.gmra.mrb[12].mxu0 %v2864_v19  ;;  %3355 = vmatprep.subr.bf16.mxu1 %v3721_v40  ;;  %v3732_v19 = vld [vmem:[%s4844_s1 + $0x208] sm:$0xff]   ;;  %v3740_v40 = vld [vmem:[%s4844_s1 + $0x218] sm:$0xff]  }
  0x3c   :  { %1964 = vmatmul.mubr.bf16.gmra.mrb[12].mxu1 %v2866_v21  ;;  %1874 = vmatprep.mubr.bf16.mxu0 %v2881_v22  ;;  %v3734_v21 = vld [vmem:[%s4844_s1 + $0x288] sm:$0xff]   ;;  %v52_v22 = vld [vmem:[%s4845_s0 + $0x110] sm:$0xff] }
  0x3d   :  { %1971 = vmatprep.mubr.bf16.mxu1 %v2883_v24  ;;  %3292 = vmatpush3.bf16.msra.mxu0 %v3720_v39  ;;  %v53_v24 = vld [vmem:[%s4845_s0 + $0x118] sm:$0xff]  ;;  %v2853_v30 = vcombine.high %v52_v22, %v60_v23 }
  0x3e   :  { %3356 = vmatpush3.bf16.msra.mxu1 %v3722_v43  ;;  %3293 = vmatprep.subr.bf16.mxu0 %v3723_v46  ;;  %v2855_v31 = vcombine.high %v53_v24, %v61_v25  ;;  %v77_v39 = vld [vmem:[%s4845_s0 + $0x1d8] sm:$0xff]  ;;  %v2852_v43 = vcombine.low %v52_v22, %v60_v23  ;;  %v2854_v45 = vcombine.low %v53_v24, %v61_v25  ;;  %v132_v24 = vld [vmem:[%s4845_s0 + $0x390] sm:$0xff] }
  0x3f   :  { %3357 = vmatprep.subr.bf16.mxu1 %v3725_v51  ;;  %v84_v51 = vld [vmem:[%s4845_s0 + $0x210] sm:$0xff] }
  0x40   :  { %v140_v25 = vld [vmem:[%s4845_s0 + $0x3d0] sm:$0xff] }
  0x41   :  { %3294 = vmatpush3.bf16.msra.mxu0 %v3724_v48  ;;  %v2871_v48 = vcombine.high %v69_v38, %v77_v39 }
  0x42   :  { %3358 = vmatpush3.bf16.msra.mxu1 %v3726_v53  ;;  %3407 = vmatprep.subr.bf16.mxu0 %v3727_v56  ;;  %v92_v53 = vld [vmem:[%s4845_s0 + $0x250] sm:$0xff]  ;;  %v3748_v56 = vld [vmem:[%s4844_s1 + $0x228] sm:$0xff]  }
  0x43   :  { %1875 = vmatmul.mubr.bf16.gmra.mrb[16].mxu0 %v2880_v34  ;;  %3471 = vmatprep.subr.bf16.mxu1 %v3729_v58  ;;  %v3739_v34 = vld [vmem:[%s4844_s1 + $0x258] sm:$0xff]   ;;  %v3751_v58 = vld [vmem:[%s4844_s1 + $0x270] sm:$0xff]  }
  0x44   :  { %1972 = vmatmul.mubr.bf16.gmra.mrb[16].mxu1 %v2882_v35  ;;  %1882 = vmatprep.mubr.bf16.mxu0 %v2897_v36  ;;  %v68_v35 = vld [vmem:[%s4845_s0 + $0x190] sm:$0xff] }
  0x45   :  { %1979 = vmatprep.mubr.bf16.mxu1 %v2899_v37  ;;  %v76_v36 = vld [vmem:[%s4845_s0 + $0x1d0] sm:$0xff]  ;;  %v3741_v37 = vld [vmem:[%s4844_s1 + $0x2d8] sm:$0xff]  }
  0x46   :  { %v2869_v46 = vcombine.high %v68_v35, %v76_v36  ;;  %v2868_v59 = vcombine.low %v68_v35, %v76_v36  ;;  %v31_v35 = vld [vmem:[%s4845_s0 + $0x68] sm:$0xff]  ;;  %v2932_v36 = vcombine.low %v132_v24, %v140_v25 }
  0x4b   :  { %1883 = vmatmul.mubr.bf16.gmra.mrb[20].mxu0 %v2896_v47  ;;  %v3744_v47 = vld [vmem:[%s4844_s1 + $0x220] sm:$0xff]  }
  0x4c   :  { %1980 = vmatmul.mubr.bf16.gmra.mrb[20].mxu1 %v2898_v49  ;;  %1890 = vmatprep.mubr.bf16.mxu0 %v2913_v50  ;;  %v3746_v49 = vld [vmem:[%s4844_s1 + $0x2a0] sm:$0xff]   ;;  %v3747_v50 = vld [vmem:[%s4844_s1 + $0x268] sm:$0xff]  }
  0x4d   :  { %1987 = vmatprep.mubr.bf16.mxu1 %v2915_v52  ;;  %v3749_v52 = vld [vmem:[%s4844_s1 + $0x2e8] sm:$0xff]  }
  0x53   :  { %1891 = vmatmul.mubr.bf16.gmra.mrb[24].mxu0 %v2912_v60  ;;  %v3753_v60 = vld [vmem:[%s4844_s1 + $0x2f0] sm:$0xff]  }
  0x54   :  { %1988 = vmatmul.mubr.bf16.gmra.mrb[24].mxu1 %v2914_v61  ;;  %1898 = vmatprep.mubr.bf16.mxu0 %v2929_v62  ;;  %v2870_v61 = vcombine.low %v69_v38, %v77_v39  ;;  %v2885_v62 = vcombine.high %v84_v51, %v92_v53 }
  0x55   :  { %1995 = vmatprep.mubr.bf16.mxu1 %v2931_v63  ;;  %v2887_v63 = vcombine.high %v85_v54, %v93_v55  ;;  %v54_v54 = vld [vmem:[%s4845_s0 + $0x120] sm:$0xff] }
  0x56   :  { %v62_v55 = vld [vmem:[%s4845_s0 + $0x160] sm:$0xff] }
  0x5b   :  { %1899 = vmatmul.mubr.bf16.gmra.mrb[28].mxu0 %v2928_v4  ;;  %v108_v4 = vld [vmem:[%s4845_s0 + $0x2d0] sm:$0xff] }
  0x5c   :  { %1996 = vmatmul.mubr.bf16.gmra.mrb[28].mxu1 %v2930_v5  ;;  %2036 = vmatprep.mubr.bf16.mxu0 %v2821_v6  ;;  %v3757_v5 = vld [vmem:[%s4844_s1 + $0x2f8] sm:$0xff]  }
  0x5d   :  { %2133 = vmatprep.mubr.bf16.mxu1 %v2823_v7  ;;  %v101_v6 = vld [vmem:[%s4845_s0 + $0x298] sm:$0xff] }
  0x5e   :  { %v109_v7 = vld [vmem:[%s4845_s0 + $0x2d8] sm:$0xff] }
  0x63   :  { %2037 = vmatmul.mubr.bf16.vlgmr.msra.gmra.mrb[32].mxu0 %v2820_v10  ;;  %v3759_v10 = vld [vmem:[%s4844_s1 + $0x340] sm:$0xff]  }
  0x64   :  { %2134 = vmatmul.mubr.bf16.vlgmr.msra.gmra.mrb[32].mxu1 %v2822_v14  ;;  %3408 = vmatpush3.bf16.msra.mxu0 %v3728_v11  ;;  %v2884_v11 = vcombine.low %v84_v51, %v92_v53  ;;  %v2901_v14 = vcombine.high %v100_v3, %v108_v4  ;;  %v3765_v51 = vld [vmem:[%s4844_s1 + $0x3c8] sm:$0xff]  }
  0x65   :  { %3472 = vmatpush3.bf16.msra.mxu1 %v3730_v15  ;;  %2044 = vmatprep.mubr.bf16.mxu0 %v2837_v16  ;;  %v2903_v15 = vcombine.high %v101_v6, %v109_v7  ;;  %v116_v16 = vld [vmem:[%s4845_s0 + $0x310] sm:$0xff]  ;;  %v3766_v53 = vld [vmem:[%s4844_s1 + $0x388] sm:$0xff]  }
  0x66   :  { %2141 = vmatprep.mubr.bf16.mxu1 %v2839_v18  ;;  %3409 = vmatprep.subr.bf16.mxu0 %v3731_v17  ;;  %v124_v17 = vld [vmem:[%s4845_s0 + $0x350] sm:$0xff]  ;;  %v117_v18 = vld [vmem:[%s4845_s0 + $0x318] sm:$0xff] }
  0x67   :  { %3473 = vmatprep.subr.bf16.mxu1 %v3733_v20  ;;  %v2900_v20 = vcombine.low %v100_v3, %v108_v4  ;;  %v2917_v22 = vcombine.high %v116_v16, %v124_v17  ;;  %v3773_v3 = vld [vmem:[%s4844_s1 + $0x3d8] sm:$0xff]   ;;  %v70_v4 = vld [vmem:[%s4845_s0 + $0x1a0] sm:$0xff] }
  0x68   :  { %3410 = vmatpush3.bf16.msra.mxu0 %v3732_v19  ;;  %v125_v19 = vld [vmem:[%s4845_s0 + $0x358] sm:$0xff] }
  0x69   :  { %3474 = vmatpush3.bf16.msra.mxu1 %v3734_v21  ;;  %3411 = vmatprep.subr.bf16.mxu0 %v3735_v26  ;;  %v2902_v21 = vcombine.low %v101_v6, %v109_v7  ;;  %v2919_v23 = vcombine.high %v117_v18, %v125_v19  ;;  %v133_v26 = vld [vmem:[%s4845_s0 + $0x398] sm:$0xff]  ;;  %v71_v6 = vld [vmem:[%s4845_s0 + $0x1a8] sm:$0xff] }
  0x6a   :  { %3475 = vmatprep.subr.bf16.mxu1 %v3737_v27  ;;  %v141_v27 = vld [vmem:[%s4845_s0 + $0x3d8] sm:$0xff] }
  0x6b   :  { %2045 = vmatmul.mubr.bf16.gmra.mrb[36].mxu0 %v2836_v28  ;;  %v2916_v28 = vcombine.low %v116_v16, %v124_v17  ;;  %v3772_v7 = vld [vmem:[%s4844_s1 + $0x318] sm:$0xff]   ;;  %v3776_v16 = vld [vmem:[%s4844_s1 + $0x320] sm:$0xff]  }
  0x6c   :  { %2142 = vmatmul.mubr.bf16.gmra.mrb[36].mxu1 %v2838_v29  ;;  %2052 = vmatprep.mubr.bf16.mxu0 %v2853_v30  ;;  %v2918_v29 = vcombine.low %v117_v18, %v125_v19  ;;  %v2933_v30 = vcombine.high %v132_v24, %v140_v25  ;;  %v3778_v17 = vld [vmem:[%s4844_s1 + $0x3a0] sm:$0xff]   ;;  %v3779_v18 = vld [vmem:[%s4844_s1 + $0x368] sm:$0xff]  }
  0x6d   :  { %2149 = vmatprep.mubr.bf16.mxu1 %v2855_v31  ;;  %3412 = vmatpush3.bf16.msra.mxu0 %v3736_v32  ;;  %v2935_v31 = vcombine.high %v133_v26, %v141_v27  ;;  %v22_v32 = vld [vmem:[%s4845_s0 + $0x20] sm:$0xff]  ;;  %v3781_v19 = vld [vmem:[%s4844_s1 + $0x3e8] sm:$0xff]  }
  0x6e   :  { %3476 = vmatpush3.bf16.msra.mxu1 %v3738_v33  ;;  %3413 = vmatprep.subr.bf16.mxu0 %v3739_v34  ;;  %v30_v33 = vld [vmem:[%s4845_s0 + $0x60] sm:$0xff]  ;;  %v23_v34 = vld [vmem:[%s4845_s0 + $0x28] sm:$0xff] }
  0x6f   :  { %3477 = vmatprep.subr.bf16.mxu1 %v3741_v37  ;;  %v2934_v37 = vcombine.low %v133_v26, %v141_v27  ;;  %v2825_v38 = vcombine.high %v22_v32, %v30_v33  ;;  %v2827_v39 = vcombine.high %v23_v34, %v31_v35  ;;  %v95_v24 = vld [vmem:[%s4845_s0 + $0x268] sm:$0xff]  ;;  %v3783_v26 = vld [vmem:[%s4844_s1 + $0x370] sm:$0xff]  }
  0x70   :  { %v3782_v25 = vld [vmem:[%s4844_s1 + $0x3a8] sm:$0xff]  }
  0x71   :  { %3414 = vmatpush3.bf16.msra.mxu0 %v3740_v40  ;;  %v38_v40 = vld [vmem:[%s4845_s0 + $0xa0] sm:$0xff] }
  0x72   :  { %3478 = vmatpush3.bf16.msra.mxu1 %v3742_v41  ;;  %3415 = vmatprep.subr.bf16.mxu0 %v3743_v42  ;;  %v46_v41 = vld [vmem:[%s4845_s0 + $0xe0] sm:$0xff]  ;;  %v2824_v42 = vcombine.low %v22_v32, %v30_v33  ;;  %v3784_v32 = vld [vmem:[%s4844_s1 + $0x330] sm:$0xff]  }
  0x73   :  { %2053 = vmatmul.mubr.bf16.gmra.mrb[40].mxu0 %v2852_v43  ;;  %3479 = vmatprep.subr.bf16.mxu1 %v3745_v44  ;;  %v39_v43 = vld [vmem:[%s4845_s0 + $0xa8] sm:$0xff]  ;;  %v3786_v33 = vld [vmem:[%s4844_s1 + $0x3b0] sm:$0xff]  }
  0x74   :  { %2150 = vmatmul.mubr.bf16.gmra.mrb[40].mxu1 %v2854_v45  ;;  %2060 = vmatprep.mubr.bf16.mxu0 %v2869_v46  ;;  %v47_v44 = vld [vmem:[%s4845_s0 + $0xe8] sm:$0xff]  ;;  %v2826_v45 = vcombine.low %v23_v34, %v31_v35  ;;  %v3760_v46 = vld [vmem:[%s4844_s1 + $0x300] sm:$0xff]   ;;  %v3787_v34 = vld [vmem:[%s4844_s1 + $0x378] sm:$0xff]  }
  0x75   :  { %2157 = vmatprep.mubr.bf16.mxu1 %v2871_v48  ;;  %3416 = vmatpush3.bf16.msra.mxu0 %v3744_v47  ;;  %v3762_v47 = vld [vmem:[%s4844_s1 + $0x380] sm:$0xff]   ;;  %v2841_v48 = vcombine.high %v38_v40, %v46_v41  ;;  %v3789_v35 = vld [vmem:[%s4844_s1 + $0x3f8] sm:$0xff]  }
  0x76   :  { %3480 = vmatpush3.bf16.msra.mxu1 %v3746_v49  ;;  %3417 = vmatprep.subr.bf16.mxu0 %v3747_v50  ;;  %v2843_v49 = vcombine.high %v39_v43, %v47_v44  ;;  %v3763_v50 = vld [vmem:[%s4844_s1 + $0x348] sm:$0xff]  }
  0x77   :  { %3481 = vmatprep.subr.bf16.mxu1 %v3749_v52  ;;  %v3764_v52 = vld [vmem:[%s4844_s1 + $0x308] sm:$0xff]  }
  0x79   :  { %3418 = vmatpush3.bf16.msra.mxu0 %v3748_v56  ;;  %v3767_v56 = vld [vmem:[%s4844_s1 + $0x350] sm:$0xff]  }
  0x7a   :  { %3482 = vmatpush3.bf16.msra.mxu1 %v3750_v57  ;;  %3419 = vmatprep.subr.bf16.mxu0 %v3751_v58  ;;  %v55_v57 = vld [vmem:[%s4845_s0 + $0x128] sm:$0xff] }
  0x7b   :  { %2061 = vmatmul.mubr.bf16.gmra.mrb[44].mxu0 %v2868_v59  ;;  %3483 = vmatprep.subr.bf16.mxu1 %v3753_v60  ;;  %v63_v58 = vld [vmem:[%s4845_s0 + $0x168] sm:$0xff]  ;;  %v3769_v59 = vld [vmem:[%s4844_s1 + $0x3d0] sm:$0xff]   ;;  %v2840_v60 = vcombine.low %v38_v40, %v46_v41  ;;  %v3790_v41 = vld [vmem:[%s4844_s1 + $0x3b8] sm:$0xff]  }
  0x7c   :  { %2158 = vmatmul.mubr.bf16.gmra.mrb[44].mxu1 %v2870_v61  ;;  %2068 = vmatprep.mubr.bf16.mxu0 %v2885_v62  ;;  %v2842_v61 = vcombine.low %v39_v43, %v47_v44  ;;  %v2857_v62 = vcombine.high %v54_v54, %v62_v55  ;;  %v111_v40 = vld [vmem:[%s4845_s0 + $0x2e8] sm:$0xff] }
  0x7d   :  { %2165 = vmatprep.mubr.bf16.mxu1 %v2887_v63  ;;  %3420 = vmatpush3.bf16.msra.mxu0 %v3752_v0  ;;  %v2859_v63 = vcombine.high %v55_v57, %v63_v58  ;;  %v3768_v0 = vld [vmem:[%s4844_s1 + $0x310] sm:$0xff]  }
  0x7e   :  { %3484 = vmatpush3.bf16.msra.mxu1 %v3754_v1  ;;  %3421 = vmatprep.subr.bf16.mxu0 %v3755_v2  ;;  %v3770_v1 = vld [vmem:[%s4844_s1 + $0x390] sm:$0xff]   ;;  %v3771_v2 = vld [vmem:[%s4844_s1 + $0x358] sm:$0xff]  }
  0x7f   :  { %3485 = vmatprep.subr.bf16.mxu1 %v3757_v5  ;;  %v78_v5 = vld [vmem:[%s4845_s0 + $0x1e0] sm:$0xff] }
  0x80   :  { %v2872_v27 = vcombine.low %v70_v4, %v78_v5 }
  0x81   :  { %3422 = vmatpush3.bf16.msra.mxu0 %v3756_v8  ;;  %v79_v8 = vld [vmem:[%s4845_s0 + $0x1e8] sm:$0xff] }
  0x82   :  { %3486 = vmatpush3.bf16.msra.mxu1 %v3758_v9  ;;  %3535 = vmatprep.subr.bf16.mxu0 %v3759_v10  ;;  %v3774_v9 = vld [vmem:[%s4844_s1 + $0x398] sm:$0xff]   ;;  %v3775_v10 = vld [vmem:[%s4844_s1 + $0x360] sm:$0xff]  }
  0x83   :  { %2069 = vmatmul.mubr.bf16.gmra.mrb[48].mxu0 %v2884_v11  ;;  %3599 = vmatprep.subr.bf16.mxu1 %v3761_v12  ;;  %v2856_v11 = vcombine.low %v54_v54, %v62_v55  ;;  %v3777_v12 = vld [vmem:[%s4844_s1 + $0x3e0] sm:$0xff]  }
  0x84   :  { %2166 = vmatmul.mubr.bf16.gmra.mrb[48].mxu1 %v2886_v13  ;;  %2076 = vmatprep.mubr.bf16.mxu0 %v2901_v14  ;;  %v2858_v13 = vcombine.low %v55_v57, %v63_v58  ;;  %v2873_v14 = vcombine.high %v70_v4, %v78_v5  ;;  %v134_v54 = vld [vmem:[%s4845_s0 + $0x3a0] sm:$0xff]  ;;  %v143_v57 = vld [vmem:[%s4845_s0 + $0x3e8] sm:$0xff] }
  0x85   :  { %2173 = vmatprep.mubr.bf16.mxu1 %v2903_v15  ;;  %v2875_v15 = vcombine.high %v71_v6, %v79_v8  ;;  %v142_v55 = vld [vmem:[%s4845_s0 + $0x3e0] sm:$0xff] }
  0x8b   :  { %2077 = vmatmul.mubr.bf16.gmra.mrb[52].mxu0 %v2900_v20  ;;  %v86_v20 = vld [vmem:[%s4845_s0 + $0x220] sm:$0xff] }
  0x8c   :  { %2174 = vmatmul.mubr.bf16.gmra.mrb[52].mxu1 %v2902_v21  ;;  %2084 = vmatprep.mubr.bf16.mxu0 %v2917_v22  ;;  %v94_v21 = vld [vmem:[%s4845_s0 + $0x260] sm:$0xff]  ;;  %v87_v22 = vld [vmem:[%s4845_s0 + $0x228] sm:$0xff] }
  0x8d   :  { %2181 = vmatprep.mubr.bf16.mxu1 %v2919_v23  ;;  %v3780_v23 = vld [vmem:[%s4844_s1 + $0x328] sm:$0xff]   ;;  %v2890_v43 = vcombine.low %v87_v22, %v95_v24 }
  0x93   :  { %2085 = vmatmul.mubr.bf16.gmra.mrb[56].mxu0 %v2916_v28  ;;  %v3785_v28 = vld [vmem:[%s4844_s1 + $0x3f0] sm:$0xff]  }
  0x94   :  { %2182 = vmatmul.mubr.bf16.gmra.mrb[56].mxu1 %v2918_v29  ;;  %2092 = vmatprep.mubr.bf16.mxu0 %v2933_v30  ;;  %v2874_v29 = vcombine.low %v71_v6, %v79_v8  ;;  %v2889_v30 = vcombine.high %v86_v20, %v94_v21  ;;  %v40_v6 = vld [vmem:[%s4845_s0 + $0xb0] sm:$0xff]  ;;  %v41_v8 = vld [vmem:[%s4845_s0 + $0xb8] sm:$0xff] }
  0x95   :  { %2189 = vmatprep.mubr.bf16.mxu1 %v2935_v31  ;;  %v2891_v31 = vcombine.high %v87_v22, %v95_v24  ;;  %v72_v22 = vld [vmem:[%s4845_s0 + $0x1b0] sm:$0xff]  ;;  %v73_v24 = vld [vmem:[%s4845_s0 + $0x1b8] sm:$0xff] }
  0x9b   :  { %2093 = vmatmul.mubr.bf16.gmra.mrb[60].mxu0 %v2932_v36  ;;  %v102_v36 = vld [vmem:[%s4845_s0 + $0x2a0] sm:$0xff] }
  0x9c   :  { %2190 = vmatmul.mubr.bf16.gmra.mrb[60].mxu1 %v2934_v37  ;;  %2230 = vmatprep.mubr.bf16.mxu0 %v2825_v38  ;;  %v110_v37 = vld [vmem:[%s4845_s0 + $0x2e0] sm:$0xff]  ;;  %v3788_v38 = vld [vmem:[%s4844_s1 + $0x338] sm:$0xff]  }
  0x9d   :  { %2327 = vmatprep.mubr.bf16.mxu1 %v2827_v39  ;;  %v103_v39 = vld [vmem:[%s4845_s0 + $0x2a8] sm:$0xff]  ;;  %v2905_v44 = vcombine.high %v102_v36, %v110_v37 }
  0xa3   :  { %2231 = vmatmul.mubr.bf16.vlgmr.msra.gmra.mrb[64].mxu0 %v2824_v42  ;;  %v2888_v42 = vcombine.low %v86_v20, %v94_v21 }
  0xa4   :  { %2328 = vmatmul.mubr.bf16.vlgmr.msra.gmra.mrb[64].mxu1 %v2826_v45  ;;  %3536 = vmatpush3.bf16.msra.mxu0 %v3760_v46  ;;  %v2907_v45 = vcombine.high %v103_v39, %v111_v40  ;;  %v118_v46 = vld [vmem:[%s4845_s0 + $0x320] sm:$0xff] }
  0xa5   :  { %3600 = vmatpush3.bf16.msra.mxu1 %v3762_v47  ;;  %2238 = vmatprep.mubr.bf16.mxu0 %v2841_v48  ;;  %v126_v47 = vld [vmem:[%s4845_s0 + $0x360] sm:$0xff]  ;;  %v119_v48 = vld [vmem:[%s4845_s0 + $0x328] sm:$0xff] }
  0xa6   :  { %2335 = vmatprep.mubr.bf16.mxu1 %v2843_v49  ;;  %3537 = vmatprep.subr.bf16.mxu0 %v3763_v50  ;;  %v127_v49 = vld [vmem:[%s4845_s0 + $0x368] sm:$0xff]  ;;  %v2904_v50 = vcombine.low %v102_v36, %v110_v37  ;;  %v2920_v58 = vcombine.low %v118_v46, %v126_v47 }
  0xa7   :  { %3601 = vmatprep.subr.bf16.mxu1 %v3765_v51  ;;  %v2906_v51 = vcombine.low %v103_v39, %v111_v40 }
  0xa8   :  { %3538 = vmatpush3.bf16.msra.mxu0 %v3764_v52  ;;  %v2921_v52 = vcombine.high %v118_v46, %v126_v47 }
  0xa9   :  { %3602 = vmatpush3.bf16.msra.mxu1 %v3766_v53  ;;  %3539 = vmatprep.subr.bf16.mxu0 %v3767_v56  ;;  %v2923_v53 = vcombine.high %v119_v48, %v127_v49  ;;  %v135_v56 = vld [vmem:[%s4845_s0 + $0x3a8] sm:$0xff] }
  0xaa   :  { %3603 = vmatprep.subr.bf16.mxu1 %v3769_v59  ;;  %v2922_v59 = vcombine.low %v119_v48, %v127_v49 }
  0xab   :  { %2239 = vmatmul.mubr.bf16.gmra.mrb[68].mxu0 %v2840_v60  ;;  %v2937_v60 = vcombine.high %v134_v54, %v142_v55 }
  0xac   :  { %2336 = vmatmul.mubr.bf16.gmra.mrb[68].mxu1 %v2842_v61  ;;  %2246 = vmatprep.mubr.bf16.mxu0 %v2857_v62  ;;  %v2939_v61 = vcombine.high %v135_v56, %v143_v57  ;;  %v24_v62 = vld [vmem:[%s4845_s0 + $0x30] sm:$0xff] }
  0xad   :  { %2343 = vmatprep.mubr.bf16.mxu1 %v2859_v63  ;;  %3540 = vmatpush3.bf16.msra.mxu0 %v3768_v0  ;;  %v32_v63 = vld [vmem:[%s4845_s0 + $0x70] sm:$0xff]  ;;  %v25_v0 = vld [vmem:[%s4845_s0 + $0x38] sm:$0xff] }
  0xae   :  { %3604 = vmatpush3.bf16.msra.mxu1 %v3770_v1  ;;  %3541 = vmatprep.subr.bf16.mxu0 %v3771_v2  ;;  %v33_v1 = vld [vmem:[%s4845_s0 + $0x78] sm:$0xff]  ;;  %v2936_v2 = vcombine.low %v134_v54, %v142_v55  ;;  %v2829_v4 = vcombine.high %v24_v62, %v32_v63 }
  0xaf   :  { %3605 = vmatprep.subr.bf16.mxu1 %v3773_v3  ;;  %v2938_v3 = vcombine.low %v135_v56, %v143_v57  ;;  %v2831_v5 = vcombine.high %v25_v0, %v33_v1  ;;  %v105_v55 = vld [vmem:[%s4845_s0 + $0x2b8] sm:$0xff] }
  0xb0   :  { %v113_v56 = vld [vmem:[%s4845_s0 + $0x2f8] sm:$0xff] }
  0xb1   :  { %3542 = vmatpush3.bf16.msra.mxu0 %v3772_v7  ;;  %v48_v7 = vld [vmem:[%s4845_s0 + $0xf0] sm:$0xff] }
  0xb2   :  { %3606 = vmatpush3.bf16.msra.mxu1 %v3774_v9  ;;  %3543 = vmatprep.subr.bf16.mxu0 %v3775_v10  ;;  %v49_v9 = vld [vmem:[%s4845_s0 + $0xf8] sm:$0xff]  ;;  %v2828_v10 = vcombine.low %v24_v62, %v32_v63 }
  0xb3   :  { %2247 = vmatmul.mubr.bf16.gmra.mrb[72].mxu0 %v2856_v11  ;;  %3607 = vmatprep.subr.bf16.mxu1 %v3777_v12  ;;  %v2830_v11 = vcombine.low %v25_v0, %v33_v1  ;;  %v2845_v12 = vcombine.high %v40_v6, %v48_v7 }
  0xb4   :  { %2344 = vmatmul.mubr.bf16.gmra.mrb[72].mxu1 %v2858_v13  ;;  %2254 = vmatprep.mubr.bf16.mxu0 %v2873_v14  ;;  %v2847_v13 = vcombine.high %v41_v8, %v49_v9  ;;  %v56_v14 = vld [vmem:[%s4845_s0 + $0x130] sm:$0xff] }
  0xb5   :  { %2351 = vmatprep.mubr.bf16.mxu1 %v2875_v15  ;;  %3544 = vmatpush3.bf16.msra.mxu0 %v3776_v16  ;;  %v64_v15 = vld [vmem:[%s4845_s0 + $0x170] sm:$0xff]  ;;  %v57_v16 = vld [vmem:[%s4845_s0 + $0x138] sm:$0xff] }
  0xb6   :  { %3608 = vmatpush3.bf16.msra.mxu1 %v3778_v17  ;;  %3545 = vmatprep.subr.bf16.mxu0 %v3779_v18  ;;  %v65_v17 = vld [vmem:[%s4845_s0 + $0x178] sm:$0xff]  ;;  %v2844_v18 = vcombine.low %v40_v6, %v48_v7  ;;  %v2861_v20 = vcombine.high %v56_v14, %v64_v15 }
  0xb7   :  { %3609 = vmatprep.subr.bf16.mxu1 %v3781_v19  ;;  %v2846_v19 = vcombine.low %v41_v8, %v49_v9  ;;  %v2863_v21 = vcombine.high %v57_v16, %v65_v17 }
  0xb9   :  { %3546 = vmatpush3.bf16.msra.mxu0 %v3780_v23  ;;  %v80_v23 = vld [vmem:[%s4845_s0 + $0x1f0] sm:$0xff] }
  0xba   :  { %3610 = vmatpush3.bf16.msra.mxu1 %v3782_v25  ;;  %3547 = vmatprep.subr.bf16.mxu0 %v3783_v26  ;;  %v81_v25 = vld [vmem:[%s4845_s0 + $0x1f8] sm:$0xff]  ;;  %v2860_v26 = vcombine.low %v56_v14, %v64_v15  ;;  %v2876_v37 = vcombine.low %v72_v22, %v80_v23 }
  0xbb   :  { %2255 = vmatmul.mubr.bf16.gmra.mrb[76].mxu0 %v2872_v27  ;;  %3611 = vmatprep.subr.bf16.mxu1 %v3785_v28  ;;  %v2862_v27 = vcombine.low %v57_v16, %v65_v17  ;;  %v2877_v28 = vcombine.high %v72_v22, %v80_v23  ;;  %v129_v14 = vld [vmem:[%s4845_s0 + $0x378] sm:$0xff] }
  0xbc   :  { %2352 = vmatmul.mubr.bf16.gmra.mrb[76].mxu1 %v2874_v29  ;;  %2262 = vmatprep.mubr.bf16.mxu0 %v2889_v30  ;;  %v2879_v29 = vcombine.high %v73_v24, %v81_v25  ;;  %v88_v30 = vld [vmem:[%s4845_s0 + $0x230] sm:$0xff] }
  0xbd   :  { %2359 = vmatprep.mubr.bf16.mxu1 %v2891_v31  ;;  %3548 = vmatpush3.bf16.msra.mxu0 %v3784_v32  ;;  %v96_v31 = vld [vmem:[%s4845_s0 + $0x270] sm:$0xff] }
  0xbe   :  { %3612 = vmatpush3.bf16.msra.mxu1 %v3786_v33  ;;  %3549 = vmatprep.subr.bf16.mxu0 %v3787_v34  ;;  %v89_v33 = vld [vmem:[%s4845_s0 + $0x238] sm:$0xff] }
  0xbf   :  { %3613 = vmatprep.subr.bf16.mxu1 %v3789_v35  ;;  %v97_v34 = vld [vmem:[%s4845_s0 + $0x278] sm:$0xff] }
  0xc0   :  { %v2895_v46 = vcombine.high %v89_v33, %v97_v34  ;;  %v2894_v63 = vcombine.low %v89_v33, %v97_v34  ;;  %v144_v33 = vld [vmem:[%s4845_s0 + $0x3f0] sm:$0xff] }
  0xc1   :  { %3550 = vmatpush3.bf16.msra.mxu0 %v3788_v38 }
  0xc2   :  { %3614 = vmatpush3.bf16.msra.mxu1 %v3790_v41  ;;  %v2878_v41 = vcombine.low %v73_v24, %v81_v25 }
  0xc3   :  { %2263 = vmatmul.mubr.bf16.gmra.mrb[80].mxu0 %v2888_v42  ;;  %v2893_v42 = vcombine.high %v88_v30, %v96_v31 }
  0xc4   :  { %2360 = vmatmul.mubr.bf16.gmra.mrb[80].mxu1 %v2890_v43  ;;  %2270 = vmatprep.mubr.bf16.mxu0 %v2905_v44 }
  0xc5   :  { %2367 = vmatprep.mubr.bf16.mxu1 %v2907_v45 }
  0xcb   :  { %2271 = vmatmul.mubr.bf16.gmra.mrb[84].mxu0 %v2904_v50 }
  0xcc   :  { %2368 = vmatmul.mubr.bf16.gmra.mrb[84].mxu1 %v2906_v51  ;;  %2278 = vmatprep.mubr.bf16.mxu0 %v2921_v52  ;;  %v104_v52 = vld [vmem:[%s4845_s0 + $0x2b0] sm:$0xff] }
  0xcd   :  { %2375 = vmatprep.mubr.bf16.mxu1 %v2923_v53  ;;  %v112_v53 = vld [vmem:[%s4845_s0 + $0x2f0] sm:$0xff] }
  0xce   :  { %v2909_v0 = vcombine.high %v104_v52, %v112_v53  ;;  %v2908_v17 = vcombine.low %v104_v52, %v112_v53 }
  0xd3   :  { %2279 = vmatmul.mubr.bf16.gmra.mrb[88].mxu0 %v2920_v58 }
  0xd4   :  { %2376 = vmatmul.mubr.bf16.gmra.mrb[88].mxu1 %v2922_v59  ;;  %2286 = vmatprep.mubr.bf16.mxu0 %v2937_v60  ;;  %v2892_v59 = vcombine.low %v88_v30, %v96_v31 }
  0xd5   :  { %2383 = vmatprep.mubr.bf16.mxu1 %v2939_v61 }
  0xdb   :  { %2287 = vmatmul.mubr.bf16.gmra.mrb[92].mxu0 %v2936_v2 }
  0xdc   :  { %2384 = vmatmul.mubr.bf16.gmra.mrb[92].mxu1 %v2938_v3  ;;  %2424 = vmatprep.mubr.bf16.mxu0 %v2829_v4  ;;  %v2911_v4 = vcombine.high %v105_v55, %v113_v56 }
  0xdd   :  { %2521 = vmatprep.mubr.bf16.mxu1 %v2831_v5 }
  0xe3   :  { %2425 = vmatmul.mubr.bf16.vlgmr.msra.gmra.mrb[96].mxu0 %v2828_v10  ;;  %v120_v10 = vld [vmem:[%s4845_s0 + $0x330] sm:$0xff] }
  0xe4   :  { %2522 = vmatmul.mubr.bf16.vlgmr.msra.gmra.mrb[96].mxu1 %v2830_v11  ;;  %2432 = vmatprep.mubr.bf16.mxu0 %v2845_v12  ;;  %v128_v11 = vld [vmem:[%s4845_s0 + $0x370] sm:$0xff] }
  0xe5   :  { %2529 = vmatprep.mubr.bf16.mxu1 %v2847_v13  ;;  %v121_v13 = vld [vmem:[%s4845_s0 + $0x338] sm:$0xff]  ;;  %v2925_v22 = vcombine.high %v120_v10, %v128_v11 }
  0xeb   :  { %2433 = vmatmul.mubr.bf16.gmra.mrb[100].mxu0 %v2844_v18 }
  0xec   :  { %2530 = vmatmul.mubr.bf16.gmra.mrb[100].mxu1 %v2846_v19  ;;  %2440 = vmatprep.mubr.bf16.mxu0 %v2861_v20 }
  0xed   :  { %2537 = vmatprep.mubr.bf16.mxu1 %v2863_v21  ;;  %v2910_v21 = vcombine.low %v105_v55, %v113_v56 }
  0xf3   :  { %2441 = vmatmul.mubr.bf16.gmra.mrb[104].mxu0 %v2860_v26  ;;  %v2927_v26 = vcombine.high %v121_v13, %v129_v14 }
  0xf4   :  { %2538 = vmatmul.mubr.bf16.gmra.mrb[104].mxu1 %v2862_v27  ;;  %2448 = vmatprep.mubr.bf16.mxu0 %v2877_v28 }
  0xf5   :  { %2545 = vmatprep.mubr.bf16.mxu1 %v2879_v29 }
  0xf6   :  { %v3167_v32 = vpop.f32.mrb[0].mxu0 }
  0xf7   :  { %v3231_v35 = vpop.f32.mrb[0].mxu1  ;;  %v3168_v36 = vpop.f32.mrb[1].mxu0 }
  0xf8   :  { %v3169_v38 = vadd.f32 %v3168_v36, %v3167_v32  ;;  %v3232_v39 = vpop.f32.mrb[1].mxu1  ;;  %v3170_v40 = vpop.f32.mrb[2].mxu0  ;;  %v136_v32 = vld [vmem:[%s4845_s0 + $0x3b0] sm:$0xff]  ;;  %v145_v36 = vld [vmem:[%s4845_s0 + $0x3f8] sm:$0xff] }
  0xf9   :  { %v3233_v43 = vadd.f32 %v3232_v39, %v3231_v35  ;;  %v3234_v44 = vpop.f32.mrb[2].mxu1  ;;  %v3171_v45 = vpop.f32.mrb[3].mxu0  ;;  %v137_v35 = vld [vmem:[%s4845_s0 + $0x3b8] sm:$0xff]  ;;  %v2924_v39 = vcombine.low %v120_v10, %v128_v11 }
  0xfa   :  { %v3172_v47 = vadd.f32 %v3171_v45, %v3170_v40  ;;  %v3235_v48 = vpop.f32.mrb[3].mxu1 }
  0xfb   :  { %v4550_v49 = vadd.f32 %v3233_v43, %v3169_v38  ;;  %v3236_v50 = vadd.f32 %v3235_v48, %v3234_v44  ;;  %2449 = vmatmul.mubr.bf16.gmra.mrb[108].mxu0 %v2876_v37  ;;  %v2926_v43 = vcombine.low %v121_v13, %v129_v14  ;;  %v2941_v44 = vcombine.high %v136_v32, %v144_v33 }
  0xfc   :  { %2546 = vmatmul.mubr.bf16.gmra.mrb[108].mxu1 %v2878_v41  ;;  %2456 = vmatprep.mubr.bf16.mxu0 %v2893_v42  ;;  %v2943_v48 = vcombine.high %v137_v35, %v145_v36 }
  0xfd   :  { %v4552_v51 = vadd.f32 %v3236_v50, %v3172_v47  ;;  %2553 = vmatprep.mubr.bf16.mxu1 %v2895_v46 }
  0xfe   :  { %v3173_v54 = vpop.f32.mrb[4].mxu0 }
  0xff   :  { %v3237_v57 = vpop.f32.mrb[4].mxu1  ;;  %v3174_v58 = vpop.f32.mrb[5].mxu0 }
 0x100   :  { %v3175_v60 = vadd.f32 %v3174_v58, %v3173_v54  ;;  %v3238_v61 = vpop.f32.mrb[5].mxu1  ;;  %v3176_v62 = vpop.f32.mrb[6].mxu0 }
 0x101   :  { %v3239_v1 = vadd.f32 %v3238_v61, %v3237_v57  ;;  %v3240_v2 = vpop.f32.mrb[6].mxu1  ;;  %v3177_v3 = vpop.f32.mrb[7].mxu0 }
 0x102   :  { %v3178_v5 = vadd.f32 %v3177_v3, %v3176_v62  ;;  %v3241_v6 = vpop.f32.mrb[7].mxu1 }
 0x103   :  { %v4566_v7 = vadd.f32 %v3239_v1, %v3175_v60  ;;  %v3242_v8 = vadd.f32 %v3241_v6, %v3240_v2  ;;  %2457 = vmatmul.mubr.bf16.gmra.mrb[112].mxu0 %v2892_v59  ;;  %v2940_v59 = vcombine.low %v136_v32, %v144_v33 }
 0x104   :  { %2554 = vmatmul.mubr.bf16.gmra.mrb[112].mxu1 %v2894_v63  ;;  %2464 = vmatprep.mubr.bf16.mxu0 %v2909_v0  ;;  %v2942_v63 = vcombine.low %v137_v35, %v145_v36 }
 0x105   :  { %v4568_v9 = vadd.f32 %v3242_v8, %v3178_v5  ;;  %2561 = vmatprep.mubr.bf16.mxu1 %v2911_v4 }
 0x106   :  { %v3179_v12 = vpop.f32.mrb[8].mxu0 }
 0x107   :  { %v3243_v15 = vpop.f32.mrb[8].mxu1  ;;  %v3180_v16 = vpop.f32.mrb[9].mxu0 }
 0x108   :  { %v3181_v18 = vadd.f32 %v3180_v16, %v3179_v12  ;;  %v3244_v19 = vpop.f32.mrb[9].mxu1  ;;  %v3182_v20 = vpop.f32.mrb[10].mxu0 }
 0x109   :  { %v3245_v23 = vadd.f32 %v3244_v19, %v3243_v15  ;;  %v3246_v24 = vpop.f32.mrb[10].mxu1  ;;  %v3183_v25 = vpop.f32.mrb[11].mxu0 }
 0x10a   :  { %v3184_v27 = vadd.f32 %v3183_v25, %v3182_v20  ;;  %v3247_v28 = vpop.f32.mrb[11].mxu1 }
 0x10b   :  { %v4582_v29 = vadd.f32 %v3245_v23, %v3181_v18  ;;  %v3248_v30 = vadd.f32 %v3247_v28, %v3246_v24  ;;  %2465 = vmatmul.mubr.bf16.gmra.mrb[116].mxu0 %v2908_v17 }
 0x10c   :  { %2562 = vmatmul.mubr.bf16.gmra.mrb[116].mxu1 %v2910_v21  ;;  %2472 = vmatprep.mubr.bf16.mxu0 %v2925_v22 }
 0x10d   :  { %v4584_v31 = vadd.f32 %v3248_v30, %v3184_v27  ;;  %2569 = vmatprep.mubr.bf16.mxu1 %v2927_v26 }
 0x10e   :  { %v3185_v34 = vpop.f32.mrb[12].mxu0 }
 0x10f   :  { %v3249_v37 = vpop.f32.mrb[12].mxu1  ;;  %v3186_v38 = vpop.f32.mrb[13].mxu0 }
 0x110   :  { %v3187_v40 = vadd.f32 %v3186_v38, %v3185_v34  ;;  %v3250_v41 = vpop.f32.mrb[13].mxu1  ;;  %v3188_v42 = vpop.f32.mrb[14].mxu0 }
 0x111   :  { %v3251_v45 = vadd.f32 %v3250_v41, %v3249_v37  ;;  %v3252_v46 = vpop.f32.mrb[14].mxu1  ;;  %v3189_v47 = vpop.f32.mrb[15].mxu0 }
 0x112   :  { %v3190_v50 = vadd.f32 %v3189_v47, %v3188_v42  ;;  %v3253_v52 = vpop.f32.mrb[15].mxu1 }
 0x113   :  { %v4598_v53 = vadd.f32 %v3251_v45, %v3187_v40  ;;  %v3254_v54 = vadd.f32 %v3253_v52, %v3252_v46  ;;  %2473 = vmatmul.mubr.bf16.gmra.mrb[120].mxu0 %v2924_v39 }
 0x114   :  { %2570 = vmatmul.mubr.bf16.gmra.mrb[120].mxu1 %v2926_v43  ;;  %2480 = vmatprep.mubr.bf16.mxu0 %v2941_v44 }
 0x115   :  { %v4600_v55 = vadd.f32 %v3254_v54, %v3190_v50  ;;  %2577 = vmatprep.mubr.bf16.mxu1 %v2943_v48 }
 0x116   :  { %v3191_v56 = vpop.f32.mrb[16].mxu0 }
 0x117   :  { %v3255_v57 = vpop.f32.mrb[16].mxu1  ;;  %v3192_v58 = vpop.f32.mrb[17].mxu0 }
 0x118   :  { %v3193_v60 = vadd.f32 %v3192_v58, %v3191_v56  ;;  %v3256_v61 = vpop.f32.mrb[17].mxu1  ;;  %v3194_v62 = vpop.f32.mrb[18].mxu0 }
 0x119   :  { %v3257_v0 = vadd.f32 %v3256_v61, %v3255_v57  ;;  %v3258_v1 = vpop.f32.mrb[18].mxu1  ;;  %v3195_v2 = vpop.f32.mrb[19].mxu0 }
 0x11a   :  { %v3196_v3 = vadd.f32 %v3195_v2, %v3194_v62  ;;  %v3259_v4 = vpop.f32.mrb[19].mxu1 }
 0x11b   :  { %v4602_v5 = vadd.f32 %v3257_v0, %v3193_v60  ;;  %v3260_v6 = vadd.f32 %v3259_v4, %v3258_v1  ;;  %2481 = vmatmul.mubr.bf16.gmra.mrb[124].mxu0 %v2940_v59 }
 0x11c   :  { %2578 = vmatmul.mubr.bf16.gmra.mrb[124].mxu1 %v2942_v63 }
 0x11d   :  { %v4604_v8 = vadd.f32 %v3260_v6, %v3196_v3 }
 0x11e   :  { %v3197_v10 = vpop.f32.mrb[20].mxu0 }
 0x11f   :  { %v3261_v11 = vpop.f32.mrb[20].mxu1  ;;  %v3198_v12 = vpop.f32.mrb[21].mxu0 }
 0x120   :  { %v3199_v13 = vadd.f32 %v3198_v12, %v3197_v10  ;;  %v3262_v14 = vpop.f32.mrb[21].mxu1  ;;  %v3200_v15 = vpop.f32.mrb[22].mxu0 }
 0x121   :  { %v3263_v16 = vadd.f32 %v3262_v14, %v3261_v11  ;;  %v3264_v17 = vpop.f32.mrb[22].mxu1  ;;  %v3201_v18 = vpop.f32.mrb[23].mxu0 }
 0x122   :  { %v3202_v19 = vadd.f32 %v3201_v18, %v3200_v15  ;;  %v3265_v20 = vpop.f32.mrb[23].mxu1 }
 0x123   :  { %v4606_v21 = vadd.f32 %v3263_v16, %v3199_v13  ;;  %v3266_v22 = vadd.f32 %v3265_v20, %v3264_v17 }
 0x125   :  { %v4608_v23 = vadd.f32 %v3266_v22, %v3202_v19 }
 0x126   :  { %v3203_v24 = vpop.f32.mrb[24].mxu0 }
 0x127   :  { %v3267_v25 = vpop.f32.mrb[24].mxu1  ;;  %v3204_v26 = vpop.f32.mrb[25].mxu0 }
 0x128   :  { %v3205_v27 = vadd.f32 %v3204_v26, %v3203_v24  ;;  %v3268_v28 = vpop.f32.mrb[25].mxu1  ;;  %v3206_v30 = vpop.f32.mrb[26].mxu0 }
 0x129   :  { %v3269_v32 = vadd.f32 %v3268_v28, %v3267_v25  ;;  %v3270_v33 = vpop.f32.mrb[26].mxu1  ;;  %v3207_v34 = vpop.f32.mrb[27].mxu0 }
 0x12a   :  { %v3208_v35 = vadd.f32 %v3207_v34, %v3206_v30  ;;  %v3271_v36 = vpop.f32.mrb[27].mxu1 }
 0x12b   :  { %v4610_v37 = vadd.f32 %v3269_v32, %v3205_v27  ;;  %v3272_v38 = vadd.f32 %v3271_v36, %v3270_v33 }
 0x12d   :  { %v4612_v39 = vadd.f32 %v3272_v38, %v3208_v35 }
 0x12e   :  { %v3209_v40 = vpop.f32.mrb[28].mxu0 }
 0x12f   :  { %v3273_v41 = vpop.f32.mrb[28].mxu1  ;;  %v3210_v42 = vpop.f32.mrb[29].mxu0 }
 0x130   :  { %v3211_v43 = vadd.f32 %v3210_v42, %v3209_v40  ;;  %v3274_v44 = vpop.f32.mrb[29].mxu1  ;;  %v3212_v45 = vpop.f32.mrb[30].mxu0 }
 0x131   :  { %v3275_v46 = vadd.f32 %v3274_v44, %v3273_v41  ;;  %v3276_v47 = vpop.f32.mrb[30].mxu1  ;;  %v3213_v48 = vpop.f32.mrb[31].mxu0 }
 0x132   :  { %v3214_v50 = vadd.f32 %v3213_v48, %v3212_v45  ;;  %v3277_v52 = vpop.f32.mrb[31].mxu1 }
 0x133   :  { %v4614_v54 = vadd.f32 %v3275_v46, %v3211_v43  ;;  %v3278_v56 = vadd.f32 %v3277_v52, %v3276_v47 }
 0x135   :  { %v4616_v57 = vadd.f32 %v3278_v56, %v3214_v50 }
 0x136   :  { %v3295_v58 = vpop.f32.mrb[32].mxu0 }
 0x137   :  { %v3359_v59 = vpop.f32.mrb[32].mxu1  ;;  %v3296_v60 = vpop.f32.mrb[33].mxu0 }
 0x138   :  { %v3297_v61 = vadd.f32 %v3296_v60, %v3295_v58  ;;  %v3360_v62 = vpop.f32.mrb[33].mxu1  ;;  %v3298_v63 = vpop.f32.mrb[34].mxu0 }
 0x139   :  { %v3361_v0 = vadd.f32 %v3360_v62, %v3359_v59  ;;  %v3362_v1 = vpop.f32.mrb[34].mxu1  ;;  %v3299_v2 = vpop.f32.mrb[35].mxu0 }
 0x13a   :  { %v2039_v3 = vadd.f32 %v3297_v61, %v4550_v49  ;;  %v3300_v4 = vadd.f32 %v3299_v2, %v3298_v63  ;;  %v3363_v6 = vpop.f32.mrb[35].mxu1 }
 0x13b   :  { %v3364_v10 = vadd.f32 %v3363_v6, %v3362_v1 }
 0x13c   :  { %v4619_v11 = vadd.f32 %v3361_v0, %v2039_v3  ;;  %v2042_v12 = vadd.f32 %v3300_v4, %v4552_v51 }
 0x13e   :  { %v4622_v13 = vadd.f32 %v3364_v10, %v2042_v12  ;;  %v3301_v14 = vpop.f32.mrb[36].mxu0 }
 0x13f   :  { %v3365_v15 = vpop.f32.mrb[36].mxu1  ;;  %v3302_v16 = vpop.f32.mrb[37].mxu0 }
 0x140   :  { %v3303_v17 = vadd.f32 %v3302_v16, %v3301_v14  ;;  %v3366_v18 = vpop.f32.mrb[37].mxu1  ;;  %v3304_v19 = vpop.f32.mrb[38].mxu0 }
 0x141   :  { %v3367_v20 = vadd.f32 %v3366_v18, %v3365_v15  ;;  %v3368_v22 = vpop.f32.mrb[38].mxu1  ;;  %v3305_v24 = vpop.f32.mrb[39].mxu0 }
 0x142   :  { %v2047_v49 = vadd.f32 %v3303_v17, %v4566_v7  ;;  %v3306_v25 = vadd.f32 %v3305_v24, %v3304_v19  ;;  %v3369_v26 = vpop.f32.mrb[39].mxu1 }
 0x143   :  { %v3370_v27 = vadd.f32 %v3369_v26, %v3368_v22 }
 0x144   :  { %v4625_v28 = vadd.f32 %v3367_v20, %v2047_v49  ;;  %v2050_v51 = vadd.f32 %v3306_v25, %v4568_v9 }
 0x146   :  { %v4628_v30 = vadd.f32 %v3370_v27, %v2050_v51  ;;  %v3307_v32 = vpop.f32.mrb[40].mxu0 }
 0x147   :  { %v3371_v33 = vpop.f32.mrb[40].mxu1  ;;  %v3308_v34 = vpop.f32.mrb[41].mxu0 }
 0x148   :  { %v3309_v35 = vadd.f32 %v3308_v34, %v3307_v32  ;;  %v3372_v36 = vpop.f32.mrb[41].mxu1  ;;  %v3310_v38 = vpop.f32.mrb[42].mxu0 }
 0x149   :  { %v3373_v40 = vadd.f32 %v3372_v36, %v3371_v33  ;;  %v3374_v41 = vpop.f32.mrb[42].mxu1  ;;  %v3311_v42 = vpop.f32.mrb[43].mxu0 }
 0x14a   :  { %v2055_v7 = vadd.f32 %v3309_v35, %v4582_v29  ;;  %v3312_v43 = vadd.f32 %v3311_v42, %v3310_v38  ;;  %v3375_v44 = vpop.f32.mrb[43].mxu1 }
 0x14b   :  { %v3376_v45 = vadd.f32 %v3375_v44, %v3374_v41 }
 0x14c   :  { %v4631_v46 = vadd.f32 %v3373_v40, %v2055_v7  ;;  %v2058_v9 = vadd.f32 %v3312_v43, %v4584_v31 }
 0x14e   :  { %v4634_v47 = vadd.f32 %v3376_v45, %v2058_v9  ;;  %v3313_v48 = vpop.f32.mrb[44].mxu0 }
 0x14f   :  { %v3377_v50 = vpop.f32.mrb[44].mxu1  ;;  %v3314_v52 = vpop.f32.mrb[45].mxu0 }
 0x150   :  { %v3315_v56 = vadd.f32 %v3314_v52, %v3313_v48  ;;  %v3378_v58 = vpop.f32.mrb[45].mxu1  ;;  %v3316_v59 = vpop.f32.mrb[46].mxu0 }
 0x151   :  { %v3379_v60 = vadd.f32 %v3378_v58, %v3377_v50  ;;  %v3380_v61 = vpop.f32.mrb[46].mxu1  ;;  %v3317_v62 = vpop.f32.mrb[47].mxu0 }
 0x152   :  { %v2063_v29 = vadd.f32 %v3315_v56, %v4598_v53  ;;  %v3318_v63 = vadd.f32 %v3317_v62, %v3316_v59  ;;  %v3381_v0 = vpop.f32.mrb[47].mxu1 }
 0x153   :  { %v3382_v1 = vadd.f32 %v3381_v0, %v3380_v61 }
 0x154   :  { %v4637_v2 = vadd.f32 %v3379_v60, %v2063_v29  ;;  %v2066_v31 = vadd.f32 %v3318_v63, %v4600_v55 }
 0x156   :  { %v4640_v3 = vadd.f32 %v3382_v1, %v2066_v31  ;;  %v3319_v4 = vpop.f32.mrb[48].mxu0 }
 0x157   :  { %v3383_v6 = vpop.f32.mrb[48].mxu1  ;;  %v3320_v10 = vpop.f32.mrb[49].mxu0 }
 0x158   :  { %v3321_v12 = vadd.f32 %v3320_v10, %v3319_v4  ;;  %v3384_v14 = vpop.f32.mrb[49].mxu1  ;;  %v3322_v15 = vpop.f32.mrb[50].mxu0 }
 0x159   :  { %v3385_v16 = vadd.f32 %v3384_v14, %v3383_v6  ;;  %v3386_v17 = vpop.f32.mrb[50].mxu1  ;;  %v3323_v18 = vpop.f32.mrb[51].mxu0 }
 0x15a   :  { %v2071_v53 = vadd.f32 %v3321_v12, %v4602_v5  ;;  %v3324_v19 = vadd.f32 %v3323_v18, %v3322_v15  ;;  %v3387_v20 = vpop.f32.mrb[51].mxu1 }
 0x15b   :  { %v3388_v22 = vadd.f32 %v3387_v20, %v3386_v17 }
 0x15c   :  { %v4643_v24 = vadd.f32 %v3385_v16, %v2071_v53  ;;  %v2074_v55 = vadd.f32 %v3324_v19, %v4604_v8 }
 0x15e   :  { %v4646_v49 = vadd.f32 %v3388_v22, %v2074_v55  ;;  %v3325_v25 = vpop.f32.mrb[52].mxu0 }
 0x15f   :  { %v3389_v26 = vpop.f32.mrb[52].mxu1  ;;  %v3326_v27 = vpop.f32.mrb[53].mxu0 }
 0x160   :  { %v3327_v51 = vadd.f32 %v3326_v27, %v3325_v25  ;;  %v3390_v32 = vpop.f32.mrb[53].mxu1  ;;  %v3328_v33 = vpop.f32.mrb[54].mxu0 }
 0x161   :  { %v3391_v34 = vadd.f32 %v3390_v32, %v3389_v26  ;;  %v3392_v35 = vpop.f32.mrb[54].mxu1  ;;  %v3329_v36 = vpop.f32.mrb[55].mxu0 }
 0x162   :  { %v2079_v5 = vadd.f32 %v3327_v51, %v4606_v21  ;;  %v3330_v38 = vadd.f32 %v3329_v36, %v3328_v33  ;;  %v3393_v40 = vpop.f32.mrb[55].mxu1 }
 0x163   :  { %v3394_v41 = vadd.f32 %v3393_v40, %v3392_v35 }
 0x164   :  { %v4649_v42 = vadd.f32 %v3391_v34, %v2079_v5  ;;  %v2082_v8 = vadd.f32 %v3330_v38, %v4608_v23 }
 0x166   :  { %v4652_v7 = vadd.f32 %v3394_v41, %v2082_v8  ;;  %v3331_v43 = vpop.f32.mrb[56].mxu0 }
 0x167   :  { %v3395_v44 = vpop.f32.mrb[56].mxu1  ;;  %v3332_v45 = vpop.f32.mrb[57].mxu0 }
 0x168   :  { %v3333_v9 = vadd.f32 %v3332_v45, %v3331_v43  ;;  %v3396_v48 = vpop.f32.mrb[57].mxu1  ;;  %v3334_v50 = vpop.f32.mrb[58].mxu0 }
 0x169   :  { %v3397_v52 = vadd.f32 %v3396_v48, %v3395_v44  ;;  %v3398_v56 = vpop.f32.mrb[58].mxu1  ;;  %v3335_v58 = vpop.f32.mrb[59].mxu0 }
 0x16a   :  { %v2087_v21 = vadd.f32 %v3333_v9, %v4610_v37  ;;  %v3336_v59 = vadd.f32 %v3335_v58, %v3334_v50  ;;  %v3399_v60 = vpop.f32.mrb[59].mxu1 }
 0x16b   :  { %v3400_v61 = vadd.f32 %v3399_v60, %v3398_v56 }
 0x16c   :  { %v4655_v62 = vadd.f32 %v3397_v52, %v2087_v21  ;;  %v2090_v23 = vadd.f32 %v3336_v59, %v4612_v39 }
 0x16e   :  { %v4658_v29 = vadd.f32 %v3400_v61, %v2090_v23  ;;  %v3337_v63 = vpop.f32.mrb[60].mxu0 }
 0x16f   :  { %v3401_v0 = vpop.f32.mrb[60].mxu1  ;;  %v3338_v1 = vpop.f32.mrb[61].mxu0 }
 0x170   :  { %v3339_v31 = vadd.f32 %v3338_v1, %v3337_v63  ;;  %v3402_v4 = vpop.f32.mrb[61].mxu1  ;;  %v3340_v6 = vpop.f32.mrb[62].mxu0 }
 0x171   :  { %v3403_v10 = vadd.f32 %v3402_v4, %v3401_v0  ;;  %v3404_v12 = vpop.f32.mrb[62].mxu1  ;;  %v3341_v14 = vpop.f32.mrb[63].mxu0 }
 0x172   :  { %v2095_v37 = vadd.f32 %v3339_v31, %v4614_v54  ;;  %v3342_v15 = vadd.f32 %v3341_v14, %v3340_v6  ;;  %v3405_v16 = vpop.f32.mrb[63].mxu1 }
 0x173   :  { %v3406_v17 = vadd.f32 %v3405_v16, %v3404_v12 }
 0x174   :  { %v4661_v18 = vadd.f32 %v3403_v10, %v2095_v37  ;;  %v2098_v39 = vadd.f32 %v3342_v15, %v4616_v57 }
 0x176   :  { %v4664_v53 = vadd.f32 %v3406_v17, %v2098_v39  ;;  %v3423_v19 = vpop.f32.mrb[64].mxu0 }
 0x177   :  { %v3487_v20 = vpop.f32.mrb[64].mxu1  ;;  %v3424_v22 = vpop.f32.mrb[65].mxu0 }
 0x178   :  { %v3425_v55 = vadd.f32 %v3424_v22, %v3423_v19  ;;  %v3488_v25 = vpop.f32.mrb[65].mxu1  ;;  %v3426_v26 = vpop.f32.mrb[66].mxu0 }
 0x179   :  { %v3489_v27 = vadd.f32 %v3488_v25, %v3487_v20  ;;  %v3490_v51 = vpop.f32.mrb[66].mxu1  ;;  %v3427_v32 = vpop.f32.mrb[67].mxu0 }
 0x17a   :  { %v2233_v54 = vadd.f32 %v3425_v55, %v4619_v11  ;;  %v3428_v33 = vadd.f32 %v3427_v32, %v3426_v26  ;;  %v3491_v34 = vpop.f32.mrb[67].mxu1 }
 0x17b   :  { %v3492_v35 = vadd.f32 %v3491_v34, %v3490_v51 }
 0x17c   :  { %v4667_v36 = vadd.f32 %v3489_v27, %v2233_v54  ;;  %v2236_v57 = vadd.f32 %v3428_v33, %v4622_v13 }
 0x17e   :  { %v4670_v5 = vadd.f32 %v3492_v35, %v2236_v57  ;;  %v3429_v38 = vpop.f32.mrb[68].mxu0 }
 0x17f   :  { %v3493_v40 = vpop.f32.mrb[68].mxu1  ;;  %v3430_v41 = vpop.f32.mrb[69].mxu0 }
 0x180   :  { %v3431_v8 = vadd.f32 %v3430_v41, %v3429_v38  ;;  %v3494_v43 = vpop.f32.mrb[69].mxu1  ;;  %v3432_v44 = vpop.f32.mrb[70].mxu0 }
 0x181   :  { %v3495_v45 = vadd.f32 %v3494_v43, %v3493_v40  ;;  %v3496_v9 = vpop.f32.mrb[70].mxu1  ;;  %v3433_v48 = vpop.f32.mrb[71].mxu0 }
 0x182   :  { %v2241_v11 = vadd.f32 %v3431_v8, %v4625_v28  ;;  %v3434_v50 = vadd.f32 %v3433_v48, %v3432_v44  ;;  %v3497_v52 = vpop.f32.mrb[71].mxu1 }
 0x183   :  { %v3498_v56 = vadd.f32 %v3497_v52, %v3496_v9 }
 0x184   :  { %v4673_v58 = vadd.f32 %v3495_v45, %v2241_v11  ;;  %v2244_v13 = vadd.f32 %v3434_v50, %v4628_v30 }
 0x186   :  { %v4676_v21 = vadd.f32 %v3498_v56, %v2244_v13  ;;  %v3435_v59 = vpop.f32.mrb[72].mxu0 }
 0x187   :  { %v3499_v60 = vpop.f32.mrb[72].mxu1  ;;  %v3436_v61 = vpop.f32.mrb[73].mxu0 }
 0x188   :  { %v3437_v23 = vadd.f32 %v3436_v61, %v3435_v59  ;;  %v3500_v63 = vpop.f32.mrb[73].mxu1  ;;  %v3438_v0 = vpop.f32.mrb[74].mxu0 }
 0x189   :  { %v3501_v1 = vadd.f32 %v3500_v63, %v3499_v60  ;;  %v3502_v31 = vpop.f32.mrb[74].mxu1  ;;  %v3439_v4 = vpop.f32.mrb[75].mxu0 }
 0x18a   :  { %v2249_v28 = vadd.f32 %v3437_v23, %v4631_v46  ;;  %v3440_v6 = vadd.f32 %v3439_v4, %v3438_v0  ;;  %v3503_v10 = vpop.f32.mrb[75].mxu1 }
 0x18b   :  { %v3504_v12 = vadd.f32 %v3503_v10, %v3502_v31 }
 0x18c   :  { %v4679_v14 = vadd.f32 %v3501_v1, %v2249_v28  ;;  %v2252_v30 = vadd.f32 %v3440_v6, %v4634_v47 }
 0x18e   :  { %v4682_v37 = vadd.f32 %v3504_v12, %v2252_v30  ;;  %v3441_v15 = vpop.f32.mrb[76].mxu0 }
 0x18f   :  { %v3505_v16 = vpop.f32.mrb[76].mxu1  ;;  %v3442_v17 = vpop.f32.mrb[77].mxu0 }
 0x190   :  { %v3443_v39 = vadd.f32 %v3442_v17, %v3441_v15  ;;  %v3506_v19 = vpop.f32.mrb[77].mxu1  ;;  %v3444_v20 = vpop.f32.mrb[78].mxu0 }
 0x191   :  { %v3507_v22 = vadd.f32 %v3506_v19, %v3505_v16  ;;  %v3508_v55 = vpop.f32.mrb[78].mxu1  ;;  %v3445_v25 = vpop.f32.mrb[79].mxu0 }
 0x192   :  { %v2257_v46 = vadd.f32 %v3443_v39, %v4637_v2  ;;  %v3446_v26 = vadd.f32 %v3445_v25, %v3444_v20  ;;  %v3509_v27 = vpop.f32.mrb[79].mxu1 }
 0x193   :  { %v3510_v51 = vadd.f32 %v3509_v27, %v3508_v55 }
 0x194   :  { %v4685_v32 = vadd.f32 %v3507_v22, %v2257_v46  ;;  %v2260_v47 = vadd.f32 %v3446_v26, %v4640_v3 }
 0x196   :  { %v4688_v54 = vadd.f32 %v3510_v51, %v2260_v47  ;;  %v3447_v33 = vpop.f32.mrb[80].mxu0 }
 0x197   :  { %v3511_v34 = vpop.f32.mrb[80].mxu1  ;;  %v3448_v35 = vpop.f32.mrb[81].mxu0 }
 0x198   :  { %v3449_v57 = vadd.f32 %v3448_v35, %v3447_v33  ;;  %v3512_v38 = vpop.f32.mrb[81].mxu1  ;;  %v3450_v40 = vpop.f32.mrb[82].mxu0 }
 0x199   :  { %v3513_v41 = vadd.f32 %v3512_v38, %v3511_v34  ;;  %v3514_v8 = vpop.f32.mrb[82].mxu1  ;;  %v3451_v43 = vpop.f32.mrb[83].mxu0 }
 0x19a   :  { %v2265_v2 = vadd.f32 %v3449_v57, %v4643_v24  ;;  %v3452_v44 = vadd.f32 %v3451_v43, %v3450_v40  ;;  %v3515_v45 = vpop.f32.mrb[83].mxu1 }
 0x19b   :  { %v3516_v9 = vadd.f32 %v3515_v45, %v3514_v8 }
 0x19c   :  { %v4691_v48 = vadd.f32 %v3513_v41, %v2265_v2  ;;  %v2268_v3 = vadd.f32 %v3452_v44, %v4646_v49 }
 0x19e   :  { %v4694_v11 = vadd.f32 %v3516_v9, %v2268_v3  ;;  %v3453_v50 = vpop.f32.mrb[84].mxu0 }
 0x19f   :  { %v3517_v52 = vpop.f32.mrb[84].mxu1  ;;  %v3454_v56 = vpop.f32.mrb[85].mxu0 }
 0x1a0   :  { %v3455_v13 = vadd.f32 %v3454_v56, %v3453_v50  ;;  %v3518_v59 = vpop.f32.mrb[85].mxu1  ;;  %v3456_v60 = vpop.f32.mrb[86].mxu0 }
 0x1a1   :  { %v3519_v61 = vadd.f32 %v3518_v59, %v3517_v52  ;;  %v3520_v23 = vpop.f32.mrb[86].mxu1  ;;  %v3457_v63 = vpop.f32.mrb[87].mxu0 }
 0x1a2   :  { %v2273_v24 = vadd.f32 %v3455_v13, %v4649_v42  ;;  %v3458_v0 = vadd.f32 %v3457_v63, %v3456_v60  ;;  %v3521_v1 = vpop.f32.mrb[87].mxu1 }
 0x1a3   :  { %v3522_v31 = vadd.f32 %v3521_v1, %v3520_v23 }
 0x1a4   :  { %v4697_v4 = vadd.f32 %v3519_v61, %v2273_v24  ;;  %v2276_v49 = vadd.f32 %v3458_v0, %v4652_v7 }
 0x1a6   :  { %v4700_v28 = vadd.f32 %v3522_v31, %v2276_v49  ;;  %v3459_v6 = vpop.f32.mrb[88].mxu0 }
 0x1a7   :  { %v3523_v10 = vpop.f32.mrb[88].mxu1  ;;  %v3460_v12 = vpop.f32.mrb[89].mxu0 }
 0x1a8   :  { %v3461_v30 = vadd.f32 %v3460_v12, %v3459_v6  ;;  %v3524_v15 = vpop.f32.mrb[89].mxu1  ;;  %v3462_v16 = vpop.f32.mrb[90].mxu0 }
 0x1a9   :  { %v3525_v17 = vadd.f32 %v3524_v15, %v3523_v10  ;;  %v3526_v39 = vpop.f32.mrb[90].mxu1  ;;  %v3463_v19 = vpop.f32.mrb[91].mxu0 }
 0x1aa   :  { %v2281_v42 = vadd.f32 %v3461_v30, %v4655_v62  ;;  %v3464_v20 = vadd.f32 %v3463_v19, %v3462_v16  ;;  %v3527_v22 = vpop.f32.mrb[91].mxu1 }
 0x1ab   :  { %v3528_v55 = vadd.f32 %v3527_v22, %v3526_v39 }
 0x1ac   :  { %v4703_v25 = vadd.f32 %v3525_v17, %v2281_v42  ;;  %v2284_v7 = vadd.f32 %v3464_v20, %v4658_v29 }
 0x1ae   :  { %v4706_v46 = vadd.f32 %v3528_v55, %v2284_v7  ;;  %v3465_v26 = vpop.f32.mrb[92].mxu0 }
 0x1af   :  { %v3529_v27 = vpop.f32.mrb[92].mxu1  ;;  %v3466_v51 = vpop.f32.mrb[93].mxu0 }
 0x1b0   :  { %v3467_v47 = vadd.f32 %v3466_v51, %v3465_v26  ;;  %v3530_v33 = vpop.f32.mrb[93].mxu1  ;;  %v3468_v34 = vpop.f32.mrb[94].mxu0 }
 0x1b1   :  { %v3531_v35 = vadd.f32 %v3530_v33, %v3529_v27  ;;  %v3532_v57 = vpop.f32.mrb[94].mxu1  ;;  %v3469_v38 = vpop.f32.mrb[95].mxu0 }
 0x1b2   :  { %v2289_v62 = vadd.f32 %v3467_v47, %v4661_v18  ;;  %v3470_v40 = vadd.f32 %v3469_v38, %v3468_v34  ;;  %v3533_v41 = vpop.f32.mrb[95].mxu1 }
 0x1b3   :  { %v3534_v8 = vadd.f32 %v3533_v41, %v3532_v57 }
 0x1b4   :  { %v4709_v43 = vadd.f32 %v3531_v35, %v2289_v62  ;;  %v2292_v29 = vadd.f32 %v3470_v40, %v4664_v53 }
 0x1b6   :  { %v4712_v2 = vadd.f32 %v3534_v8, %v2292_v29  ;;  %v3551_v44 = vpop.f32.mrb[96].mxu0 }
 0x1b7   :  { %v3615_v45 = vpop.f32.mrb[96].mxu1  ;;  %v3552_v9 = vpop.f32.mrb[97].mxu0 }
 0x1b8   :  { %v3553_v3 = vadd.f32 %v3552_v9, %v3551_v44  ;;  %v3616_v50 = vpop.f32.mrb[97].mxu1  ;;  %v3554_v52 = vpop.f32.mrb[98].mxu0 }
 0x1b9   :  { %v3617_v56 = vadd.f32 %v3616_v50, %v3615_v45  ;;  %v3618_v13 = vpop.f32.mrb[98].mxu1  ;;  %v3555_v59 = vpop.f32.mrb[99].mxu0 }
 0x1ba   :  { %v2427_v18 = vadd.f32 %v3553_v3, %v4667_v36  ;;  %v3556_v60 = vadd.f32 %v3555_v59, %v3554_v52  ;;  %v3619_v61 = vpop.f32.mrb[99].mxu1 }
 0x1bb   :  { %v3620_v23 = vadd.f32 %v3619_v61, %v3618_v13 }
 0x1bc   :  { %v4715_v63 = vadd.f32 %v3617_v56, %v2427_v18  ;;  %v2430_v53 = vadd.f32 %v3556_v60, %v4670_v5 }
 0x1be   :  { %v4718_v24 = vadd.f32 %v3620_v23, %v2430_v53  ;;  %v3557_v0 = vpop.f32.mrb[100].mxu0  ;;  %v2608_v20 = vmul.f32 %v4715_v63, %v4715_v63 }
 0x1bf   :  { %v3621_v1 = vpop.f32.mrb[100].mxu1  ;;  %v3558_v31 = vpop.f32.mrb[101].mxu0 }
 0x1c0   :  { %v3559_v49 = vadd.f32 %v3558_v31, %v3557_v0  ;;  %v3622_v6 = vpop.f32.mrb[101].mxu1  ;;  %v3560_v10 = vpop.f32.mrb[102].mxu0  ;;  %v2609_v19 = vmul.f32 %v4718_v24, %v4718_v24  ;;  %v2586_v22 = vadd.f32 %v4718_v24, %v4715_v63 }
 0x1c1   :  { %v3623_v12 = vadd.f32 %v3622_v6, %v3621_v1  ;;  %v3624_v30 = vpop.f32.mrb[102].mxu1  ;;  %v3561_v15 = vpop.f32.mrb[103].mxu0 }
 0x1c2   :  { %v2435_v36 = vadd.f32 %v3559_v49, %v4673_v58  ;;  %v3562_v16 = vadd.f32 %v3561_v15, %v3560_v10  ;;  %v3625_v17 = vpop.f32.mrb[103].mxu1  ;;  %v2624_v51 = vadd.f32 %v2609_v19, %v2608_v20 }
 0x1c3   :  { %v3626_v39 = vadd.f32 %v3625_v17, %v3624_v30 }
 0x1c4   :  { %v4723_v5 = vadd.f32 %v3623_v12, %v2435_v36  ;;  %v2438_v42 = vadd.f32 %v3562_v16, %v4676_v21 }
 0x1c6   :  { %v2610_v55 = vmul.f32 %v4723_v5, %v4723_v5  ;;  %v4732_v58 = vadd.f32 %v3626_v39, %v2438_v42  ;;  %v3563_v7 = vpop.f32.mrb[104].mxu0  ;;  %v2587_v47 = vadd.f32 %v2586_v22, %v4723_v5 }
 0x1c7   :  { %v3627_v26 = vpop.f32.mrb[104].mxu1  ;;  %v3564_v27 = vpop.f32.mrb[105].mxu0 }
 0x1c8   :  { %v3565_v33 = vadd.f32 %v3564_v27, %v3563_v7  ;;  %v3628_v34 = vpop.f32.mrb[105].mxu1  ;;  %v3566_v21 = vpop.f32.mrb[106].mxu0  ;;  %v2625_v62 = vadd.f32 %v2624_v51, %v2610_v55  ;;  %v2611_v40 = vmul.f32 %v4732_v58, %v4732_v58  ;;  %v2588_v45 = vadd.f32 %v2587_v47, %v4732_v58 }
 0x1c9   :  { %v3629_v35 = vadd.f32 %v3628_v34, %v3627_v26  ;;  %v3630_v57 = vpop.f32.mrb[106].mxu1  ;;  %v3567_v38 = vpop.f32.mrb[107].mxu0 }
 0x1ca   :  { %v2443_v41 = vadd.f32 %v3565_v33, %v4679_v14  ;;  %v3568_v8 = vadd.f32 %v3567_v38, %v3566_v21  ;;  %v3631_v29 = vpop.f32.mrb[107].mxu1  ;;  %v2626_v50 = vadd.f32 %v2625_v62, %v2611_v40 }
 0x1cb   :  { %v3632_v44 = vadd.f32 %v3631_v29, %v3630_v57 }
 0x1cc   :  { %v4739_v9 = vadd.f32 %v3629_v35, %v2443_v41  ;;  %v2446_v3 = vadd.f32 %v3568_v8, %v4682_v37 }
 0x1ce   :  { %v2589_v52 = vadd.f32 %v2588_v45, %v4739_v9  ;;  %v2612_v56 = vmul.f32 %v4739_v9, %v4739_v9  ;;  %v4745_v13 = vadd.f32 %v3632_v44, %v2446_v3  ;;  %v3569_v59 = vpop.f32.mrb[108].mxu0 }
 0x1cf   :  { %v3633_v18 = vpop.f32.mrb[108].mxu1  ;;  %v3570_v14 = vpop.f32.mrb[109].mxu0 }
 0x1d0   :  { %v2627_v60 = vadd.f32 %v2626_v50, %v2612_v56  ;;  %v2590_v61 = vadd.f32 %v2589_v52, %v4745_v13  ;;  %v2613_v23 = vmul.f32 %v4745_v13, %v4745_v13  ;;  %v3571_v53 = vadd.f32 %v3570_v14, %v3569_v59  ;;  %v3634_v0 = vpop.f32.mrb[109].mxu1  ;;  %v3572_v37 = vpop.f32.mrb[110].mxu0 }
 0x1d1   :  { %v3635_v1 = vadd.f32 %v3634_v0, %v3633_v18  ;;  %v3636_v31 = vpop.f32.mrb[110].mxu1  ;;  %v3573_v49 = vpop.f32.mrb[111].mxu0 }
 0x1d2   :  { %v2628_v6 = vadd.f32 %v2627_v60, %v2613_v23  ;;  %v2451_v10 = vadd.f32 %v3571_v53, %v4685_v32  ;;  %v3574_v12 = vadd.f32 %v3573_v49, %v3572_v37  ;;  %v3637_v30 = vpop.f32.mrb[111].mxu1 }
 0x1d3   :  { %v3638_v15 = vadd.f32 %v3637_v30, %v3636_v31 }
 0x1d4   :  { %v4751_v36 = vadd.f32 %v3635_v1, %v2451_v10  ;;  %v2454_v16 = vadd.f32 %v3574_v12, %v4688_v54 }
 0x1d6   :  { %v2591_v17 = vadd.f32 %v2590_v61, %v4751_v36  ;;  %v2614_v39 = vmul.f32 %v4751_v36, %v4751_v36  ;;  %v4757_v19 = vadd.f32 %v3638_v15, %v2454_v16  ;;  %v3575_v42 = vpop.f32.mrb[112].mxu0 }
 0x1d7   :  { %v3639_v20 = vpop.f32.mrb[112].mxu1  ;;  %v3576_v22 = vpop.f32.mrb[113].mxu0 }
 0x1d8   :  { %v2629_v55 = vadd.f32 %v2628_v6, %v2614_v39  ;;  %v2592_v32 = vadd.f32 %v2591_v17, %v4757_v19  ;;  %v2615_v7 = vmul.f32 %v4757_v19, %v4757_v19  ;;  %v3577_v26 = vadd.f32 %v3576_v22, %v3575_v42  ;;  %v3640_v27 = vpop.f32.mrb[113].mxu1  ;;  %v3578_v51 = vpop.f32.mrb[114].mxu0 }
 0x1d9   :  { %v3641_v54 = vadd.f32 %v3640_v27, %v3639_v20  ;;  %v3642_v47 = vpop.f32.mrb[114].mxu1  ;;  %v3579_v33 = vpop.f32.mrb[115].mxu0 }
 0x1da   :  { %v2630_v34 = vadd.f32 %v2629_v55, %v2615_v7  ;;  %v2459_v21 = vadd.f32 %v3577_v26, %v4691_v48  ;;  %v3580_v35 = vadd.f32 %v3579_v33, %v3578_v51  ;;  %v3643_v57 = vpop.f32.mrb[115].mxu1 }
 0x1db   :  { %v3644_v38 = vadd.f32 %v3643_v57, %v3642_v47 }
 0x1dc   :  { %v4763_v62 = vadd.f32 %v3641_v54, %v2459_v21  ;;  %v2462_v40 = vadd.f32 %v3580_v35, %v4694_v11 }
 0x1de   :  { %v2593_v41 = vadd.f32 %v2592_v32, %v4763_v62  ;;  %v2616_v8 = vmul.f32 %v4763_v62, %v4763_v62  ;;  %v4769_v29 = vadd.f32 %v3644_v38, %v2462_v40  ;;  %v3581_v44 = vpop.f32.mrb[116].mxu0 }
 0x1df   :  { %v3645_v45 = vpop.f32.mrb[116].mxu1  ;;  %v3582_v3 = vpop.f32.mrb[117].mxu0 }
 0x1e0   :  { %v2631_v50 = vadd.f32 %v2630_v34, %v2616_v8  ;;  %v2594_v48 = vadd.f32 %v2593_v41, %v4769_v29  ;;  %v2617_v52 = vmul.f32 %v4769_v29, %v4769_v29  ;;  %v3583_v56 = vadd.f32 %v3582_v3, %v3581_v44  ;;  %v3646_v59 = vpop.f32.mrb[117].mxu1  ;;  %v3584_v18 = vpop.f32.mrb[118].mxu0 }
 0x1e1   :  { %v3647_v11 = vadd.f32 %v3646_v59, %v3645_v45  ;;  %v3648_v14 = vpop.f32.mrb[118].mxu1  ;;  %v3585_v60 = vpop.f32.mrb[119].mxu0 }
 0x1e2   :  { %v2632_v61 = vadd.f32 %v2631_v50, %v2617_v52  ;;  %v2467_v23 = vadd.f32 %v3583_v56, %v4697_v4  ;;  %v3586_v53 = vadd.f32 %v3585_v60, %v3584_v18  ;;  %v3649_v0 = vpop.f32.mrb[119].mxu1 }
 0x1e3   :  { %v3650_v37 = vadd.f32 %v3649_v0, %v3648_v14 }
 0x1e4   :  { %v4775_v1 = vadd.f32 %v3647_v11, %v2467_v23  ;;  %v2470_v31 = vadd.f32 %v3586_v53, %v4700_v28 }
 0x1e6   :  { %v2595_v49 = vadd.f32 %v2594_v48, %v4775_v1  ;;  %v2618_v6 = vmul.f32 %v4775_v1, %v4775_v1  ;;  %v4781_v10 = vadd.f32 %v3650_v37, %v2470_v31  ;;  %v3587_v12 = vpop.f32.mrb[120].mxu0 }
 0x1e7   :  { %v3651_v30 = vpop.f32.mrb[120].mxu1  ;;  %v3588_v15 = vpop.f32.mrb[121].mxu0 }
 0x1e8   :  { %v2633_v16 = vadd.f32 %v2632_v61, %v2618_v6  ;;  %v2596_v4 = vadd.f32 %v2595_v49, %v4781_v10  ;;  %v2619_v17 = vmul.f32 %v4781_v10, %v4781_v10  ;;  %v3589_v39 = vadd.f32 %v3588_v15, %v3587_v12  ;;  %v3652_v42 = vpop.f32.mrb[121].mxu1  ;;  %v3590_v20 = vpop.f32.mrb[122].mxu0 }
 0x1e9   :  { %v3653_v28 = vadd.f32 %v3652_v42, %v3651_v30  ;;  %v3654_v22 = vpop.f32.mrb[122].mxu1  ;;  %v3591_v55 = vpop.f32.mrb[123].mxu0 }
 0x1ea   :  { %v2634_v32 = vadd.f32 %v2633_v16, %v2619_v17  ;;  %v2475_v7 = vadd.f32 %v3589_v39, %v4703_v25  ;;  %v3592_v26 = vadd.f32 %v3591_v55, %v3590_v20  ;;  %v3655_v27 = vpop.f32.mrb[123].mxu1 }
 0x1eb   :  { %v3656_v51 = vadd.f32 %v3655_v27, %v3654_v22 }
 0x1ec   :  { %v4787_v54 = vadd.f32 %v3653_v28, %v2475_v7  ;;  %v2478_v47 = vadd.f32 %v3592_v26, %v4706_v46  ;;  %v2657_v26 = vlaneseq }
 0x1ee   :  { %v2597_v33 = vadd.f32 %v2596_v4, %v4787_v54  ;;  %v2620_v34 = vmul.f32 %v4787_v54, %v4787_v54  ;;  %v4793_v21 = vadd.f32 %v3656_v51, %v2478_v47  ;;  %v3593_v35 = vpop.f32.mrb[124].mxu0  ;;  %v2658_v27 = vshrl.u32 %v2657_v26, 7  ;;  %v2649_v51 = vld [vmem:[%s4846_s2] sm:$0x1] }
 0x1ef   :  { %v3657_v57 = vpop.f32.mrb[124].mxu1  ;;  %v3594_v38 = vpop.f32.mrb[125].mxu0 }
 0x1f0   :  { %v2635_v40 = vadd.f32 %v2634_v32, %v2620_v34  ;;  %v2598_v25 = vadd.f32 %v2597_v33, %v4793_v21  ;;  %v2621_v41 = vmul.f32 %v4793_v21, %v4793_v21  ;;  %v3595_v8 = vadd.f32 %v3594_v38, %v3593_v35  ;;  %v3658_v44 = vpop.f32.mrb[125].mxu1  ;;  %v3596_v45 = vpop.f32.mrb[126].mxu0  ;;  %v2653_v35 = vld [vmem:[%s4847_s3] sm:$0x1] }
 0x1f1   :  { %v3659_v46 = vadd.f32 %v3658_v44, %v3657_v57  ;;  %v3660_v3 = vpop.f32.mrb[126].mxu1  ;;  %v3597_v50 = vpop.f32.mrb[127].mxu0  ;;  %v2659_v47 = vsub.s32 0, %v2658_v27 }
 0x1f2   :  { %v2636_v48 = vadd.f32 %v2635_v40, %v2621_v41  ;;  %v2483_v52 = vadd.f32 %v3595_v8, %v4709_v43  ;;  %v3598_v56 = vadd.f32 %v3597_v50, %v3596_v45  ;;  %v3661_v59 = vpop.f32.mrb[127].mxu1 }
 0x1f3   :  { %v3662_v18 = vadd.f32 %v3661_v59, %v3660_v3 }
 0x1f4   :  { %v2580_v11 = vadd.f32 %v3659_v46, %v2483_v52  ;;  %v2486_v14 = vadd.f32 %v3598_v56, %v4712_v2 }
 0x1f6   :  { %v2599_v60 = vadd.f32 %v2598_v25, %v2580_v11  ;;  %v2622_v61 = vmul.f32 %v2580_v11, %v2580_v11  ;;  %v2583_v23 = vadd.f32 %v3662_v18, %v2486_v14 }
 0x1f8   :  { %v2637_v53 = vadd.f32 %v2636_v48, %v2622_v61  ;;  %v2600_v0 = vadd.f32 %v2599_v60, %v2583_v23  ;;  %v2623_v37 = vmul.f32 %v2583_v23, %v2583_v23 }
 0x1fa   :  { %v2601_v31 = vrot.slane %v2600_v0, 4  ;;  %v2638_v49 = vadd.f32 %v2637_v53, %v2623_v37 }
 0x1fc   :  { %v2602_v6 = vadd.f32 %v2601_v31, %v2600_v0  ;;  %v2639_v12 = vrot.slane %v2638_v49, 4 }
 0x1fe   :  { %v2603_v30 = vrot.slane %v2602_v6, 2  ;;  %v2640_v15 = vadd.f32 %v2639_v12, %v2638_v49 }
 0x200   :  { %v2604_v16 = vadd.f32 %v2603_v30, %v2602_v6  ;;  %v2641_v43 = vrot.slane %v2640_v15, 2 }
 0x202   :  { %v2605_v4 = vrot.slane %v2604_v16, 1  ;;  %v2642_v17 = vadd.f32 %v2641_v43, %v2640_v15 }
 0x204   :  { %v2606_v39 = vadd.f32 %v2605_v4, %v2604_v16  ;;  %v2643_v42 = vrot.slane %v2642_v17, 1 }
 0x206   :  { %v2607_v20 = vmul.f32 0.0078125, %v2606_v39  ;;  %v2644_v2 = vadd.f32 %v2643_v42, %v2642_v17 }
 0x208   :  { %v2645_v28 = vmul.f32 0.0078125, %v2644_v2  ;;  %v2646_v22 = vmul.f32 %v2607_v20, %v2607_v20 }
 0x20a   :  { %v2647_v55 = vsub.f32 %v2645_v28, %v2646_v22 }
 0x20c   :  { %v2648_v32 = vmax.f32 %v2647_v55, 0.0 }
 0x20e   :  { %v2650_v7 = vadd.f32 1e-05, %v2648_v32 }
 0x210   :  { %3791 = vrsqrt.f32 %v2650_v7 }
 0x21a   :  { %v3792_v33 = vpop.eup %3791 }
 0x21b   :  { %v2652_v34 = vmul.f32 %v3792_v33, %v2649_v51 }
 0x21d   :  { %v2654_v57 = vmul.f32 %v2652_v34, %v2607_v20  ;;  %v2660_v38 = vrot.slane %v2652_v34, %v2659_v47 }
 0x21f   :  { %v2655_v40 = vsub.f32 %v2653_v35, %v2654_v57  ;;  %v2662_v25 = vmul.f32 %v2660_v38, %v4715_v63  ;;  %v2663_v41 = vmul.f32 %v2660_v38, %v4718_v24  ;;  %v2666_v8 = vmul.f32 %v2660_v38, %v4739_v9 }
 0x220   :  { %v2667_v44 = vmul.f32 %v2660_v38, %v4745_v13  ;;  %v2668_v45 = vmul.f32 %v2660_v38, %v4751_v36  ;;  %v2669_v46 = vmul.f32 %v2660_v38, %v4757_v19  ;;  %v2670_v3 = vmul.f32 %v2660_v38, %v4763_v62 }
 0x221   :  { %v2671_v50 = vmul.f32 %v2660_v38, %v4769_v29  ;;  %v2672_v48 = vmul.f32 %v2660_v38, %v4775_v1  ;;  %v2673_v52 = vmul.f32 %v2660_v38, %v4781_v10  ;;  %v2674_v63 = vmul.f32 %v2660_v38, %v4787_v54 }
 0x222   :  { %v2675_v24 = vmul.f32 %v2660_v38, %v4793_v21  ;;  %v2676_v56 = vmul.f32 %v2660_v38, %v2580_v11  ;;  %v2664_v9 = vmul.f32 %v2660_v38, %v4723_v5  ;;  %v2665_v13 = vmul.f32 %v2660_v38, %v4732_v58 }
 0x223   :  { %v2677_v36 = vmul.f32 %v2660_v38, %v2583_v23  ;;  %v2682_v59 = vrot.slane %v2655_v40, %v2659_v47 }
 0x225   :  { %v2684_v19 = vadd.f32 %v2682_v59, %v2662_v25  ;;  %v2685_v18 = vadd.f32 %v2682_v59, %v2663_v41  ;;  %v2686_v62 = vadd.f32 %v2682_v59, %v2664_v9  ;;  %v2687_v14 = vadd.f32 %v2682_v59, %v2665_v13 }
 0x226   :  { %v2688_v29 = vadd.f32 %v2682_v59, %v2666_v8  ;;  %v2689_v60 = vadd.f32 %v2682_v59, %v2667_v44  ;;  %v2690_v1 = vadd.f32 %v2682_v59, %v2668_v45  ;;  %v2691_v61 = vadd.f32 %v2682_v59, %v2669_v46 }
 0x227   :  { %v2692_v10 = vadd.f32 %v2682_v59, %v2670_v3  ;;  %v2693_v53 = vadd.f32 %v2682_v59, %v2671_v50  ;;  %v2694_v54 = vadd.f32 %v2682_v59, %v2672_v48  ;;  %v2695_v0 = vadd.f32 %v2682_v59, %v2673_v52 }
 0x228   :  { %v2696_v21 = vadd.f32 %v2682_v59, %v2674_v63  ;;  %v2697_v11 = vadd.f32 %v2682_v59, %v2675_v24  ;;  %v2698_v37 = vadd.f32 %v2682_v59, %v2676_v56  ;;  %v2699_v5 = vadd.f32 %v2682_v59, %v2677_v36 }
 0x229   :  { %v2700_v31 = vmul.f32 0.2, %v2684_v19  ;;  %v2701_v58 = vmul.f32 0.2, %v2685_v18  ;;  %v2702_v23 = vmul.f32 0.2, %v2686_v62 }
 0x22a   :  { %v2703_v49 = vmul.f32 0.2, %v2687_v14  ;;  %v2704_v6 = vmul.f32 0.2, %v2688_v29  ;;  %v2705_v12 = vmul.f32 0.2, %v2689_v60 }
 0x22b   :  { %v2706_v30 = vmul.f32 0.2, %v2690_v1  ;;  %v2707_v15 = vmul.f32 0.2, %v2691_v61  ;;  %v2708_v16 = vmul.f32 0.2, %v2692_v10  ;;  %v2716_v43 = vmax.f32 %v2684_v19, %v2700_v31 }
 0x22c   :  { %v2709_v4 = vmul.f32 0.2, %v2693_v53  ;;  %v2710_v17 = vmul.f32 0.2, %v2694_v54  ;;  %v2711_v39 = vmul.f32 0.2, %v2695_v0  ;;  %v2717_v42 = vmax.f32 %v2685_v18, %v2701_v58 }
 0x22d   :  { %v2712_v20 = vmul.f32 0.2, %v2696_v21  ;;  %v2713_v2 = vmul.f32 0.2, %v2697_v11  ;;  %v2714_v28 = vmul.f32 0.2, %v2698_v37  ;;  %v2718_v22 = vmax.f32 %v2686_v62, %v2702_v23 }
 0x22e   :  { %v2715_v55 = vmul.f32 0.2, %v2699_v5  ;;  %v2719_v32 = vmax.f32 %v2687_v14, %v2703_v49  ;;  %v2720_v7 = vmax.f32 %v2688_v29, %v2704_v6  ;;  %v2721_v26 = vmax.f32 %v2689_v60, %v2705_v12 }
 0x22f   :  { %v2722_v27 = vmax.f32 %v2690_v1, %v2706_v30  ;;  %v2723_v51 = vmax.f32 %v2691_v61, %v2707_v15  ;;  %v2724_v47 = vmax.f32 %v2692_v10, %v2708_v16  ;;  %v2725_v33 = vmax.f32 %v2693_v53, %v2709_v4 }
 0x230   :  { %v2726_v34 = vmax.f32 %v2694_v54, %v2710_v17  ;;  %v2727_v35 = vmax.f32 %v2695_v0, %v2711_v39  ;;  %v2728_v57 = vmax.f32 %v2696_v21, %v2712_v20  ;;  %v2729_v38 = vmax.f32 %v2697_v11, %v2713_v2 }
 0x231   :  { %v2730_v40 = vmax.f32 %v2698_v37, %v2714_v28  ;;  %v2731_v25 = vmax.f32 %v2699_v5, %v2715_v55  ;;  %v3107_v41 = vpack.c.bf16 %v2717_v42, %v2716_v43  ;;  %v3112_v8 = vpack.c.bf16 %v2719_v32, %v2718_v22 }
 0x232   :  { %v3117_v44 = vpack.c.bf16 %v2721_v26, %v2720_v7  ;;  %v3122_v45 = vpack.c.bf16 %v2723_v51, %v2722_v27  ;;  %v3127_v46 = vpack.c.bf16 %v2725_v33, %v2724_v47  ;;  %v3132_v3 = vpack.c.bf16 %v2727_v35, %v2726_v34 }
 0x233   :  { %3108 = vst [vmem:[%s4848_s4] sm:$0xff] %v3107_v41   ;;  %3144 = vst [vmem:[%s4848_s4 + $0x8] sm:$0xff] %v3112_v8   ;;  %v3137_v50 = vpack.c.bf16 %v2729_v38, %v2728_v57  ;;  %v3142_v48 = vpack.c.bf16 %v2731_v25, %v2730_v40 }
 0x234   :  { %3145 = vst [vmem:[%s4848_s4 + $0x10] sm:$0xff] %v3117_v44   ;;  %3146 = vst [vmem:[%s4848_s4 + $0x18] sm:$0xff] %v3122_v45  }
 0x235   :  { %3147 = vst [vmem:[%s4848_s4 + $0x20] sm:$0xff] %v3127_v46   ;;  %3148 = vst [vmem:[%s4848_s4 + $0x28] sm:$0xff] %v3132_v3  }
 0x236   :  { %3149 = vst [vmem:[%s4848_s4 + $0x30] sm:$0xff] %v3137_v50   ;;  %3150 = vst [vmem:[%s4848_s4 + $0x38] sm:$0xff] %v3142_v48  }

// kernel: discriminator_forward.7
= control target key start
LH: loop header
LB: loop body
LE: loop exit
PB: predicated region body
PF: predicated region fallthrough
CT: control target
= control target key end

     0   :  { %s3725_s15 = smov 0   ;;  %s3727_s16 = smov 0   ;;  %s4555_s0 = inlined_call_operand.vmem [shape: bf16[32,2048], index: 0, kind: input, shape index: {}]   ;;  %s4556_s1 = inlined_call_operand.vmem [shape: bf16[2048,256], index: 1, kind: input, shape index: {}]   ;;  %s4557_s2 = inlined_call_operand.vmem [shape: f32[1,256], index: 2, kind: input, shape index: {}]   ;;  %s4558_s3 = inlined_call_operand.vmem [shape: f32[1,256], index: 3, kind: input, shape index: {}]   ;;  %s4559_s4 = inlined_call_operand.vmem [shape: bf16[32,256], index: 4, kind: output, shape index: {}]  }
   0x1   :  { %s3729_s17 = smov 0  }
   0x2 LB: > { %s3741_s18 = sadd.s32 4294967295, %s3698_s17   ;;  %s3744_s19 = sadd.s32 1, %s3698_s17   ;;  %s3698_s17 = sphi %s3729_s17, %s4563_s17   ;;  %s3694_s16 = sphi %s3727_s16, %s4562_s16   ;;  %s3690_s15 = sphi %s3725_s15, %s4561_s15  }
   0x3   : > { %s39_s20 = ssub.s32 %s3698_s17, %s3744_s19  ;;  %s42_s21 = sadd.s32 1, %s3694_s16 }
   0x4   : > { %p40_p0 = scmp.eq.s32.totalorder %s39_s20, 0  ;;  %p49_p1 = scmp.ne.s32.totalorder %s3694_s16, %s3690_s15 }
   0x5   : > { %p50_p2 = scmp.eq.s32.totalorder %s3698_s17, 0  ;;  %p131_p3 = scmp.eq.s32.totalorder %s3741_s18, 1 }
   0x6   : > { %s3754_s22 = scalar_select %p40_p0, %s3694_s16, %s42_s21  }
   0x7   : > { %p51_p4 = por %p50_p2, %p49_p1  ;;  %p3756_p5 = por %p131_p3, %p49_p1 }
   0x8   : > { %p3109_p6 = scmp.ge.s32.totalorder %s3698_s17, 2 }
   0xa   : > { %156 = sbr.rel (%p3109_p6) target bundleno = 191 (0xbf), region = 20 }
  0x11   : > { %159 = sbr.rel (!%p51_p4) target bundleno = 191 (0xbf), region = 24  ;;  %s161_s24 = sand.u32 (%p51_p4), 1, %s3694_s16  }
  0x12   : > { %s3111_s25 = sshll.u32 (%p51_p4), %s3698_s17, 2  ;;  %s3110_s26 = sshll.u32 (%p51_p4), %s161_s24, 10 }
  0x13   : > { %s3766_s29 = scalar_lea.vmem (%p51_p4), %s4556_s1, %s3111_s25  ;;  %s3770_s30 = scalar_lea.vmem (%p51_p4), [#allocation2], %s3110_s26 }
  0x14   : > { %v181_v0 = vld [vmem:[%s3766_s29] sm:$0xf] (%p51_p4)  ;;  %v183_v1 = vld [vmem:[%s3766_s29 + $0x8] sm:$0xf] (%p51_p4)  ;;  %v185_v2 = vld [vmem:[%s3766_s29 + $0x10] sm:$0xf] (%p51_p4) }
  0x15   : > { %182 = vst [vmem:[%s3770_s30] sm:$0xf] (%p51_p4), %v181_v0  ;;  %184 = vst [vmem:[%s3770_s30 + $0x4] sm:$0xf] (%p51_p4), %v183_v1  ;;  %v187_v3 = vld [vmem:[%s3766_s29 + $0x18] sm:$0xf] (%p51_p4) }
  0x16   : > { %v189_v4 = vld [vmem:[%s3766_s29 + $0x20] sm:$0xf] (%p51_p4)  ;;  %186 = vst [vmem:[%s3770_s30 + $0x8] sm:$0xf] (%p51_p4), %v185_v2  ;;  %188 = vst [vmem:[%s3770_s30 + $0xc] sm:$0xf] (%p51_p4), %v187_v3 }
  0x17   : > { %190 = vst [vmem:[%s3770_s30 + $0x10] sm:$0xf] (%p51_p4), %v189_v4  ;;  %v191_v5 = vld [vmem:[%s3766_s29 + $0x28] sm:$0xf] (%p51_p4)  ;;  %v193_v6 = vld [vmem:[%s3766_s29 + $0x30] sm:$0xf] (%p51_p4) }
  0x18   : > { %v195_v7 = vld [vmem:[%s3766_s29 + $0x38] sm:$0xf]  ;;  %192 = vst [vmem:[%s3770_s30 + $0x14] sm:$0xf] %v191_v5  ;;  %194 = vst [vmem:[%s3770_s30 + $0x18] sm:$0xf] %v193_v6 }
  0x19   : > { %196 = vst [vmem:[%s3770_s30 + $0x1c] sm:$0xf] %v195_v7  ;;  %v197_v8 = vld [vmem:[%s3766_s29 + $0x40] sm:$0xf]  ;;  %v199_v9 = vld [vmem:[%s3766_s29 + $0x48] sm:$0xf] }
  0x1a   : > { %v201_v10 = vld [vmem:[%s3766_s29 + $0x50] sm:$0xf]  ;;  %198 = vst [vmem:[%s3770_s30 + $0x20] sm:$0xf] %v197_v8  ;;  %200 = vst [vmem:[%s3770_s30 + $0x24] sm:$0xf] %v199_v9 }
  0x1b   : > { %202 = vst [vmem:[%s3770_s30 + $0x28] sm:$0xf] %v201_v10  ;;  %v203_v11 = vld [vmem:[%s3766_s29 + $0x58] sm:$0xf]  ;;  %v205_v12 = vld [vmem:[%s3766_s29 + $0x60] sm:$0xf] }
  0x1c   : > { %v207_v13 = vld [vmem:[%s3766_s29 + $0x68] sm:$0xf]  ;;  %204 = vst [vmem:[%s3770_s30 + $0x2c] sm:$0xf] %v203_v11  ;;  %206 = vst [vmem:[%s3770_s30 + $0x30] sm:$0xf] %v205_v12 }
  0x1d   : > { %208 = vst [vmem:[%s3770_s30 + $0x34] sm:$0xf] %v207_v13  ;;  %v209_v14 = vld [vmem:[%s3766_s29 + $0x70] sm:$0xf]  ;;  %v211_v15 = vld [vmem:[%s3766_s29 + $0x78] sm:$0xf] }
  0x1e   : > { %v213_v16 = vld [vmem:[%s3766_s29 + $0x80] sm:$0xf]  ;;  %210 = vst [vmem:[%s3770_s30 + $0x38] sm:$0xf] %v209_v14  ;;  %212 = vst [vmem:[%s3770_s30 + $0x3c] sm:$0xf] %v211_v15 }
  0x1f   : > { %214 = vst [vmem:[%s3770_s30 + $0x40] sm:$0xf] %v213_v16  ;;  %v215_v17 = vld [vmem:[%s3766_s29 + $0x88] sm:$0xf]  ;;  %v217_v18 = vld [vmem:[%s3766_s29 + $0x90] sm:$0xf] }
  0x20   : > { %v219_v19 = vld [vmem:[%s3766_s29 + $0x98] sm:$0xf]  ;;  %216 = vst [vmem:[%s3770_s30 + $0x44] sm:$0xf] %v215_v17  ;;  %218 = vst [vmem:[%s3770_s30 + $0x48] sm:$0xf] %v217_v18 }
  0x21   : > { %220 = vst [vmem:[%s3770_s30 + $0x4c] sm:$0xf] %v219_v19  ;;  %v221_v20 = vld [vmem:[%s3766_s29 + $0xa0] sm:$0xf]  ;;  %v223_v21 = vld [vmem:[%s3766_s29 + $0xa8] sm:$0xf] }
  0x22   : > { %v225_v22 = vld [vmem:[%s3766_s29 + $0xb0] sm:$0xf]  ;;  %222 = vst [vmem:[%s3770_s30 + $0x50] sm:$0xf] %v221_v20  ;;  %224 = vst [vmem:[%s3770_s30 + $0x54] sm:$0xf] %v223_v21 }
  0x23   : > { %226 = vst [vmem:[%s3770_s30 + $0x58] sm:$0xf] %v225_v22  ;;  %v227_v23 = vld [vmem:[%s3766_s29 + $0xb8] sm:$0xf]  ;;  %v229_v24 = vld [vmem:[%s3766_s29 + $0xc0] sm:$0xf] }
  0x24   : > { %v231_v25 = vld [vmem:[%s3766_s29 + $0xc8] sm:$0xf]  ;;  %228 = vst [vmem:[%s3770_s30 + $0x5c] sm:$0xf] %v227_v23  ;;  %230 = vst [vmem:[%s3770_s30 + $0x60] sm:$0xf] %v229_v24 }
  0x25   : > { %232 = vst [vmem:[%s3770_s30 + $0x64] sm:$0xf] %v231_v25  ;;  %v233_v26 = vld [vmem:[%s3766_s29 + $0xd0] sm:$0xf]  ;;  %v235_v27 = vld [vmem:[%s3766_s29 + $0xd8] sm:$0xf] }
  0x26   : > { %v237_v28 = vld [vmem:[%s3766_s29 + $0xe0] sm:$0xf]  ;;  %234 = vst [vmem:[%s3770_s30 + $0x68] sm:$0xf] %v233_v26  ;;  %236 = vst [vmem:[%s3770_s30 + $0x6c] sm:$0xf] %v235_v27 }
  0x27   : > { %238 = vst [vmem:[%s3770_s30 + $0x70] sm:$0xf] %v237_v28  ;;  %v239_v29 = vld [vmem:[%s3766_s29 + $0xe8] sm:$0xf]  ;;  %v241_v30 = vld [vmem:[%s3766_s29 + $0xf0] sm:$0xf] }
  0x28   : > { %v243_v31 = vld [vmem:[%s3766_s29 + $0xf8] sm:$0xf]  ;;  %240 = vst [vmem:[%s3770_s30 + $0x74] sm:$0xf] %v239_v29  ;;  %242 = vst [vmem:[%s3770_s30 + $0x78] sm:$0xf] %v241_v30 }
  0x29   : > { %244 = vst [vmem:[%s3770_s30 + $0x7c] sm:$0xf] %v243_v31  ;;  %v245_v32 = vld [vmem:[%s3766_s29 + $0x100] sm:$0xf]  ;;  %v247_v33 = vld [vmem:[%s3766_s29 + $0x108] sm:$0xf] }
  0x2a   : > { %v249_v34 = vld [vmem:[%s3766_s29 + $0x110] sm:$0xf]  ;;  %246 = vst [vmem:[%s3770_s30 + $0x80] sm:$0xf] %v245_v32  ;;  %248 = vst [vmem:[%s3770_s30 + $0x84] sm:$0xf] %v247_v33 }
  0x2b   : > { %250 = vst [vmem:[%s3770_s30 + $0x88] sm:$0xf] %v249_v34  ;;  %v251_v35 = vld [vmem:[%s3766_s29 + $0x118] sm:$0xf]  ;;  %v253_v36 = vld [vmem:[%s3766_s29 + $0x120] sm:$0xf] }
  0x2c   : > { %v255_v37 = vld [vmem:[%s3766_s29 + $0x128] sm:$0xf]  ;;  %252 = vst [vmem:[%s3770_s30 + $0x8c] sm:$0xf] %v251_v35  ;;  %254 = vst [vmem:[%s3770_s30 + $0x90] sm:$0xf] %v253_v36 }
  0x2d   : > { %256 = vst [vmem:[%s3770_s30 + $0x94] sm:$0xf] %v255_v37  ;;  %v257_v38 = vld [vmem:[%s3766_s29 + $0x130] sm:$0xf]  ;;  %v259_v39 = vld [vmem:[%s3766_s29 + $0x138] sm:$0xf] }
  0x2e   : > { %v261_v40 = vld [vmem:[%s3766_s29 + $0x140] sm:$0xf]  ;;  %258 = vst [vmem:[%s3770_s30 + $0x98] sm:$0xf] %v257_v38  ;;  %260 = vst [vmem:[%s3770_s30 + $0x9c] sm:$0xf] %v259_v39 }
  0x2f   : > { %262 = vst [vmem:[%s3770_s30 + $0xa0] sm:$0xf] %v261_v40  ;;  %v263_v41 = vld [vmem:[%s3766_s29 + $0x148] sm:$0xf]  ;;  %v265_v42 = vld [vmem:[%s3766_s29 + $0x150] sm:$0xf] }
  0x30   : > { %v267_v43 = vld [vmem:[%s3766_s29 + $0x158] sm:$0xf]  ;;  %264 = vst [vmem:[%s3770_s30 + $0xa4] sm:$0xf] %v263_v41  ;;  %266 = vst [vmem:[%s3770_s30 + $0xa8] sm:$0xf] %v265_v42 }
  0x31   : > { %268 = vst [vmem:[%s3770_s30 + $0xac] sm:$0xf] %v267_v43  ;;  %v269_v44 = vld [vmem:[%s3766_s29 + $0x160] sm:$0xf]  ;;  %v271_v45 = vld [vmem:[%s3766_s29 + $0x168] sm:$0xf] }
  0x32   : > { %v273_v46 = vld [vmem:[%s3766_s29 + $0x170] sm:$0xf]  ;;  %270 = vst [vmem:[%s3770_s30 + $0xb0] sm:$0xf] %v269_v44  ;;  %272 = vst [vmem:[%s3770_s30 + $0xb4] sm:$0xf] %v271_v45 }
  0x33   : > { %274 = vst [vmem:[%s3770_s30 + $0xb8] sm:$0xf] %v273_v46  ;;  %v275_v47 = vld [vmem:[%s3766_s29 + $0x178] sm:$0xf]  ;;  %v277_v48 = vld [vmem:[%s3766_s29 + $0x180] sm:$0xf] }
  0x34   : > { %v279_v49 = vld [vmem:[%s3766_s29 + $0x188] sm:$0xf]  ;;  %276 = vst [vmem:[%s3770_s30 + $0xbc] sm:$0xf] %v275_v47  ;;  %278 = vst [vmem:[%s3770_s30 + $0xc0] sm:$0xf] %v277_v48 }
  0x35   : > { %280 = vst [vmem:[%s3770_s30 + $0xc4] sm:$0xf] %v279_v49  ;;  %v281_v50 = vld [vmem:[%s3766_s29 + $0x190] sm:$0xf]  ;;  %v283_v51 = vld [vmem:[%s3766_s29 + $0x198] sm:$0xf] }
  0x36   : > { %v285_v52 = vld [vmem:[%s3766_s29 + $0x1a0] sm:$0xf]  ;;  %282 = vst [vmem:[%s3770_s30 + $0xc8] sm:$0xf] %v281_v50  ;;  %284 = vst [vmem:[%s3770_s30 + $0xcc] sm:$0xf] %v283_v51 }
  0x37   : > { %286 = vst [vmem:[%s3770_s30 + $0xd0] sm:$0xf] %v285_v52  ;;  %v287_v53 = vld [vmem:[%s3766_s29 + $0x1a8] sm:$0xf]  ;;  %v289_v54 = vld [vmem:[%s3766_s29 + $0x1b0] sm:$0xf] }
  0x38   : > { %v291_v55 = vld [vmem:[%s3766_s29 + $0x1b8] sm:$0xf]  ;;  %288 = vst [vmem:[%s3770_s30 + $0xd4] sm:$0xf] %v287_v53  ;;  %290 = vst [vmem:[%s3770_s30 + $0xd8] sm:$0xf] %v289_v54 }
  0x39   : > { %292 = vst [vmem:[%s3770_s30 + $0xdc] sm:$0xf] %v291_v55  ;;  %v293_v56 = vld [vmem:[%s3766_s29 + $0x1c0] sm:$0xf]  ;;  %v295_v57 = vld [vmem:[%s3766_s29 + $0x1c8] sm:$0xf] }
  0x3a   : > { %v297_v58 = vld [vmem:[%s3766_s29 + $0x1d0] sm:$0xf]  ;;  %294 = vst [vmem:[%s3770_s30 + $0xe0] sm:$0xf] %v293_v56  ;;  %296 = vst [vmem:[%s3770_s30 + $0xe4] sm:$0xf] %v295_v57 }
  0x3b   : > { %298 = vst [vmem:[%s3770_s30 + $0xe8] sm:$0xf] %v297_v58  ;;  %v299_v59 = vld [vmem:[%s3766_s29 + $0x1d8] sm:$0xf]  ;;  %v301_v60 = vld [vmem:[%s3766_s29 + $0x1e0] sm:$0xf] }
  0x3c   : > { %v303_v61 = vld [vmem:[%s3766_s29 + $0x1e8] sm:$0xf]  ;;  %300 = vst [vmem:[%s3770_s30 + $0xec] sm:$0xf] %v299_v59  ;;  %302 = vst [vmem:[%s3770_s30 + $0xf0] sm:$0xf] %v301_v60 }
  0x3d   : > { %304 = vst [vmem:[%s3770_s30 + $0xf4] sm:$0xf] %v303_v61  ;;  %v305_v62 = vld [vmem:[%s3766_s29 + $0x1f0] sm:$0xf]  ;;  %v307_v63 = vld [vmem:[%s3766_s29 + $0x1f8] sm:$0xf] }
  0x3e   : > { %v309_v0 = vld [vmem:[%s3766_s29 + $0x200] sm:$0xf]  ;;  %306 = vst [vmem:[%s3770_s30 + $0xf8] sm:$0xf] %v305_v62  ;;  %308 = vst [vmem:[%s3770_s30 + $0xfc] sm:$0xf] %v307_v63 }
  0x3f   : > { %310 = vst [vmem:[%s3770_s30 + $0x100] sm:$0xf] %v309_v0  ;;  %v311_v1 = vld [vmem:[%s3766_s29 + $0x208] sm:$0xf]  ;;  %v313_v2 = vld [vmem:[%s3766_s29 + $0x210] sm:$0xf] }
  0x40   : > { %v315_v3 = vld [vmem:[%s3766_s29 + $0x218] sm:$0xf]  ;;  %312 = vst [vmem:[%s3770_s30 + $0x104] sm:$0xf] %v311_v1  ;;  %314 = vst [vmem:[%s3770_s30 + $0x108] sm:$0xf] %v313_v2 }
  0x41   : > { %316 = vst [vmem:[%s3770_s30 + $0x10c] sm:$0xf] %v315_v3  ;;  %v317_v4 = vld [vmem:[%s3766_s29 + $0x220] sm:$0xf]  ;;  %v319_v5 = vld [vmem:[%s3766_s29 + $0x228] sm:$0xf] }
  0x42   : > { %v321_v6 = vld [vmem:[%s3766_s29 + $0x230] sm:$0xf]  ;;  %318 = vst [vmem:[%s3770_s30 + $0x110] sm:$0xf] %v317_v4  ;;  %320 = vst [vmem:[%s3770_s30 + $0x114] sm:$0xf] %v319_v5 }
  0x43   : > { %322 = vst [vmem:[%s3770_s30 + $0x118] sm:$0xf] %v321_v6  ;;  %v323_v7 = vld [vmem:[%s3766_s29 + $0x238] sm:$0xf]  ;;  %v325_v8 = vld [vmem:[%s3766_s29 + $0x240] sm:$0xf] }
  0x44   : > { %v327_v9 = vld [vmem:[%s3766_s29 + $0x248] sm:$0xf]  ;;  %324 = vst [vmem:[%s3770_s30 + $0x11c] sm:$0xf] %v323_v7  ;;  %326 = vst [vmem:[%s3770_s30 + $0x120] sm:$0xf] %v325_v8 }
  0x45   : > { %328 = vst [vmem:[%s3770_s30 + $0x124] sm:$0xf] %v327_v9  ;;  %v329_v10 = vld [vmem:[%s3766_s29 + $0x250] sm:$0xf]  ;;  %v331_v11 = vld [vmem:[%s3766_s29 + $0x258] sm:$0xf] }
  0x46   : > { %v333_v12 = vld [vmem:[%s3766_s29 + $0x260] sm:$0xf]  ;;  %330 = vst [vmem:[%s3770_s30 + $0x128] sm:$0xf] %v329_v10  ;;  %332 = vst [vmem:[%s3770_s30 + $0x12c] sm:$0xf] %v331_v11 }
  0x47   : > { %334 = vst [vmem:[%s3770_s30 + $0x130] sm:$0xf] %v333_v12  ;;  %v335_v13 = vld [vmem:[%s3766_s29 + $0x268] sm:$0xf]  ;;  %v337_v14 = vld [vmem:[%s3766_s29 + $0x270] sm:$0xf] }
  0x48   : > { %v339_v15 = vld [vmem:[%s3766_s29 + $0x278] sm:$0xf]  ;;  %336 = vst [vmem:[%s3770_s30 + $0x134] sm:$0xf] %v335_v13  ;;  %338 = vst [vmem:[%s3770_s30 + $0x138] sm:$0xf] %v337_v14 }
  0x49   : > { %340 = vst [vmem:[%s3770_s30 + $0x13c] sm:$0xf] %v339_v15  ;;  %v341_v16 = vld [vmem:[%s3766_s29 + $0x280] sm:$0xf]  ;;  %v343_v17 = vld [vmem:[%s3766_s29 + $0x288] sm:$0xf] }
  0x4a   : > { %v345_v18 = vld [vmem:[%s3766_s29 + $0x290] sm:$0xf]  ;;  %342 = vst [vmem:[%s3770_s30 + $0x140] sm:$0xf] %v341_v16  ;;  %344 = vst [vmem:[%s3770_s30 + $0x144] sm:$0xf] %v343_v17 }
  0x4b   : > { %346 = vst [vmem:[%s3770_s30 + $0x148] sm:$0xf] %v345_v18  ;;  %v347_v19 = vld [vmem:[%s3766_s29 + $0x298] sm:$0xf]  ;;  %v349_v20 = vld [vmem:[%s3766_s29 + $0x2a0] sm:$0xf] }
  0x4c   : > { %v351_v21 = vld [vmem:[%s3766_s29 + $0x2a8] sm:$0xf]  ;;  %348 = vst [vmem:[%s3770_s30 + $0x14c] sm:$0xf] %v347_v19  ;;  %350 = vst [vmem:[%s3770_s30 + $0x150] sm:$0xf] %v349_v20 }
  0x4d   : > { %352 = vst [vmem:[%s3770_s30 + $0x154] sm:$0xf] %v351_v21  ;;  %v353_v22 = vld [vmem:[%s3766_s29 + $0x2b0] sm:$0xf]  ;;  %v355_v23 = vld [vmem:[%s3766_s29 + $0x2b8] sm:$0xf] }
  0x4e   : > { %v357_v24 = vld [vmem:[%s3766_s29 + $0x2c0] sm:$0xf]  ;;  %354 = vst [vmem:[%s3770_s30 + $0x158] sm:$0xf] %v353_v22  ;;  %356 = vst [vmem:[%s3770_s30 + $0x15c] sm:$0xf] %v355_v23 }
  0x4f   : > { %358 = vst [vmem:[%s3770_s30 + $0x160] sm:$0xf] %v357_v24  ;;  %v359_v25 = vld [vmem:[%s3766_s29 + $0x2c8] sm:$0xf]  ;;  %v361_v26 = vld [vmem:[%s3766_s29 + $0x2d0] sm:$0xf] }
  0x50   : > { %v363_v27 = vld [vmem:[%s3766_s29 + $0x2d8] sm:$0xf]  ;;  %360 = vst [vmem:[%s3770_s30 + $0x164] sm:$0xf] %v359_v25  ;;  %362 = vst [vmem:[%s3770_s30 + $0x168] sm:$0xf] %v361_v26 }
  0x51   : > { %364 = vst [vmem:[%s3770_s30 + $0x16c] sm:$0xf] %v363_v27  ;;  %v365_v28 = vld [vmem:[%s3766_s29 + $0x2e0] sm:$0xf]  ;;  %v367_v29 = vld [vmem:[%s3766_s29 + $0x2e8] sm:$0xf] }
  0x52   : > { %v369_v30 = vld [vmem:[%s3766_s29 + $0x2f0] sm:$0xf]  ;;  %366 = vst [vmem:[%s3770_s30 + $0x170] sm:$0xf] %v365_v28  ;;  %368 = vst [vmem:[%s3770_s30 + $0x174] sm:$0xf] %v367_v29 }
  0x53   : > { %370 = vst [vmem:[%s3770_s30 + $0x178] sm:$0xf] %v369_v30  ;;  %v371_v31 = vld [vmem:[%s3766_s29 + $0x2f8] sm:$0xf]  ;;  %v373_v32 = vld [vmem:[%s3766_s29 + $0x300] sm:$0xf] }
  0x54   : > { %v375_v33 = vld [vmem:[%s3766_s29 + $0x308] sm:$0xf]  ;;  %372 = vst [vmem:[%s3770_s30 + $0x17c] sm:$0xf] %v371_v31  ;;  %374 = vst [vmem:[%s3770_s30 + $0x180] sm:$0xf] %v373_v32 }
  0x55   : > { %376 = vst [vmem:[%s3770_s30 + $0x184] sm:$0xf] %v375_v33  ;;  %v377_v34 = vld [vmem:[%s3766_s29 + $0x310] sm:$0xf]  ;;  %v379_v35 = vld [vmem:[%s3766_s29 + $0x318] sm:$0xf] }
  0x56   : > { %v381_v36 = vld [vmem:[%s3766_s29 + $0x320] sm:$0xf]  ;;  %378 = vst [vmem:[%s3770_s30 + $0x188] sm:$0xf] %v377_v34  ;;  %380 = vst [vmem:[%s3770_s30 + $0x18c] sm:$0xf] %v379_v35 }
  0x57   : > { %382 = vst [vmem:[%s3770_s30 + $0x190] sm:$0xf] %v381_v36  ;;  %v383_v37 = vld [vmem:[%s3766_s29 + $0x328] sm:$0xf]  ;;  %v385_v38 = vld [vmem:[%s3766_s29 + $0x330] sm:$0xf] }
  0x58   : > { %v387_v39 = vld [vmem:[%s3766_s29 + $0x338] sm:$0xf]  ;;  %384 = vst [vmem:[%s3770_s30 + $0x194] sm:$0xf] %v383_v37  ;;  %386 = vst [vmem:[%s3770_s30 + $0x198] sm:$0xf] %v385_v38 }
  0x59   : > { %388 = vst [vmem:[%s3770_s30 + $0x19c] sm:$0xf] %v387_v39  ;;  %v389_v40 = vld [vmem:[%s3766_s29 + $0x340] sm:$0xf]  ;;  %v391_v41 = vld [vmem:[%s3766_s29 + $0x348] sm:$0xf] }
  0x5a   : > { %v393_v42 = vld [vmem:[%s3766_s29 + $0x350] sm:$0xf]  ;;  %390 = vst [vmem:[%s3770_s30 + $0x1a0] sm:$0xf] %v389_v40  ;;  %392 = vst [vmem:[%s3770_s30 + $0x1a4] sm:$0xf] %v391_v41 }
  0x5b   : > { %394 = vst [vmem:[%s3770_s30 + $0x1a8] sm:$0xf] %v393_v42  ;;  %v395_v43 = vld [vmem:[%s3766_s29 + $0x358] sm:$0xf]  ;;  %v397_v44 = vld [vmem:[%s3766_s29 + $0x360] sm:$0xf] }
  0x5c   : > { %v399_v45 = vld [vmem:[%s3766_s29 + $0x368] sm:$0xf]  ;;  %396 = vst [vmem:[%s3770_s30 + $0x1ac] sm:$0xf] %v395_v43  ;;  %398 = vst [vmem:[%s3770_s30 + $0x1b0] sm:$0xf] %v397_v44 }
  0x5d   : > { %400 = vst [vmem:[%s3770_s30 + $0x1b4] sm:$0xf] %v399_v45  ;;  %v401_v46 = vld [vmem:[%s3766_s29 + $0x370] sm:$0xf]  ;;  %v403_v47 = vld [vmem:[%s3766_s29 + $0x378] sm:$0xf] }
  0x5e   : > { %v405_v48 = vld [vmem:[%s3766_s29 + $0x380] sm:$0xf]  ;;  %402 = vst [vmem:[%s3770_s30 + $0x1b8] sm:$0xf] %v401_v46  ;;  %404 = vst [vmem:[%s3770_s30 + $0x1bc] sm:$0xf] %v403_v47 }
  0x5f   : > { %406 = vst [vmem:[%s3770_s30 + $0x1c0] sm:$0xf] %v405_v48  ;;  %v407_v49 = vld [vmem:[%s3766_s29 + $0x388] sm:$0xf]  ;;  %v409_v50 = vld [vmem:[%s3766_s29 + $0x390] sm:$0xf] }
  0x60   : > { %v411_v51 = vld [vmem:[%s3766_s29 + $0x398] sm:$0xf]  ;;  %408 = vst [vmem:[%s3770_s30 + $0x1c4] sm:$0xf] %v407_v49  ;;  %410 = vst [vmem:[%s3770_s30 + $0x1c8] sm:$0xf] %v409_v50 }
  0x61   : > { %412 = vst [vmem:[%s3770_s30 + $0x1cc] sm:$0xf] %v411_v51  ;;  %v413_v52 = vld [vmem:[%s3766_s29 + $0x3a0] sm:$0xf]  ;;  %v415_v53 = vld [vmem:[%s3766_s29 + $0x3a8] sm:$0xf] }
  0x62   : > { %v417_v54 = vld [vmem:[%s3766_s29 + $0x3b0] sm:$0xf]  ;;  %414 = vst [vmem:[%s3770_s30 + $0x1d0] sm:$0xf] %v413_v52  ;;  %416 = vst [vmem:[%s3770_s30 + $0x1d4] sm:$0xf] %v415_v53 }
  0x63   : > { %418 = vst [vmem:[%s3770_s30 + $0x1d8] sm:$0xf] %v417_v54  ;;  %v419_v55 = vld [vmem:[%s3766_s29 + $0x3b8] sm:$0xf]  ;;  %v421_v56 = vld [vmem:[%s3766_s29 + $0x3c0] sm:$0xf] }
  0x64   : > { %v423_v57 = vld [vmem:[%s3766_s29 + $0x3c8] sm:$0xf]  ;;  %420 = vst [vmem:[%s3770_s30 + $0x1dc] sm:$0xf] %v419_v55  ;;  %422 = vst [vmem:[%s3770_s30 + $0x1e0] sm:$0xf] %v421_v56 }
  0x65   : > { %424 = vst [vmem:[%s3770_s30 + $0x1e4] sm:$0xf] %v423_v57  ;;  %v425_v58 = vld [vmem:[%s3766_s29 + $0x3d0] sm:$0xf]  ;;  %v427_v59 = vld [vmem:[%s3766_s29 + $0x3d8] sm:$0xf] }
  0x66   : > { %v429_v60 = vld [vmem:[%s3766_s29 + $0x3e0] sm:$0xf]  ;;  %426 = vst [vmem:[%s3770_s30 + $0x1e8] sm:$0xf] %v425_v58  ;;  %428 = vst [vmem:[%s3770_s30 + $0x1ec] sm:$0xf] %v427_v59 }
  0x67   : > { %430 = vst [vmem:[%s3770_s30 + $0x1f0] sm:$0xf] %v429_v60  ;;  %v431_v61 = vld [vmem:[%s3766_s29 + $0x3e8] sm:$0xf]  ;;  %v433_v62 = vld [vmem:[%s3766_s29 + $0x3f0] sm:$0xf] }
  0x68   : > { %v435_v63 = vld [vmem:[%s3766_s29 + $0x3f8] sm:$0xf]  ;;  %432 = vst [vmem:[%s3770_s30 + $0x1f4] sm:$0xf] %v431_v61  ;;  %434 = vst [vmem:[%s3770_s30 + $0x1f8] sm:$0xf] %v433_v62 }
  0x69   : > { %436 = vst [vmem:[%s3770_s30 + $0x1fc] sm:$0xf] %v435_v63  ;;  %v437_v0 = vld [vmem:[%s3766_s29 + $0x400] sm:$0xf]  ;;  %v439_v1 = vld [vmem:[%s3766_s29 + $0x408] sm:$0xf] }
  0x6a   : > { %v441_v2 = vld [vmem:[%s3766_s29 + $0x410] sm:$0xf]  ;;  %438 = vst [vmem:[%s3770_s30 + $0x200] sm:$0xf] %v437_v0  ;;  %440 = vst [vmem:[%s3770_s30 + $0x204] sm:$0xf] %v439_v1 }
  0x6b   : > { %442 = vst [vmem:[%s3770_s30 + $0x208] sm:$0xf] %v441_v2  ;;  %v443_v3 = vld [vmem:[%s3766_s29 + $0x418] sm:$0xf]  ;;  %v445_v4 = vld [vmem:[%s3766_s29 + $0x420] sm:$0xf] }
  0x6c   : > { %v447_v5 = vld [vmem:[%s3766_s29 + $0x428] sm:$0xf]  ;;  %444 = vst [vmem:[%s3770_s30 + $0x20c] sm:$0xf] %v443_v3  ;;  %446 = vst [vmem:[%s3770_s30 + $0x210] sm:$0xf] %v445_v4 }
  0x6d   : > { %448 = vst [vmem:[%s3770_s30 + $0x214] sm:$0xf] %v447_v5  ;;  %v449_v6 = vld [vmem:[%s3766_s29 + $0x430] sm:$0xf]  ;;  %v451_v7 = vld [vmem:[%s3766_s29 + $0x438] sm:$0xf] }
  0x6e   : > { %v453_v8 = vld [vmem:[%s3766_s29 + $0x440] sm:$0xf]  ;;  %450 = vst [vmem:[%s3770_s30 + $0x218] sm:$0xf] %v449_v6  ;;  %452 = vst [vmem:[%s3770_s30 + $0x21c] sm:$0xf] %v451_v7 }
  0x6f   : > { %454 = vst [vmem:[%s3770_s30 + $0x220] sm:$0xf] %v453_v8  ;;  %v455_v9 = vld [vmem:[%s3766_s29 + $0x448] sm:$0xf]  ;;  %v457_v10 = vld [vmem:[%s3766_s29 + $0x450] sm:$0xf] }
  0x70   : > { %v459_v11 = vld [vmem:[%s3766_s29 + $0x458] sm:$0xf]  ;;  %456 = vst [vmem:[%s3770_s30 + $0x224] sm:$0xf] %v455_v9  ;;  %458 = vst [vmem:[%s3770_s30 + $0x228] sm:$0xf] %v457_v10 }
  0x71   : > { %460 = vst [vmem:[%s3770_s30 + $0x22c] sm:$0xf] %v459_v11  ;;  %v461_v12 = vld [vmem:[%s3766_s29 + $0x460] sm:$0xf]  ;;  %v463_v13 = vld [vmem:[%s3766_s29 + $0x468] sm:$0xf] }
  0x72   : > { %v465_v14 = vld [vmem:[%s3766_s29 + $0x470] sm:$0xf]  ;;  %462 = vst [vmem:[%s3770_s30 + $0x230] sm:$0xf] %v461_v12  ;;  %464 = vst [vmem:[%s3770_s30 + $0x234] sm:$0xf] %v463_v13 }
  0x73   : > { %466 = vst [vmem:[%s3770_s30 + $0x238] sm:$0xf] %v465_v14  ;;  %v467_v15 = vld [vmem:[%s3766_s29 + $0x478] sm:$0xf]  ;;  %v469_v16 = vld [vmem:[%s3766_s29 + $0x480] sm:$0xf] }
  0x74   : > { %v471_v17 = vld [vmem:[%s3766_s29 + $0x488] sm:$0xf]  ;;  %468 = vst [vmem:[%s3770_s30 + $0x23c] sm:$0xf] %v467_v15  ;;  %470 = vst [vmem:[%s3770_s30 + $0x240] sm:$0xf] %v469_v16 }
  0x75   : > { %472 = vst [vmem:[%s3770_s30 + $0x244] sm:$0xf] %v471_v17  ;;  %v473_v18 = vld [vmem:[%s3766_s29 + $0x490] sm:$0xf]  ;;  %v475_v19 = vld [vmem:[%s3766_s29 + $0x498] sm:$0xf] }
  0x76   : > { %v477_v20 = vld [vmem:[%s3766_s29 + $0x4a0] sm:$0xf]  ;;  %474 = vst [vmem:[%s3770_s30 + $0x248] sm:$0xf] %v473_v18  ;;  %476 = vst [vmem:[%s3770_s30 + $0x24c] sm:$0xf] %v475_v19 }
  0x77   : > { %478 = vst [vmem:[%s3770_s30 + $0x250] sm:$0xf] %v477_v20  ;;  %v479_v21 = vld [vmem:[%s3766_s29 + $0x4a8] sm:$0xf]  ;;  %v481_v22 = vld [vmem:[%s3766_s29 + $0x4b0] sm:$0xf] }
  0x78   : > { %v483_v23 = vld [vmem:[%s3766_s29 + $0x4b8] sm:$0xf]  ;;  %480 = vst [vmem:[%s3770_s30 + $0x254] sm:$0xf] %v479_v21  ;;  %482 = vst [vmem:[%s3770_s30 + $0x258] sm:$0xf] %v481_v22 }
  0x79   : > { %484 = vst [vmem:[%s3770_s30 + $0x25c] sm:$0xf] %v483_v23  ;;  %v485_v24 = vld [vmem:[%s3766_s29 + $0x4c0] sm:$0xf]  ;;  %v487_v25 = vld [vmem:[%s3766_s29 + $0x4c8] sm:$0xf] }
  0x7a   : > { %v489_v26 = vld [vmem:[%s3766_s29 + $0x4d0] sm:$0xf]  ;;  %486 = vst [vmem:[%s3770_s30 + $0x260] sm:$0xf] %v485_v24  ;;  %488 = vst [vmem:[%s3770_s30 + $0x264] sm:$0xf] %v487_v25 }
  0x7b   : > { %490 = vst [vmem:[%s3770_s30 + $0x268] sm:$0xf] %v489_v26  ;;  %v491_v27 = vld [vmem:[%s3766_s29 + $0x4d8] sm:$0xf]  ;;  %v493_v28 = vld [vmem:[%s3766_s29 + $0x4e0] sm:$0xf] }
  0x7c   : > { %v495_v29 = vld [vmem:[%s3766_s29 + $0x4e8] sm:$0xf]  ;;  %492 = vst [vmem:[%s3770_s30 + $0x26c] sm:$0xf] %v491_v27  ;;  %494 = vst [vmem:[%s3770_s30 + $0x270] sm:$0xf] %v493_v28 }
  0x7d   : > { %496 = vst [vmem:[%s3770_s30 + $0x274] sm:$0xf] %v495_v29  ;;  %v497_v30 = vld [vmem:[%s3766_s29 + $0x4f0] sm:$0xf]  ;;  %v499_v31 = vld [vmem:[%s3766_s29 + $0x4f8] sm:$0xf] }
  0x7e   : > { %v501_v32 = vld [vmem:[%s3766_s29 + $0x500] sm:$0xf]  ;;  %498 = vst [vmem:[%s3770_s30 + $0x278] sm:$0xf] %v497_v30  ;;  %500 = vst [vmem:[%s3770_s30 + $0x27c] sm:$0xf] %v499_v31 }
  0x7f   : > { %502 = vst [vmem:[%s3770_s30 + $0x280] sm:$0xf] %v501_v32  ;;  %v503_v33 = vld [vmem:[%s3766_s29 + $0x508] sm:$0xf]  ;;  %v505_v34 = vld [vmem:[%s3766_s29 + $0x510] sm:$0xf] }
  0x80   : > { %v507_v35 = vld [vmem:[%s3766_s29 + $0x518] sm:$0xf]  ;;  %504 = vst [vmem:[%s3770_s30 + $0x284] sm:$0xf] %v503_v33  ;;  %506 = vst [vmem:[%s3770_s30 + $0x288] sm:$0xf] %v505_v34 }
  0x81   : > { %508 = vst [vmem:[%s3770_s30 + $0x28c] sm:$0xf] %v507_v35  ;;  %v509_v36 = vld [vmem:[%s3766_s29 + $0x520] sm:$0xf]  ;;  %v511_v37 = vld [vmem:[%s3766_s29 + $0x528] sm:$0xf] }
  0x82   : > { %v513_v38 = vld [vmem:[%s3766_s29 + $0x530] sm:$0xf]  ;;  %510 = vst [vmem:[%s3770_s30 + $0x290] sm:$0xf] %v509_v36  ;;  %512 = vst [vmem:[%s3770_s30 + $0x294] sm:$0xf] %v511_v37 }
  0x83   : > { %514 = vst [vmem:[%s3770_s30 + $0x298] sm:$0xf] %v513_v38  ;;  %v515_v39 = vld [vmem:[%s3766_s29 + $0x538] sm:$0xf]  ;;  %v517_v40 = vld [vmem:[%s3766_s29 + $0x540] sm:$0xf] }
  0x84   : > { %v519_v41 = vld [vmem:[%s3766_s29 + $0x548] sm:$0xf]  ;;  %516 = vst [vmem:[%s3770_s30 + $0x29c] sm:$0xf] %v515_v39  ;;  %518 = vst [vmem:[%s3770_s30 + $0x2a0] sm:$0xf] %v517_v40 }
  0x85   : > { %520 = vst [vmem:[%s3770_s30 + $0x2a4] sm:$0xf] %v519_v41  ;;  %v521_v42 = vld [vmem:[%s3766_s29 + $0x550] sm:$0xf]  ;;  %v523_v43 = vld [vmem:[%s3766_s29 + $0x558] sm:$0xf] }
  0x86   : > { %v525_v44 = vld [vmem:[%s3766_s29 + $0x560] sm:$0xf]  ;;  %522 = vst [vmem:[%s3770_s30 + $0x2a8] sm:$0xf] %v521_v42  ;;  %524 = vst [vmem:[%s3770_s30 + $0x2ac] sm:$0xf] %v523_v43 }
  0x87   : > { %526 = vst [vmem:[%s3770_s30 + $0x2b0] sm:$0xf] %v525_v44  ;;  %v527_v45 = vld [vmem:[%s3766_s29 + $0x568] sm:$0xf]  ;;  %v529_v46 = vld [vmem:[%s3766_s29 + $0x570] sm:$0xf] }
  0x88   : > { %v531_v47 = vld [vmem:[%s3766_s29 + $0x578] sm:$0xf]  ;;  %528 = vst [vmem:[%s3770_s30 + $0x2b4] sm:$0xf] %v527_v45  ;;  %530 = vst [vmem:[%s3770_s30 + $0x2b8] sm:$0xf] %v529_v46 }
  0x89   : > { %532 = vst [vmem:[%s3770_s30 + $0x2bc] sm:$0xf] %v531_v47  ;;  %v533_v48 = vld [vmem:[%s3766_s29 + $0x580] sm:$0xf]  ;;  %v535_v49 = vld [vmem:[%s3766_s29 + $0x588] sm:$0xf] }
  0x8a   : > { %v537_v50 = vld [vmem:[%s3766_s29 + $0x590] sm:$0xf]  ;;  %534 = vst [vmem:[%s3770_s30 + $0x2c0] sm:$0xf] %v533_v48  ;;  %536 = vst [vmem:[%s3770_s30 + $0x2c4] sm:$0xf] %v535_v49 }
  0x8b   : > { %538 = vst [vmem:[%s3770_s30 + $0x2c8] sm:$0xf] %v537_v50  ;;  %v539_v51 = vld [vmem:[%s3766_s29 + $0x598] sm:$0xf]  ;;  %v541_v52 = vld [vmem:[%s3766_s29 + $0x5a0] sm:$0xf] }
  0x8c   : > { %v543_v53 = vld [vmem:[%s3766_s29 + $0x5a8] sm:$0xf]  ;;  %540 = vst [vmem:[%s3770_s30 + $0x2cc] sm:$0xf] %v539_v51  ;;  %542 = vst [vmem:[%s3770_s30 + $0x2d0] sm:$0xf] %v541_v52 }
  0x8d   : > { %544 = vst [vmem:[%s3770_s30 + $0x2d4] sm:$0xf] %v543_v53  ;;  %v545_v54 = vld [vmem:[%s3766_s29 + $0x5b0] sm:$0xf]  ;;  %v547_v55 = vld [vmem:[%s3766_s29 + $0x5b8] sm:$0xf] }
  0x8e   : > { %v549_v56 = vld [vmem:[%s3766_s29 + $0x5c0] sm:$0xf]  ;;  %546 = vst [vmem:[%s3770_s30 + $0x2d8] sm:$0xf] %v545_v54  ;;  %548 = vst [vmem:[%s3770_s30 + $0x2dc] sm:$0xf] %v547_v55 }
  0x8f   : > { %550 = vst [vmem:[%s3770_s30 + $0x2e0] sm:$0xf] %v549_v56  ;;  %v551_v57 = vld [vmem:[%s3766_s29 + $0x5c8] sm:$0xf]  ;;  %v553_v58 = vld [vmem:[%s3766_s29 + $0x5d0] sm:$0xf] }
  0x90   : > { %v555_v59 = vld [vmem:[%s3766_s29 + $0x5d8] sm:$0xf]  ;;  %552 = vst [vmem:[%s3770_s30 + $0x2e4] sm:$0xf] %v551_v57  ;;  %554 = vst [vmem:[%s3770_s30 + $0x2e8] sm:$0xf] %v553_v58 }
  0x91   : > { %556 = vst [vmem:[%s3770_s30 + $0x2ec] sm:$0xf] %v555_v59  ;;  %v557_v60 = vld [vmem:[%s3766_s29 + $0x5e0] sm:$0xf]  ;;  %v559_v61 = vld [vmem:[%s3766_s29 + $0x5e8] sm:$0xf] }
  0x92   : > { %v561_v62 = vld [vmem:[%s3766_s29 + $0x5f0] sm:$0xf]  ;;  %558 = vst [vmem:[%s3770_s30 + $0x2f0] sm:$0xf] %v557_v60  ;;  %560 = vst [vmem:[%s3770_s30 + $0x2f4] sm:$0xf] %v559_v61 }
  0x93   : > { %562 = vst [vmem:[%s3770_s30 + $0x2f8] sm:$0xf] %v561_v62  ;;  %v563_v63 = vld [vmem:[%s3766_s29 + $0x5f8] sm:$0xf]  ;;  %v565_v0 = vld [vmem:[%s3766_s29 + $0x600] sm:$0xf] }
  0x94   : > { %v567_v1 = vld [vmem:[%s3766_s29 + $0x608] sm:$0xf]  ;;  %564 = vst [vmem:[%s3770_s30 + $0x2fc] sm:$0xf] %v563_v63  ;;  %566 = vst [vmem:[%s3770_s30 + $0x300] sm:$0xf] %v565_v0 }
  0x95   : > { %568 = vst [vmem:[%s3770_s30 + $0x304] sm:$0xf] %v567_v1  ;;  %v569_v2 = vld [vmem:[%s3766_s29 + $0x610] sm:$0xf]  ;;  %v571_v3 = vld [vmem:[%s3766_s29 + $0x618] sm:$0xf] }
  0x96   : > { %v573_v4 = vld [vmem:[%s3766_s29 + $0x620] sm:$0xf]  ;;  %570 = vst [vmem:[%s3770_s30 + $0x308] sm:$0xf] %v569_v2  ;;  %572 = vst [vmem:[%s3770_s30 + $0x30c] sm:$0xf] %v571_v3 }
  0x97   : > { %574 = vst [vmem:[%s3770_s30 + $0x310] sm:$0xf] %v573_v4  ;;  %v575_v5 = vld [vmem:[%s3766_s29 + $0x628] sm:$0xf]  ;;  %v577_v6 = vld [vmem:[%s3766_s29 + $0x630] sm:$0xf] }
  0x98   : > { %v579_v7 = vld [vmem:[%s3766_s29 + $0x638] sm:$0xf]  ;;  %576 = vst [vmem:[%s3770_s30 + $0x314] sm:$0xf] %v575_v5  ;;  %578 = vst [vmem:[%s3770_s30 + $0x318] sm:$0xf] %v577_v6 }
  0x99   : > { %580 = vst [vmem:[%s3770_s30 + $0x31c] sm:$0xf] %v579_v7  ;;  %v581_v8 = vld [vmem:[%s3766_s29 + $0x640] sm:$0xf]  ;;  %v583_v9 = vld [vmem:[%s3766_s29 + $0x648] sm:$0xf] }
  0x9a   : > { %v585_v10 = vld [vmem:[%s3766_s29 + $0x650] sm:$0xf]  ;;  %582 = vst [vmem:[%s3770_s30 + $0x320] sm:$0xf] %v581_v8  ;;  %584 = vst [vmem:[%s3770_s30 + $0x324] sm:$0xf] %v583_v9 }
  0x9b   : > { %586 = vst [vmem:[%s3770_s30 + $0x328] sm:$0xf] %v585_v10  ;;  %v587_v11 = vld [vmem:[%s3766_s29 + $0x658] sm:$0xf]  ;;  %v589_v12 = vld [vmem:[%s3766_s29 + $0x660] sm:$0xf] }
  0x9c   : > { %v591_v13 = vld [vmem:[%s3766_s29 + $0x668] sm:$0xf]  ;;  %588 = vst [vmem:[%s3770_s30 + $0x32c] sm:$0xf] %v587_v11  ;;  %590 = vst [vmem:[%s3770_s30 + $0x330] sm:$0xf] %v589_v12 }
  0x9d   : > { %592 = vst [vmem:[%s3770_s30 + $0x334] sm:$0xf] %v591_v13  ;;  %v593_v14 = vld [vmem:[%s3766_s29 + $0x670] sm:$0xf]  ;;  %v595_v15 = vld [vmem:[%s3766_s29 + $0x678] sm:$0xf] }
  0x9e   : > { %v597_v16 = vld [vmem:[%s3766_s29 + $0x680] sm:$0xf]  ;;  %594 = vst [vmem:[%s3770_s30 + $0x338] sm:$0xf] %v593_v14  ;;  %596 = vst [vmem:[%s3770_s30 + $0x33c] sm:$0xf] %v595_v15 }
  0x9f   : > { %598 = vst [vmem:[%s3770_s30 + $0x340] sm:$0xf] %v597_v16  ;;  %v599_v17 = vld [vmem:[%s3766_s29 + $0x688] sm:$0xf]  ;;  %v601_v18 = vld [vmem:[%s3766_s29 + $0x690] sm:$0xf] }
  0xa0   : > { %v603_v19 = vld [vmem:[%s3766_s29 + $0x698] sm:$0xf]  ;;  %600 = vst [vmem:[%s3770_s30 + $0x344] sm:$0xf] %v599_v17  ;;  %602 = vst [vmem:[%s3770_s30 + $0x348] sm:$0xf] %v601_v18 }
  0xa1   : > { %604 = vst [vmem:[%s3770_s30 + $0x34c] sm:$0xf] %v603_v19  ;;  %v605_v20 = vld [vmem:[%s3766_s29 + $0x6a0] sm:$0xf]  ;;  %v607_v21 = vld [vmem:[%s3766_s29 + $0x6a8] sm:$0xf] }
  0xa2   : > { %v609_v22 = vld [vmem:[%s3766_s29 + $0x6b0] sm:$0xf]  ;;  %606 = vst [vmem:[%s3770_s30 + $0x350] sm:$0xf] %v605_v20  ;;  %608 = vst [vmem:[%s3770_s30 + $0x354] sm:$0xf] %v607_v21 }
  0xa3   : > { %610 = vst [vmem:[%s3770_s30 + $0x358] sm:$0xf] %v609_v22  ;;  %v611_v23 = vld [vmem:[%s3766_s29 + $0x6b8] sm:$0xf]  ;;  %v613_v24 = vld [vmem:[%s3766_s29 + $0x6c0] sm:$0xf] }
  0xa4   : > { %v615_v25 = vld [vmem:[%s3766_s29 + $0x6c8] sm:$0xf]  ;;  %612 = vst [vmem:[%s3770_s30 + $0x35c] sm:$0xf] %v611_v23  ;;  %614 = vst [vmem:[%s3770_s30 + $0x360] sm:$0xf] %v613_v24 }
  0xa5   : > { %616 = vst [vmem:[%s3770_s30 + $0x364] sm:$0xf] %v615_v25  ;;  %v617_v26 = vld [vmem:[%s3766_s29 + $0x6d0] sm:$0xf]  ;;  %v619_v27 = vld [vmem:[%s3766_s29 + $0x6d8] sm:$0xf] }
  0xa6   : > { %v621_v28 = vld [vmem:[%s3766_s29 + $0x6e0] sm:$0xf]  ;;  %618 = vst [vmem:[%s3770_s30 + $0x368] sm:$0xf] %v617_v26  ;;  %620 = vst [vmem:[%s3770_s30 + $0x36c] sm:$0xf] %v619_v27 }
  0xa7   : > { %622 = vst [vmem:[%s3770_s30 + $0x370] sm:$0xf] %v621_v28  ;;  %v623_v29 = vld [vmem:[%s3766_s29 + $0x6e8] sm:$0xf]  ;;  %v625_v30 = vld [vmem:[%s3766_s29 + $0x6f0] sm:$0xf] }
  0xa8   : > { %v627_v31 = vld [vmem:[%s3766_s29 + $0x6f8] sm:$0xf]  ;;  %624 = vst [vmem:[%s3770_s30 + $0x374] sm:$0xf] %v623_v29  ;;  %626 = vst [vmem:[%s3770_s30 + $0x378] sm:$0xf] %v625_v30 }
  0xa9   : > { %628 = vst [vmem:[%s3770_s30 + $0x37c] sm:$0xf] %v627_v31  ;;  %v629_v32 = vld [vmem:[%s3766_s29 + $0x700] sm:$0xf]  ;;  %v631_v33 = vld [vmem:[%s3766_s29 + $0x708] sm:$0xf] }
  0xaa   : > { %v633_v34 = vld [vmem:[%s3766_s29 + $0x710] sm:$0xf]  ;;  %630 = vst [vmem:[%s3770_s30 + $0x380] sm:$0xf] %v629_v32  ;;  %632 = vst [vmem:[%s3770_s30 + $0x384] sm:$0xf] %v631_v33 }
  0xab   : > { %634 = vst [vmem:[%s3770_s30 + $0x388] sm:$0xf] %v633_v34  ;;  %v635_v35 = vld [vmem:[%s3766_s29 + $0x718] sm:$0xf]  ;;  %v637_v36 = vld [vmem:[%s3766_s29 + $0x720] sm:$0xf] }
  0xac   : > { %v639_v37 = vld [vmem:[%s3766_s29 + $0x728] sm:$0xf]  ;;  %636 = vst [vmem:[%s3770_s30 + $0x38c] sm:$0xf] %v635_v35  ;;  %638 = vst [vmem:[%s3770_s30 + $0x390] sm:$0xf] %v637_v36 }
  0xad   : > { %640 = vst [vmem:[%s3770_s30 + $0x394] sm:$0xf] %v639_v37  ;;  %v641_v38 = vld [vmem:[%s3766_s29 + $0x730] sm:$0xf]  ;;  %v643_v39 = vld [vmem:[%s3766_s29 + $0x738] sm:$0xf] }
  0xae   : > { %v645_v40 = vld [vmem:[%s3766_s29 + $0x740] sm:$0xf]  ;;  %642 = vst [vmem:[%s3770_s30 + $0x398] sm:$0xf] %v641_v38  ;;  %644 = vst [vmem:[%s3770_s30 + $0x39c] sm:$0xf] %v643_v39 }
  0xaf   : > { %646 = vst [vmem:[%s3770_s30 + $0x3a0] sm:$0xf] %v645_v40  ;;  %v647_v41 = vld [vmem:[%s3766_s29 + $0x748] sm:$0xf]  ;;  %v649_v42 = vld [vmem:[%s3766_s29 + $0x750] sm:$0xf] }
  0xb0   : > { %v651_v43 = vld [vmem:[%s3766_s29 + $0x758] sm:$0xf]  ;;  %648 = vst [vmem:[%s3770_s30 + $0x3a4] sm:$0xf] %v647_v41  ;;  %650 = vst [vmem:[%s3770_s30 + $0x3a8] sm:$0xf] %v649_v42 }
  0xb1   : > { %652 = vst [vmem:[%s3770_s30 + $0x3ac] sm:$0xf] %v651_v43  ;;  %v653_v44 = vld [vmem:[%s3766_s29 + $0x760] sm:$0xf]  ;;  %v655_v45 = vld [vmem:[%s3766_s29 + $0x768] sm:$0xf] }
  0xb2   : > { %v657_v46 = vld [vmem:[%s3766_s29 + $0x770] sm:$0xf]  ;;  %654 = vst [vmem:[%s3770_s30 + $0x3b0] sm:$0xf] %v653_v44  ;;  %656 = vst [vmem:[%s3770_s30 + $0x3b4] sm:$0xf] %v655_v45 }
  0xb3   : > { %658 = vst [vmem:[%s3770_s30 + $0x3b8] sm:$0xf] %v657_v46  ;;  %v659_v47 = vld [vmem:[%s3766_s29 + $0x778] sm:$0xf]  ;;  %v661_v48 = vld [vmem:[%s3766_s29 + $0x780] sm:$0xf] }
  0xb4   : > { %v663_v49 = vld [vmem:[%s3766_s29 + $0x788] sm:$0xf]  ;;  %660 = vst [vmem:[%s3770_s30 + $0x3bc] sm:$0xf] %v659_v47  ;;  %662 = vst [vmem:[%s3770_s30 + $0x3c0] sm:$0xf] %v661_v48 }
  0xb5   : > { %664 = vst [vmem:[%s3770_s30 + $0x3c4] sm:$0xf] %v663_v49  ;;  %v665_v50 = vld [vmem:[%s3766_s29 + $0x790] sm:$0xf]  ;;  %v667_v51 = vld [vmem:[%s3766_s29 + $0x798] sm:$0xf] }
  0xb6   : > { %v669_v52 = vld [vmem:[%s3766_s29 + $0x7a0] sm:$0xf]  ;;  %666 = vst [vmem:[%s3770_s30 + $0x3c8] sm:$0xf] %v665_v50  ;;  %668 = vst [vmem:[%s3770_s30 + $0x3cc] sm:$0xf] %v667_v51 }
  0xb7   : > { %670 = vst [vmem:[%s3770_s30 + $0x3d0] sm:$0xf] %v669_v52  ;;  %v671_v53 = vld [vmem:[%s3766_s29 + $0x7a8] sm:$0xf]  ;;  %v673_v54 = vld [vmem:[%s3766_s29 + $0x7b0] sm:$0xf] }
  0xb8   : > { %v675_v55 = vld [vmem:[%s3766_s29 + $0x7b8] sm:$0xf]  ;;  %672 = vst [vmem:[%s3770_s30 + $0x3d4] sm:$0xf] %v671_v53  ;;  %674 = vst [vmem:[%s3770_s30 + $0x3d8] sm:$0xf] %v673_v54 }
  0xb9   : > { %676 = vst [vmem:[%s3770_s30 + $0x3dc] sm:$0xf] %v675_v55  ;;  %v677_v56 = vld [vmem:[%s3766_s29 + $0x7c0] sm:$0xf]  ;;  %v679_v57 = vld [vmem:[%s3766_s29 + $0x7c8] sm:$0xf] }
  0xba   : > { %v681_v58 = vld [vmem:[%s3766_s29 + $0x7d0] sm:$0xf]  ;;  %678 = vst [vmem:[%s3770_s30 + $0x3e0] sm:$0xf] %v677_v56  ;;  %680 = vst [vmem:[%s3770_s30 + $0x3e4] sm:$0xf] %v679_v57 }
  0xbb   : > { %682 = vst [vmem:[%s3770_s30 + $0x3e8] sm:$0xf] %v681_v58  ;;  %v683_v59 = vld [vmem:[%s3766_s29 + $0x7d8] sm:$0xf]  ;;  %v685_v60 = vld [vmem:[%s3766_s29 + $0x7e0] sm:$0xf] }
  0xbc   : > { %v687_v61 = vld [vmem:[%s3766_s29 + $0x7e8] sm:$0xf]  ;;  %684 = vst [vmem:[%s3770_s30 + $0x3ec] sm:$0xf] %v683_v59  ;;  %686 = vst [vmem:[%s3770_s30 + $0x3f0] sm:$0xf] %v685_v60 }
  0xbd   : > { %688 = vst [vmem:[%s3770_s30 + $0x3f4] sm:$0xf] %v687_v61  ;;  %v689_v62 = vld [vmem:[%s3766_s29 + $0x7f0] sm:$0xf]  ;;  %v691_v63 = vld [vmem:[%s3766_s29 + $0x7f8] sm:$0xf] }
  0xbe   : > { %690 = vst [vmem:[%s3770_s30 + $0x3f8] sm:$0xf] %v689_v62  ;;  %692 = vst [vmem:[%s3770_s30 + $0x3fc] sm:$0xf] %v691_v63 }
  0xbf PF: > { %p3112_p7 = scmp.ge.s32.totalorder %s3698_s17, 1  ;;  %p1238_p8 = scmp.lt.s32.totalorder %s3698_s17, 3 }
  0xc1   : > { %p1239_p9 = pnand %p3112_p7, %p1238_p8 }
  0xc2   : > { %s1245_s5 = sand.u32 (!%p1239_p9), 1, %s3690_s15   ;;  %v4288_v0 = vld [vmem:[%s4555_s0] sm:$0xff] (!%p1239_p9)  ;;  %v4298_v2 = vld [vmem:[%s4555_s0 + $0x8] sm:$0xff] (!%p1239_p9)  ;;  %p1275_p10 = scmp.lt.s32.totalorder (!%p1239_p9), %s3741_s18, 1 }
  0xc3   : > { %1242 = sbr.rel (%p1239_p9) target bundleno = 618 (0x26a), region = 73  ;;  %v4293_v1 = vld [vmem:[%s4555_s0 + $0x40] sm:$0xff] (!%p1239_p9)  ;;  %s3113_s12 = sshll.u32 (!%p1239_p9), %s1245_s5, 10  ;;  %v4307_v4 = vld [vmem:[%s4555_s0 + $0x48] sm:$0xff] (!%p1239_p9) }
  0xc4   : > { %v3116_v3 = vcombine.high (!%p1239_p9), %v4288_v0, %v4293_v1  ;;  %v3118_v5 = vcombine.high (!%p1239_p9), %v4298_v2, %v4307_v4  ;;  %s4311_s17 = scalar_lea.vmem (!%p1239_p9), [#allocation2], %s3113_s12  ;;  %v1298_v35 = vld [vmem:[%s4555_s0 + $0x80] sm:$0xff] (!%p1239_p9)  ;;  %v1299_v38 = vld [vmem:[%s4555_s0 + $0x88] sm:$0xff] (!%p1239_p9)  ;;  %v3115_v42 = vcombine.low (!%p1239_p9), %v4288_v0, %v4293_v1  ;;  %v3117_v43 = vcombine.low (!%p1239_p9), %v4298_v2, %v4307_v4  ;;  %s3114_s30 = sshll.u32 (!%p1239_p9), %s1245_s5, 4 }
  0xc5   : > { %v3546_v6 = vld [vmem:[%s4311_s17 + $0x40] sm:$0xff] (!%p1239_p9)   ;;  %v3550_v10 = vld [vmem:[%s4311_s17 + $0x48] sm:$0xff] (!%p1239_p9)   ;;  %v3554_v14 = vld [vmem:[%s4311_s17 + $0x50] sm:$0xff] (!%p1239_p9)   ;;  %s1274_s6 = scalar_lea.vmem (!%p1239_p9), [#allocation3], %s3114_s30 }
  0xc6   : > { %2530 = vmatprep.mubr.bf16.mxu0 (!%p1239_p9), %v3116_v3  ;;  %v3547_v7 = vld [vmem:[%s4311_s17 + $0xc0] sm:$0xff] (!%p1239_p9)   ;;  %2579 = vmatprep.mubr.bf16.mxu1 (!%p1239_p9), %v3118_v5  ;;  %v3551_v11 = vld [vmem:[%s4311_s17 + $0xc8] sm:$0xff] (!%p1239_p9)   ;;  %v3555_v15 = vld [vmem:[%s4311_s17 + $0xd0] sm:$0xff] (!%p1239_p9)  }
  0xc7   : > { %3298 = vmatprep.subr.bf16.mxu0 (!%p1239_p9), %v3546_v6  ;;  %v3548_v8 = vld [vmem:[%s4311_s17] sm:$0xff] (!%p1239_p9)   ;;  %3326 = vmatprep.subr.bf16.mxu1 (!%p1239_p9), %v3547_v7  ;;  %v3552_v12 = vld [vmem:[%s4311_s17 + $0x8] sm:$0xff] (!%p1239_p9)   ;;  %v3556_v16 = vld [vmem:[%s4311_s17 + $0x10] sm:$0xff] (!%p1239_p9)  }
  0xc8   : > { %v3549_v9 = vld [vmem:[%s4311_s17 + $0x80] sm:$0xff] (!%p1239_p9)   ;;  %3299 = vmatpush3.bf16.msra.mxu0 (!%p1239_p9), %v3548_v8  ;;  %v3553_v13 = vld [vmem:[%s4311_s17 + $0x88] sm:$0xff] (!%p1239_p9)   ;;  %v3557_v17 = vld [vmem:[%s4311_s17 + $0x90] sm:$0xff] (!%p1239_p9)  }
  0xc9   : > { %3327 = vmatpush3.bf16.msra.mxu1 (!%p1239_p9), %v3549_v9  ;;  %3300 = vmatprep.subr.bf16.mxu0 (!%p1239_p9), %v3550_v10  ;;  %v3558_v18 = vld [vmem:[%s4311_s17 + $0x58] sm:$0xff] (!%p1239_p9)   ;;  %v3562_v22 = vld [vmem:[%s4311_s17 + $0x60] sm:$0xff] (!%p1239_p9)   ;;  %v3566_v26 = vld [vmem:[%s4311_s17 + $0x68] sm:$0xff] (!%p1239_p9)  }
  0xca   : > { %3328 = vmatprep.subr.bf16.mxu1 %v3551_v11  ;;  %v3559_v19 = vld [vmem:[%s4311_s17 + $0xd8] sm:$0xff]   ;;  %v3563_v23 = vld [vmem:[%s4311_s17 + $0xe0] sm:$0xff]   ;;  %v3567_v27 = vld [vmem:[%s4311_s17 + $0xe8] sm:$0xff]   ;;  %s1276_s21 = scalar_select %p1275_p10, %s3741_s18, 1 }
  0xcb   : > { %v3560_v20 = vld [vmem:[%s4311_s17 + $0x18] sm:$0xff]   ;;  %v3564_v24 = vld [vmem:[%s4311_s17 + $0x20] sm:$0xff]   ;;  %v3568_v28 = vld [vmem:[%s4311_s17 + $0x28] sm:$0xff]   ;;  %s3280_s7 = sshll.u32 (%p3756_p5), %s3741_s18, 2 }
  0xcc   : > { %3301 = vmatpush3.bf16.msra.mxu0 %v3552_v12  ;;  %v3561_v21 = vld [vmem:[%s4311_s17 + $0x98] sm:$0xff]   ;;  %v3565_v25 = vld [vmem:[%s4311_s17 + $0xa0] sm:$0xff]   ;;  %v3569_v29 = vld [vmem:[%s4311_s17 + $0xa8] sm:$0xff]   ;;  %s1277_s26 = scalar_lea.vmem %s4557_s2, %s1276_s21  ;;  %s1280_s29 = scalar_lea.vmem %s4558_s3, %s1276_s21 }
  0xcd   : > { %3329 = vmatpush3.bf16.msra.mxu1 %v3553_v13  ;;  %3302 = vmatprep.subr.bf16.mxu0 %v3554_v14  ;;  %v3570_v30 = vld [vmem:[%s4311_s17 + $0x70] sm:$0xff]   ;;  %v3574_v34 = vld [vmem:[%s4311_s17 + $0x78] sm:$0xff]   ;;  %v1306_v36 = vld [vmem:[%s4555_s0 + $0xc0] sm:$0xff]  ;;  %s2980_s8 = scalar_lea.vmem (%p3756_p5), %s4559_s4, %s3280_s7 }
  0xce   : > { %3330 = vmatprep.subr.bf16.mxu1 %v3555_v15  ;;  %v3571_v31 = vld [vmem:[%s4311_s17 + $0xf0] sm:$0xff]   ;;  %v3575_v37 = vld [vmem:[%s4311_s17 + $0xf8] sm:$0xff]   ;;  %v1307_v39 = vld [vmem:[%s4555_s0 + $0xc8] sm:$0xff]  ;;  %v3132_v46 = vcombine.high %v1298_v35, %v1306_v36  ;;  %v3131_v54 = vcombine.low %v1298_v35, %v1306_v36 }
  0xcf   : > { %v3572_v32 = vld [vmem:[%s4311_s17 + $0x30] sm:$0xff]   ;;  %v3576_v40 = vld [vmem:[%s4311_s17 + $0x38] sm:$0xff]   ;;  %v3578_v44 = vld [vmem:[%s4311_s17 + $0x140] sm:$0xff]   ;;  %v3134_v48 = vcombine.high %v1299_v38, %v1307_v39  ;;  %v3133_v56 = vcombine.low %v1299_v38, %v1307_v39 }
  0xd0   : > { %3303 = vmatpush3.bf16.msra.mxu0 %v3556_v16  ;;  %v3573_v33 = vld [vmem:[%s4311_s17 + $0xb0] sm:$0xff]   ;;  %v3577_v41 = vld [vmem:[%s4311_s17 + $0xb8] sm:$0xff]   ;;  %v3579_v45 = vld [vmem:[%s4311_s17 + $0x1c0] sm:$0xff]  }
  0xd1   : > { %3331 = vmatpush3.bf16.msra.mxu1 %v3557_v17  ;;  %3304 = vmatprep.subr.bf16.mxu0 %v3558_v18  ;;  %v3580_v47 = vld [vmem:[%s4311_s17 + $0x100] sm:$0xff]   ;;  %v3582_v50 = vld [vmem:[%s4311_s17 + $0x148] sm:$0xff]   ;;  %v3586_v55 = vld [vmem:[%s4311_s17 + $0x150] sm:$0xff]  }
  0xd2   : > { %3332 = vmatprep.subr.bf16.mxu1 %v3559_v19  ;;  %v3581_v49 = vld [vmem:[%s4311_s17 + $0x180] sm:$0xff]   ;;  %v3583_v51 = vld [vmem:[%s4311_s17 + $0x1c8] sm:$0xff]   ;;  %v3587_v57 = vld [vmem:[%s4311_s17 + $0x1d0] sm:$0xff]  }
  0xd3   : > { %v3584_v52 = vld [vmem:[%s4311_s17 + $0x108] sm:$0xff]   ;;  %v3588_v58 = vld [vmem:[%s4311_s17 + $0x110] sm:$0xff]   ;;  %v3590_v60 = vld [vmem:[%s4311_s17 + $0x158] sm:$0xff]  }
  0xd4   : > { %3305 = vmatpush3.bf16.msra.mxu0 %v3560_v20  ;;  %v3585_v53 = vld [vmem:[%s4311_s17 + $0x188] sm:$0xff]   ;;  %v3589_v59 = vld [vmem:[%s4311_s17 + $0x190] sm:$0xff]   ;;  %v3591_v61 = vld [vmem:[%s4311_s17 + $0x1d8] sm:$0xff]  }
  0xd5   : > { %3333 = vmatpush3.bf16.msra.mxu1 %v3561_v21  ;;  %3306 = vmatprep.subr.bf16.mxu0 %v3562_v22  ;;  %v3592_v62 = vld [vmem:[%s4311_s17 + $0x118] sm:$0xff]   ;;  %v3594_v0 = vld [vmem:[%s4311_s17 + $0x160] sm:$0xff]   ;;  %v3598_v4 = vld [vmem:[%s4311_s17 + $0x168] sm:$0xff]  }
  0xd6   : > { %3334 = vmatprep.subr.bf16.mxu1 %v3563_v23  ;;  %v3593_v63 = vld [vmem:[%s4311_s17 + $0x198] sm:$0xff]   ;;  %v3595_v1 = vld [vmem:[%s4311_s17 + $0x1e0] sm:$0xff]   ;;  %v3599_v5 = vld [vmem:[%s4311_s17 + $0x1e8] sm:$0xff]  }
  0xd7   : > { %v3596_v2 = vld [vmem:[%s4311_s17 + $0x120] sm:$0xff]   ;;  %v3600_v6 = vld [vmem:[%s4311_s17 + $0x128] sm:$0xff]   ;;  %v3602_v8 = vld [vmem:[%s4311_s17 + $0x170] sm:$0xff]  }
  0xd8   : > { %3307 = vmatpush3.bf16.msra.mxu0 %v3564_v24  ;;  %v3597_v3 = vld [vmem:[%s4311_s17 + $0x1a0] sm:$0xff]   ;;  %v3601_v7 = vld [vmem:[%s4311_s17 + $0x1a8] sm:$0xff]   ;;  %v3603_v9 = vld [vmem:[%s4311_s17 + $0x1f0] sm:$0xff]  }
  0xd9   : > { %3335 = vmatpush3.bf16.msra.mxu1 %v3565_v25  ;;  %3308 = vmatprep.subr.bf16.mxu0 %v3566_v26  ;;  %v3604_v10 = vld [vmem:[%s4311_s17 + $0x130] sm:$0xff]   ;;  %v3606_v12 = vld [vmem:[%s4311_s17 + $0x178] sm:$0xff]   ;;  %v3610_v24 = vld [vmem:[%s4311_s17 + $0x240] sm:$0xff]  }
  0xda   : > { %3336 = vmatprep.subr.bf16.mxu1 %v3567_v27  ;;  %v3605_v11 = vld [vmem:[%s4311_s17 + $0x1b0] sm:$0xff]   ;;  %v3607_v14 = vld [vmem:[%s4311_s17 + $0x1f8] sm:$0xff]   ;;  %v3611_v25 = vld [vmem:[%s4311_s17 + $0x2c0] sm:$0xff]  }
  0xdb   : > { %v1284_v13 = vld [vmem:[%s4555_s0 + $0x10] sm:$0xff]  ;;  %v3608_v15 = vld [vmem:[%s4311_s17 + $0x138] sm:$0xff]   ;;  %v3612_v26 = vld [vmem:[%s4311_s17 + $0x200] sm:$0xff]  }
  0xdc   : > { %3309 = vmatpush3.bf16.msra.mxu0 %v3568_v28  ;;  %v3609_v16 = vld [vmem:[%s4311_s17 + $0x1b8] sm:$0xff]   ;;  %v1292_v17 = vld [vmem:[%s4555_s0 + $0x50] sm:$0xff]  ;;  %v3613_v27 = vld [vmem:[%s4311_s17 + $0x280] sm:$0xff]  }
  0xdd   : > { %3337 = vmatpush3.bf16.msra.mxu1 %v3569_v29  ;;  %3310 = vmatprep.subr.bf16.mxu0 %v3570_v30  ;;  %v1285_v18 = vld [vmem:[%s4555_s0 + $0x18] sm:$0xff]  ;;  %v3119_v20 = vcombine.low %v1284_v13, %v1292_v17  ;;  %v3120_v21 = vcombine.high %v1284_v13, %v1292_v17  ;;  %v3614_v28 = vld [vmem:[%s4311_s17 + $0x248] sm:$0xff]   ;;  %v3618_v36 = vld [vmem:[%s4311_s17 + $0x250] sm:$0xff]  }
  0xde   : > { %3338 = vmatprep.subr.bf16.mxu1 %v3571_v31  ;;  %v1293_v19 = vld [vmem:[%s4555_s0 + $0x58] sm:$0xff]  ;;  %v3615_v29 = vld [vmem:[%s4311_s17 + $0x2c8] sm:$0xff]   ;;  %v1310_v17 = vld [vmem:[%s4555_s0 + $0xe0] sm:$0xff] }
  0xdf   : > { %v3121_v22 = vcombine.low %v1285_v18, %v1293_v19  ;;  %v3122_v23 = vcombine.high %v1285_v18, %v1293_v19  ;;  %v3616_v30 = vld [vmem:[%s4311_s17 + $0x208] sm:$0xff]   ;;  %v1301_v38 = vld [vmem:[%s4555_s0 + $0x98] sm:$0xff] }
  0xe0   : > { %3311 = vmatpush3.bf16.msra.mxu0 %v3572_v32  ;;  %v3617_v31 = vld [vmem:[%s4311_s17 + $0x288] sm:$0xff]   ;;  %v1300_v32 = vld [vmem:[%s4555_s0 + $0x90] sm:$0xff]  ;;  %v1309_v39 = vld [vmem:[%s4555_s0 + $0xd8] sm:$0xff] }
  0xe1   : > { %3339 = vmatpush3.bf16.msra.mxu1 %v3573_v33  ;;  %3312 = vmatprep.subr.bf16.mxu0 %v3574_v34  ;;  %v1308_v33 = vld [vmem:[%s4555_s0 + $0xd0] sm:$0xff]  ;;  %v3647_v13 = vld [vmem:[%s4311_s17 + $0x3c8] sm:$0xff]  }
  0xe2   : > { %3340 = vmatprep.subr.bf16.mxu1 %v3575_v37  ;;  %v3136_v34 = vcombine.high %v1300_v32, %v1308_v33  ;;  %v3135_v35 = vcombine.low %v1300_v32, %v1308_v33  ;;  %v3619_v37 = vld [vmem:[%s4311_s17 + $0x2d0] sm:$0xff]   ;;  %v3658_v32 = vld [vmem:[%s4311_s17 + $0x360] sm:$0xff]  }
  0xe3   : > { %v3659_v33 = vld [vmem:[%s4311_s17 + $0x3e0] sm:$0xff]  }
  0xe4   : > { %3313 = vmatpush3.bf16.msra.mxu0 %v3576_v40  ;;  %v3138_v40 = vcombine.high %v1301_v38, %v1309_v39 }
  0xe5   : > { %3341 = vmatpush3.bf16.msra.mxu1 %v3577_v41  ;;  %3354 = vmatprep.subr.bf16.mxu0 %v3578_v44  ;;  %v3620_v41 = vld [vmem:[%s4311_s17 + $0x210] sm:$0xff]   ;;  %v3622_v44 = vld [vmem:[%s4311_s17 + $0x258] sm:$0xff]  }
  0xe6   : > { %3382 = vmatprep.subr.bf16.mxu1 %v3579_v45  ;;  %v3623_v45 = vld [vmem:[%s4311_s17 + $0x2d8] sm:$0xff]  }
  0xe7   : > { %2531 = vmatmul.mubr.bf16.vlgmr.msra.gmra.mrb[0].mxu0 %v3115_v42  ;;  %v3137_v42 = vcombine.low %v1301_v38, %v1309_v39  ;;  %v3664_v38 = vld [vmem:[%s4311_s17 + $0x328] sm:$0xff]  }
  0xe8   : > { %2580 = vmatmul.mubr.bf16.vlgmr.msra.gmra.mrb[0].mxu1 %v3117_v43  ;;  %3355 = vmatpush3.bf16.msra.mxu0 %v3580_v47  ;;  %v3621_v43 = vld [vmem:[%s4311_s17 + $0x290] sm:$0xff]   ;;  %v3625_v47 = vld [vmem:[%s4311_s17 + $0x298] sm:$0xff]   ;;  %v3665_v39 = vld [vmem:[%s4311_s17 + $0x3a8] sm:$0xff]  }
  0xe9   : > { %3383 = vmatpush3.bf16.msra.mxu1 %v3581_v49  ;;  %2538 = vmatprep.mubr.bf16.mxu0 %v3132_v46  ;;  %v3624_v46 = vld [vmem:[%s4311_s17 + $0x218] sm:$0xff]   ;;  %v3627_v49 = vld [vmem:[%s4311_s17 + $0x2e0] sm:$0xff]  }
  0xea   : > { %3356 = vmatprep.subr.bf16.mxu0 %v3582_v50  ;;  %2587 = vmatprep.mubr.bf16.mxu1 %v3134_v48  ;;  %v3626_v48 = vld [vmem:[%s4311_s17 + $0x260] sm:$0xff]  }
  0xeb   : > { %3384 = vmatprep.subr.bf16.mxu1 %v3583_v51  ;;  %v3628_v50 = vld [vmem:[%s4311_s17 + $0x220] sm:$0xff]  }
  0xec   : > { %3357 = vmatpush3.bf16.msra.mxu0 %v3584_v52  ;;  %v3629_v51 = vld [vmem:[%s4311_s17 + $0x2a0] sm:$0xff]   ;;  %v3630_v52 = vld [vmem:[%s4311_s17 + $0x268] sm:$0xff]  }
  0xed   : > { %3385 = vmatpush3.bf16.msra.mxu1 %v3585_v53  ;;  %3358 = vmatprep.subr.bf16.mxu0 %v3586_v55  ;;  %v3631_v53 = vld [vmem:[%s4311_s17 + $0x2e8] sm:$0xff]  }
  0xee   : > { %3386 = vmatprep.subr.bf16.mxu1 %v3587_v57  ;;  %v3633_v55 = vld [vmem:[%s4311_s17 + $0x2a8] sm:$0xff]   ;;  %v3635_v57 = vld [vmem:[%s4311_s17 + $0x2f0] sm:$0xff]  }
  0xef   : > { %2539 = vmatmul.mubr.bf16.gmra.mrb[4].mxu0 %v3131_v54  ;;  %v3632_v54 = vld [vmem:[%s4311_s17 + $0x228] sm:$0xff]  }
  0xf0   : > { %3359 = vmatpush3.bf16.msra.mxu0 %v3588_v58  ;;  %2588 = vmatmul.mubr.bf16.gmra.mrb[4].mxu1 %v3133_v56  ;;  %v3634_v56 = vld [vmem:[%s4311_s17 + $0x270] sm:$0xff]  }
  0xf1   : > { %3387 = vmatpush3.bf16.msra.mxu1 %v3589_v59  ;;  %3360 = vmatprep.subr.bf16.mxu0 %v3590_v60  ;;  %v3636_v58 = vld [vmem:[%s4311_s17 + $0x230] sm:$0xff]   ;;  %v3638_v60 = vld [vmem:[%s4311_s17 + $0x278] sm:$0xff]  }
  0xf2   : > { %3388 = vmatprep.subr.bf16.mxu1 %v3591_v61  ;;  %2628 = vmatprep.mubr.bf16.mxu0 %v3120_v21  ;;  %v3637_v59 = vld [vmem:[%s4311_s17 + $0x2b0] sm:$0xff]   ;;  %v3639_v61 = vld [vmem:[%s4311_s17 + $0x2f8] sm:$0xff]  }
  0xf3   : > { %2677 = vmatprep.mubr.bf16.mxu1 %v3122_v23  ;;  %v3651_v21 = vld [vmem:[%s4311_s17 + $0x3d0] sm:$0xff]   ;;  %v1311_v23 = vld [vmem:[%s4555_s0 + $0xe8] sm:$0xff] }
  0xf4   : > { %3361 = vmatpush3.bf16.msra.mxu0 %v3592_v62  ;;  %v3640_v62 = vld [vmem:[%s4311_s17 + $0x238] sm:$0xff]  }
  0xf5   : > { %3389 = vmatpush3.bf16.msra.mxu1 %v3593_v63  ;;  %3362 = vmatprep.subr.bf16.mxu0 %v3594_v0  ;;  %v3641_v63 = vld [vmem:[%s4311_s17 + $0x2b8] sm:$0xff]   ;;  %v1286_v0 = vld [vmem:[%s4555_s0 + $0x20] sm:$0xff] }
  0xf6   : > { %3390 = vmatprep.subr.bf16.mxu1 %v3595_v1  ;;  %v1294_v1 = vld [vmem:[%s4555_s0 + $0x60] sm:$0xff] }
  0xf8   : > { %3363 = vmatpush3.bf16.msra.mxu0 %v3596_v2  ;;  %v3123_v2 = vcombine.low %v1286_v0, %v1294_v1 }
  0xf9   : > { %3391 = vmatpush3.bf16.msra.mxu1 %v3597_v3  ;;  %3364 = vmatprep.subr.bf16.mxu0 %v3598_v4  ;;  %v3124_v3 = vcombine.high %v1286_v0, %v1294_v1  ;;  %v1287_v4 = vld [vmem:[%s4555_s0 + $0x28] sm:$0xff] }
  0xfa   : > { %3392 = vmatprep.subr.bf16.mxu1 %v3599_v5  ;;  %v1295_v5 = vld [vmem:[%s4555_s0 + $0x68] sm:$0xff] }
  0xfc   : > { %3365 = vmatpush3.bf16.msra.mxu0 %v3600_v6  ;;  %v3125_v6 = vcombine.low %v1287_v4, %v1295_v5 }
  0xfd   : > { %3393 = vmatpush3.bf16.msra.mxu1 %v3601_v7  ;;  %3366 = vmatprep.subr.bf16.mxu0 %v3602_v8  ;;  %v3126_v7 = vcombine.high %v1287_v4, %v1295_v5  ;;  %v3642_v8 = vld [vmem:[%s4311_s17 + $0x340] sm:$0xff]  }
  0xfe   : > { %3394 = vmatprep.subr.bf16.mxu1 %v3603_v9  ;;  %v3643_v9 = vld [vmem:[%s4311_s17 + $0x3c0] sm:$0xff]  }
 0x100   : > { %3367 = vmatpush3.bf16.msra.mxu0 %v3604_v10  ;;  %v3644_v10 = vld [vmem:[%s4311_s17 + $0x300] sm:$0xff]  }
 0x101   : > { %3395 = vmatpush3.bf16.msra.mxu1 %v3605_v11  ;;  %3368 = vmatprep.subr.bf16.mxu0 %v3606_v12  ;;  %v3645_v11 = vld [vmem:[%s4311_s17 + $0x380] sm:$0xff]   ;;  %v3646_v12 = vld [vmem:[%s4311_s17 + $0x348] sm:$0xff]  }
 0x102   : > { %3396 = vmatprep.subr.bf16.mxu1 %v3607_v14  ;;  %v3648_v14 = vld [vmem:[%s4311_s17 + $0x308] sm:$0xff]  }
 0x104   : > { %3369 = vmatpush3.bf16.msra.mxu0 %v3608_v15  ;;  %v3649_v15 = vld [vmem:[%s4311_s17 + $0x388] sm:$0xff]  }
 0x105   : > { %3397 = vmatpush3.bf16.msra.mxu1 %v3609_v16  ;;  %3410 = vmatprep.subr.bf16.mxu0 %v3610_v24  ;;  %v1302_v16 = vld [vmem:[%s4555_s0 + $0xa0] sm:$0xff] }
 0x106   : > { %3438 = vmatprep.subr.bf16.mxu1 %v3611_v25  ;;  %v3140_v18 = vcombine.high %v1302_v16, %v1310_v17  ;;  %v3139_v19 = vcombine.low %v1302_v16, %v1310_v17  ;;  %v3652_v25 = vld [vmem:[%s4311_s17 + $0x310] sm:$0xff]  }
 0x107   : > { %2629 = vmatmul.mubr.bf16.vlgmr.msra.gmra.mrb[8].mxu0 %v3119_v20  ;;  %v3650_v20 = vld [vmem:[%s4311_s17 + $0x350] sm:$0xff]  }
 0x108   : > { %2678 = vmatmul.mubr.bf16.vlgmr.msra.gmra.mrb[8].mxu1 %v3121_v22  ;;  %3411 = vmatpush3.bf16.msra.mxu0 %v3612_v26  ;;  %v1303_v22 = vld [vmem:[%s4555_s0 + $0xa8] sm:$0xff] }
 0x109   : > { %3439 = vmatpush3.bf16.msra.mxu1 %v3613_v27  ;;  %3412 = vmatprep.subr.bf16.mxu0 %v3614_v28  ;;  %v3142_v24 = vcombine.high %v1303_v22, %v1311_v23  ;;  %v3141_v26 = vcombine.low %v1303_v22, %v1311_v23  ;;  %v3653_v27 = vld [vmem:[%s4311_s17 + $0x390] sm:$0xff]   ;;  %v3654_v28 = vld [vmem:[%s4311_s17 + $0x358] sm:$0xff]  }
 0x10a   : > { %3440 = vmatprep.subr.bf16.mxu1 %v3615_v29  ;;  %2636 = vmatprep.mubr.bf16.mxu0 %v3136_v34  ;;  %v3655_v29 = vld [vmem:[%s4311_s17 + $0x3d8] sm:$0xff]   ;;  %v3660_v34 = vld [vmem:[%s4311_s17 + $0x320] sm:$0xff]  }
 0x10b   : > { %2685 = vmatprep.mubr.bf16.mxu1 %v3138_v40  ;;  %v3666_v40 = vld [vmem:[%s4311_s17 + $0x370] sm:$0xff]  }
 0x10c   : > { %3413 = vmatpush3.bf16.msra.mxu0 %v3616_v30  ;;  %v3656_v30 = vld [vmem:[%s4311_s17 + $0x318] sm:$0xff]  }
 0x10d   : > { %3441 = vmatpush3.bf16.msra.mxu1 %v3617_v31  ;;  %3414 = vmatprep.subr.bf16.mxu0 %v3618_v36  ;;  %v3657_v31 = vld [vmem:[%s4311_s17 + $0x398] sm:$0xff]   ;;  %v3662_v36 = vld [vmem:[%s4311_s17 + $0x368] sm:$0xff]  }
 0x10e   : > { %3442 = vmatprep.subr.bf16.mxu1 %v3619_v37  ;;  %v3663_v37 = vld [vmem:[%s4311_s17 + $0x3e8] sm:$0xff]  }
 0x10f   : > { %2637 = vmatmul.mubr.bf16.gmra.mrb[12].mxu0 %v3135_v35  ;;  %v3661_v35 = vld [vmem:[%s4311_s17 + $0x3a0] sm:$0xff]  }
 0x110   : > { %3415 = vmatpush3.bf16.msra.mxu0 %v3620_v41  ;;  %2686 = vmatmul.mubr.bf16.gmra.mrb[12].mxu1 %v3137_v42  ;;  %v3667_v41 = vld [vmem:[%s4311_s17 + $0x3f0] sm:$0xff]  }
 0x111   : > { %3443 = vmatpush3.bf16.msra.mxu1 %v3621_v43  ;;  %3416 = vmatprep.subr.bf16.mxu0 %v3622_v44  ;;  %v3668_v42 = vld [vmem:[%s4311_s17 + $0x330] sm:$0xff]   ;;  %v3670_v44 = vld [vmem:[%s4311_s17 + $0x378] sm:$0xff]  }
 0x112   : > { %3444 = vmatprep.subr.bf16.mxu1 %v3623_v45  ;;  %2726 = vmatprep.mubr.bf16.mxu0 %v3124_v3  ;;  %v3669_v43 = vld [vmem:[%s4311_s17 + $0x3b0] sm:$0xff]   ;;  %v3671_v45 = vld [vmem:[%s4311_s17 + $0x3f8] sm:$0xff]  }
 0x113   : > { %2775 = vmatprep.mubr.bf16.mxu1 %v3126_v7 }
 0x114   : > { %3417 = vmatpush3.bf16.msra.mxu0 %v3624_v46  ;;  %v3672_v46 = vld [vmem:[%s4311_s17 + $0x338] sm:$0xff]  }
 0x115   : > { %3445 = vmatpush3.bf16.msra.mxu1 %v3625_v47  ;;  %3418 = vmatprep.subr.bf16.mxu0 %v3626_v48  ;;  %v3673_v47 = vld [vmem:[%s4311_s17 + $0x3b8] sm:$0xff]   ;;  %v1288_v48 = vld [vmem:[%s4555_s0 + $0x30] sm:$0xff] }
 0x116   : > { %3446 = vmatprep.subr.bf16.mxu1 %v3627_v49  ;;  %v1296_v49 = vld [vmem:[%s4555_s0 + $0x70] sm:$0xff] }
 0x118   : > { %3419 = vmatpush3.bf16.msra.mxu0 %v3628_v50  ;;  %v1289_v50 = vld [vmem:[%s4555_s0 + $0x38] sm:$0xff] }
 0x119   : > { %3447 = vmatpush3.bf16.msra.mxu1 %v3629_v51  ;;  %3420 = vmatprep.subr.bf16.mxu0 %v3630_v52  ;;  %v3127_v51 = vcombine.low %v1288_v48, %v1296_v49  ;;  %v3128_v52 = vcombine.high %v1288_v48, %v1296_v49 }
 0x11a   : > { %3448 = vmatprep.subr.bf16.mxu1 %v3631_v53  ;;  %v1297_v53 = vld [vmem:[%s4555_s0 + $0x78] sm:$0xff] }
 0x11c   : > { %3421 = vmatpush3.bf16.msra.mxu0 %v3632_v54  ;;  %v1304_v54 = vld [vmem:[%s4555_s0 + $0xb0] sm:$0xff] }
 0x11d   : > { %3449 = vmatpush3.bf16.msra.mxu1 %v3633_v55  ;;  %3422 = vmatprep.subr.bf16.mxu0 %v3634_v56  ;;  %v1312_v55 = vld [vmem:[%s4555_s0 + $0xf0] sm:$0xff]  ;;  %v3129_v56 = vcombine.low %v1289_v50, %v1297_v53 }
 0x11e   : > { %3450 = vmatprep.subr.bf16.mxu1 %v3635_v57  ;;  %v3130_v57 = vcombine.high %v1289_v50, %v1297_v53 }
 0x120   : > { %3423 = vmatpush3.bf16.msra.mxu0 %v3636_v58  ;;  %v3144_v58 = vcombine.high %v1304_v54, %v1312_v55 }
 0x121   : > { %3451 = vmatpush3.bf16.msra.mxu1 %v3637_v59  ;;  %3424 = vmatprep.subr.bf16.mxu0 %v3638_v60  ;;  %v1305_v59 = vld [vmem:[%s4555_s0 + $0xb8] sm:$0xff] }
 0x122   : > { %3452 = vmatprep.subr.bf16.mxu1 %v3639_v61  ;;  %v1313_v60 = vld [vmem:[%s4555_s0 + $0xf8] sm:$0xff] }
 0x123   : > { %v3146_v61 = vcombine.high %v1305_v59, %v1313_v60 }
 0x124   : > { %3425 = vmatpush3.bf16.msra.mxu0 %v3640_v62  ;;  %v3143_v62 = vcombine.low %v1304_v54, %v1312_v55 }
 0x125   : > { %3453 = vmatpush3.bf16.msra.mxu1 %v3641_v63  ;;  %3466 = vmatprep.subr.bf16.mxu0 %v3642_v8  ;;  %v3145_v63 = vcombine.low %v1305_v59, %v1313_v60 }
 0x126   : > { %3494 = vmatprep.subr.bf16.mxu1 %v3643_v9 }
 0x127   : > { %2727 = vmatmul.mubr.bf16.vlgmr.msra.gmra.mrb[16].mxu0 %v3123_v2 }
 0x128   : > { %2776 = vmatmul.mubr.bf16.vlgmr.msra.gmra.mrb[16].mxu1 %v3125_v6  ;;  %3467 = vmatpush3.bf16.msra.mxu0 %v3644_v10 }
 0x129   : > { %3495 = vmatpush3.bf16.msra.mxu1 %v3645_v11  ;;  %3468 = vmatprep.subr.bf16.mxu0 %v3646_v12 }
 0x12a   : > { %3496 = vmatprep.subr.bf16.mxu1 %v3647_v13  ;;  %2734 = vmatprep.mubr.bf16.mxu0 %v3140_v18 }
 0x12b   : > { %2783 = vmatprep.mubr.bf16.mxu1 %v3142_v24 }
 0x12c   : > { %3469 = vmatpush3.bf16.msra.mxu0 %v3648_v14 }
 0x12d   : > { %3497 = vmatpush3.bf16.msra.mxu1 %v3649_v15  ;;  %3470 = vmatprep.subr.bf16.mxu0 %v3650_v20 }
 0x12e   : > { %3498 = vmatprep.subr.bf16.mxu1 %v3651_v21 }
 0x12f   : > { %2735 = vmatmul.mubr.bf16.gmra.mrb[20].mxu0 %v3139_v19 }
 0x130   : > { %3471 = vmatpush3.bf16.msra.mxu0 %v3652_v25  ;;  %2784 = vmatmul.mubr.bf16.gmra.mrb[20].mxu1 %v3141_v26 }
 0x131   : > { %3499 = vmatpush3.bf16.msra.mxu1 %v3653_v27  ;;  %3472 = vmatprep.subr.bf16.mxu0 %v3654_v28 }
 0x132   : > { %3500 = vmatprep.subr.bf16.mxu1 %v3655_v29  ;;  %2824 = vmatprep.mubr.bf16.mxu0 %v3128_v52 }
 0x133   : > { %2873 = vmatprep.mubr.bf16.mxu1 %v3130_v57 }
 0x134   : > { %3473 = vmatpush3.bf16.msra.mxu0 %v3656_v30 }
 0x135   : > { %3501 = vmatpush3.bf16.msra.mxu1 %v3657_v31  ;;  %3474 = vmatprep.subr.bf16.mxu0 %v3658_v32 }
 0x136   : > { %3502 = vmatprep.subr.bf16.mxu1 %v3659_v33 }
 0x138   : > { %3475 = vmatpush3.bf16.msra.mxu0 %v3660_v34 }
 0x139   : > { %3503 = vmatpush3.bf16.msra.mxu1 %v3661_v35  ;;  %3476 = vmatprep.subr.bf16.mxu0 %v3662_v36 }
 0x13a   : > { %3504 = vmatprep.subr.bf16.mxu1 %v3663_v37 }
 0x13c   : > { %3477 = vmatpush3.bf16.msra.mxu0 %v3664_v38 }
 0x13d   : > { %3505 = vmatpush3.bf16.msra.mxu1 %v3665_v39  ;;  %3478 = vmatprep.subr.bf16.mxu0 %v3666_v40 }
 0x13e   : > { %3506 = vmatprep.subr.bf16.mxu1 %v3667_v41 }
 0x140   : > { %3479 = vmatpush3.bf16.msra.mxu0 %v3668_v42 }
 0x141   : > { %3507 = vmatpush3.bf16.msra.mxu1 %v3669_v43  ;;  %3480 = vmatprep.subr.bf16.mxu0 %v3670_v44 }
 0x142   : > { %3508 = vmatprep.subr.bf16.mxu1 %v3671_v45 }
 0x144   : > { %3481 = vmatpush3.bf16.msra.mxu0 %v3672_v46 }
 0x145   : > { %3509 = vmatpush3.bf16.msra.mxu1 %v3673_v47 }
 0x147   : > { %2825 = vmatmul.mubr.bf16.vlgmr.msra.gmra.mrb[24].mxu0 %v3127_v51 }
 0x148   : > { %2874 = vmatmul.mubr.bf16.vlgmr.msra.gmra.mrb[24].mxu1 %v3129_v56  ;;  %2832 = vmatprep.mubr.bf16.mxu0 %v3144_v58 }
 0x149   : > { %2881 = vmatprep.mubr.bf16.mxu1 %v3146_v61 }
 0x14f   : > { %2833 = vmatmul.mubr.bf16.gmra.mrb[28].mxu0 %v3143_v62 }
 0x150   : > { %2882 = vmatmul.mubr.bf16.gmra.mrb[28].mxu1 %v3145_v63 }
 0x1ba   : > { %v3314_v0 = vpop.f32.mrb[0].mxu0 }
 0x1bb   : > { %v3342_v1 = vpop.f32.mrb[0].mxu1  ;;  %v3315_v2 = vpop.f32.mrb[1].mxu0 }
 0x1bc   : > { %v3316_v3 = vadd.f32 %v3315_v2, %v3314_v0  ;;  %v3343_v4 = vpop.f32.mrb[1].mxu1  ;;  %v3317_v5 = vpop.f32.mrb[2].mxu0 }
 0x1bd   : > { %v3344_v6 = vadd.f32 %v3343_v4, %v3342_v1  ;;  %v3345_v7 = vpop.f32.mrb[2].mxu1  ;;  %v3318_v8 = vpop.f32.mrb[3].mxu0 }
 0x1be   : > { %v3319_v9 = vadd.f32 %v3318_v8, %v3317_v5  ;;  %v3346_v10 = vpop.f32.mrb[3].mxu1 }
 0x1bf   : > { %v2582_v11 = vadd.f32 %v3344_v6, %v3316_v3  ;;  %v3347_v12 = vadd.f32 %v3346_v10, %v3345_v7 }
 0x1c1   : > { %v2585_v13 = vadd.f32 %v3347_v12, %v3319_v9 }
 0x1c2   : > { %v3320_v14 = vpop.f32.mrb[4].mxu0 }
 0x1c3   : > { %v3348_v15 = vpop.f32.mrb[4].mxu1  ;;  %v3321_v16 = vpop.f32.mrb[5].mxu0 }
 0x1c4   : > { %v3322_v17 = vadd.f32 %v3321_v16, %v3320_v14  ;;  %v3349_v18 = vpop.f32.mrb[5].mxu1  ;;  %v3323_v19 = vpop.f32.mrb[6].mxu0 }
 0x1c5   : > { %v3350_v20 = vadd.f32 %v3349_v18, %v3348_v15  ;;  %v3351_v21 = vpop.f32.mrb[6].mxu1  ;;  %v3324_v22 = vpop.f32.mrb[7].mxu0 }
 0x1c6   : > { %v3325_v23 = vadd.f32 %v3324_v22, %v3323_v19  ;;  %v3352_v24 = vpop.f32.mrb[7].mxu1 }
 0x1c7   : > { %v2590_v25 = vadd.f32 %v3350_v20, %v3322_v17  ;;  %v3353_v26 = vadd.f32 %v3352_v24, %v3351_v21 }
 0x1c9   : > { %v2593_v27 = vadd.f32 %v3353_v26, %v3325_v23 }
 0x1da   : > { %v3370_v28 = vpop.f32.mrb[8].mxu0 }
 0x1db   : > { %v3398_v29 = vpop.f32.mrb[8].mxu1  ;;  %v3371_v30 = vpop.f32.mrb[9].mxu0 }
 0x1dc   : > { %v3399_v31 = vpop.f32.mrb[9].mxu1  ;;  %v3372_v32 = vadd.f32 %v3371_v30, %v3370_v28  ;;  %v3373_v34 = vpop.f32.mrb[10].mxu0 }
 0x1dd   : > { %v3400_v33 = vadd.f32 %v3399_v31, %v3398_v29  ;;  %v3401_v35 = vpop.f32.mrb[10].mxu1  ;;  %v3374_v36 = vpop.f32.mrb[11].mxu0 }
 0x1de   : > { %v3402_v37 = vpop.f32.mrb[11].mxu1  ;;  %v2631_v38 = vadd.f32 %v3372_v32, %v2582_v11  ;;  %v3375_v39 = vadd.f32 %v3374_v36, %v3373_v34 }
 0x1df   : > { %v3403_v40 = vadd.f32 %v3402_v37, %v3401_v35 }
 0x1e0   : > { %v2680_v41 = vadd.f32 %v3400_v33, %v2631_v38  ;;  %v2634_v42 = vadd.f32 %v3375_v39, %v2585_v13 }
 0x1e2   : > { %v2683_v43 = vadd.f32 %v3403_v40, %v2634_v42  ;;  %v3376_v44 = vpop.f32.mrb[12].mxu0 }
 0x1e3   : > { %v3377_v45 = vpop.f32.mrb[13].mxu0  ;;  %v3404_v50 = vpop.f32.mrb[12].mxu1 }
 0x1e4   : > { %v3378_v46 = vadd.f32 %v3377_v45, %v3376_v44  ;;  %v3379_v47 = vpop.f32.mrb[14].mxu0  ;;  %v3405_v52 = vpop.f32.mrb[13].mxu1 }
 0x1e5   : > { %v3380_v48 = vpop.f32.mrb[15].mxu0  ;;  %v3406_v54 = vadd.f32 %v3405_v52, %v3404_v50  ;;  %v3407_v55 = vpop.f32.mrb[14].mxu1 }
 0x1e6   : > { %v2639_v49 = vadd.f32 %v3378_v46, %v2590_v25  ;;  %v3381_v51 = vadd.f32 %v3380_v48, %v3379_v47  ;;  %v3408_v56 = vpop.f32.mrb[15].mxu1 }
 0x1e7   : > { %v3409_v58 = vadd.f32 %v3408_v56, %v3407_v55 }
 0x1e8   : > { %v2642_v53 = vadd.f32 %v3381_v51, %v2593_v27  ;;  %v2688_v57 = vadd.f32 %v3406_v54, %v2639_v49 }
 0x1ea   : > { %v2691_v59 = vadd.f32 %v3409_v58, %v2642_v53 }
 0x1fa   : > { %v3426_v60 = vpop.f32.mrb[16].mxu0 }
 0x1fb   : > { %v3454_v61 = vpop.f32.mrb[16].mxu1  ;;  %v3427_v62 = vpop.f32.mrb[17].mxu0 }
 0x1fc   : > { %v3428_v63 = vadd.f32 %v3427_v62, %v3426_v60  ;;  %v3455_v0 = vpop.f32.mrb[17].mxu1  ;;  %v3429_v1 = vpop.f32.mrb[18].mxu0 }
 0x1fd   : > { %v3456_v2 = vadd.f32 %v3455_v0, %v3454_v61  ;;  %v3457_v3 = vpop.f32.mrb[18].mxu1  ;;  %v3430_v4 = vpop.f32.mrb[19].mxu0 }
 0x1fe   : > { %v2729_v5 = vadd.f32 %v3428_v63, %v2680_v41  ;;  %v3431_v6 = vadd.f32 %v3430_v4, %v3429_v1  ;;  %v3458_v7 = vpop.f32.mrb[19].mxu1 }
 0x1ff   : > { %v3459_v8 = vadd.f32 %v3458_v7, %v3457_v3 }
 0x200   : > { %v2778_v9 = vadd.f32 %v3456_v2, %v2729_v5  ;;  %v2732_v10 = vadd.f32 %v3431_v6, %v2683_v43 }
 0x202   : > { %v2781_v11 = vadd.f32 %v3459_v8, %v2732_v10  ;;  %v3432_v12 = vpop.f32.mrb[20].mxu0 }
 0x203   : > { %v3433_v13 = vpop.f32.mrb[21].mxu0  ;;  %v3460_v16 = vpop.f32.mrb[20].mxu1 }
 0x204   : > { %v3434_v14 = vadd.f32 %v3433_v13, %v3432_v12  ;;  %v3435_v15 = vpop.f32.mrb[22].mxu0  ;;  %v3461_v20 = vpop.f32.mrb[21].mxu1 }
 0x205   : > { %v3436_v17 = vpop.f32.mrb[23].mxu0  ;;  %v3462_v21 = vadd.f32 %v3461_v20, %v3460_v16  ;;  %v3463_v22 = vpop.f32.mrb[22].mxu1 }
 0x206   : > { %v2737_v18 = vadd.f32 %v3434_v14, %v2688_v57  ;;  %v3437_v19 = vadd.f32 %v3436_v17, %v3435_v15  ;;  %v3464_v24 = vpop.f32.mrb[23].mxu1 }
 0x207   : > { %v3465_v26 = vadd.f32 %v3464_v24, %v3463_v22  ;;  %v2925_v24 = vlaneseq }
 0x208   : > { %v2740_v23 = vadd.f32 %v3437_v19, %v2691_v59  ;;  %v2786_v25 = vadd.f32 %v3462_v21, %v2737_v18 }
 0x20a   : > { %v2789_v27 = vadd.f32 %v3465_v26, %v2740_v23  ;;  %v2917_v26 = vld [vmem:[%s1277_s26] sm:$0x1] }
 0x21a   : > { %v3482_v28 = vpop.f32.mrb[24].mxu0 }
 0x21b   : > { %v3510_v29 = vpop.f32.mrb[24].mxu1  ;;  %v3483_v30 = vpop.f32.mrb[25].mxu0 }
 0x21c   : > { %v3484_v31 = vadd.f32 %v3483_v30, %v3482_v28  ;;  %v3511_v32 = vpop.f32.mrb[25].mxu1  ;;  %v3485_v33 = vpop.f32.mrb[26].mxu0  ;;  %v2921_v30 = vld [vmem:[%s1280_s29] sm:$0x1] }
 0x21d   : > { %v3512_v34 = vadd.f32 %v3511_v32, %v3510_v29  ;;  %v3513_v35 = vpop.f32.mrb[26].mxu1  ;;  %v3486_v36 = vpop.f32.mrb[27].mxu0 }
 0x21e   : > { %v2827_v37 = vadd.f32 %v3484_v31, %v2778_v9  ;;  %v3487_v38 = vadd.f32 %v3486_v36, %v3485_v33  ;;  %v3514_v39 = vpop.f32.mrb[27].mxu1 }
 0x21f   : > { %v3515_v40 = vadd.f32 %v3514_v39, %v3513_v35 }
 0x220   : > { %v2876_v41 = vadd.f32 %v3512_v34, %v2827_v37  ;;  %v2830_v42 = vadd.f32 %v3487_v38, %v2781_v11 }
 0x222   : > { %v2879_v43 = vadd.f32 %v3515_v40, %v2830_v42  ;;  %v3488_v44 = vpop.f32.mrb[28].mxu0  ;;  %v2900_v47 = vmul.f32 %v2876_v41, %v2876_v41 }
 0x223   : > { %v3516_v45 = vpop.f32.mrb[28].mxu1  ;;  %v3489_v46 = vpop.f32.mrb[29].mxu0 }
 0x224   : > { %v2890_v48 = vadd.f32 %v2879_v43, %v2876_v41  ;;  %v2901_v49 = vmul.f32 %v2879_v43, %v2879_v43  ;;  %v3490_v50 = vadd.f32 %v3489_v46, %v3488_v44  ;;  %v3517_v51 = vpop.f32.mrb[29].mxu1  ;;  %v3491_v52 = vpop.f32.mrb[30].mxu0 }
 0x225   : > { %v3518_v53 = vadd.f32 %v3517_v51, %v3516_v45  ;;  %v3519_v54 = vpop.f32.mrb[30].mxu1  ;;  %v3492_v55 = vpop.f32.mrb[31].mxu0 }
 0x226   : > { %v2904_v56 = vadd.f32 %v2901_v49, %v2900_v47  ;;  %v2835_v57 = vadd.f32 %v3490_v50, %v2786_v25  ;;  %v3493_v58 = vadd.f32 %v3492_v55, %v3491_v52  ;;  %v3520_v59 = vpop.f32.mrb[31].mxu1  ;;  %v2926_v25 = vshrl.u32 %v2925_v24, 7 }
 0x227   : > { %v3521_v60 = vadd.f32 %v3520_v59, %v3519_v54 }
 0x228   : > { %v2884_v61 = vadd.f32 %v3518_v53, %v2835_v57  ;;  %v2838_v62 = vadd.f32 %v3493_v58, %v2789_v27  ;;  %v2927_v27 = vsub.s32 0, %v2926_v25 }
 0x22a   : > { %v2891_v63 = vadd.f32 %v2890_v48, %v2884_v61  ;;  %v2902_v0 = vmul.f32 %v2884_v61, %v2884_v61  ;;  %v2887_v1 = vadd.f32 %v3521_v60, %v2838_v62 }
 0x22c   : > { %v2905_v2 = vadd.f32 %v2904_v56, %v2902_v0  ;;  %v2892_v3 = vadd.f32 %v2891_v63, %v2887_v1  ;;  %v2903_v4 = vmul.f32 %v2887_v1, %v2887_v1 }
 0x22e   : > { %v2893_v5 = vrot.slane %v2892_v3, 4  ;;  %v2906_v6 = vadd.f32 %v2905_v2, %v2903_v4 }
 0x230   : > { %v2894_v7 = vadd.f32 %v2893_v5, %v2892_v3  ;;  %v2907_v8 = vrot.slane %v2906_v6, 4 }
 0x232   : > { %v2895_v9 = vrot.slane %v2894_v7, 2  ;;  %v2908_v10 = vadd.f32 %v2907_v8, %v2906_v6 }
 0x234   : > { %v2896_v11 = vadd.f32 %v2895_v9, %v2894_v7  ;;  %v2909_v12 = vrot.slane %v2908_v10, 2 }
 0x236   : > { %v2897_v13 = vrot.slane %v2896_v11, 1  ;;  %v2910_v14 = vadd.f32 %v2909_v12, %v2908_v10 }
 0x238   : > { %v2898_v15 = vadd.f32 %v2897_v13, %v2896_v11  ;;  %v2911_v16 = vrot.slane %v2910_v14, 1 }
 0x23a   : > { %v2899_v17 = vmul.f32 0.03125, %v2898_v15  ;;  %v2912_v18 = vadd.f32 %v2911_v16, %v2910_v14 }
 0x23c   : > { %v2913_v19 = vmul.f32 0.03125, %v2912_v18  ;;  %v2914_v20 = vmul.f32 %v2899_v17, %v2899_v17 }
 0x23e   : > { %v2915_v21 = vsub.f32 %v2913_v19, %v2914_v20 }
 0x240   : > { %v2916_v22 = vmax.f32 %v2915_v21, 0.0 }
 0x242   : > { %v2918_v23 = vadd.f32 1e-05, %v2916_v22 }
 0x244   : > { %3674 = vrsqrt.f32 %v2918_v23 }
 0x24e   : > { %v3675_v28 = vpop.eup %3674 }
 0x24f   : > { %v2920_v29 = vmul.f32 %v3675_v28, %v2917_v26 }
 0x251   : > { %v2922_v31 = vmul.f32 %v2920_v29, %v2899_v17  ;;  %v2928_v32 = vrot.slane %v2920_v29, %v2927_v27 }
 0x253   : > { %v2923_v33 = vsub.f32 %v2921_v30, %v2922_v31  ;;  %v2930_v34 = vmul.f32 %v2928_v32, %v2876_v41  ;;  %v2931_v35 = vmul.f32 %v2928_v32, %v2879_v43  ;;  %v2932_v36 = vmul.f32 %v2928_v32, %v2884_v61 }
 0x254   : > { %v2933_v37 = vmul.f32 %v2928_v32, %v2887_v1 }
 0x255   : > { %v2938_v38 = vrot.slane %v2923_v33, %v2927_v27 }
 0x257   : > { %v2940_v39 = vadd.f32 %v2938_v38, %v2930_v34  ;;  %v2941_v40 = vadd.f32 %v2938_v38, %v2931_v35  ;;  %v2942_v42 = vadd.f32 %v2938_v38, %v2932_v36  ;;  %v2943_v44 = vadd.f32 %v2938_v38, %v2933_v37 }
 0x259   : > { %v2944_v45 = vmul.f32 0.2, %v2940_v39  ;;  %v2945_v46 = vmul.f32 0.2, %v2941_v40  ;;  %v2946_v47 = vmul.f32 0.2, %v2942_v42 }
 0x25a   : > { %v2947_v48 = vmul.f32 0.2, %v2943_v44  ;;  %2978 = sbr.rel (!%p3756_p5) target bundleno = 618 (0x26a), region = 81 }
 0x25b   : > { %v2948_v49 = vmax.f32 %v2940_v39, %v2944_v45  ;;  %v2949_v50 = vmax.f32 %v2941_v40, %v2945_v46  ;;  %v2950_v51 = vmax.f32 %v2942_v42, %v2946_v47 }
 0x25c   : > { %v2951_v52 = vmax.f32 %v2943_v44, %v2947_v48 }
 0x25d   : > { %v3290_v53 = vpack.c.bf16 %v2949_v50, %v2948_v49 }
 0x25e   : > { %v3295_v41 = vpack.c.bf16 %v2951_v52, %v2950_v51 }
 0x25f   : > { %3291 = vst [vmem:[%s1274_s6] sm:$0xff] %v3290_v53  }
 0x260   : > { %3297 = vst [vmem:[%s1274_s6 + $0x8] sm:$0xff] %v3295_v41  }
 0x266   : > { %v2996_v43 = vld [vmem:[%s1274_s6] sm:$0xf]  ;;  %v2998_v54 = vld [vmem:[%s1274_s6 + $0x4] sm:$0xf] }
 0x267   : > { %v3000_v55 = vld [vmem:[%s1274_s6 + $0x8] sm:$0xf]  ;;  %v3002_v56 = vld [vmem:[%s1274_s6 + $0xc] sm:$0xf]  ;;  %2997 = vst [vmem:[%s2980_s8] sm:$0xf] %v2996_v43 }
 0x268   : > { %2999 = vst [vmem:[%s2980_s8 + $0x8] sm:$0xf] %v2998_v54  ;;  %3001 = vst [vmem:[%s2980_s8 + $0x10] sm:$0xf] %v3000_v55 }
 0x269   : > { %3003 = vst [vmem:[%s2980_s8 + $0x18] sm:$0xf] %v3002_v56 }
 0x26a PF: > { %p11_p11 = scmp.ge.s32.totalorder %s3744_s19, 4   ;;  %s4561_s15 = smov %s3694_s16 }
 0x26b   : > { %s4562_s16 = smov %s3754_s22  ;;  %s4563_s17 = smov %s3744_s19 }
 0x26c   :  { %13 = sbr.rel (!%p11_p11) target bundleno = 2 (0x2), region = 159 }

// kernel: discriminator_forward.8
= control target key start
LH: loop header
LB: loop body
LE: loop exit
PB: predicated region body
PF: predicated region fallthrough
CT: control target
= control target key end

     0   :  { %s8346_s15 = smov 0   ;;  %s8348_s16 = smov 0   ;;  %s9776_s0 = inlined_call_operand.vmem [shape: bf16[8,4096], index: 0, kind: input, shape index: {}]   ;;  %s9777_s1 = inlined_call_operand.vmem [shape: bf16[4096,512], index: 1, kind: input, shape index: {}]   ;;  %s9778_s2 = inlined_call_operand.vmem [shape: f32[1,512], index: 2, kind: input, shape index: {}]   ;;  %s9779_s3 = inlined_call_operand.vmem [shape: f32[1,512], index: 3, kind: input, shape index: {}]   ;;  %s9780_s4 = inlined_call_operand.vmem [shape: bf16[8,512], index: 4, kind: output, shape index: {}]  }
   0x1   :  { %s8350_s17 = smov 0  }
   0x2 LB: > { %s7332_s18 = sadd.s32 4294967295, %s8319_s17   ;;  %s8363_s19 = sadd.s32 1, %s8319_s17   ;;  %s8319_s17 = sphi %s8350_s17, %s9783_s17   ;;  %s8315_s16 = sphi %s8348_s16, %s9782_s16   ;;  %s8311_s15 = sphi %s8346_s15, %s9781_s15  }
   0x3   : > { %s39_s20 = ssub.s32 %s8319_s17, %s8363_s19  ;;  %s42_s21 = sadd.s32 1, %s8315_s16 }
   0x4   : > { %p40_p0 = scmp.eq.s32.totalorder %s39_s20, 0  ;;  %p49_p1 = scmp.ne.s32.totalorder %s8315_s16, %s8311_s15 }
   0x5   : > { %p50_p2 = scmp.eq.s32.totalorder %s8319_s17, 0  ;;  %p7335_p4 = scmp.ge.s32.totalorder %s8319_s17, 4 }
   0x6   : > { %s8372_s22 = scalar_select %p40_p0, %s8315_s16, %s42_s21  }
   0x7   : > { %p51_p3 = por %p50_p2, %p49_p1  ;;  %156 = sbr.rel (%p7335_p4) target bundleno = 359 (0x167), region = 20 }
   0xe   : > { %159 = sbr.rel (!%p51_p3) target bundleno = 359 (0x167), region = 24  ;;  %s161_s23 = sand.u32 (%p51_p3), 1, %s8315_s16  }
   0xf   : > { %s7337_s24 = sshll.u32 (%p51_p3), %s8319_s17, 2  ;;  %s7336_s25 = sshll.u32 (%p51_p3), %s161_s23, 11 }
  0x10   : > { %s8380_s28 = scalar_lea.vmem (%p51_p3), %s9777_s1, %s7337_s24  ;;  %s8384_s29 = scalar_lea.vmem (%p51_p3), [#allocation2], %s7336_s25 }
  0x11   : > { %v181_v0 = vld [vmem:[%s8380_s28] sm:$0xf] (%p51_p3)  ;;  %v183_v1 = vld [vmem:[%s8380_s28 + $0x10] sm:$0xf] (%p51_p3) }
  0x12   : > { %182 = vst [vmem:[%s8384_s29] sm:$0xf] (%p51_p3), %v181_v0  ;;  %184 = vst [vmem:[%s8384_s29 + $0x4] sm:$0xf] (%p51_p3), %v183_v1  ;;  %v185_v2 = vld [vmem:[%s8380_s28 + $0x20] sm:$0xf] (%p51_p3) }
  0x13   : > { %v187_v3 = vld [vmem:[%s8380_s28 + $0x30] sm:$0xf] (%p51_p3)  ;;  %v189_v4 = vld [vmem:[%s8380_s28 + $0x40] sm:$0xf] (%p51_p3)  ;;  %186 = vst [vmem:[%s8384_s29 + $0x8] sm:$0xf] (%p51_p3), %v185_v2 }
  0x14   : > { %188 = vst [vmem:[%s8384_s29 + $0xc] sm:$0xf] (%p51_p3), %v187_v3  ;;  %190 = vst [vmem:[%s8384_s29 + $0x10] sm:$0xf] (%p51_p3), %v189_v4  ;;  %v191_v5 = vld [vmem:[%s8380_s28 + $0x50] sm:$0xf] (%p51_p3) }
  0x15   : > { %v193_v6 = vld [vmem:[%s8380_s28 + $0x60] sm:$0xf]  ;;  %v195_v7 = vld [vmem:[%s8380_s28 + $0x70] sm:$0xf]  ;;  %192 = vst [vmem:[%s8384_s29 + $0x14] sm:$0xf] %v191_v5 }
  0x16   : > { %194 = vst [vmem:[%s8384_s29 + $0x18] sm:$0xf] %v193_v6  ;;  %196 = vst [vmem:[%s8384_s29 + $0x1c] sm:$0xf] %v195_v7  ;;  %v197_v8 = vld [vmem:[%s8380_s28 + $0x80] sm:$0xf] }
  0x17   : > { %v199_v9 = vld [vmem:[%s8380_s28 + $0x90] sm:$0xf]  ;;  %v201_v10 = vld [vmem:[%s8380_s28 + $0xa0] sm:$0xf]  ;;  %198 = vst [vmem:[%s8384_s29 + $0x20] sm:$0xf] %v197_v8 }
  0x18   : > { %200 = vst [vmem:[%s8384_s29 + $0x24] sm:$0xf] %v199_v9  ;;  %202 = vst [vmem:[%s8384_s29 + $0x28] sm:$0xf] %v201_v10  ;;  %v203_v11 = vld [vmem:[%s8380_s28 + $0xb0] sm:$0xf] }
  0x19   : > { %v205_v12 = vld [vmem:[%s8380_s28 + $0xc0] sm:$0xf]  ;;  %v207_v13 = vld [vmem:[%s8380_s28 + $0xd0] sm:$0xf]  ;;  %204 = vst [vmem:[%s8384_s29 + $0x2c] sm:$0xf] %v203_v11 }
  0x1a   : > { %206 = vst [vmem:[%s8384_s29 + $0x30] sm:$0xf] %v205_v12  ;;  %208 = vst [vmem:[%s8384_s29 + $0x34] sm:$0xf] %v207_v13  ;;  %v209_v14 = vld [vmem:[%s8380_s28 + $0xe0] sm:$0xf] }
  0x1b   : > { %v211_v15 = vld [vmem:[%s8380_s28 + $0xf0] sm:$0xf]  ;;  %v213_v16 = vld [vmem:[%s8380_s28 + $0x100] sm:$0xf]  ;;  %210 = vst [vmem:[%s8384_s29 + $0x38] sm:$0xf] %v209_v14 }
  0x1c   : > { %212 = vst [vmem:[%s8384_s29 + $0x3c] sm:$0xf] %v211_v15  ;;  %214 = vst [vmem:[%s8384_s29 + $0x40] sm:$0xf] %v213_v16  ;;  %v215_v17 = vld [vmem:[%s8380_s28 + $0x110] sm:$0xf] }
  0x1d   : > { %v217_v18 = vld [vmem:[%s8380_s28 + $0x120] sm:$0xf]  ;;  %v219_v19 = vld [vmem:[%s8380_s28 + $0x130] sm:$0xf]  ;;  %216 = vst [vmem:[%s8384_s29 + $0x44] sm:$0xf] %v215_v17 }
  0x1e   : > { %218 = vst [vmem:[%s8384_s29 + $0x48] sm:$0xf] %v217_v18  ;;  %220 = vst [vmem:[%s8384_s29 + $0x4c] sm:$0xf] %v219_v19  ;;  %v221_v20 = vld [vmem:[%s8380_s28 + $0x140] sm:$0xf] }
  0x1f   : > { %v223_v21 = vld [vmem:[%s8380_s28 + $0x150] sm:$0xf]  ;;  %v225_v22 = vld [vmem:[%s8380_s28 + $0x160] sm:$0xf]  ;;  %222 = vst [vmem:[%s8384_s29 + $0x50] sm:$0xf] %v221_v20 }
  0x20   : > { %224 = vst [vmem:[%s8384_s29 + $0x54] sm:$0xf] %v223_v21  ;;  %226 = vst [vmem:[%s8384_s29 + $0x58] sm:$0xf] %v225_v22  ;;  %v227_v23 = vld [vmem:[%s8380_s28 + $0x170] sm:$0xf] }
  0x21   : > { %v229_v24 = vld [vmem:[%s8380_s28 + $0x180] sm:$0xf]  ;;  %v231_v25 = vld [vmem:[%s8380_s28 + $0x190] sm:$0xf]  ;;  %228 = vst [vmem:[%s8384_s29 + $0x5c] sm:$0xf] %v227_v23 }
  0x22   : > { %230 = vst [vmem:[%s8384_s29 + $0x60] sm:$0xf] %v229_v24  ;;  %232 = vst [vmem:[%s8384_s29 + $0x64] sm:$0xf] %v231_v25  ;;  %v233_v26 = vld [vmem:[%s8380_s28 + $0x1a0] sm:$0xf] }
  0x23   : > { %v235_v27 = vld [vmem:[%s8380_s28 + $0x1b0] sm:$0xf]  ;;  %v237_v28 = vld [vmem:[%s8380_s28 + $0x1c0] sm:$0xf]  ;;  %234 = vst [vmem:[%s8384_s29 + $0x68] sm:$0xf] %v233_v26 }
  0x24   : > { %236 = vst [vmem:[%s8384_s29 + $0x6c] sm:$0xf] %v235_v27  ;;  %238 = vst [vmem:[%s8384_s29 + $0x70] sm:$0xf] %v237_v28  ;;  %v239_v29 = vld [vmem:[%s8380_s28 + $0x1d0] sm:$0xf] }
  0x25   : > { %v241_v30 = vld [vmem:[%s8380_s28 + $0x1e0] sm:$0xf]  ;;  %v243_v31 = vld [vmem:[%s8380_s28 + $0x1f0] sm:$0xf]  ;;  %240 = vst [vmem:[%s8384_s29 + $0x74] sm:$0xf] %v239_v29 }
  0x26   : > { %242 = vst [vmem:[%s8384_s29 + $0x78] sm:$0xf] %v241_v30  ;;  %244 = vst [vmem:[%s8384_s29 + $0x7c] sm:$0xf] %v243_v31  ;;  %v245_v32 = vld [vmem:[%s8380_s28 + $0x200] sm:$0xf] }
  0x27   : > { %v247_v33 = vld [vmem:[%s8380_s28 + $0x210] sm:$0xf]  ;;  %v249_v34 = vld [vmem:[%s8380_s28 + $0x220] sm:$0xf]  ;;  %246 = vst [vmem:[%s8384_s29 + $0x80] sm:$0xf] %v245_v32 }
  0x28   : > { %248 = vst [vmem:[%s8384_s29 + $0x84] sm:$0xf] %v247_v33  ;;  %250 = vst [vmem:[%s8384_s29 + $0x88] sm:$0xf] %v249_v34  ;;  %v251_v35 = vld [vmem:[%s8380_s28 + $0x230] sm:$0xf] }
  0x29   : > { %v253_v36 = vld [vmem:[%s8380_s28 + $0x240] sm:$0xf]  ;;  %v255_v37 = vld [vmem:[%s8380_s28 + $0x250] sm:$0xf]  ;;  %252 = vst [vmem:[%s8384_s29 + $0x8c] sm:$0xf] %v251_v35 }
  0x2a   : > { %254 = vst [vmem:[%s8384_s29 + $0x90] sm:$0xf] %v253_v36  ;;  %256 = vst [vmem:[%s8384_s29 + $0x94] sm:$0xf] %v255_v37  ;;  %v257_v38 = vld [vmem:[%s8380_s28 + $0x260] sm:$0xf] }
  0x2b   : > { %v259_v39 = vld [vmem:[%s8380_s28 + $0x270] sm:$0xf]  ;;  %v261_v40 = vld [vmem:[%s8380_s28 + $0x280] sm:$0xf]  ;;  %258 = vst [vmem:[%s8384_s29 + $0x98] sm:$0xf] %v257_v38 }
  0x2c   : > { %260 = vst [vmem:[%s8384_s29 + $0x9c] sm:$0xf] %v259_v39  ;;  %262 = vst [vmem:[%s8384_s29 + $0xa0] sm:$0xf] %v261_v40  ;;  %v263_v41 = vld [vmem:[%s8380_s28 + $0x290] sm:$0xf] }
  0x2d   : > { %v265_v42 = vld [vmem:[%s8380_s28 + $0x2a0] sm:$0xf]  ;;  %v267_v43 = vld [vmem:[%s8380_s28 + $0x2b0] sm:$0xf]  ;;  %264 = vst [vmem:[%s8384_s29 + $0xa4] sm:$0xf] %v263_v41 }
  0x2e   : > { %266 = vst [vmem:[%s8384_s29 + $0xa8] sm:$0xf] %v265_v42  ;;  %268 = vst [vmem:[%s8384_s29 + $0xac] sm:$0xf] %v267_v43  ;;  %v269_v44 = vld [vmem:[%s8380_s28 + $0x2c0] sm:$0xf] }
  0x2f   : > { %v271_v45 = vld [vmem:[%s8380_s28 + $0x2d0] sm:$0xf]  ;;  %v273_v46 = vld [vmem:[%s8380_s28 + $0x2e0] sm:$0xf]  ;;  %270 = vst [vmem:[%s8384_s29 + $0xb0] sm:$0xf] %v269_v44 }
  0x30   : > { %272 = vst [vmem:[%s8384_s29 + $0xb4] sm:$0xf] %v271_v45  ;;  %274 = vst [vmem:[%s8384_s29 + $0xb8] sm:$0xf] %v273_v46  ;;  %v275_v47 = vld [vmem:[%s8380_s28 + $0x2f0] sm:$0xf] }
  0x31   : > { %v277_v48 = vld [vmem:[%s8380_s28 + $0x300] sm:$0xf]  ;;  %v279_v49 = vld [vmem:[%s8380_s28 + $0x310] sm:$0xf]  ;;  %276 = vst [vmem:[%s8384_s29 + $0xbc] sm:$0xf] %v275_v47 }
  0x32   : > { %278 = vst [vmem:[%s8384_s29 + $0xc0] sm:$0xf] %v277_v48  ;;  %280 = vst [vmem:[%s8384_s29 + $0xc4] sm:$0xf] %v279_v49  ;;  %v281_v50 = vld [vmem:[%s8380_s28 + $0x320] sm:$0xf] }
  0x33   : > { %v283_v51 = vld [vmem:[%s8380_s28 + $0x330] sm:$0xf]  ;;  %v285_v52 = vld [vmem:[%s8380_s28 + $0x340] sm:$0xf]  ;;  %282 = vst [vmem:[%s8384_s29 + $0xc8] sm:$0xf] %v281_v50 }
  0x34   : > { %284 = vst [vmem:[%s8384_s29 + $0xcc] sm:$0xf] %v283_v51  ;;  %286 = vst [vmem:[%s8384_s29 + $0xd0] sm:$0xf] %v285_v52  ;;  %v287_v53 = vld [vmem:[%s8380_s28 + $0x350] sm:$0xf] }
  0x35   : > { %v289_v54 = vld [vmem:[%s8380_s28 + $0x360] sm:$0xf]  ;;  %v291_v55 = vld [vmem:[%s8380_s28 + $0x370] sm:$0xf]  ;;  %288 = vst [vmem:[%s8384_s29 + $0xd4] sm:$0xf] %v287_v53 }
  0x36   : > { %290 = vst [vmem:[%s8384_s29 + $0xd8] sm:$0xf] %v289_v54  ;;  %292 = vst [vmem:[%s8384_s29 + $0xdc] sm:$0xf] %v291_v55  ;;  %v293_v56 = vld [vmem:[%s8380_s28 + $0x380] sm:$0xf] }
  0x37   : > { %v295_v57 = vld [vmem:[%s8380_s28 + $0x390] sm:$0xf]  ;;  %v297_v58 = vld [vmem:[%s8380_s28 + $0x3a0] sm:$0xf]  ;;  %294 = vst [vmem:[%s8384_s29 + $0xe0] sm:$0xf] %v293_v56 }
  0x38   : > { %296 = vst [vmem:[%s8384_s29 + $0xe4] sm:$0xf] %v295_v57  ;;  %298 = vst [vmem:[%s8384_s29 + $0xe8] sm:$0xf] %v297_v58  ;;  %v299_v59 = vld [vmem:[%s8380_s28 + $0x3b0] sm:$0xf] }
  0x39   : > { %v301_v60 = vld [vmem:[%s8380_s28 + $0x3c0] sm:$0xf]  ;;  %v303_v61 = vld [vmem:[%s8380_s28 + $0x3d0] sm:$0xf]  ;;  %300 = vst [vmem:[%s8384_s29 + $0xec] sm:$0xf] %v299_v59 }
  0x3a   : > { %302 = vst [vmem:[%s8384_s29 + $0xf0] sm:$0xf] %v301_v60  ;;  %304 = vst [vmem:[%s8384_s29 + $0xf4] sm:$0xf] %v303_v61  ;;  %v305_v62 = vld [vmem:[%s8380_s28 + $0x3e0] sm:$0xf] }
  0x3b   : > { %v307_v63 = vld [vmem:[%s8380_s28 + $0x3f0] sm:$0xf]  ;;  %v309_v0 = vld [vmem:[%s8380_s28 + $0x400] sm:$0xf]  ;;  %306 = vst [vmem:[%s8384_s29 + $0xf8] sm:$0xf] %v305_v62 }
  0x3c   : > { %308 = vst [vmem:[%s8384_s29 + $0xfc] sm:$0xf] %v307_v63  ;;  %310 = vst [vmem:[%s8384_s29 + $0x100] sm:$0xf] %v309_v0  ;;  %v311_v1 = vld [vmem:[%s8380_s28 + $0x410] sm:$0xf] }
  0x3d   : > { %v313_v2 = vld [vmem:[%s8380_s28 + $0x420] sm:$0xf]  ;;  %v315_v3 = vld [vmem:[%s8380_s28 + $0x430] sm:$0xf]  ;;  %312 = vst [vmem:[%s8384_s29 + $0x104] sm:$0xf] %v311_v1 }
  0x3e   : > { %314 = vst [vmem:[%s8384_s29 + $0x108] sm:$0xf] %v313_v2  ;;  %316 = vst [vmem:[%s8384_s29 + $0x10c] sm:$0xf] %v315_v3  ;;  %v317_v4 = vld [vmem:[%s8380_s28 + $0x440] sm:$0xf] }
  0x3f   : > { %v319_v5 = vld [vmem:[%s8380_s28 + $0x450] sm:$0xf]  ;;  %v321_v6 = vld [vmem:[%s8380_s28 + $0x460] sm:$0xf]  ;;  %318 = vst [vmem:[%s8384_s29 + $0x110] sm:$0xf] %v317_v4 }
  0x40   : > { %320 = vst [vmem:[%s8384_s29 + $0x114] sm:$0xf] %v319_v5  ;;  %322 = vst [vmem:[%s8384_s29 + $0x118] sm:$0xf] %v321_v6  ;;  %v323_v7 = vld [vmem:[%s8380_s28 + $0x470] sm:$0xf] }
  0x41   : > { %v325_v8 = vld [vmem:[%s8380_s28 + $0x480] sm:$0xf]  ;;  %v327_v9 = vld [vmem:[%s8380_s28 + $0x490] sm:$0xf]  ;;  %324 = vst [vmem:[%s8384_s29 + $0x11c] sm:$0xf] %v323_v7 }
  0x42   : > { %326 = vst [vmem:[%s8384_s29 + $0x120] sm:$0xf] %v325_v8  ;;  %328 = vst [vmem:[%s8384_s29 + $0x124] sm:$0xf] %v327_v9  ;;  %v329_v10 = vld [vmem:[%s8380_s28 + $0x4a0] sm:$0xf] }
  0x43   : > { %v331_v11 = vld [vmem:[%s8380_s28 + $0x4b0] sm:$0xf]  ;;  %v333_v12 = vld [vmem:[%s8380_s28 + $0x4c0] sm:$0xf]  ;;  %330 = vst [vmem:[%s8384_s29 + $0x128] sm:$0xf] %v329_v10 }
  0x44   : > { %332 = vst [vmem:[%s8384_s29 + $0x12c] sm:$0xf] %v331_v11  ;;  %334 = vst [vmem:[%s8384_s29 + $0x130] sm:$0xf] %v333_v12  ;;  %v335_v13 = vld [vmem:[%s8380_s28 + $0x4d0] sm:$0xf] }
  0x45   : > { %v337_v14 = vld [vmem:[%s8380_s28 + $0x4e0] sm:$0xf]  ;;  %v339_v15 = vld [vmem:[%s8380_s28 + $0x4f0] sm:$0xf]  ;;  %336 = vst [vmem:[%s8384_s29 + $0x134] sm:$0xf] %v335_v13 }
  0x46   : > { %338 = vst [vmem:[%s8384_s29 + $0x138] sm:$0xf] %v337_v14  ;;  %340 = vst [vmem:[%s8384_s29 + $0x13c] sm:$0xf] %v339_v15  ;;  %v341_v16 = vld [vmem:[%s8380_s28 + $0x500] sm:$0xf] }
  0x47   : > { %v343_v17 = vld [vmem:[%s8380_s28 + $0x510] sm:$0xf]  ;;  %v345_v18 = vld [vmem:[%s8380_s28 + $0x520] sm:$0xf]  ;;  %342 = vst [vmem:[%s8384_s29 + $0x140] sm:$0xf] %v341_v16 }
  0x48   : > { %344 = vst [vmem:[%s8384_s29 + $0x144] sm:$0xf] %v343_v17  ;;  %346 = vst [vmem:[%s8384_s29 + $0x148] sm:$0xf] %v345_v18  ;;  %v347_v19 = vld [vmem:[%s8380_s28 + $0x530] sm:$0xf] }
  0x49   : > { %v349_v20 = vld [vmem:[%s8380_s28 + $0x540] sm:$0xf]  ;;  %v351_v21 = vld [vmem:[%s8380_s28 + $0x550] sm:$0xf]  ;;  %348 = vst [vmem:[%s8384_s29 + $0x14c] sm:$0xf] %v347_v19 }
  0x4a   : > { %350 = vst [vmem:[%s8384_s29 + $0x150] sm:$0xf] %v349_v20  ;;  %352 = vst [vmem:[%s8384_s29 + $0x154] sm:$0xf] %v351_v21  ;;  %v353_v22 = vld [vmem:[%s8380_s28 + $0x560] sm:$0xf] }
  0x4b   : > { %v355_v23 = vld [vmem:[%s8380_s28 + $0x570] sm:$0xf]  ;;  %v357_v24 = vld [vmem:[%s8380_s28 + $0x580] sm:$0xf]  ;;  %354 = vst [vmem:[%s8384_s29 + $0x158] sm:$0xf] %v353_v22 }
  0x4c   : > { %356 = vst [vmem:[%s8384_s29 + $0x15c] sm:$0xf] %v355_v23  ;;  %358 = vst [vmem:[%s8384_s29 + $0x160] sm:$0xf] %v357_v24  ;;  %v359_v25 = vld [vmem:[%s8380_s28 + $0x590] sm:$0xf] }
  0x4d   : > { %v361_v26 = vld [vmem:[%s8380_s28 + $0x5a0] sm:$0xf]  ;;  %v363_v27 = vld [vmem:[%s8380_s28 + $0x5b0] sm:$0xf]  ;;  %360 = vst [vmem:[%s8384_s29 + $0x164] sm:$0xf] %v359_v25 }
  0x4e   : > { %362 = vst [vmem:[%s8384_s29 + $0x168] sm:$0xf] %v361_v26  ;;  %364 = vst [vmem:[%s8384_s29 + $0x16c] sm:$0xf] %v363_v27  ;;  %v365_v28 = vld [vmem:[%s8380_s28 + $0x5c0] sm:$0xf] }
  0x4f   : > { %v367_v29 = vld [vmem:[%s8380_s28 + $0x5d0] sm:$0xf]  ;;  %v369_v30 = vld [vmem:[%s8380_s28 + $0x5e0] sm:$0xf]  ;;  %366 = vst [vmem:[%s8384_s29 + $0x170] sm:$0xf] %v365_v28 }
  0x50   : > { %368 = vst [vmem:[%s8384_s29 + $0x174] sm:$0xf] %v367_v29  ;;  %370 = vst [vmem:[%s8384_s29 + $0x178] sm:$0xf] %v369_v30  ;;  %v371_v31 = vld [vmem:[%s8380_s28 + $0x5f0] sm:$0xf] }
  0x51   : > { %v373_v32 = vld [vmem:[%s8380_s28 + $0x600] sm:$0xf]  ;;  %v375_v33 = vld [vmem:[%s8380_s28 + $0x610] sm:$0xf]  ;;  %372 = vst [vmem:[%s8384_s29 + $0x17c] sm:$0xf] %v371_v31 }
  0x52   : > { %374 = vst [vmem:[%s8384_s29 + $0x180] sm:$0xf] %v373_v32  ;;  %376 = vst [vmem:[%s8384_s29 + $0x184] sm:$0xf] %v375_v33  ;;  %v377_v34 = vld [vmem:[%s8380_s28 + $0x620] sm:$0xf] }
  0x53   : > { %v379_v35 = vld [vmem:[%s8380_s28 + $0x630] sm:$0xf]  ;;  %v381_v36 = vld [vmem:[%s8380_s28 + $0x640] sm:$0xf]  ;;  %378 = vst [vmem:[%s8384_s29 + $0x188] sm:$0xf] %v377_v34 }
  0x54   : > { %380 = vst [vmem:[%s8384_s29 + $0x18c] sm:$0xf] %v379_v35  ;;  %382 = vst [vmem:[%s8384_s29 + $0x190] sm:$0xf] %v381_v36  ;;  %v383_v37 = vld [vmem:[%s8380_s28 + $0x650] sm:$0xf] }
  0x55   : > { %v385_v38 = vld [vmem:[%s8380_s28 + $0x660] sm:$0xf]  ;;  %v387_v39 = vld [vmem:[%s8380_s28 + $0x670] sm:$0xf]  ;;  %384 = vst [vmem:[%s8384_s29 + $0x194] sm:$0xf] %v383_v37 }
  0x56   : > { %386 = vst [vmem:[%s8384_s29 + $0x198] sm:$0xf] %v385_v38  ;;  %388 = vst [vmem:[%s8384_s29 + $0x19c] sm:$0xf] %v387_v39  ;;  %v389_v40 = vld [vmem:[%s8380_s28 + $0x680] sm:$0xf] }
  0x57   : > { %v391_v41 = vld [vmem:[%s8380_s28 + $0x690] sm:$0xf]  ;;  %v393_v42 = vld [vmem:[%s8380_s28 + $0x6a0] sm:$0xf]  ;;  %390 = vst [vmem:[%s8384_s29 + $0x1a0] sm:$0xf] %v389_v40 }
  0x58   : > { %392 = vst [vmem:[%s8384_s29 + $0x1a4] sm:$0xf] %v391_v41  ;;  %394 = vst [vmem:[%s8384_s29 + $0x1a8] sm:$0xf] %v393_v42  ;;  %v395_v43 = vld [vmem:[%s8380_s28 + $0x6b0] sm:$0xf] }
  0x59   : > { %v397_v44 = vld [vmem:[%s8380_s28 + $0x6c0] sm:$0xf]  ;;  %v399_v45 = vld [vmem:[%s8380_s28 + $0x6d0] sm:$0xf]  ;;  %396 = vst [vmem:[%s8384_s29 + $0x1ac] sm:$0xf] %v395_v43 }
  0x5a   : > { %398 = vst [vmem:[%s8384_s29 + $0x1b0] sm:$0xf] %v397_v44  ;;  %400 = vst [vmem:[%s8384_s29 + $0x1b4] sm:$0xf] %v399_v45  ;;  %v401_v46 = vld [vmem:[%s8380_s28 + $0x6e0] sm:$0xf] }
  0x5b   : > { %v403_v47 = vld [vmem:[%s8380_s28 + $0x6f0] sm:$0xf]  ;;  %v405_v48 = vld [vmem:[%s8380_s28 + $0x700] sm:$0xf]  ;;  %402 = vst [vmem:[%s8384_s29 + $0x1b8] sm:$0xf] %v401_v46 }
  0x5c   : > { %404 = vst [vmem:[%s8384_s29 + $0x1bc] sm:$0xf] %v403_v47  ;;  %406 = vst [vmem:[%s8384_s29 + $0x1c0] sm:$0xf] %v405_v48  ;;  %v407_v49 = vld [vmem:[%s8380_s28 + $0x710] sm:$0xf] }
  0x5d   : > { %v409_v50 = vld [vmem:[%s8380_s28 + $0x720] sm:$0xf]  ;;  %v411_v51 = vld [vmem:[%s8380_s28 + $0x730] sm:$0xf]  ;;  %408 = vst [vmem:[%s8384_s29 + $0x1c4] sm:$0xf] %v407_v49 }
  0x5e   : > { %410 = vst [vmem:[%s8384_s29 + $0x1c8] sm:$0xf] %v409_v50  ;;  %412 = vst [vmem:[%s8384_s29 + $0x1cc] sm:$0xf] %v411_v51  ;;  %v413_v52 = vld [vmem:[%s8380_s28 + $0x740] sm:$0xf] }
  0x5f   : > { %v415_v53 = vld [vmem:[%s8380_s28 + $0x750] sm:$0xf]  ;;  %v417_v54 = vld [vmem:[%s8380_s28 + $0x760] sm:$0xf]  ;;  %414 = vst [vmem:[%s8384_s29 + $0x1d0] sm:$0xf] %v413_v52 }
  0x60   : > { %416 = vst [vmem:[%s8384_s29 + $0x1d4] sm:$0xf] %v415_v53  ;;  %418 = vst [vmem:[%s8384_s29 + $0x1d8] sm:$0xf] %v417_v54  ;;  %v419_v55 = vld [vmem:[%s8380_s28 + $0x770] sm:$0xf] }
  0x61   : > { %v421_v56 = vld [vmem:[%s8380_s28 + $0x780] sm:$0xf]  ;;  %v423_v57 = vld [vmem:[%s8380_s28 + $0x790] sm:$0xf]  ;;  %420 = vst [vmem:[%s8384_s29 + $0x1dc] sm:$0xf] %v419_v55 }
  0x62   : > { %422 = vst [vmem:[%s8384_s29 + $0x1e0] sm:$0xf] %v421_v56  ;;  %424 = vst [vmem:[%s8384_s29 + $0x1e4] sm:$0xf] %v423_v57  ;;  %v425_v58 = vld [vmem:[%s8380_s28 + $0x7a0] sm:$0xf] }
  0x63   : > { %v427_v59 = vld [vmem:[%s8380_s28 + $0x7b0] sm:$0xf]  ;;  %v429_v60 = vld [vmem:[%s8380_s28 + $0x7c0] sm:$0xf]  ;;  %426 = vst [vmem:[%s8384_s29 + $0x1e8] sm:$0xf] %v425_v58 }
  0x64   : > { %428 = vst [vmem:[%s8384_s29 + $0x1ec] sm:$0xf] %v427_v59  ;;  %430 = vst [vmem:[%s8384_s29 + $0x1f0] sm:$0xf] %v429_v60  ;;  %v431_v61 = vld [vmem:[%s8380_s28 + $0x7d0] sm:$0xf] }
  0x65   : > { %v433_v62 = vld [vmem:[%s8380_s28 + $0x7e0] sm:$0xf]  ;;  %v435_v63 = vld [vmem:[%s8380_s28 + $0x7f0] sm:$0xf]  ;;  %432 = vst [vmem:[%s8384_s29 + $0x1f4] sm:$0xf] %v431_v61 }
  0x66   : > { %434 = vst [vmem:[%s8384_s29 + $0x1f8] sm:$0xf] %v433_v62  ;;  %436 = vst [vmem:[%s8384_s29 + $0x1fc] sm:$0xf] %v435_v63  ;;  %v437_v0 = vld [vmem:[%s8380_s28 + $0x800] sm:$0xf] }
  0x67   : > { %v439_v1 = vld [vmem:[%s8380_s28 + $0x810] sm:$0xf]  ;;  %v441_v2 = vld [vmem:[%s8380_s28 + $0x820] sm:$0xf]  ;;  %438 = vst [vmem:[%s8384_s29 + $0x200] sm:$0xf] %v437_v0 }
  0x68   : > { %440 = vst [vmem:[%s8384_s29 + $0x204] sm:$0xf] %v439_v1  ;;  %442 = vst [vmem:[%s8384_s29 + $0x208] sm:$0xf] %v441_v2  ;;  %v443_v3 = vld [vmem:[%s8380_s28 + $0x830] sm:$0xf] }
  0x69   : > { %v445_v4 = vld [vmem:[%s8380_s28 + $0x840] sm:$0xf]  ;;  %v447_v5 = vld [vmem:[%s8380_s28 + $0x850] sm:$0xf]  ;;  %444 = vst [vmem:[%s8384_s29 + $0x20c] sm:$0xf] %v443_v3 }
  0x6a   : > { %446 = vst [vmem:[%s8384_s29 + $0x210] sm:$0xf] %v445_v4  ;;  %448 = vst [vmem:[%s8384_s29 + $0x214] sm:$0xf] %v447_v5  ;;  %v449_v6 = vld [vmem:[%s8380_s28 + $0x860] sm:$0xf] }
  0x6b   : > { %v451_v7 = vld [vmem:[%s8380_s28 + $0x870] sm:$0xf]  ;;  %v453_v8 = vld [vmem:[%s8380_s28 + $0x880] sm:$0xf]  ;;  %450 = vst [vmem:[%s8384_s29 + $0x218] sm:$0xf] %v449_v6 }
  0x6c   : > { %452 = vst [vmem:[%s8384_s29 + $0x21c] sm:$0xf] %v451_v7  ;;  %454 = vst [vmem:[%s8384_s29 + $0x220] sm:$0xf] %v453_v8  ;;  %v455_v9 = vld [vmem:[%s8380_s28 + $0x890] sm:$0xf] }
  0x6d   : > { %v457_v10 = vld [vmem:[%s8380_s28 + $0x8a0] sm:$0xf]  ;;  %v459_v11 = vld [vmem:[%s8380_s28 + $0x8b0] sm:$0xf]  ;;  %456 = vst [vmem:[%s8384_s29 + $0x224] sm:$0xf] %v455_v9 }
  0x6e   : > { %458 = vst [vmem:[%s8384_s29 + $0x228] sm:$0xf] %v457_v10  ;;  %460 = vst [vmem:[%s8384_s29 + $0x22c] sm:$0xf] %v459_v11  ;;  %v461_v12 = vld [vmem:[%s8380_s28 + $0x8c0] sm:$0xf] }
  0x6f   : > { %v463_v13 = vld [vmem:[%s8380_s28 + $0x8d0] sm:$0xf]  ;;  %v465_v14 = vld [vmem:[%s8380_s28 + $0x8e0] sm:$0xf]  ;;  %462 = vst [vmem:[%s8384_s29 + $0x230] sm:$0xf] %v461_v12 }
  0x70   : > { %464 = vst [vmem:[%s8384_s29 + $0x234] sm:$0xf] %v463_v13  ;;  %466 = vst [vmem:[%s8384_s29 + $0x238] sm:$0xf] %v465_v14  ;;  %v467_v15 = vld [vmem:[%s8380_s28 + $0x8f0] sm:$0xf] }
  0x71   : > { %v469_v16 = vld [vmem:[%s8380_s28 + $0x900] sm:$0xf]  ;;  %v471_v17 = vld [vmem:[%s8380_s28 + $0x910] sm:$0xf]  ;;  %468 = vst [vmem:[%s8384_s29 + $0x23c] sm:$0xf] %v467_v15 }
  0x72   : > { %470 = vst [vmem:[%s8384_s29 + $0x240] sm:$0xf] %v469_v16  ;;  %472 = vst [vmem:[%s8384_s29 + $0x244] sm:$0xf] %v471_v17  ;;  %v473_v18 = vld [vmem:[%s8380_s28 + $0x920] sm:$0xf] }
  0x73   : > { %v475_v19 = vld [vmem:[%s8380_s28 + $0x930] sm:$0xf]  ;;  %v477_v20 = vld [vmem:[%s8380_s28 + $0x940] sm:$0xf]  ;;  %474 = vst [vmem:[%s8384_s29 + $0x248] sm:$0xf] %v473_v18 }
  0x74   : > { %476 = vst [vmem:[%s8384_s29 + $0x24c] sm:$0xf] %v475_v19  ;;  %478 = vst [vmem:[%s8384_s29 + $0x250] sm:$0xf] %v477_v20  ;;  %v479_v21 = vld [vmem:[%s8380_s28 + $0x950] sm:$0xf] }
  0x75   : > { %v481_v22 = vld [vmem:[%s8380_s28 + $0x960] sm:$0xf]  ;;  %v483_v23 = vld [vmem:[%s8380_s28 + $0x970] sm:$0xf]  ;;  %480 = vst [vmem:[%s8384_s29 + $0x254] sm:$0xf] %v479_v21 }
  0x76   : > { %482 = vst [vmem:[%s8384_s29 + $0x258] sm:$0xf] %v481_v22  ;;  %484 = vst [vmem:[%s8384_s29 + $0x25c] sm:$0xf] %v483_v23  ;;  %v485_v24 = vld [vmem:[%s8380_s28 + $0x980] sm:$0xf] }
  0x77   : > { %v487_v25 = vld [vmem:[%s8380_s28 + $0x990] sm:$0xf]  ;;  %v489_v26 = vld [vmem:[%s8380_s28 + $0x9a0] sm:$0xf]  ;;  %486 = vst [vmem:[%s8384_s29 + $0x260] sm:$0xf] %v485_v24 }
  0x78   : > { %488 = vst [vmem:[%s8384_s29 + $0x264] sm:$0xf] %v487_v25  ;;  %490 = vst [vmem:[%s8384_s29 + $0x268] sm:$0xf] %v489_v26  ;;  %v491_v27 = vld [vmem:[%s8380_s28 + $0x9b0] sm:$0xf] }
  0x79   : > { %v493_v28 = vld [vmem:[%s8380_s28 + $0x9c0] sm:$0xf]  ;;  %v495_v29 = vld [vmem:[%s8380_s28 + $0x9d0] sm:$0xf]  ;;  %492 = vst [vmem:[%s8384_s29 + $0x26c] sm:$0xf] %v491_v27 }
  0x7a   : > { %494 = vst [vmem:[%s8384_s29 + $0x270] sm:$0xf] %v493_v28  ;;  %496 = vst [vmem:[%s8384_s29 + $0x274] sm:$0xf] %v495_v29  ;;  %v497_v30 = vld [vmem:[%s8380_s28 + $0x9e0] sm:$0xf] }
  0x7b   : > { %v499_v31 = vld [vmem:[%s8380_s28 + $0x9f0] sm:$0xf]  ;;  %v501_v32 = vld [vmem:[%s8380_s28 + $0xa00] sm:$0xf]  ;;  %498 = vst [vmem:[%s8384_s29 + $0x278] sm:$0xf] %v497_v30 }
  0x7c   : > { %500 = vst [vmem:[%s8384_s29 + $0x27c] sm:$0xf] %v499_v31  ;;  %502 = vst [vmem:[%s8384_s29 + $0x280] sm:$0xf] %v501_v32  ;;  %v503_v33 = vld [vmem:[%s8380_s28 + $0xa10] sm:$0xf] }
  0x7d   : > { %v505_v34 = vld [vmem:[%s8380_s28 + $0xa20] sm:$0xf]  ;;  %v507_v35 = vld [vmem:[%s8380_s28 + $0xa30] sm:$0xf]  ;;  %504 = vst [vmem:[%s8384_s29 + $0x284] sm:$0xf] %v503_v33 }
  0x7e   : > { %506 = vst [vmem:[%s8384_s29 + $0x288] sm:$0xf] %v505_v34  ;;  %508 = vst [vmem:[%s8384_s29 + $0x28c] sm:$0xf] %v507_v35  ;;  %v509_v36 = vld [vmem:[%s8380_s28 + $0xa40] sm:$0xf] }
  0x7f   : > { %v511_v37 = vld [vmem:[%s8380_s28 + $0xa50] sm:$0xf]  ;;  %v513_v38 = vld [vmem:[%s8380_s28 + $0xa60] sm:$0xf]  ;;  %510 = vst [vmem:[%s8384_s29 + $0x290] sm:$0xf] %v509_v36 }
  0x80   : > { %512 = vst [vmem:[%s8384_s29 + $0x294] sm:$0xf] %v511_v37  ;;  %514 = vst [vmem:[%s8384_s29 + $0x298] sm:$0xf] %v513_v38  ;;  %v515_v39 = vld [vmem:[%s8380_s28 + $0xa70] sm:$0xf] }
  0x81   : > { %v517_v40 = vld [vmem:[%s8380_s28 + $0xa80] sm:$0xf]  ;;  %v519_v41 = vld [vmem:[%s8380_s28 + $0xa90] sm:$0xf]  ;;  %516 = vst [vmem:[%s8384_s29 + $0x29c] sm:$0xf] %v515_v39 }
  0x82   : > { %518 = vst [vmem:[%s8384_s29 + $0x2a0] sm:$0xf] %v517_v40  ;;  %520 = vst [vmem:[%s8384_s29 + $0x2a4] sm:$0xf] %v519_v41  ;;  %v521_v42 = vld [vmem:[%s8380_s28 + $0xaa0] sm:$0xf] }
  0x83   : > { %v523_v43 = vld [vmem:[%s8380_s28 + $0xab0] sm:$0xf]  ;;  %v525_v44 = vld [vmem:[%s8380_s28 + $0xac0] sm:$0xf]  ;;  %522 = vst [vmem:[%s8384_s29 + $0x2a8] sm:$0xf] %v521_v42 }
  0x84   : > { %524 = vst [vmem:[%s8384_s29 + $0x2ac] sm:$0xf] %v523_v43  ;;  %526 = vst [vmem:[%s8384_s29 + $0x2b0] sm:$0xf] %v525_v44  ;;  %v527_v45 = vld [vmem:[%s8380_s28 + $0xad0] sm:$0xf] }
  0x85   : > { %v529_v46 = vld [vmem:[%s8380_s28 + $0xae0] sm:$0xf]  ;;  %v531_v47 = vld [vmem:[%s8380_s28 + $0xaf0] sm:$0xf]  ;;  %528 = vst [vmem:[%s8384_s29 + $0x2b4] sm:$0xf] %v527_v45 }
  0x86   : > { %530 = vst [vmem:[%s8384_s29 + $0x2b8] sm:$0xf] %v529_v46  ;;  %532 = vst [vmem:[%s8384_s29 + $0x2bc] sm:$0xf] %v531_v47  ;;  %v533_v48 = vld [vmem:[%s8380_s28 + $0xb00] sm:$0xf] }
  0x87   : > { %v535_v49 = vld [vmem:[%s8380_s28 + $0xb10] sm:$0xf]  ;;  %v537_v50 = vld [vmem:[%s8380_s28 + $0xb20] sm:$0xf]  ;;  %534 = vst [vmem:[%s8384_s29 + $0x2c0] sm:$0xf] %v533_v48 }
  0x88   : > { %536 = vst [vmem:[%s8384_s29 + $0x2c4] sm:$0xf] %v535_v49  ;;  %538 = vst [vmem:[%s8384_s29 + $0x2c8] sm:$0xf] %v537_v50  ;;  %v539_v51 = vld [vmem:[%s8380_s28 + $0xb30] sm:$0xf] }
  0x89   : > { %v541_v52 = vld [vmem:[%s8380_s28 + $0xb40] sm:$0xf]  ;;  %v543_v53 = vld [vmem:[%s8380_s28 + $0xb50] sm:$0xf]  ;;  %540 = vst [vmem:[%s8384_s29 + $0x2cc] sm:$0xf] %v539_v51 }
  0x8a   : > { %542 = vst [vmem:[%s8384_s29 + $0x2d0] sm:$0xf] %v541_v52  ;;  %544 = vst [vmem:[%s8384_s29 + $0x2d4] sm:$0xf] %v543_v53  ;;  %v545_v54 = vld [vmem:[%s8380_s28 + $0xb60] sm:$0xf] }
  0x8b   : > { %v547_v55 = vld [vmem:[%s8380_s28 + $0xb70] sm:$0xf]  ;;  %v549_v56 = vld [vmem:[%s8380_s28 + $0xb80] sm:$0xf]  ;;  %546 = vst [vmem:[%s8384_s29 + $0x2d8] sm:$0xf] %v545_v54 }
  0x8c   : > { %548 = vst [vmem:[%s8384_s29 + $0x2dc] sm:$0xf] %v547_v55  ;;  %550 = vst [vmem:[%s8384_s29 + $0x2e0] sm:$0xf] %v549_v56  ;;  %v551_v57 = vld [vmem:[%s8380_s28 + $0xb90] sm:$0xf] }
  0x8d   : > { %v553_v58 = vld [vmem:[%s8380_s28 + $0xba0] sm:$0xf]  ;;  %v555_v59 = vld [vmem:[%s8380_s28 + $0xbb0] sm:$0xf]  ;;  %552 = vst [vmem:[%s8384_s29 + $0x2e4] sm:$0xf] %v551_v57 }
  0x8e   : > { %554 = vst [vmem:[%s8384_s29 + $0x2e8] sm:$0xf] %v553_v58  ;;  %556 = vst [vmem:[%s8384_s29 + $0x2ec] sm:$0xf] %v555_v59  ;;  %v557_v60 = vld [vmem:[%s8380_s28 + $0xbc0] sm:$0xf] }
  0x8f   : > { %v559_v61 = vld [vmem:[%s8380_s28 + $0xbd0] sm:$0xf]  ;;  %v561_v62 = vld [vmem:[%s8380_s28 + $0xbe0] sm:$0xf]  ;;  %558 = vst [vmem:[%s8384_s29 + $0x2f0] sm:$0xf] %v557_v60 }
  0x90   : > { %560 = vst [vmem:[%s8384_s29 + $0x2f4] sm:$0xf] %v559_v61  ;;  %562 = vst [vmem:[%s8384_s29 + $0x2f8] sm:$0xf] %v561_v62  ;;  %v563_v63 = vld [vmem:[%s8380_s28 + $0xbf0] sm:$0xf] }
  0x91   : > { %v565_v0 = vld [vmem:[%s8380_s28 + $0xc00] sm:$0xf]  ;;  %v567_v1 = vld [vmem:[%s8380_s28 + $0xc10] sm:$0xf]  ;;  %564 = vst [vmem:[%s8384_s29 + $0x2fc] sm:$0xf] %v563_v63 }
  0x92   : > { %566 = vst [vmem:[%s8384_s29 + $0x300] sm:$0xf] %v565_v0  ;;  %568 = vst [vmem:[%s8384_s29 + $0x304] sm:$0xf] %v567_v1  ;;  %v569_v2 = vld [vmem:[%s8380_s28 + $0xc20] sm:$0xf] }
  0x93   : > { %v571_v3 = vld [vmem:[%s8380_s28 + $0xc30] sm:$0xf]  ;;  %v573_v4 = vld [vmem:[%s8380_s28 + $0xc40] sm:$0xf]  ;;  %570 = vst [vmem:[%s8384_s29 + $0x308] sm:$0xf] %v569_v2 }
  0x94   : > { %572 = vst [vmem:[%s8384_s29 + $0x30c] sm:$0xf] %v571_v3  ;;  %574 = vst [vmem:[%s8384_s29 + $0x310] sm:$0xf] %v573_v4  ;;  %v575_v5 = vld [vmem:[%s8380_s28 + $0xc50] sm:$0xf] }
  0x95   : > { %v577_v6 = vld [vmem:[%s8380_s28 + $0xc60] sm:$0xf]  ;;  %v579_v7 = vld [vmem:[%s8380_s28 + $0xc70] sm:$0xf]  ;;  %576 = vst [vmem:[%s8384_s29 + $0x314] sm:$0xf] %v575_v5 }
  0x96   : > { %578 = vst [vmem:[%s8384_s29 + $0x318] sm:$0xf] %v577_v6  ;;  %580 = vst [vmem:[%s8384_s29 + $0x31c] sm:$0xf] %v579_v7  ;;  %v581_v8 = vld [vmem:[%s8380_s28 + $0xc80] sm:$0xf] }
  0x97   : > { %v583_v9 = vld [vmem:[%s8380_s28 + $0xc90] sm:$0xf]  ;;  %v585_v10 = vld [vmem:[%s8380_s28 + $0xca0] sm:$0xf]  ;;  %582 = vst [vmem:[%s8384_s29 + $0x320] sm:$0xf] %v581_v8 }
  0x98   : > { %584 = vst [vmem:[%s8384_s29 + $0x324] sm:$0xf] %v583_v9  ;;  %586 = vst [vmem:[%s8384_s29 + $0x328] sm:$0xf] %v585_v10  ;;  %v587_v11 = vld [vmem:[%s8380_s28 + $0xcb0] sm:$0xf] }
  0x99   : > { %v589_v12 = vld [vmem:[%s8380_s28 + $0xcc0] sm:$0xf]  ;;  %v591_v13 = vld [vmem:[%s8380_s28 + $0xcd0] sm:$0xf]  ;;  %588 = vst [vmem:[%s8384_s29 + $0x32c] sm:$0xf] %v587_v11 }
  0x9a   : > { %590 = vst [vmem:[%s8384_s29 + $0x330] sm:$0xf] %v589_v12  ;;  %592 = vst [vmem:[%s8384_s29 + $0x334] sm:$0xf] %v591_v13  ;;  %v593_v14 = vld [vmem:[%s8380_s28 + $0xce0] sm:$0xf] }
  0x9b   : > { %v595_v15 = vld [vmem:[%s8380_s28 + $0xcf0] sm:$0xf]  ;;  %v597_v16 = vld [vmem:[%s8380_s28 + $0xd00] sm:$0xf]  ;;  %594 = vst [vmem:[%s8384_s29 + $0x338] sm:$0xf] %v593_v14 }
  0x9c   : > { %596 = vst [vmem:[%s8384_s29 + $0x33c] sm:$0xf] %v595_v15  ;;  %598 = vst [vmem:[%s8384_s29 + $0x340] sm:$0xf] %v597_v16  ;;  %v599_v17 = vld [vmem:[%s8380_s28 + $0xd10] sm:$0xf] }
  0x9d   : > { %v601_v18 = vld [vmem:[%s8380_s28 + $0xd20] sm:$0xf]  ;;  %v603_v19 = vld [vmem:[%s8380_s28 + $0xd30] sm:$0xf]  ;;  %600 = vst [vmem:[%s8384_s29 + $0x344] sm:$0xf] %v599_v17 }
  0x9e   : > { %602 = vst [vmem:[%s8384_s29 + $0x348] sm:$0xf] %v601_v18  ;;  %604 = vst [vmem:[%s8384_s29 + $0x34c] sm:$0xf] %v603_v19  ;;  %v605_v20 = vld [vmem:[%s8380_s28 + $0xd40] sm:$0xf] }
  0x9f   : > { %v607_v21 = vld [vmem:[%s8380_s28 + $0xd50] sm:$0xf]  ;;  %v609_v22 = vld [vmem:[%s8380_s28 + $0xd60] sm:$0xf]  ;;  %606 = vst [vmem:[%s8384_s29 + $0x350] sm:$0xf] %v605_v20 }
  0xa0   : > { %608 = vst [vmem:[%s8384_s29 + $0x354] sm:$0xf] %v607_v21  ;;  %610 = vst [vmem:[%s8384_s29 + $0x358] sm:$0xf] %v609_v22  ;;  %v611_v23 = vld [vmem:[%s8380_s28 + $0xd70] sm:$0xf] }
  0xa1   : > { %v613_v24 = vld [vmem:[%s8380_s28 + $0xd80] sm:$0xf]  ;;  %v615_v25 = vld [vmem:[%s8380_s28 + $0xd90] sm:$0xf]  ;;  %612 = vst [vmem:[%s8384_s29 + $0x35c] sm:$0xf] %v611_v23 }
  0xa2   : > { %614 = vst [vmem:[%s8384_s29 + $0x360] sm:$0xf] %v613_v24  ;;  %616 = vst [vmem:[%s8384_s29 + $0x364] sm:$0xf] %v615_v25  ;;  %v617_v26 = vld [vmem:[%s8380_s28 + $0xda0] sm:$0xf] }
  0xa3   : > { %v619_v27 = vld [vmem:[%s8380_s28 + $0xdb0] sm:$0xf]  ;;  %v621_v28 = vld [vmem:[%s8380_s28 + $0xdc0] sm:$0xf]  ;;  %618 = vst [vmem:[%s8384_s29 + $0x368] sm:$0xf] %v617_v26 }
  0xa4   : > { %620 = vst [vmem:[%s8384_s29 + $0x36c] sm:$0xf] %v619_v27  ;;  %622 = vst [vmem:[%s8384_s29 + $0x370] sm:$0xf] %v621_v28  ;;  %v623_v29 = vld [vmem:[%s8380_s28 + $0xdd0] sm:$0xf] }
  0xa5   : > { %v625_v30 = vld [vmem:[%s8380_s28 + $0xde0] sm:$0xf]  ;;  %v627_v31 = vld [vmem:[%s8380_s28 + $0xdf0] sm:$0xf]  ;;  %624 = vst [vmem:[%s8384_s29 + $0x374] sm:$0xf] %v623_v29 }
  0xa6   : > { %626 = vst [vmem:[%s8384_s29 + $0x378] sm:$0xf] %v625_v30  ;;  %628 = vst [vmem:[%s8384_s29 + $0x37c] sm:$0xf] %v627_v31  ;;  %v629_v32 = vld [vmem:[%s8380_s28 + $0xe00] sm:$0xf] }
  0xa7   : > { %v631_v33 = vld [vmem:[%s8380_s28 + $0xe10] sm:$0xf]  ;;  %v633_v34 = vld [vmem:[%s8380_s28 + $0xe20] sm:$0xf]  ;;  %630 = vst [vmem:[%s8384_s29 + $0x380] sm:$0xf] %v629_v32 }
  0xa8   : > { %632 = vst [vmem:[%s8384_s29 + $0x384] sm:$0xf] %v631_v33  ;;  %634 = vst [vmem:[%s8384_s29 + $0x388] sm:$0xf] %v633_v34  ;;  %v635_v35 = vld [vmem:[%s8380_s28 + $0xe30] sm:$0xf] }
  0xa9   : > { %v637_v36 = vld [vmem:[%s8380_s28 + $0xe40] sm:$0xf]  ;;  %v639_v37 = vld [vmem:[%s8380_s28 + $0xe50] sm:$0xf]  ;;  %636 = vst [vmem:[%s8384_s29 + $0x38c] sm:$0xf] %v635_v35 }
  0xaa   : > { %638 = vst [vmem:[%s8384_s29 + $0x390] sm:$0xf] %v637_v36  ;;  %640 = vst [vmem:[%s8384_s29 + $0x394] sm:$0xf] %v639_v37  ;;  %v641_v38 = vld [vmem:[%s8380_s28 + $0xe60] sm:$0xf] }
  0xab   : > { %v643_v39 = vld [vmem:[%s8380_s28 + $0xe70] sm:$0xf]  ;;  %v645_v40 = vld [vmem:[%s8380_s28 + $0xe80] sm:$0xf]  ;;  %642 = vst [vmem:[%s8384_s29 + $0x398] sm:$0xf] %v641_v38 }
  0xac   : > { %644 = vst [vmem:[%s8384_s29 + $0x39c] sm:$0xf] %v643_v39  ;;  %646 = vst [vmem:[%s8384_s29 + $0x3a0] sm:$0xf] %v645_v40  ;;  %v647_v41 = vld [vmem:[%s8380_s28 + $0xe90] sm:$0xf] }
  0xad   : > { %v649_v42 = vld [vmem:[%s8380_s28 + $0xea0] sm:$0xf]  ;;  %v651_v43 = vld [vmem:[%s8380_s28 + $0xeb0] sm:$0xf]  ;;  %648 = vst [vmem:[%s8384_s29 + $0x3a4] sm:$0xf] %v647_v41 }
  0xae   : > { %650 = vst [vmem:[%s8384_s29 + $0x3a8] sm:$0xf] %v649_v42  ;;  %652 = vst [vmem:[%s8384_s29 + $0x3ac] sm:$0xf] %v651_v43  ;;  %v653_v44 = vld [vmem:[%s8380_s28 + $0xec0] sm:$0xf] }
  0xaf   : > { %v655_v45 = vld [vmem:[%s8380_s28 + $0xed0] sm:$0xf]  ;;  %v657_v46 = vld [vmem:[%s8380_s28 + $0xee0] sm:$0xf]  ;;  %654 = vst [vmem:[%s8384_s29 + $0x3b0] sm:$0xf] %v653_v44 }
  0xb0   : > { %656 = vst [vmem:[%s8384_s29 + $0x3b4] sm:$0xf] %v655_v45  ;;  %658 = vst [vmem:[%s8384_s29 + $0x3b8] sm:$0xf] %v657_v46  ;;  %v659_v47 = vld [vmem:[%s8380_s28 + $0xef0] sm:$0xf] }
  0xb1   : > { %v661_v48 = vld [vmem:[%s8380_s28 + $0xf00] sm:$0xf]  ;;  %v663_v49 = vld [vmem:[%s8380_s28 + $0xf10] sm:$0xf]  ;;  %660 = vst [vmem:[%s8384_s29 + $0x3bc] sm:$0xf] %v659_v47 }
  0xb2   : > { %662 = vst [vmem:[%s8384_s29 + $0x3c0] sm:$0xf] %v661_v48  ;;  %664 = vst [vmem:[%s8384_s29 + $0x3c4] sm:$0xf] %v663_v49  ;;  %v665_v50 = vld [vmem:[%s8380_s28 + $0xf20] sm:$0xf] }
  0xb3   : > { %v667_v51 = vld [vmem:[%s8380_s28 + $0xf30] sm:$0xf]  ;;  %v669_v52 = vld [vmem:[%s8380_s28 + $0xf40] sm:$0xf]  ;;  %666 = vst [vmem:[%s8384_s29 + $0x3c8] sm:$0xf] %v665_v50 }
  0xb4   : > { %668 = vst [vmem:[%s8384_s29 + $0x3cc] sm:$0xf] %v667_v51  ;;  %670 = vst [vmem:[%s8384_s29 + $0x3d0] sm:$0xf] %v669_v52  ;;  %v671_v53 = vld [vmem:[%s8380_s28 + $0xf50] sm:$0xf] }
  0xb5   : > { %v673_v54 = vld [vmem:[%s8380_s28 + $0xf60] sm:$0xf]  ;;  %v675_v55 = vld [vmem:[%s8380_s28 + $0xf70] sm:$0xf]  ;;  %672 = vst [vmem:[%s8384_s29 + $0x3d4] sm:$0xf] %v671_v53 }
  0xb6   : > { %674 = vst [vmem:[%s8384_s29 + $0x3d8] sm:$0xf] %v673_v54  ;;  %676 = vst [vmem:[%s8384_s29 + $0x3dc] sm:$0xf] %v675_v55  ;;  %v677_v56 = vld [vmem:[%s8380_s28 + $0xf80] sm:$0xf] }
  0xb7   : > { %v679_v57 = vld [vmem:[%s8380_s28 + $0xf90] sm:$0xf]  ;;  %v681_v58 = vld [vmem:[%s8380_s28 + $0xfa0] sm:$0xf]  ;;  %678 = vst [vmem:[%s8384_s29 + $0x3e0] sm:$0xf] %v677_v56 }
  0xb8   : > { %680 = vst [vmem:[%s8384_s29 + $0x3e4] sm:$0xf] %v679_v57  ;;  %682 = vst [vmem:[%s8384_s29 + $0x3e8] sm:$0xf] %v681_v58  ;;  %v683_v59 = vld [vmem:[%s8380_s28 + $0xfb0] sm:$0xf] }
  0xb9   : > { %v685_v60 = vld [vmem:[%s8380_s28 + $0xfc0] sm:$0xf]  ;;  %v687_v61 = vld [vmem:[%s8380_s28 + $0xfd0] sm:$0xf]  ;;  %684 = vst [vmem:[%s8384_s29 + $0x3ec] sm:$0xf] %v683_v59 }
  0xba   : > { %686 = vst [vmem:[%s8384_s29 + $0x3f0] sm:$0xf] %v685_v60  ;;  %688 = vst [vmem:[%s8384_s29 + $0x3f4] sm:$0xf] %v687_v61  ;;  %v689_v62 = vld [vmem:[%s8380_s28 + $0xfe0] sm:$0xf] }
  0xbb   : > { %v691_v63 = vld [vmem:[%s8380_s28 + $0xff0] sm:$0xf]  ;;  %v693_v0 = vld [vmem:[%s8380_s28 + $0x1000] sm:$0xf]  ;;  %690 = vst [vmem:[%s8384_s29 + $0x3f8] sm:$0xf] %v689_v62 }
  0xbc   : > { %692 = vst [vmem:[%s8384_s29 + $0x3fc] sm:$0xf] %v691_v63  ;;  %694 = vst [vmem:[%s8384_s29 + $0x400] sm:$0xf] %v693_v0  ;;  %v695_v1 = vld [vmem:[%s8380_s28 + $0x1010] sm:$0xf] }
  0xbd   : > { %v697_v2 = vld [vmem:[%s8380_s28 + $0x1020] sm:$0xf]  ;;  %v699_v3 = vld [vmem:[%s8380_s28 + $0x1030] sm:$0xf]  ;;  %696 = vst [vmem:[%s8384_s29 + $0x404] sm:$0xf] %v695_v1 }
  0xbe   : > { %698 = vst [vmem:[%s8384_s29 + $0x408] sm:$0xf] %v697_v2  ;;  %700 = vst [vmem:[%s8384_s29 + $0x40c] sm:$0xf] %v699_v3  ;;  %v701_v4 = vld [vmem:[%s8380_s28 + $0x1040] sm:$0xf] }
  0xbf   : > { %v703_v5 = vld [vmem:[%s8380_s28 + $0x1050] sm:$0xf]  ;;  %v705_v6 = vld [vmem:[%s8380_s28 + $0x1060] sm:$0xf]  ;;  %702 = vst [vmem:[%s8384_s29 + $0x410] sm:$0xf] %v701_v4 }
  0xc0   : > { %704 = vst [vmem:[%s8384_s29 + $0x414] sm:$0xf] %v703_v5  ;;  %706 = vst [vmem:[%s8384_s29 + $0x418] sm:$0xf] %v705_v6  ;;  %v707_v7 = vld [vmem:[%s8380_s28 + $0x1070] sm:$0xf] }
  0xc1   : > { %v709_v8 = vld [vmem:[%s8380_s28 + $0x1080] sm:$0xf]  ;;  %v711_v9 = vld [vmem:[%s8380_s28 + $0x1090] sm:$0xf]  ;;  %708 = vst [vmem:[%s8384_s29 + $0x41c] sm:$0xf] %v707_v7 }
  0xc2   : > { %710 = vst [vmem:[%s8384_s29 + $0x420] sm:$0xf] %v709_v8  ;;  %712 = vst [vmem:[%s8384_s29 + $0x424] sm:$0xf] %v711_v9  ;;  %v713_v10 = vld [vmem:[%s8380_s28 + $0x10a0] sm:$0xf] }
  0xc3   : > { %v715_v11 = vld [vmem:[%s8380_s28 + $0x10b0] sm:$0xf]  ;;  %v717_v12 = vld [vmem:[%s8380_s28 + $0x10c0] sm:$0xf]  ;;  %714 = vst [vmem:[%s8384_s29 + $0x428] sm:$0xf] %v713_v10 }
  0xc4   : > { %716 = vst [vmem:[%s8384_s29 + $0x42c] sm:$0xf] %v715_v11  ;;  %718 = vst [vmem:[%s8384_s29 + $0x430] sm:$0xf] %v717_v12  ;;  %v719_v13 = vld [vmem:[%s8380_s28 + $0x10d0] sm:$0xf] }
  0xc5   : > { %v721_v14 = vld [vmem:[%s8380_s28 + $0x10e0] sm:$0xf]  ;;  %v723_v15 = vld [vmem:[%s8380_s28 + $0x10f0] sm:$0xf]  ;;  %720 = vst [vmem:[%s8384_s29 + $0x434] sm:$0xf] %v719_v13 }
  0xc6   : > { %722 = vst [vmem:[%s8384_s29 + $0x438] sm:$0xf] %v721_v14  ;;  %724 = vst [vmem:[%s8384_s29 + $0x43c] sm:$0xf] %v723_v15  ;;  %v725_v16 = vld [vmem:[%s8380_s28 + $0x1100] sm:$0xf] }
  0xc7   : > { %v727_v17 = vld [vmem:[%s8380_s28 + $0x1110] sm:$0xf]  ;;  %v729_v18 = vld [vmem:[%s8380_s28 + $0x1120] sm:$0xf]  ;;  %726 = vst [vmem:[%s8384_s29 + $0x440] sm:$0xf] %v725_v16 }
  0xc8   : > { %728 = vst [vmem:[%s8384_s29 + $0x444] sm:$0xf] %v727_v17  ;;  %730 = vst [vmem:[%s8384_s29 + $0x448] sm:$0xf] %v729_v18  ;;  %v731_v19 = vld [vmem:[%s8380_s28 + $0x1130] sm:$0xf] }
  0xc9   : > { %v733_v20 = vld [vmem:[%s8380_s28 + $0x1140] sm:$0xf]  ;;  %v735_v21 = vld [vmem:[%s8380_s28 + $0x1150] sm:$0xf]  ;;  %732 = vst [vmem:[%s8384_s29 + $0x44c] sm:$0xf] %v731_v19 }
  0xca   : > { %734 = vst [vmem:[%s8384_s29 + $0x450] sm:$0xf] %v733_v20  ;;  %736 = vst [vmem:[%s8384_s29 + $0x454] sm:$0xf] %v735_v21  ;;  %v737_v22 = vld [vmem:[%s8380_s28 + $0x1160] sm:$0xf] }
  0xcb   : > { %v739_v23 = vld [vmem:[%s8380_s28 + $0x1170] sm:$0xf]  ;;  %v741_v24 = vld [vmem:[%s8380_s28 + $0x1180] sm:$0xf]  ;;  %738 = vst [vmem:[%s8384_s29 + $0x458] sm:$0xf] %v737_v22 }
  0xcc   : > { %740 = vst [vmem:[%s8384_s29 + $0x45c] sm:$0xf] %v739_v23  ;;  %742 = vst [vmem:[%s8384_s29 + $0x460] sm:$0xf] %v741_v24  ;;  %v743_v25 = vld [vmem:[%s8380_s28 + $0x1190] sm:$0xf] }
  0xcd   : > { %v745_v26 = vld [vmem:[%s8380_s28 + $0x11a0] sm:$0xf]  ;;  %v747_v27 = vld [vmem:[%s8380_s28 + $0x11b0] sm:$0xf]  ;;  %744 = vst [vmem:[%s8384_s29 + $0x464] sm:$0xf] %v743_v25 }
  0xce   : > { %746 = vst [vmem:[%s8384_s29 + $0x468] sm:$0xf] %v745_v26  ;;  %748 = vst [vmem:[%s8384_s29 + $0x46c] sm:$0xf] %v747_v27  ;;  %v749_v28 = vld [vmem:[%s8380_s28 + $0x11c0] sm:$0xf] }
  0xcf   : > { %v751_v29 = vld [vmem:[%s8380_s28 + $0x11d0] sm:$0xf]  ;;  %v753_v30 = vld [vmem:[%s8380_s28 + $0x11e0] sm:$0xf]  ;;  %750 = vst [vmem:[%s8384_s29 + $0x470] sm:$0xf] %v749_v28 }
  0xd0   : > { %752 = vst [vmem:[%s8384_s29 + $0x474] sm:$0xf] %v751_v29  ;;  %754 = vst [vmem:[%s8384_s29 + $0x478] sm:$0xf] %v753_v30  ;;  %v755_v31 = vld [vmem:[%s8380_s28 + $0x11f0] sm:$0xf] }
  0xd1   : > { %v757_v32 = vld [vmem:[%s8380_s28 + $0x1200] sm:$0xf]  ;;  %v759_v33 = vld [vmem:[%s8380_s28 + $0x1210] sm:$0xf]  ;;  %756 = vst [vmem:[%s8384_s29 + $0x47c] sm:$0xf] %v755_v31 }
  0xd2   : > { %758 = vst [vmem:[%s8384_s29 + $0x480] sm:$0xf] %v757_v32  ;;  %760 = vst [vmem:[%s8384_s29 + $0x484] sm:$0xf] %v759_v33  ;;  %v761_v34 = vld [vmem:[%s8380_s28 + $0x1220] sm:$0xf] }
  0xd3   : > { %v763_v35 = vld [vmem:[%s8380_s28 + $0x1230] sm:$0xf]  ;;  %v765_v36 = vld [vmem:[%s8380_s28 + $0x1240] sm:$0xf]  ;;  %762 = vst [vmem:[%s8384_s29 + $0x488] sm:$0xf] %v761_v34 }
  0xd4   : > { %764 = vst [vmem:[%s8384_s29 + $0x48c] sm:$0xf] %v763_v35  ;;  %766 = vst [vmem:[%s8384_s29 + $0x490] sm:$0xf] %v765_v36  ;;  %v767_v37 = vld [vmem:[%s8380_s28 + $0x1250] sm:$0xf] }
  0xd5   : > { %v769_v38 = vld [vmem:[%s8380_s28 + $0x1260] sm:$0xf]  ;;  %v771_v39 = vld [vmem:[%s8380_s28 + $0x1270] sm:$0xf]  ;;  %768 = vst [vmem:[%s8384_s29 + $0x494] sm:$0xf] %v767_v37 }
  0xd6   : > { %770 = vst [vmem:[%s8384_s29 + $0x498] sm:$0xf] %v769_v38  ;;  %772 = vst [vmem:[%s8384_s29 + $0x49c] sm:$0xf] %v771_v39  ;;  %v773_v40 = vld [vmem:[%s8380_s28 + $0x1280] sm:$0xf] }
  0xd7   : > { %v775_v41 = vld [vmem:[%s8380_s28 + $0x1290] sm:$0xf]  ;;  %v777_v42 = vld [vmem:[%s8380_s28 + $0x12a0] sm:$0xf]  ;;  %774 = vst [vmem:[%s8384_s29 + $0x4a0] sm:$0xf] %v773_v40 }
  0xd8   : > { %776 = vst [vmem:[%s8384_s29 + $0x4a4] sm:$0xf] %v775_v41  ;;  %778 = vst [vmem:[%s8384_s29 + $0x4a8] sm:$0xf] %v777_v42  ;;  %v779_v43 = vld [vmem:[%s8380_s28 + $0x12b0] sm:$0xf] }
  0xd9   : > { %v781_v44 = vld [vmem:[%s8380_s28 + $0x12c0] sm:$0xf]  ;;  %v783_v45 = vld [vmem:[%s8380_s28 + $0x12d0] sm:$0xf]  ;;  %780 = vst [vmem:[%s8384_s29 + $0x4ac] sm:$0xf] %v779_v43 }
  0xda   : > { %782 = vst [vmem:[%s8384_s29 + $0x4b0] sm:$0xf] %v781_v44  ;;  %784 = vst [vmem:[%s8384_s29 + $0x4b4] sm:$0xf] %v783_v45  ;;  %v785_v46 = vld [vmem:[%s8380_s28 + $0x12e0] sm:$0xf] }
  0xdb   : > { %v787_v47 = vld [vmem:[%s8380_s28 + $0x12f0] sm:$0xf]  ;;  %v789_v48 = vld [vmem:[%s8380_s28 + $0x1300] sm:$0xf]  ;;  %786 = vst [vmem:[%s8384_s29 + $0x4b8] sm:$0xf] %v785_v46 }
  0xdc   : > { %788 = vst [vmem:[%s8384_s29 + $0x4bc] sm:$0xf] %v787_v47  ;;  %790 = vst [vmem:[%s8384_s29 + $0x4c0] sm:$0xf] %v789_v48  ;;  %v791_v49 = vld [vmem:[%s8380_s28 + $0x1310] sm:$0xf] }
  0xdd   : > { %v793_v50 = vld [vmem:[%s8380_s28 + $0x1320] sm:$0xf]  ;;  %v795_v51 = vld [vmem:[%s8380_s28 + $0x1330] sm:$0xf]  ;;  %792 = vst [vmem:[%s8384_s29 + $0x4c4] sm:$0xf] %v791_v49 }
  0xde   : > { %794 = vst [vmem:[%s8384_s29 + $0x4c8] sm:$0xf] %v793_v50  ;;  %796 = vst [vmem:[%s8384_s29 + $0x4cc] sm:$0xf] %v795_v51  ;;  %v797_v52 = vld [vmem:[%s8380_s28 + $0x1340] sm:$0xf] }
  0xdf   : > { %v799_v53 = vld [vmem:[%s8380_s28 + $0x1350] sm:$0xf]  ;;  %v801_v54 = vld [vmem:[%s8380_s28 + $0x1360] sm:$0xf]  ;;  %798 = vst [vmem:[%s8384_s29 + $0x4d0] sm:$0xf] %v797_v52 }
  0xe0   : > { %800 = vst [vmem:[%s8384_s29 + $0x4d4] sm:$0xf] %v799_v53  ;;  %802 = vst [vmem:[%s8384_s29 + $0x4d8] sm:$0xf] %v801_v54  ;;  %v803_v55 = vld [vmem:[%s8380_s28 + $0x1370] sm:$0xf] }
  0xe1   : > { %v805_v56 = vld [vmem:[%s8380_s28 + $0x1380] sm:$0xf]  ;;  %v807_v57 = vld [vmem:[%s8380_s28 + $0x1390] sm:$0xf]  ;;  %804 = vst [vmem:[%s8384_s29 + $0x4dc] sm:$0xf] %v803_v55 }
  0xe2   : > { %806 = vst [vmem:[%s8384_s29 + $0x4e0] sm:$0xf] %v805_v56  ;;  %808 = vst [vmem:[%s8384_s29 + $0x4e4] sm:$0xf] %v807_v57  ;;  %v809_v58 = vld [vmem:[%s8380_s28 + $0x13a0] sm:$0xf] }
  0xe3   : > { %v811_v59 = vld [vmem:[%s8380_s28 + $0x13b0] sm:$0xf]  ;;  %v813_v60 = vld [vmem:[%s8380_s28 + $0x13c0] sm:$0xf]  ;;  %810 = vst [vmem:[%s8384_s29 + $0x4e8] sm:$0xf] %v809_v58 }
  0xe4   : > { %812 = vst [vmem:[%s8384_s29 + $0x4ec] sm:$0xf] %v811_v59  ;;  %814 = vst [vmem:[%s8384_s29 + $0x4f0] sm:$0xf] %v813_v60  ;;  %v815_v61 = vld [vmem:[%s8380_s28 + $0x13d0] sm:$0xf] }
  0xe5   : > { %v817_v62 = vld [vmem:[%s8380_s28 + $0x13e0] sm:$0xf]  ;;  %v819_v63 = vld [vmem:[%s8380_s28 + $0x13f0] sm:$0xf]  ;;  %816 = vst [vmem:[%s8384_s29 + $0x4f4] sm:$0xf] %v815_v61 }
  0xe6   : > { %818 = vst [vmem:[%s8384_s29 + $0x4f8] sm:$0xf] %v817_v62  ;;  %820 = vst [vmem:[%s8384_s29 + $0x4fc] sm:$0xf] %v819_v63  ;;  %v821_v0 = vld [vmem:[%s8380_s28 + $0x1400] sm:$0xf] }
  0xe7   : > { %v823_v1 = vld [vmem:[%s8380_s28 + $0x1410] sm:$0xf]  ;;  %v825_v2 = vld [vmem:[%s8380_s28 + $0x1420] sm:$0xf]  ;;  %822 = vst [vmem:[%s8384_s29 + $0x500] sm:$0xf] %v821_v0 }
  0xe8   : > { %824 = vst [vmem:[%s8384_s29 + $0x504] sm:$0xf] %v823_v1  ;;  %826 = vst [vmem:[%s8384_s29 + $0x508] sm:$0xf] %v825_v2  ;;  %v827_v3 = vld [vmem:[%s8380_s28 + $0x1430] sm:$0xf] }
  0xe9   : > { %v829_v4 = vld [vmem:[%s8380_s28 + $0x1440] sm:$0xf]  ;;  %v831_v5 = vld [vmem:[%s8380_s28 + $0x1450] sm:$0xf]  ;;  %828 = vst [vmem:[%s8384_s29 + $0x50c] sm:$0xf] %v827_v3 }
  0xea   : > { %830 = vst [vmem:[%s8384_s29 + $0x510] sm:$0xf] %v829_v4  ;;  %832 = vst [vmem:[%s8384_s29 + $0x514] sm:$0xf] %v831_v5  ;;  %v833_v6 = vld [vmem:[%s8380_s28 + $0x1460] sm:$0xf] }
  0xeb   : > { %v835_v7 = vld [vmem:[%s8380_s28 + $0x1470] sm:$0xf]  ;;  %v837_v8 = vld [vmem:[%s8380_s28 + $0x1480] sm:$0xf]  ;;  %834 = vst [vmem:[%s8384_s29 + $0x518] sm:$0xf] %v833_v6 }
  0xec   : > { %836 = vst [vmem:[%s8384_s29 + $0x51c] sm:$0xf] %v835_v7  ;;  %838 = vst [vmem:[%s8384_s29 + $0x520] sm:$0xf] %v837_v8  ;;  %v839_v9 = vld [vmem:[%s8380_s28 + $0x1490] sm:$0xf] }
  0xed   : > { %v841_v10 = vld [vmem:[%s8380_s28 + $0x14a0] sm:$0xf]  ;;  %v843_v11 = vld [vmem:[%s8380_s28 + $0x14b0] sm:$0xf]  ;;  %840 = vst [vmem:[%s8384_s29 + $0x524] sm:$0xf] %v839_v9 }
  0xee   : > { %842 = vst [vmem:[%s8384_s29 + $0x528] sm:$0xf] %v841_v10  ;;  %844 = vst [vmem:[%s8384_s29 + $0x52c] sm:$0xf] %v843_v11  ;;  %v845_v12 = vld [vmem:[%s8380_s28 + $0x14c0] sm:$0xf] }
  0xef   : > { %v847_v13 = vld [vmem:[%s8380_s28 + $0x14d0] sm:$0xf]  ;;  %v849_v14 = vld [vmem:[%s8380_s28 + $0x14e0] sm:$0xf]  ;;  %846 = vst [vmem:[%s8384_s29 + $0x530] sm:$0xf] %v845_v12 }
  0xf0   : > { %848 = vst [vmem:[%s8384_s29 + $0x534] sm:$0xf] %v847_v13  ;;  %850 = vst [vmem:[%s8384_s29 + $0x538] sm:$0xf] %v849_v14  ;;  %v851_v15 = vld [vmem:[%s8380_s28 + $0x14f0] sm:$0xf] }
  0xf1   : > { %v853_v16 = vld [vmem:[%s8380_s28 + $0x1500] sm:$0xf]  ;;  %v855_v17 = vld [vmem:[%s8380_s28 + $0x1510] sm:$0xf]  ;;  %852 = vst [vmem:[%s8384_s29 + $0x53c] sm:$0xf] %v851_v15 }
  0xf2   : > { %854 = vst [vmem:[%s8384_s29 + $0x540] sm:$0xf] %v853_v16  ;;  %856 = vst [vmem:[%s8384_s29 + $0x544] sm:$0xf] %v855_v17  ;;  %v857_v18 = vld [vmem:[%s8380_s28 + $0x1520] sm:$0xf] }
  0xf3   : > { %v859_v19 = vld [vmem:[%s8380_s28 + $0x1530] sm:$0xf]  ;;  %v861_v20 = vld [vmem:[%s8380_s28 + $0x1540] sm:$0xf]  ;;  %858 = vst [vmem:[%s8384_s29 + $0x548] sm:$0xf] %v857_v18 }
  0xf4   : > { %860 = vst [vmem:[%s8384_s29 + $0x54c] sm:$0xf] %v859_v19  ;;  %862 = vst [vmem:[%s8384_s29 + $0x550] sm:$0xf] %v861_v20  ;;  %v863_v21 = vld [vmem:[%s8380_s28 + $0x1550] sm:$0xf] }
  0xf5   : > { %v865_v22 = vld [vmem:[%s8380_s28 + $0x1560] sm:$0xf]  ;;  %v867_v23 = vld [vmem:[%s8380_s28 + $0x1570] sm:$0xf]  ;;  %864 = vst [vmem:[%s8384_s29 + $0x554] sm:$0xf] %v863_v21 }
  0xf6   : > { %866 = vst [vmem:[%s8384_s29 + $0x558] sm:$0xf] %v865_v22  ;;  %868 = vst [vmem:[%s8384_s29 + $0x55c] sm:$0xf] %v867_v23  ;;  %v869_v24 = vld [vmem:[%s8380_s28 + $0x1580] sm:$0xf] }
  0xf7   : > { %v871_v25 = vld [vmem:[%s8380_s28 + $0x1590] sm:$0xf]  ;;  %v873_v26 = vld [vmem:[%s8380_s28 + $0x15a0] sm:$0xf]  ;;  %870 = vst [vmem:[%s8384_s29 + $0x560] sm:$0xf] %v869_v24 }
  0xf8   : > { %872 = vst [vmem:[%s8384_s29 + $0x564] sm:$0xf] %v871_v25  ;;  %874 = vst [vmem:[%s8384_s29 + $0x568] sm:$0xf] %v873_v26  ;;  %v875_v27 = vld [vmem:[%s8380_s28 + $0x15b0] sm:$0xf] }
  0xf9   : > { %v877_v28 = vld [vmem:[%s8380_s28 + $0x15c0] sm:$0xf]  ;;  %v879_v29 = vld [vmem:[%s8380_s28 + $0x15d0] sm:$0xf]  ;;  %876 = vst [vmem:[%s8384_s29 + $0x56c] sm:$0xf] %v875_v27 }
  0xfa   : > { %878 = vst [vmem:[%s8384_s29 + $0x570] sm:$0xf] %v877_v28  ;;  %880 = vst [vmem:[%s8384_s29 + $0x574] sm:$0xf] %v879_v29  ;;  %v881_v30 = vld [vmem:[%s8380_s28 + $0x15e0] sm:$0xf] }
  0xfb   : > { %v883_v31 = vld [vmem:[%s8380_s28 + $0x15f0] sm:$0xf]  ;;  %v885_v32 = vld [vmem:[%s8380_s28 + $0x1600] sm:$0xf]  ;;  %882 = vst [vmem:[%s8384_s29 + $0x578] sm:$0xf] %v881_v30 }
  0xfc   : > { %884 = vst [vmem:[%s8384_s29 + $0x57c] sm:$0xf] %v883_v31  ;;  %886 = vst [vmem:[%s8384_s29 + $0x580] sm:$0xf] %v885_v32  ;;  %v887_v33 = vld [vmem:[%s8380_s28 + $0x1610] sm:$0xf] }
  0xfd   : > { %v889_v34 = vld [vmem:[%s8380_s28 + $0x1620] sm:$0xf]  ;;  %v891_v35 = vld [vmem:[%s8380_s28 + $0x1630] sm:$0xf]  ;;  %888 = vst [vmem:[%s8384_s29 + $0x584] sm:$0xf] %v887_v33 }
  0xfe   : > { %890 = vst [vmem:[%s8384_s29 + $0x588] sm:$0xf] %v889_v34  ;;  %892 = vst [vmem:[%s8384_s29 + $0x58c] sm:$0xf] %v891_v35  ;;  %v893_v36 = vld [vmem:[%s8380_s28 + $0x1640] sm:$0xf] }
  0xff   : > { %v895_v37 = vld [vmem:[%s8380_s28 + $0x1650] sm:$0xf]  ;;  %v897_v38 = vld [vmem:[%s8380_s28 + $0x1660] sm:$0xf]  ;;  %894 = vst [vmem:[%s8384_s29 + $0x590] sm:$0xf] %v893_v36 }
 0x100   : > { %896 = vst [vmem:[%s8384_s29 + $0x594] sm:$0xf] %v895_v37  ;;  %898 = vst [vmem:[%s8384_s29 + $0x598] sm:$0xf] %v897_v38  ;;  %v899_v39 = vld [vmem:[%s8380_s28 + $0x1670] sm:$0xf] }
 0x101   : > { %v901_v40 = vld [vmem:[%s8380_s28 + $0x1680] sm:$0xf]  ;;  %v903_v41 = vld [vmem:[%s8380_s28 + $0x1690] sm:$0xf]  ;;  %900 = vst [vmem:[%s8384_s29 + $0x59c] sm:$0xf] %v899_v39 }
 0x102   : > { %902 = vst [vmem:[%s8384_s29 + $0x5a0] sm:$0xf] %v901_v40  ;;  %904 = vst [vmem:[%s8384_s29 + $0x5a4] sm:$0xf] %v903_v41  ;;  %v905_v42 = vld [vmem:[%s8380_s28 + $0x16a0] sm:$0xf] }
 0x103   : > { %v907_v43 = vld [vmem:[%s8380_s28 + $0x16b0] sm:$0xf]  ;;  %v909_v44 = vld [vmem:[%s8380_s28 + $0x16c0] sm:$0xf]  ;;  %906 = vst [vmem:[%s8384_s29 + $0x5a8] sm:$0xf] %v905_v42 }
 0x104   : > { %908 = vst [vmem:[%s8384_s29 + $0x5ac] sm:$0xf] %v907_v43  ;;  %910 = vst [vmem:[%s8384_s29 + $0x5b0] sm:$0xf] %v909_v44  ;;  %v911_v45 = vld [vmem:[%s8380_s28 + $0x16d0] sm:$0xf] }
 0x105   : > { %v913_v46 = vld [vmem:[%s8380_s28 + $0x16e0] sm:$0xf]  ;;  %v915_v47 = vld [vmem:[%s8380_s28 + $0x16f0] sm:$0xf]  ;;  %912 = vst [vmem:[%s8384_s29 + $0x5b4] sm:$0xf] %v911_v45 }
 0x106   : > { %914 = vst [vmem:[%s8384_s29 + $0x5b8] sm:$0xf] %v913_v46  ;;  %916 = vst [vmem:[%s8384_s29 + $0x5bc] sm:$0xf] %v915_v47  ;;  %v917_v48 = vld [vmem:[%s8380_s28 + $0x1700] sm:$0xf] }
 0x107   : > { %v919_v49 = vld [vmem:[%s8380_s28 + $0x1710] sm:$0xf]  ;;  %v921_v50 = vld [vmem:[%s8380_s28 + $0x1720] sm:$0xf]  ;;  %918 = vst [vmem:[%s8384_s29 + $0x5c0] sm:$0xf] %v917_v48 }
 0x108   : > { %920 = vst [vmem:[%s8384_s29 + $0x5c4] sm:$0xf] %v919_v49  ;;  %922 = vst [vmem:[%s8384_s29 + $0x5c8] sm:$0xf] %v921_v50  ;;  %v923_v51 = vld [vmem:[%s8380_s28 + $0x1730] sm:$0xf] }
 0x109   : > { %v925_v52 = vld [vmem:[%s8380_s28 + $0x1740] sm:$0xf]  ;;  %v927_v53 = vld [vmem:[%s8380_s28 + $0x1750] sm:$0xf]  ;;  %924 = vst [vmem:[%s8384_s29 + $0x5cc] sm:$0xf] %v923_v51 }
 0x10a   : > { %926 = vst [vmem:[%s8384_s29 + $0x5d0] sm:$0xf] %v925_v52  ;;  %928 = vst [vmem:[%s8384_s29 + $0x5d4] sm:$0xf] %v927_v53  ;;  %v929_v54 = vld [vmem:[%s8380_s28 + $0x1760] sm:$0xf] }
 0x10b   : > { %v931_v55 = vld [vmem:[%s8380_s28 + $0x1770] sm:$0xf]  ;;  %v933_v56 = vld [vmem:[%s8380_s28 + $0x1780] sm:$0xf]  ;;  %930 = vst [vmem:[%s8384_s29 + $0x5d8] sm:$0xf] %v929_v54 }
 0x10c   : > { %932 = vst [vmem:[%s8384_s29 + $0x5dc] sm:$0xf] %v931_v55  ;;  %934 = vst [vmem:[%s8384_s29 + $0x5e0] sm:$0xf] %v933_v56  ;;  %v935_v57 = vld [vmem:[%s8380_s28 + $0x1790] sm:$0xf] }
 0x10d   : > { %v937_v58 = vld [vmem:[%s8380_s28 + $0x17a0] sm:$0xf]  ;;  %v939_v59 = vld [vmem:[%s8380_s28 + $0x17b0] sm:$0xf]  ;;  %936 = vst [vmem:[%s8384_s29 + $0x5e4] sm:$0xf] %v935_v57 }
 0x10e   : > { %938 = vst [vmem:[%s8384_s29 + $0x5e8] sm:$0xf] %v937_v58  ;;  %940 = vst [vmem:[%s8384_s29 + $0x5ec] sm:$0xf] %v939_v59  ;;  %v941_v60 = vld [vmem:[%s8380_s28 + $0x17c0] sm:$0xf] }
 0x10f   : > { %v943_v61 = vld [vmem:[%s8380_s28 + $0x17d0] sm:$0xf]  ;;  %v945_v62 = vld [vmem:[%s8380_s28 + $0x17e0] sm:$0xf]  ;;  %942 = vst [vmem:[%s8384_s29 + $0x5f0] sm:$0xf] %v941_v60 }
 0x110   : > { %944 = vst [vmem:[%s8384_s29 + $0x5f4] sm:$0xf] %v943_v61  ;;  %946 = vst [vmem:[%s8384_s29 + $0x5f8] sm:$0xf] %v945_v62  ;;  %v947_v63 = vld [vmem:[%s8380_s28 + $0x17f0] sm:$0xf] }
 0x111   : > { %v949_v0 = vld [vmem:[%s8380_s28 + $0x1800] sm:$0xf]  ;;  %v951_v1 = vld [vmem:[%s8380_s28 + $0x1810] sm:$0xf]  ;;  %948 = vst [vmem:[%s8384_s29 + $0x5fc] sm:$0xf] %v947_v63 }
 0x112   : > { %950 = vst [vmem:[%s8384_s29 + $0x600] sm:$0xf] %v949_v0  ;;  %952 = vst [vmem:[%s8384_s29 + $0x604] sm:$0xf] %v951_v1  ;;  %v953_v2 = vld [vmem:[%s8380_s28 + $0x1820] sm:$0xf] }
 0x113   : > { %v955_v3 = vld [vmem:[%s8380_s28 + $0x1830] sm:$0xf]  ;;  %v957_v4 = vld [vmem:[%s8380_s28 + $0x1840] sm:$0xf]  ;;  %954 = vst [vmem:[%s8384_s29 + $0x608] sm:$0xf] %v953_v2 }
 0x114   : > { %956 = vst [vmem:[%s8384_s29 + $0x60c] sm:$0xf] %v955_v3  ;;  %958 = vst [vmem:[%s8384_s29 + $0x610] sm:$0xf] %v957_v4  ;;  %v959_v5 = vld [vmem:[%s8380_s28 + $0x1850] sm:$0xf] }
 0x115   : > { %v961_v6 = vld [vmem:[%s8380_s28 + $0x1860] sm:$0xf]  ;;  %v963_v7 = vld [vmem:[%s8380_s28 + $0x1870] sm:$0xf]  ;;  %960 = vst [vmem:[%s8384_s29 + $0x614] sm:$0xf] %v959_v5 }
 0x116   : > { %962 = vst [vmem:[%s8384_s29 + $0x618] sm:$0xf] %v961_v6  ;;  %964 = vst [vmem:[%s8384_s29 + $0x61c] sm:$0xf] %v963_v7  ;;  %v965_v8 = vld [vmem:[%s8380_s28 + $0x1880] sm:$0xf] }
 0x117   : > { %v967_v9 = vld [vmem:[%s8380_s28 + $0x1890] sm:$0xf]  ;;  %v969_v10 = vld [vmem:[%s8380_s28 + $0x18a0] sm:$0xf]  ;;  %966 = vst [vmem:[%s8384_s29 + $0x620] sm:$0xf] %v965_v8 }
 0x118   : > { %968 = vst [vmem:[%s8384_s29 + $0x624] sm:$0xf] %v967_v9  ;;  %970 = vst [vmem:[%s8384_s29 + $0x628] sm:$0xf] %v969_v10  ;;  %v971_v11 = vld [vmem:[%s8380_s28 + $0x18b0] sm:$0xf] }
 0x119   : > { %v973_v12 = vld [vmem:[%s8380_s28 + $0x18c0] sm:$0xf]  ;;  %v975_v13 = vld [vmem:[%s8380_s28 + $0x18d0] sm:$0xf]  ;;  %972 = vst [vmem:[%s8384_s29 + $0x62c] sm:$0xf] %v971_v11 }
 0x11a   : > { %974 = vst [vmem:[%s8384_s29 + $0x630] sm:$0xf] %v973_v12  ;;  %976 = vst [vmem:[%s8384_s29 + $0x634] sm:$0xf] %v975_v13  ;;  %v977_v14 = vld [vmem:[%s8380_s28 + $0x18e0] sm:$0xf] }
 0x11b   : > { %v979_v15 = vld [vmem:[%s8380_s28 + $0x18f0] sm:$0xf]  ;;  %v981_v16 = vld [vmem:[%s8380_s28 + $0x1900] sm:$0xf]  ;;  %978 = vst [vmem:[%s8384_s29 + $0x638] sm:$0xf] %v977_v14 }
 0x11c   : > { %980 = vst [vmem:[%s8384_s29 + $0x63c] sm:$0xf] %v979_v15  ;;  %982 = vst [vmem:[%s8384_s29 + $0x640] sm:$0xf] %v981_v16  ;;  %v983_v17 = vld [vmem:[%s8380_s28 + $0x1910] sm:$0xf] }
 0x11d   : > { %v985_v18 = vld [vmem:[%s8380_s28 + $0x1920] sm:$0xf]  ;;  %v987_v19 = vld [vmem:[%s8380_s28 + $0x1930] sm:$0xf]  ;;  %984 = vst [vmem:[%s8384_s29 + $0x644] sm:$0xf] %v983_v17 }
 0x11e   : > { %986 = vst [vmem:[%s8384_s29 + $0x648] sm:$0xf] %v985_v18  ;;  %988 = vst [vmem:[%s8384_s29 + $0x64c] sm:$0xf] %v987_v19  ;;  %v989_v20 = vld [vmem:[%s8380_s28 + $0x1940] sm:$0xf] }
 0x11f   : > { %v991_v21 = vld [vmem:[%s8380_s28 + $0x1950] sm:$0xf]  ;;  %v993_v22 = vld [vmem:[%s8380_s28 + $0x1960] sm:$0xf]  ;;  %990 = vst [vmem:[%s8384_s29 + $0x650] sm:$0xf] %v989_v20 }
 0x120   : > { %992 = vst [vmem:[%s8384_s29 + $0x654] sm:$0xf] %v991_v21  ;;  %994 = vst [vmem:[%s8384_s29 + $0x658] sm:$0xf] %v993_v22  ;;  %v995_v23 = vld [vmem:[%s8380_s28 + $0x1970] sm:$0xf] }
 0x121   : > { %v997_v24 = vld [vmem:[%s8380_s28 + $0x1980] sm:$0xf]  ;;  %v999_v25 = vld [vmem:[%s8380_s28 + $0x1990] sm:$0xf]  ;;  %996 = vst [vmem:[%s8384_s29 + $0x65c] sm:$0xf] %v995_v23 }
 0x122   : > { %998 = vst [vmem:[%s8384_s29 + $0x660] sm:$0xf] %v997_v24  ;;  %1000 = vst [vmem:[%s8384_s29 + $0x664] sm:$0xf] %v999_v25  ;;  %v1001_v26 = vld [vmem:[%s8380_s28 + $0x19a0] sm:$0xf] }
 0x123   : > { %v1003_v27 = vld [vmem:[%s8380_s28 + $0x19b0] sm:$0xf]  ;;  %v1005_v28 = vld [vmem:[%s8380_s28 + $0x19c0] sm:$0xf]  ;;  %1002 = vst [vmem:[%s8384_s29 + $0x668] sm:$0xf] %v1001_v26 }
 0x124   : > { %1004 = vst [vmem:[%s8384_s29 + $0x66c] sm:$0xf] %v1003_v27  ;;  %1006 = vst [vmem:[%s8384_s29 + $0x670] sm:$0xf] %v1005_v28  ;;  %v1007_v29 = vld [vmem:[%s8380_s28 + $0x19d0] sm:$0xf] }
 0x125   : > { %v1009_v30 = vld [vmem:[%s8380_s28 + $0x19e0] sm:$0xf]  ;;  %v1011_v31 = vld [vmem:[%s8380_s28 + $0x19f0] sm:$0xf]  ;;  %1008 = vst [vmem:[%s8384_s29 + $0x674] sm:$0xf] %v1007_v29 }
 0x126   : > { %1010 = vst [vmem:[%s8384_s29 + $0x678] sm:$0xf] %v1009_v30  ;;  %1012 = vst [vmem:[%s8384_s29 + $0x67c] sm:$0xf] %v1011_v31  ;;  %v1013_v32 = vld [vmem:[%s8380_s28 + $0x1a00] sm:$0xf] }
 0x127   : > { %v1015_v33 = vld [vmem:[%s8380_s28 + $0x1a10] sm:$0xf]  ;;  %v1017_v34 = vld [vmem:[%s8380_s28 + $0x1a20] sm:$0xf]  ;;  %1014 = vst [vmem:[%s8384_s29 + $0x680] sm:$0xf] %v1013_v32 }
 0x128   : > { %1016 = vst [vmem:[%s8384_s29 + $0x684] sm:$0xf] %v1015_v33  ;;  %1018 = vst [vmem:[%s8384_s29 + $0x688] sm:$0xf] %v1017_v34  ;;  %v1019_v35 = vld [vmem:[%s8380_s28 + $0x1a30] sm:$0xf] }
 0x129   : > { %v1021_v36 = vld [vmem:[%s8380_s28 + $0x1a40] sm:$0xf]  ;;  %v1023_v37 = vld [vmem:[%s8380_s28 + $0x1a50] sm:$0xf]  ;;  %1020 = vst [vmem:[%s8384_s29 + $0x68c] sm:$0xf] %v1019_v35 }
 0x12a   : > { %1022 = vst [vmem:[%s8384_s29 + $0x690] sm:$0xf] %v1021_v36  ;;  %1024 = vst [vmem:[%s8384_s29 + $0x694] sm:$0xf] %v1023_v37  ;;  %v1025_v38 = vld [vmem:[%s8380_s28 + $0x1a60] sm:$0xf] }
 0x12b   : > { %v1027_v39 = vld [vmem:[%s8380_s28 + $0x1a70] sm:$0xf]  ;;  %v1029_v40 = vld [vmem:[%s8380_s28 + $0x1a80] sm:$0xf]  ;;  %1026 = vst [vmem:[%s8384_s29 + $0x698] sm:$0xf] %v1025_v38 }
 0x12c   : > { %1028 = vst [vmem:[%s8384_s29 + $0x69c] sm:$0xf] %v1027_v39  ;;  %1030 = vst [vmem:[%s8384_s29 + $0x6a0] sm:$0xf] %v1029_v40  ;;  %v1031_v41 = vld [vmem:[%s8380_s28 + $0x1a90] sm:$0xf] }
 0x12d   : > { %v1033_v42 = vld [vmem:[%s8380_s28 + $0x1aa0] sm:$0xf]  ;;  %v1035_v43 = vld [vmem:[%s8380_s28 + $0x1ab0] sm:$0xf]  ;;  %1032 = vst [vmem:[%s8384_s29 + $0x6a4] sm:$0xf] %v1031_v41 }
 0x12e   : > { %1034 = vst [vmem:[%s8384_s29 + $0x6a8] sm:$0xf] %v1033_v42  ;;  %1036 = vst [vmem:[%s8384_s29 + $0x6ac] sm:$0xf] %v1035_v43  ;;  %v1037_v44 = vld [vmem:[%s8380_s28 + $0x1ac0] sm:$0xf] }
 0x12f   : > { %v1039_v45 = vld [vmem:[%s8380_s28 + $0x1ad0] sm:$0xf]  ;;  %v1041_v46 = vld [vmem:[%s8380_s28 + $0x1ae0] sm:$0xf]  ;;  %1038 = vst [vmem:[%s8384_s29 + $0x6b0] sm:$0xf] %v1037_v44 }
 0x130   : > { %1040 = vst [vmem:[%s8384_s29 + $0x6b4] sm:$0xf] %v1039_v45  ;;  %1042 = vst [vmem:[%s8384_s29 + $0x6b8] sm:$0xf] %v1041_v46  ;;  %v1043_v47 = vld [vmem:[%s8380_s28 + $0x1af0] sm:$0xf] }
 0x131   : > { %v1045_v48 = vld [vmem:[%s8380_s28 + $0x1b00] sm:$0xf]  ;;  %v1047_v49 = vld [vmem:[%s8380_s28 + $0x1b10] sm:$0xf]  ;;  %1044 = vst [vmem:[%s8384_s29 + $0x6bc] sm:$0xf] %v1043_v47 }
 0x132   : > { %1046 = vst [vmem:[%s8384_s29 + $0x6c0] sm:$0xf] %v1045_v48  ;;  %1048 = vst [vmem:[%s8384_s29 + $0x6c4] sm:$0xf] %v1047_v49  ;;  %v1049_v50 = vld [vmem:[%s8380_s28 + $0x1b20] sm:$0xf] }
 0x133   : > { %v1051_v51 = vld [vmem:[%s8380_s28 + $0x1b30] sm:$0xf]  ;;  %v1053_v52 = vld [vmem:[%s8380_s28 + $0x1b40] sm:$0xf]  ;;  %1050 = vst [vmem:[%s8384_s29 + $0x6c8] sm:$0xf] %v1049_v50 }
 0x134   : > { %1052 = vst [vmem:[%s8384_s29 + $0x6cc] sm:$0xf] %v1051_v51  ;;  %1054 = vst [vmem:[%s8384_s29 + $0x6d0] sm:$0xf] %v1053_v52  ;;  %v1055_v53 = vld [vmem:[%s8380_s28 + $0x1b50] sm:$0xf] }
 0x135   : > { %v1057_v54 = vld [vmem:[%s8380_s28 + $0x1b60] sm:$0xf]  ;;  %v1059_v55 = vld [vmem:[%s8380_s28 + $0x1b70] sm:$0xf]  ;;  %1056 = vst [vmem:[%s8384_s29 + $0x6d4] sm:$0xf] %v1055_v53 }
 0x136   : > { %1058 = vst [vmem:[%s8384_s29 + $0x6d8] sm:$0xf] %v1057_v54  ;;  %1060 = vst [vmem:[%s8384_s29 + $0x6dc] sm:$0xf] %v1059_v55  ;;  %v1061_v56 = vld [vmem:[%s8380_s28 + $0x1b80] sm:$0xf] }
 0x137   : > { %v1063_v57 = vld [vmem:[%s8380_s28 + $0x1b90] sm:$0xf]  ;;  %v1065_v58 = vld [vmem:[%s8380_s28 + $0x1ba0] sm:$0xf]  ;;  %1062 = vst [vmem:[%s8384_s29 + $0x6e0] sm:$0xf] %v1061_v56 }
 0x138   : > { %1064 = vst [vmem:[%s8384_s29 + $0x6e4] sm:$0xf] %v1063_v57  ;;  %1066 = vst [vmem:[%s8384_s29 + $0x6e8] sm:$0xf] %v1065_v58  ;;  %v1067_v59 = vld [vmem:[%s8380_s28 + $0x1bb0] sm:$0xf] }
 0x139   : > { %v1069_v60 = vld [vmem:[%s8380_s28 + $0x1bc0] sm:$0xf]  ;;  %v1071_v61 = vld [vmem:[%s8380_s28 + $0x1bd0] sm:$0xf]  ;;  %1068 = vst [vmem:[%s8384_s29 + $0x6ec] sm:$0xf] %v1067_v59 }
 0x13a   : > { %1070 = vst [vmem:[%s8384_s29 + $0x6f0] sm:$0xf] %v1069_v60  ;;  %1072 = vst [vmem:[%s8384_s29 + $0x6f4] sm:$0xf] %v1071_v61  ;;  %v1073_v62 = vld [vmem:[%s8380_s28 + $0x1be0] sm:$0xf] }
 0x13b   : > { %v1075_v63 = vld [vmem:[%s8380_s28 + $0x1bf0] sm:$0xf]  ;;  %v1077_v0 = vld [vmem:[%s8380_s28 + $0x1c00] sm:$0xf]  ;;  %1074 = vst [vmem:[%s8384_s29 + $0x6f8] sm:$0xf] %v1073_v62 }
 0x13c   : > { %1076 = vst [vmem:[%s8384_s29 + $0x6fc] sm:$0xf] %v1075_v63  ;;  %1078 = vst [vmem:[%s8384_s29 + $0x700] sm:$0xf] %v1077_v0  ;;  %v1079_v1 = vld [vmem:[%s8380_s28 + $0x1c10] sm:$0xf] }
 0x13d   : > { %v1081_v2 = vld [vmem:[%s8380_s28 + $0x1c20] sm:$0xf]  ;;  %v1083_v3 = vld [vmem:[%s8380_s28 + $0x1c30] sm:$0xf]  ;;  %1080 = vst [vmem:[%s8384_s29 + $0x704] sm:$0xf] %v1079_v1 }
 0x13e   : > { %1082 = vst [vmem:[%s8384_s29 + $0x708] sm:$0xf] %v1081_v2  ;;  %1084 = vst [vmem:[%s8384_s29 + $0x70c] sm:$0xf] %v1083_v3  ;;  %v1085_v4 = vld [vmem:[%s8380_s28 + $0x1c40] sm:$0xf] }
 0x13f   : > { %v1087_v5 = vld [vmem:[%s8380_s28 + $0x1c50] sm:$0xf]  ;;  %v1089_v6 = vld [vmem:[%s8380_s28 + $0x1c60] sm:$0xf]  ;;  %1086 = vst [vmem:[%s8384_s29 + $0x710] sm:$0xf] %v1085_v4 }
 0x140   : > { %1088 = vst [vmem:[%s8384_s29 + $0x714] sm:$0xf] %v1087_v5  ;;  %1090 = vst [vmem:[%s8384_s29 + $0x718] sm:$0xf] %v1089_v6  ;;  %v1091_v7 = vld [vmem:[%s8380_s28 + $0x1c70] sm:$0xf] }
 0x141   : > { %v1093_v8 = vld [vmem:[%s8380_s28 + $0x1c80] sm:$0xf]  ;;  %v1095_v9 = vld [vmem:[%s8380_s28 + $0x1c90] sm:$0xf]  ;;  %1092 = vst [vmem:[%s8384_s29 + $0x71c] sm:$0xf] %v1091_v7 }
 0x142   : > { %1094 = vst [vmem:[%s8384_s29 + $0x720] sm:$0xf] %v1093_v8  ;;  %1096 = vst [vmem:[%s8384_s29 + $0x724] sm:$0xf] %v1095_v9  ;;  %v1097_v10 = vld [vmem:[%s8380_s28 + $0x1ca0] sm:$0xf] }
 0x143   : > { %v1099_v11 = vld [vmem:[%s8380_s28 + $0x1cb0] sm:$0xf]  ;;  %v1101_v12 = vld [vmem:[%s8380_s28 + $0x1cc0] sm:$0xf]  ;;  %1098 = vst [vmem:[%s8384_s29 + $0x728] sm:$0xf] %v1097_v10 }
 0x144   : > { %1100 = vst [vmem:[%s8384_s29 + $0x72c] sm:$0xf] %v1099_v11  ;;  %1102 = vst [vmem:[%s8384_s29 + $0x730] sm:$0xf] %v1101_v12  ;;  %v1103_v13 = vld [vmem:[%s8380_s28 + $0x1cd0] sm:$0xf] }
 0x145   : > { %v1105_v14 = vld [vmem:[%s8380_s28 + $0x1ce0] sm:$0xf]  ;;  %v1107_v15 = vld [vmem:[%s8380_s28 + $0x1cf0] sm:$0xf]  ;;  %1104 = vst [vmem:[%s8384_s29 + $0x734] sm:$0xf] %v1103_v13 }
 0x146   : > { %1106 = vst [vmem:[%s8384_s29 + $0x738] sm:$0xf] %v1105_v14  ;;  %1108 = vst [vmem:[%s8384_s29 + $0x73c] sm:$0xf] %v1107_v15  ;;  %v1109_v16 = vld [vmem:[%s8380_s28 + $0x1d00] sm:$0xf] }
 0x147   : > { %v1111_v17 = vld [vmem:[%s8380_s28 + $0x1d10] sm:$0xf]  ;;  %v1113_v18 = vld [vmem:[%s8380_s28 + $0x1d20] sm:$0xf]  ;;  %1110 = vst [vmem:[%s8384_s29 + $0x740] sm:$0xf] %v1109_v16 }
 0x148   : > { %1112 = vst [vmem:[%s8384_s29 + $0x744] sm:$0xf] %v1111_v17  ;;  %1114 = vst [vmem:[%s8384_s29 + $0x748] sm:$0xf] %v1113_v18  ;;  %v1115_v19 = vld [vmem:[%s8380_s28 + $0x1d30] sm:$0xf] }
 0x149   : > { %v1117_v20 = vld [vmem:[%s8380_s28 + $0x1d40] sm:$0xf]  ;;  %v1119_v21 = vld [vmem:[%s8380_s28 + $0x1d50] sm:$0xf]  ;;  %1116 = vst [vmem:[%s8384_s29 + $0x74c] sm:$0xf] %v1115_v19 }
 0x14a   : > { %1118 = vst [vmem:[%s8384_s29 + $0x750] sm:$0xf] %v1117_v20  ;;  %1120 = vst [vmem:[%s8384_s29 + $0x754] sm:$0xf] %v1119_v21  ;;  %v1121_v22 = vld [vmem:[%s8380_s28 + $0x1d60] sm:$0xf] }
 0x14b   : > { %v1123_v23 = vld [vmem:[%s8380_s28 + $0x1d70] sm:$0xf]  ;;  %v1125_v24 = vld [vmem:[%s8380_s28 + $0x1d80] sm:$0xf]  ;;  %1122 = vst [vmem:[%s8384_s29 + $0x758] sm:$0xf] %v1121_v22 }
 0x14c   : > { %1124 = vst [vmem:[%s8384_s29 + $0x75c] sm:$0xf] %v1123_v23  ;;  %1126 = vst [vmem:[%s8384_s29 + $0x760] sm:$0xf] %v1125_v24  ;;  %v1127_v25 = vld [vmem:[%s8380_s28 + $0x1d90] sm:$0xf] }
 0x14d   : > { %v1129_v26 = vld [vmem:[%s8380_s28 + $0x1da0] sm:$0xf]  ;;  %v1131_v27 = vld [vmem:[%s8380_s28 + $0x1db0] sm:$0xf]  ;;  %1128 = vst [vmem:[%s8384_s29 + $0x764] sm:$0xf] %v1127_v25 }
 0x14e   : > { %1130 = vst [vmem:[%s8384_s29 + $0x768] sm:$0xf] %v1129_v26  ;;  %1132 = vst [vmem:[%s8384_s29 + $0x76c] sm:$0xf] %v1131_v27  ;;  %v1133_v28 = vld [vmem:[%s8380_s28 + $0x1dc0] sm:$0xf] }
 0x14f   : > { %v1135_v29 = vld [vmem:[%s8380_s28 + $0x1dd0] sm:$0xf]  ;;  %v1137_v30 = vld [vmem:[%s8380_s28 + $0x1de0] sm:$0xf]  ;;  %1134 = vst [vmem:[%s8384_s29 + $0x770] sm:$0xf] %v1133_v28 }
 0x150   : > { %1136 = vst [vmem:[%s8384_s29 + $0x774] sm:$0xf] %v1135_v29  ;;  %1138 = vst [vmem:[%s8384_s29 + $0x778] sm:$0xf] %v1137_v30  ;;  %v1139_v31 = vld [vmem:[%s8380_s28 + $0x1df0] sm:$0xf] }
 0x151   : > { %v1141_v32 = vld [vmem:[%s8380_s28 + $0x1e00] sm:$0xf]  ;;  %v1143_v33 = vld [vmem:[%s8380_s28 + $0x1e10] sm:$0xf]  ;;  %1140 = vst [vmem:[%s8384_s29 + $0x77c] sm:$0xf] %v1139_v31 }
 0x152   : > { %1142 = vst [vmem:[%s8384_s29 + $0x780] sm:$0xf] %v1141_v32  ;;  %1144 = vst [vmem:[%s8384_s29 + $0x784] sm:$0xf] %v1143_v33  ;;  %v1145_v34 = vld [vmem:[%s8380_s28 + $0x1e20] sm:$0xf] }
 0x153   : > { %v1147_v35 = vld [vmem:[%s8380_s28 + $0x1e30] sm:$0xf]  ;;  %v1149_v36 = vld [vmem:[%s8380_s28 + $0x1e40] sm:$0xf]  ;;  %1146 = vst [vmem:[%s8384_s29 + $0x788] sm:$0xf] %v1145_v34 }
 0x154   : > { %1148 = vst [vmem:[%s8384_s29 + $0x78c] sm:$0xf] %v1147_v35  ;;  %1150 = vst [vmem:[%s8384_s29 + $0x790] sm:$0xf] %v1149_v36  ;;  %v1151_v37 = vld [vmem:[%s8380_s28 + $0x1e50] sm:$0xf] }
 0x155   : > { %v1153_v38 = vld [vmem:[%s8380_s28 + $0x1e60] sm:$0xf]  ;;  %v1155_v39 = vld [vmem:[%s8380_s28 + $0x1e70] sm:$0xf]  ;;  %1152 = vst [vmem:[%s8384_s29 + $0x794] sm:$0xf] %v1151_v37 }
 0x156   : > { %1154 = vst [vmem:[%s8384_s29 + $0x798] sm:$0xf] %v1153_v38  ;;  %1156 = vst [vmem:[%s8384_s29 + $0x79c] sm:$0xf] %v1155_v39  ;;  %v1157_v40 = vld [vmem:[%s8380_s28 + $0x1e80] sm:$0xf] }
 0x157   : > { %v1159_v41 = vld [vmem:[%s8380_s28 + $0x1e90] sm:$0xf]  ;;  %v1161_v42 = vld [vmem:[%s8380_s28 + $0x1ea0] sm:$0xf]  ;;  %1158 = vst [vmem:[%s8384_s29 + $0x7a0] sm:$0xf] %v1157_v40 }
 0x158   : > { %1160 = vst [vmem:[%s8384_s29 + $0x7a4] sm:$0xf] %v1159_v41  ;;  %1162 = vst [vmem:[%s8384_s29 + $0x7a8] sm:$0xf] %v1161_v42  ;;  %v1163_v43 = vld [vmem:[%s8380_s28 + $0x1eb0] sm:$0xf] }
 0x159   : > { %v1165_v44 = vld [vmem:[%s8380_s28 + $0x1ec0] sm:$0xf]  ;;  %v1167_v45 = vld [vmem:[%s8380_s28 + $0x1ed0] sm:$0xf]  ;;  %1164 = vst [vmem:[%s8384_s29 + $0x7ac] sm:$0xf] %v1163_v43 }
 0x15a   : > { %1166 = vst [vmem:[%s8384_s29 + $0x7b0] sm:$0xf] %v1165_v44  ;;  %1168 = vst [vmem:[%s8384_s29 + $0x7b4] sm:$0xf] %v1167_v45  ;;  %v1169_v46 = vld [vmem:[%s8380_s28 + $0x1ee0] sm:$0xf] }
 0x15b   : > { %v1171_v47 = vld [vmem:[%s8380_s28 + $0x1ef0] sm:$0xf]  ;;  %v1173_v48 = vld [vmem:[%s8380_s28 + $0x1f00] sm:$0xf]  ;;  %1170 = vst [vmem:[%s8384_s29 + $0x7b8] sm:$0xf] %v1169_v46 }
 0x15c   : > { %1172 = vst [vmem:[%s8384_s29 + $0x7bc] sm:$0xf] %v1171_v47  ;;  %1174 = vst [vmem:[%s8384_s29 + $0x7c0] sm:$0xf] %v1173_v48  ;;  %v1175_v49 = vld [vmem:[%s8380_s28 + $0x1f10] sm:$0xf] }
 0x15d   : > { %v1177_v50 = vld [vmem:[%s8380_s28 + $0x1f20] sm:$0xf]  ;;  %v1179_v51 = vld [vmem:[%s8380_s28 + $0x1f30] sm:$0xf]  ;;  %1176 = vst [vmem:[%s8384_s29 + $0x7c4] sm:$0xf] %v1175_v49 }
 0x15e   : > { %1178 = vst [vmem:[%s8384_s29 + $0x7c8] sm:$0xf] %v1177_v50  ;;  %1180 = vst [vmem:[%s8384_s29 + $0x7cc] sm:$0xf] %v1179_v51  ;;  %v1181_v52 = vld [vmem:[%s8380_s28 + $0x1f40] sm:$0xf] }
 0x15f   : > { %v1183_v53 = vld [vmem:[%s8380_s28 + $0x1f50] sm:$0xf]  ;;  %v1185_v54 = vld [vmem:[%s8380_s28 + $0x1f60] sm:$0xf]  ;;  %1182 = vst [vmem:[%s8384_s29 + $0x7d0] sm:$0xf] %v1181_v52 }
 0x160   : > { %1184 = vst [vmem:[%s8384_s29 + $0x7d4] sm:$0xf] %v1183_v53  ;;  %1186 = vst [vmem:[%s8384_s29 + $0x7d8] sm:$0xf] %v1185_v54  ;;  %v1187_v55 = vld [vmem:[%s8380_s28 + $0x1f70] sm:$0xf] }
 0x161   : > { %v1189_v56 = vld [vmem:[%s8380_s28 + $0x1f80] sm:$0xf]  ;;  %v1191_v57 = vld [vmem:[%s8380_s28 + $0x1f90] sm:$0xf]  ;;  %1188 = vst [vmem:[%s8384_s29 + $0x7dc] sm:$0xf] %v1187_v55 }
 0x162   : > { %1190 = vst [vmem:[%s8384_s29 + $0x7e0] sm:$0xf] %v1189_v56  ;;  %1192 = vst [vmem:[%s8384_s29 + $0x7e4] sm:$0xf] %v1191_v57  ;;  %v1193_v58 = vld [vmem:[%s8380_s28 + $0x1fa0] sm:$0xf] }
 0x163   : > { %v1195_v59 = vld [vmem:[%s8380_s28 + $0x1fb0] sm:$0xf]  ;;  %v1197_v60 = vld [vmem:[%s8380_s28 + $0x1fc0] sm:$0xf]  ;;  %1194 = vst [vmem:[%s8384_s29 + $0x7e8] sm:$0xf] %v1193_v58 }
 0x164   : > { %1196 = vst [vmem:[%s8384_s29 + $0x7ec] sm:$0xf] %v1195_v59  ;;  %1198 = vst [vmem:[%s8384_s29 + $0x7f0] sm:$0xf] %v1197_v60  ;;  %v1199_v61 = vld [vmem:[%s8380_s28 + $0x1fd0] sm:$0xf] }
 0x165   : > { %v1201_v62 = vld [vmem:[%s8380_s28 + $0x1fe0] sm:$0xf]  ;;  %v1203_v63 = vld [vmem:[%s8380_s28 + $0x1ff0] sm:$0xf]  ;;  %1200 = vst [vmem:[%s8384_s29 + $0x7f4] sm:$0xf] %v1199_v61 }
 0x166   : > { %1202 = vst [vmem:[%s8384_s29 + $0x7f8] sm:$0xf] %v1201_v62  ;;  %1204 = vst [vmem:[%s8384_s29 + $0x7fc] sm:$0xf] %v1203_v63 }
 0x167 PF: > { %p7338_p5 = scmp.ge.s32.totalorder %s8319_s17, 1  ;;  %p4340_p6 = scmp.lt.s32.totalorder %s8319_s17, 5 }
 0x169   : > { %p4341_p7 = pnand %p7338_p5, %p4340_p6 }
 0x16a   : > { %s4347_s30 = sand.u32 (!%p4341_p7), 1, %s8311_s15   ;;  %v9414_v0 = vld [vmem:[%s9776_s0] sm:$0xff] (!%p4341_p7)  ;;  %v9419_v1 = vld [vmem:[%s9776_s0 + $0x8] sm:$0xff] (!%p4341_p7)  ;;  %v9459_v33 = vld [vmem:[%s9776_s0 + $0x10] sm:$0xff] (!%p4341_p7)  ;;  %p4377_p8 = scmp.lt.s32.totalorder (!%p4341_p7), %s7332_s18, 3 }
 0x16b   : > { %4344 = sbr.rel (%p4341_p7) target bundleno = 892 (0x37c), region = 84  ;;  %s7339_s9 = sshll.u32 (!%p4341_p7), %s4347_s30, 11  ;;  %v7342_v2 = vcombine.high (!%p4341_p7), %v9414_v0, %v9414_v0  ;;  %v7344_v3 = vcombine.high (!%p4341_p7), %v9419_v1, %v9419_v1  ;;  %v9465_v35 = vld [vmem:[%s9776_s0 + $0x18] sm:$0xff] (!%p4341_p7)  ;;  %v7341_v38 = vcombine.low (!%p4341_p7), %v9414_v0, %v9414_v0  ;;  %v7343_v39 = vcombine.low (!%p4341_p7), %v9419_v1, %v9419_v1 }
 0x16c   : > { %s9425_s10 = scalar_lea.vmem (!%p4341_p7), [#allocation2], %s7339_s9  ;;  %v7346_v42 = vcombine.high (!%p4341_p7), %v9459_v33, %v9459_v33  ;;  %v7348_v44 = vcombine.high (!%p4341_p7), %v9465_v35, %v9465_v35 }
 0x16d   : > { %v8007_v4 = vld [vmem:[%s9425_s10 + $0x40] sm:$0xff] (!%p4341_p7)   ;;  %6596 = vmatprep.mubr.bf16.mxu0 (!%p4341_p7), %v7342_v2  ;;  %6636 = vmatprep.mubr.bf16.mxu1 (!%p4341_p7), %v7344_v3  ;;  %v8011_v8 = vld [vmem:[%s9425_s10 + $0x48] sm:$0xff] (!%p4341_p7)   ;;  %v8015_v12 = vld [vmem:[%s9425_s10 + $0x50] sm:$0xff] (!%p4341_p7)  }
 0x16e   : > { %v8008_v5 = vld [vmem:[%s9425_s10 + $0xc0] sm:$0xff] (!%p4341_p7)   ;;  %7631 = vmatprep.subr.bf16.mxu0 (!%p4341_p7), %v8007_v4  ;;  %v8012_v9 = vld [vmem:[%s9425_s10 + $0xc8] sm:$0xff] (!%p4341_p7)   ;;  %v8016_v13 = vld [vmem:[%s9425_s10 + $0xd0] sm:$0xff] (!%p4341_p7)  }
 0x16f   : > { %v8009_v6 = vld [vmem:[%s9425_s10] sm:$0xff] (!%p4341_p7)   ;;  %7653 = vmatprep.subr.bf16.mxu1 (!%p4341_p7), %v8008_v5  ;;  %v8013_v10 = vld [vmem:[%s9425_s10 + $0x8] sm:$0xff] (!%p4341_p7)   ;;  %v8017_v14 = vld [vmem:[%s9425_s10 + $0x10] sm:$0xff] (!%p4341_p7)  }
 0x170   : > { %v8010_v7 = vld [vmem:[%s9425_s10 + $0x80] sm:$0xff] (!%p4341_p7)   ;;  %7632 = vmatpush3.bf16.msra.mxu0 (!%p4341_p7), %v8009_v6  ;;  %v8014_v11 = vld [vmem:[%s9425_s10 + $0x88] sm:$0xff] (!%p4341_p7)   ;;  %v8018_v15 = vld [vmem:[%s9425_s10 + $0x90] sm:$0xff] (!%p4341_p7)  }
 0x171   : > { %7654 = vmatpush3.bf16.msra.mxu1 (!%p4341_p7), %v8010_v7  ;;  %7633 = vmatprep.subr.bf16.mxu0 (!%p4341_p7), %v8011_v8  ;;  %v8019_v16 = vld [vmem:[%s9425_s10 + $0x58] sm:$0xff] (!%p4341_p7)   ;;  %v8023_v20 = vld [vmem:[%s9425_s10 + $0x60] sm:$0xff] (!%p4341_p7)   ;;  %v8027_v24 = vld [vmem:[%s9425_s10 + $0x68] sm:$0xff] (!%p4341_p7)  }
 0x172   : > { %7655 = vmatprep.subr.bf16.mxu1 %v8012_v9  ;;  %v8020_v17 = vld [vmem:[%s9425_s10 + $0xd8] sm:$0xff]   ;;  %v8024_v21 = vld [vmem:[%s9425_s10 + $0xe0] sm:$0xff]   ;;  %v8028_v25 = vld [vmem:[%s9425_s10 + $0xe8] sm:$0xff]   ;;  %s9785_s18 = smov (!%p4377_p8, %s7332_s18), 3 }
 0x173   : > { %v8021_v18 = vld [vmem:[%s9425_s10 + $0x18] sm:$0xff]   ;;  %v8025_v22 = vld [vmem:[%s9425_s10 + $0x20] sm:$0xff]   ;;  %v8029_v26 = vld [vmem:[%s9425_s10 + $0x28] sm:$0xff]   ;;  %s4379_s25 = scalar_lea.vmem %s9778_s2, %s9785_s18  ;;  %s4382_s28 = scalar_lea.vmem %s9779_s3, %s9785_s18 }
 0x174   : > { %7634 = vmatpush3.bf16.msra.mxu0 %v8013_v10  ;;  %v8022_v19 = vld [vmem:[%s9425_s10 + $0x98] sm:$0xff]   ;;  %v8026_v23 = vld [vmem:[%s9425_s10 + $0xa0] sm:$0xff]   ;;  %v8030_v27 = vld [vmem:[%s9425_s10 + $0xa8] sm:$0xff]   ;;  %s7340_s17 = sshll.u32 %s9785_s18, 2 }
 0x175   : > { %7656 = vmatpush3.bf16.msra.mxu1 %v8014_v11  ;;  %7635 = vmatprep.subr.bf16.mxu0 %v8015_v12  ;;  %v8031_v28 = vld [vmem:[%s9425_s10 + $0x70] sm:$0xff]   ;;  %v8035_v32 = vld [vmem:[%s9425_s10 + $0x78] sm:$0xff]   ;;  %v8043_v40 = vld [vmem:[%s9425_s10 + $0x140] sm:$0xff]   ;;  %v7345_v12 = vcombine.low %v9459_v33, %v9459_v33  ;;  %s4386_s5 = scalar_lea.vmem %s9780_s4, %s7340_s17 }
 0x176   : > { %7657 = vmatprep.subr.bf16.mxu1 %v8016_v13  ;;  %v8032_v29 = vld [vmem:[%s9425_s10 + $0xf0] sm:$0xff]   ;;  %v8036_v34 = vld [vmem:[%s9425_s10 + $0xf8] sm:$0xff]   ;;  %v8044_v41 = vld [vmem:[%s9425_s10 + $0x1c0] sm:$0xff]   ;;  %v7347_v13 = vcombine.low %v9465_v35, %v9465_v35 }
 0x177   : > { %v8033_v30 = vld [vmem:[%s9425_s10 + $0x30] sm:$0xff]   ;;  %v8037_v36 = vld [vmem:[%s9425_s10 + $0x38] sm:$0xff]   ;;  %v8045_v43 = vld [vmem:[%s9425_s10 + $0x100] sm:$0xff]  }
 0x178   : > { %7636 = vmatpush3.bf16.msra.mxu0 %v8017_v14  ;;  %v8034_v31 = vld [vmem:[%s9425_s10 + $0xb0] sm:$0xff]   ;;  %v8038_v37 = vld [vmem:[%s9425_s10 + $0xb8] sm:$0xff]   ;;  %v8046_v45 = vld [vmem:[%s9425_s10 + $0x180] sm:$0xff]  }
 0x179   : > { %7658 = vmatpush3.bf16.msra.mxu1 %v8018_v15  ;;  %7637 = vmatprep.subr.bf16.mxu0 %v8019_v16  ;;  %v8047_v46 = vld [vmem:[%s9425_s10 + $0x148] sm:$0xff]   ;;  %v8051_v50 = vld [vmem:[%s9425_s10 + $0x150] sm:$0xff]   ;;  %v8055_v54 = vld [vmem:[%s9425_s10 + $0x158] sm:$0xff]  }
 0x17a   : > { %7659 = vmatprep.subr.bf16.mxu1 %v8020_v17  ;;  %v8048_v47 = vld [vmem:[%s9425_s10 + $0x1c8] sm:$0xff]   ;;  %v8052_v51 = vld [vmem:[%s9425_s10 + $0x1d0] sm:$0xff]   ;;  %v8056_v55 = vld [vmem:[%s9425_s10 + $0x1d8] sm:$0xff]  }
 0x17b   : > { %v8049_v48 = vld [vmem:[%s9425_s10 + $0x108] sm:$0xff]   ;;  %v8053_v52 = vld [vmem:[%s9425_s10 + $0x110] sm:$0xff]   ;;  %v8057_v56 = vld [vmem:[%s9425_s10 + $0x118] sm:$0xff]  }
 0x17c   : > { %7638 = vmatpush3.bf16.msra.mxu0 %v8021_v18  ;;  %v8050_v49 = vld [vmem:[%s9425_s10 + $0x188] sm:$0xff]   ;;  %v8054_v53 = vld [vmem:[%s9425_s10 + $0x190] sm:$0xff]   ;;  %v8058_v57 = vld [vmem:[%s9425_s10 + $0x198] sm:$0xff]  }
 0x17d   : > { %7660 = vmatpush3.bf16.msra.mxu1 %v8022_v19  ;;  %7639 = vmatprep.subr.bf16.mxu0 %v8023_v20  ;;  %v8059_v58 = vld [vmem:[%s9425_s10 + $0x160] sm:$0xff]   ;;  %v8063_v62 = vld [vmem:[%s9425_s10 + $0x168] sm:$0xff]   ;;  %v8067_v2 = vld [vmem:[%s9425_s10 + $0x170] sm:$0xff]  }
 0x17e   : > { %7661 = vmatprep.subr.bf16.mxu1 %v8024_v21  ;;  %v8060_v59 = vld [vmem:[%s9425_s10 + $0x1e0] sm:$0xff]   ;;  %v8064_v63 = vld [vmem:[%s9425_s10 + $0x1e8] sm:$0xff]   ;;  %v8068_v3 = vld [vmem:[%s9425_s10 + $0x1f0] sm:$0xff]  }
 0x17f   : > { %v8061_v60 = vld [vmem:[%s9425_s10 + $0x120] sm:$0xff]   ;;  %v8065_v0 = vld [vmem:[%s9425_s10 + $0x128] sm:$0xff]   ;;  %v8069_v4 = vld [vmem:[%s9425_s10 + $0x130] sm:$0xff]  }
 0x180   : > { %7640 = vmatpush3.bf16.msra.mxu0 %v8025_v22  ;;  %v8062_v61 = vld [vmem:[%s9425_s10 + $0x1a0] sm:$0xff]   ;;  %v8066_v1 = vld [vmem:[%s9425_s10 + $0x1a8] sm:$0xff]   ;;  %v8070_v5 = vld [vmem:[%s9425_s10 + $0x1b0] sm:$0xff]  }
 0x181   : > { %7662 = vmatpush3.bf16.msra.mxu1 %v8026_v23  ;;  %7641 = vmatprep.subr.bf16.mxu0 %v8027_v24  ;;  %v8071_v6 = vld [vmem:[%s9425_s10 + $0x178] sm:$0xff]   ;;  %v9509_v7 = vld [vmem:[%s9776_s0 + $0x20] sm:$0xff]  ;;  %v9515_v9 = vld [vmem:[%s9776_s0 + $0x28] sm:$0xff] }
 0x182   : > { %7663 = vmatprep.subr.bf16.mxu1 %v8028_v25  ;;  %v8072_v8 = vld [vmem:[%s9425_s10 + $0x1f8] sm:$0xff]   ;;  %v8079_v14 = vld [vmem:[%s9425_s10 + $0x240] sm:$0xff]   ;;  %v7350_v16 = vcombine.high %v9509_v7, %v9509_v7  ;;  %v7352_v18 = vcombine.high %v9515_v9, %v9515_v9  ;;  %v8083_v20 = vld [vmem:[%s9425_s10 + $0x248] sm:$0xff]  }
 0x183   : > { %v8073_v10 = vld [vmem:[%s9425_s10 + $0x138] sm:$0xff]   ;;  %v8080_v15 = vld [vmem:[%s9425_s10 + $0x2c0] sm:$0xff]   ;;  %v8084_v21 = vld [vmem:[%s9425_s10 + $0x2c8] sm:$0xff]  }
 0x184   : > { %7642 = vmatpush3.bf16.msra.mxu0 %v8029_v26  ;;  %v8074_v11 = vld [vmem:[%s9425_s10 + $0x1b8] sm:$0xff]   ;;  %v8081_v17 = vld [vmem:[%s9425_s10 + $0x200] sm:$0xff]   ;;  %v8085_v22 = vld [vmem:[%s9425_s10 + $0x208] sm:$0xff]  }
 0x185   : > { %7664 = vmatpush3.bf16.msra.mxu1 %v8030_v27  ;;  %7643 = vmatprep.subr.bf16.mxu0 %v8031_v28  ;;  %v8082_v19 = vld [vmem:[%s9425_s10 + $0x280] sm:$0xff]   ;;  %v8086_v23 = vld [vmem:[%s9425_s10 + $0x288] sm:$0xff]   ;;  %v8087_v24 = vld [vmem:[%s9425_s10 + $0x250] sm:$0xff]  }
 0x186   : > { %7665 = vmatprep.subr.bf16.mxu1 %v8032_v29  ;;  %v8088_v25 = vld [vmem:[%s9425_s10 + $0x2d0] sm:$0xff]   ;;  %v8091_v28 = vld [vmem:[%s9425_s10 + $0x258] sm:$0xff]   ;;  %v8096_v33 = vld [vmem:[%s9425_s10 + $0x2e0] sm:$0xff]  }
 0x187   : > { %v8089_v26 = vld [vmem:[%s9425_s10 + $0x210] sm:$0xff]   ;;  %v8092_v29 = vld [vmem:[%s9425_s10 + $0x2d8] sm:$0xff]   ;;  %v8098_v35 = vld [vmem:[%s9425_s10 + $0x2a0] sm:$0xff]  }
 0x188   : > { %7644 = vmatpush3.bf16.msra.mxu0 %v8033_v30  ;;  %v8090_v27 = vld [vmem:[%s9425_s10 + $0x290] sm:$0xff]   ;;  %v8093_v30 = vld [vmem:[%s9425_s10 + $0x218] sm:$0xff]  }
 0x189   : > { %7666 = vmatpush3.bf16.msra.mxu1 %v8034_v31  ;;  %7645 = vmatprep.subr.bf16.mxu0 %v8035_v32  ;;  %v8094_v31 = vld [vmem:[%s9425_s10 + $0x298] sm:$0xff]   ;;  %v8095_v32 = vld [vmem:[%s9425_s10 + $0x260] sm:$0xff]  }
 0x18a   : > { %7667 = vmatprep.subr.bf16.mxu1 %v8036_v34  ;;  %v8097_v34 = vld [vmem:[%s9425_s10 + $0x220] sm:$0xff]  }
 0x18c   : > { %7646 = vmatpush3.bf16.msra.mxu0 %v8037_v36  ;;  %v8099_v36 = vld [vmem:[%s9425_s10 + $0x268] sm:$0xff]  }
 0x18d   : > { %7668 = vmatpush3.bf16.msra.mxu1 %v8038_v37  ;;  %7675 = vmatprep.subr.bf16.mxu0 %v8043_v40  ;;  %v8100_v37 = vld [vmem:[%s9425_s10 + $0x2e8] sm:$0xff]   ;;  %v8103_v40 = vld [vmem:[%s9425_s10 + $0x270] sm:$0xff]  }
 0x18e   : > { %7697 = vmatprep.subr.bf16.mxu1 %v8044_v41  ;;  %v8104_v41 = vld [vmem:[%s9425_s10 + $0x2f0] sm:$0xff]  }
 0x18f   : > { %6597 = vmatmul.mubr.bf16.vlgmr.msra.gmra.mrb[0].mxu0 %v7341_v38  ;;  %v8101_v38 = vld [vmem:[%s9425_s10 + $0x228] sm:$0xff]  }
 0x190   : > { %6637 = vmatmul.mubr.bf16.vlgmr.msra.gmra.mrb[0].mxu1 %v7343_v39  ;;  %7676 = vmatpush3.bf16.msra.mxu0 %v8045_v43  ;;  %v8102_v39 = vld [vmem:[%s9425_s10 + $0x2a8] sm:$0xff]   ;;  %v8106_v43 = vld [vmem:[%s9425_s10 + $0x2b0] sm:$0xff]  }
 0x191   : > { %7698 = vmatpush3.bf16.msra.mxu1 %v8046_v45  ;;  %6676 = vmatprep.mubr.bf16.mxu0 %v7346_v42  ;;  %v8105_v42 = vld [vmem:[%s9425_s10 + $0x230] sm:$0xff]   ;;  %v8108_v45 = vld [vmem:[%s9425_s10 + $0x2f8] sm:$0xff]  }
 0x192   : > { %7677 = vmatprep.subr.bf16.mxu0 %v8047_v46  ;;  %6716 = vmatprep.mubr.bf16.mxu1 %v7348_v44  ;;  %v8107_v44 = vld [vmem:[%s9425_s10 + $0x278] sm:$0xff]  }
 0x193   : > { %7699 = vmatprep.subr.bf16.mxu1 %v8048_v47  ;;  %v8109_v46 = vld [vmem:[%s9425_s10 + $0x238] sm:$0xff]  }
 0x194   : > { %7678 = vmatpush3.bf16.msra.mxu0 %v8049_v48  ;;  %v8110_v47 = vld [vmem:[%s9425_s10 + $0x2b8] sm:$0xff]   ;;  %v7349_v48 = vcombine.low %v9509_v7, %v9509_v7  ;;  %v8136_v7 = vld [vmem:[%s9425_s10 + $0x3e8] sm:$0xff]  }
 0x195   : > { %7700 = vmatpush3.bf16.msra.mxu1 %v8050_v49  ;;  %7679 = vmatprep.subr.bf16.mxu0 %v8051_v50  ;;  %v7351_v49 = vcombine.low %v9515_v9, %v9515_v9  ;;  %v8115_v50 = vld [vmem:[%s9425_s10 + $0x340] sm:$0xff]   ;;  %v8138_v9 = vld [vmem:[%s9425_s10 + $0x3a8] sm:$0xff]  }
 0x196   : > { %7701 = vmatprep.subr.bf16.mxu1 %v8052_v51  ;;  %v8116_v51 = vld [vmem:[%s9425_s10 + $0x3c0] sm:$0xff]  }
 0x198   : > { %7680 = vmatpush3.bf16.msra.mxu0 %v8053_v52  ;;  %v8117_v52 = vld [vmem:[%s9425_s10 + $0x300] sm:$0xff]  }
 0x199   : > { %7702 = vmatpush3.bf16.msra.mxu1 %v8054_v53  ;;  %7681 = vmatprep.subr.bf16.mxu0 %v8055_v54  ;;  %v8118_v53 = vld [vmem:[%s9425_s10 + $0x380] sm:$0xff]   ;;  %v8119_v54 = vld [vmem:[%s9425_s10 + $0x348] sm:$0xff]  }
 0x19a   : > { %7703 = vmatprep.subr.bf16.mxu1 %v8056_v55  ;;  %v8120_v55 = vld [vmem:[%s9425_s10 + $0x3c8] sm:$0xff]  }
 0x19c   : > { %7682 = vmatpush3.bf16.msra.mxu0 %v8057_v56  ;;  %v8121_v56 = vld [vmem:[%s9425_s10 + $0x308] sm:$0xff]  }
 0x19d   : > { %7704 = vmatpush3.bf16.msra.mxu1 %v8058_v57  ;;  %7683 = vmatprep.subr.bf16.mxu0 %v8059_v58  ;;  %v8122_v57 = vld [vmem:[%s9425_s10 + $0x388] sm:$0xff]   ;;  %v8123_v58 = vld [vmem:[%s9425_s10 + $0x350] sm:$0xff]  }
 0x19e   : > { %7705 = vmatprep.subr.bf16.mxu1 %v8060_v59  ;;  %v8124_v59 = vld [vmem:[%s9425_s10 + $0x3d0] sm:$0xff]  }
 0x1a0   : > { %7684 = vmatpush3.bf16.msra.mxu0 %v8061_v60  ;;  %v8125_v60 = vld [vmem:[%s9425_s10 + $0x310] sm:$0xff]  }
 0x1a1   : > { %7706 = vmatpush3.bf16.msra.mxu1 %v8062_v61  ;;  %7685 = vmatprep.subr.bf16.mxu0 %v8063_v62  ;;  %v8126_v61 = vld [vmem:[%s9425_s10 + $0x390] sm:$0xff]   ;;  %v8127_v62 = vld [vmem:[%s9425_s10 + $0x358] sm:$0xff]  }
 0x1a2   : > { %7707 = vmatprep.subr.bf16.mxu1 %v8064_v63  ;;  %v8128_v63 = vld [vmem:[%s9425_s10 + $0x3d8] sm:$0xff]  }
 0x1a4   : > { %7686 = vmatpush3.bf16.msra.mxu0 %v8065_v0  ;;  %v8129_v0 = vld [vmem:[%s9425_s10 + $0x318] sm:$0xff]  }
 0x1a5   : > { %7708 = vmatpush3.bf16.msra.mxu1 %v8066_v1  ;;  %7687 = vmatprep.subr.bf16.mxu0 %v8067_v2  ;;  %v8130_v1 = vld [vmem:[%s9425_s10 + $0x398] sm:$0xff]   ;;  %v8131_v2 = vld [vmem:[%s9425_s10 + $0x360] sm:$0xff]  }
 0x1a6   : > { %7709 = vmatprep.subr.bf16.mxu1 %v8068_v3  ;;  %v8132_v3 = vld [vmem:[%s9425_s10 + $0x3e0] sm:$0xff]  }
 0x1a8   : > { %7688 = vmatpush3.bf16.msra.mxu0 %v8069_v4  ;;  %v8133_v4 = vld [vmem:[%s9425_s10 + $0x320] sm:$0xff]  }
 0x1a9   : > { %7710 = vmatpush3.bf16.msra.mxu1 %v8070_v5  ;;  %7689 = vmatprep.subr.bf16.mxu0 %v8071_v6  ;;  %v8134_v5 = vld [vmem:[%s9425_s10 + $0x3a0] sm:$0xff]   ;;  %v8135_v6 = vld [vmem:[%s9425_s10 + $0x368] sm:$0xff]  }
 0x1aa   : > { %7711 = vmatprep.subr.bf16.mxu1 %v8072_v8  ;;  %v8137_v8 = vld [vmem:[%s9425_s10 + $0x328] sm:$0xff]  }
 0x1ac   : > { %7690 = vmatpush3.bf16.msra.mxu0 %v8073_v10  ;;  %v8139_v10 = vld [vmem:[%s9425_s10 + $0x370] sm:$0xff]  }
 0x1ad   : > { %7712 = vmatpush3.bf16.msra.mxu1 %v8074_v11  ;;  %7719 = vmatprep.subr.bf16.mxu0 %v8079_v14  ;;  %v8140_v11 = vld [vmem:[%s9425_s10 + $0x3f0] sm:$0xff]   ;;  %v8143_v14 = vld [vmem:[%s9425_s10 + $0x378] sm:$0xff]  }
 0x1ae   : > { %7741 = vmatprep.subr.bf16.mxu1 %v8080_v15  ;;  %v8144_v15 = vld [vmem:[%s9425_s10 + $0x3f8] sm:$0xff]  }
 0x1af   : > { %6677 = vmatmul.mubr.bf16.vlgmr.msra.gmra.mrb[4].mxu0 %v7345_v12  ;;  %v8141_v12 = vld [vmem:[%s9425_s10 + $0x330] sm:$0xff]  }
 0x1b0   : > { %6717 = vmatmul.mubr.bf16.vlgmr.msra.gmra.mrb[4].mxu1 %v7347_v13  ;;  %7720 = vmatpush3.bf16.msra.mxu0 %v8081_v17  ;;  %v8142_v13 = vld [vmem:[%s9425_s10 + $0x3b0] sm:$0xff]   ;;  %v8146_v17 = vld [vmem:[%s9425_s10 + $0x3b8] sm:$0xff]  }
 0x1b1   : > { %7742 = vmatpush3.bf16.msra.mxu1 %v8082_v19  ;;  %6756 = vmatprep.mubr.bf16.mxu0 %v7350_v16  ;;  %v8145_v16 = vld [vmem:[%s9425_s10 + $0x338] sm:$0xff]  }
 0x1b2   : > { %7721 = vmatprep.subr.bf16.mxu0 %v8083_v20  ;;  %6796 = vmatprep.mubr.bf16.mxu1 %v7352_v18  ;;  %v4394_v18 = vld [vmem:[%s9776_s0 + $0x30] sm:$0xff]  ;;  %v4395_v19 = vld [vmem:[%s9776_s0 + $0x38] sm:$0xff] }
 0x1b3   : > { %7743 = vmatprep.subr.bf16.mxu1 %v8084_v21  ;;  %v7353_v20 = vcombine.low %v4394_v18, %v4394_v18  ;;  %v7354_v21 = vcombine.high %v4394_v18, %v4394_v18  ;;  %v8207_v18 = vld [vmem:[%s9425_s10 + $0x568] sm:$0xff]  }
 0x1b4   : > { %7722 = vmatpush3.bf16.msra.mxu0 %v8085_v22  ;;  %v7355_v22 = vcombine.low %v4395_v19, %v4395_v19 }
 0x1b5   : > { %7744 = vmatpush3.bf16.msra.mxu1 %v8086_v23  ;;  %7723 = vmatprep.subr.bf16.mxu0 %v8087_v24  ;;  %v7356_v23 = vcombine.high %v4395_v19, %v4395_v19  ;;  %v8151_v24 = vld [vmem:[%s9425_s10 + $0x440] sm:$0xff]   ;;  %v8208_v19 = vld [vmem:[%s9425_s10 + $0x5e8] sm:$0xff]  }
 0x1b6   : > { %7745 = vmatprep.subr.bf16.mxu1 %v8088_v25  ;;  %v8152_v25 = vld [vmem:[%s9425_s10 + $0x4c0] sm:$0xff]  }
 0x1b8   : > { %7724 = vmatpush3.bf16.msra.mxu0 %v8089_v26  ;;  %v8153_v26 = vld [vmem:[%s9425_s10 + $0x400] sm:$0xff]  }
 0x1b9   : > { %7746 = vmatpush3.bf16.msra.mxu1 %v8090_v27  ;;  %7725 = vmatprep.subr.bf16.mxu0 %v8091_v28  ;;  %v8154_v27 = vld [vmem:[%s9425_s10 + $0x480] sm:$0xff]   ;;  %v8155_v28 = vld [vmem:[%s9425_s10 + $0x448] sm:$0xff]  }
 0x1ba   : > { %7747 = vmatprep.subr.bf16.mxu1 %v8092_v29  ;;  %v8156_v29 = vld [vmem:[%s9425_s10 + $0x4c8] sm:$0xff]  }
 0x1bc   : > { %7726 = vmatpush3.bf16.msra.mxu0 %v8093_v30  ;;  %v8157_v30 = vld [vmem:[%s9425_s10 + $0x408] sm:$0xff]  }
 0x1bd   : > { %7748 = vmatpush3.bf16.msra.mxu1 %v8094_v31  ;;  %7727 = vmatprep.subr.bf16.mxu0 %v8095_v32  ;;  %v8158_v31 = vld [vmem:[%s9425_s10 + $0x488] sm:$0xff]   ;;  %v8159_v32 = vld [vmem:[%s9425_s10 + $0x450] sm:$0xff]  }
 0x1be   : > { %7749 = vmatprep.subr.bf16.mxu1 %v8096_v33  ;;  %v8160_v33 = vld [vmem:[%s9425_s10 + $0x4d0] sm:$0xff]  }
 0x1c0   : > { %7728 = vmatpush3.bf16.msra.mxu0 %v8097_v34  ;;  %v8161_v34 = vld [vmem:[%s9425_s10 + $0x410] sm:$0xff]  }
 0x1c1   : > { %7750 = vmatpush3.bf16.msra.mxu1 %v8098_v35  ;;  %7729 = vmatprep.subr.bf16.mxu0 %v8099_v36  ;;  %v8162_v35 = vld [vmem:[%s9425_s10 + $0x490] sm:$0xff]   ;;  %v8163_v36 = vld [vmem:[%s9425_s10 + $0x458] sm:$0xff]  }
 0x1c2   : > { %7751 = vmatprep.subr.bf16.mxu1 %v8100_v37  ;;  %v8164_v37 = vld [vmem:[%s9425_s10 + $0x4d8] sm:$0xff]  }
 0x1c4   : > { %7730 = vmatpush3.bf16.msra.mxu0 %v8101_v38  ;;  %v8165_v38 = vld [vmem:[%s9425_s10 + $0x418] sm:$0xff]  }
 0x1c5   : > { %7752 = vmatpush3.bf16.msra.mxu1 %v8102_v39  ;;  %7731 = vmatprep.subr.bf16.mxu0 %v8103_v40  ;;  %v8166_v39 = vld [vmem:[%s9425_s10 + $0x498] sm:$0xff]   ;;  %v8167_v40 = vld [vmem:[%s9425_s10 + $0x460] sm:$0xff]  }
 0x1c6   : > { %7753 = vmatprep.subr.bf16.mxu1 %v8104_v41  ;;  %v8168_v41 = vld [vmem:[%s9425_s10 + $0x4e0] sm:$0xff]  }
 0x1c8   : > { %7732 = vmatpush3.bf16.msra.mxu0 %v8105_v42  ;;  %v8169_v42 = vld [vmem:[%s9425_s10 + $0x420] sm:$0xff]  }
 0x1c9   : > { %7754 = vmatpush3.bf16.msra.mxu1 %v8106_v43  ;;  %7733 = vmatprep.subr.bf16.mxu0 %v8107_v44  ;;  %v8170_v43 = vld [vmem:[%s9425_s10 + $0x4a0] sm:$0xff]   ;;  %v8171_v44 = vld [vmem:[%s9425_s10 + $0x468] sm:$0xff]  }
 0x1ca   : > { %7755 = vmatprep.subr.bf16.mxu1 %v8108_v45  ;;  %v8172_v45 = vld [vmem:[%s9425_s10 + $0x4e8] sm:$0xff]  }
 0x1cc   : > { %7734 = vmatpush3.bf16.msra.mxu0 %v8109_v46  ;;  %v8173_v46 = vld [vmem:[%s9425_s10 + $0x428] sm:$0xff]  }
 0x1cd   : > { %7756 = vmatpush3.bf16.msra.mxu1 %v8110_v47  ;;  %7763 = vmatprep.subr.bf16.mxu0 %v8115_v50  ;;  %v8174_v47 = vld [vmem:[%s9425_s10 + $0x4a8] sm:$0xff]   ;;  %v8177_v50 = vld [vmem:[%s9425_s10 + $0x430] sm:$0xff]  }
 0x1ce   : > { %7785 = vmatprep.subr.bf16.mxu1 %v8116_v51  ;;  %v8178_v51 = vld [vmem:[%s9425_s10 + $0x4b0] sm:$0xff]  }
 0x1cf   : > { %6757 = vmatmul.mubr.bf16.vlgmr.msra.gmra.mrb[8].mxu0 %v7349_v48  ;;  %v8175_v48 = vld [vmem:[%s9425_s10 + $0x470] sm:$0xff]  }
 0x1d0   : > { %6797 = vmatmul.mubr.bf16.vlgmr.msra.gmra.mrb[8].mxu1 %v7351_v49  ;;  %7764 = vmatpush3.bf16.msra.mxu0 %v8117_v52  ;;  %v8176_v49 = vld [vmem:[%s9425_s10 + $0x4f0] sm:$0xff]   ;;  %v8179_v52 = vld [vmem:[%s9425_s10 + $0x478] sm:$0xff]  }
 0x1d1   : > { %7786 = vmatpush3.bf16.msra.mxu1 %v8118_v53  ;;  %7765 = vmatprep.subr.bf16.mxu0 %v8119_v54  ;;  %v8180_v53 = vld [vmem:[%s9425_s10 + $0x4f8] sm:$0xff]  }
 0x1d2   : > { %7787 = vmatprep.subr.bf16.mxu1 %v8120_v55  ;;  %6836 = vmatprep.mubr.bf16.mxu0 %v7354_v21  ;;  %v8181_v54 = vld [vmem:[%s9425_s10 + $0x438] sm:$0xff]   ;;  %v8210_v21 = vld [vmem:[%s9425_s10 + $0x5a8] sm:$0xff]  }
 0x1d3   : > { %6876 = vmatprep.mubr.bf16.mxu1 %v7356_v23  ;;  %v8182_v55 = vld [vmem:[%s9425_s10 + $0x4b8] sm:$0xff]   ;;  %v8212_v23 = vld [vmem:[%s9425_s10 + $0x5f0] sm:$0xff]  }
 0x1d4   : > { %7766 = vmatpush3.bf16.msra.mxu0 %v8121_v56  ;;  %v4396_v56 = vld [vmem:[%s9776_s0 + $0x40] sm:$0xff] }
 0x1d5   : > { %7788 = vmatpush3.bf16.msra.mxu1 %v8122_v57  ;;  %7767 = vmatprep.subr.bf16.mxu0 %v8123_v58  ;;  %v7357_v57 = vcombine.low %v4396_v56, %v4396_v56  ;;  %v7358_v58 = vcombine.high %v4396_v56, %v4396_v56  ;;  %v8243_v56 = vld [vmem:[%s9425_s10 + $0x668] sm:$0xff]  }
 0x1d6   : > { %7789 = vmatprep.subr.bf16.mxu1 %v8124_v59  ;;  %v4397_v59 = vld [vmem:[%s9776_s0 + $0x48] sm:$0xff] }
 0x1d8   : > { %7768 = vmatpush3.bf16.msra.mxu0 %v8125_v60  ;;  %v7359_v60 = vcombine.low %v4397_v59, %v4397_v59 }
 0x1d9   : > { %7790 = vmatpush3.bf16.msra.mxu1 %v8126_v61  ;;  %7769 = vmatprep.subr.bf16.mxu0 %v8127_v62  ;;  %v7360_v61 = vcombine.high %v4397_v59, %v4397_v59  ;;  %v8187_v62 = vld [vmem:[%s9425_s10 + $0x540] sm:$0xff]   ;;  %v8246_v59 = vld [vmem:[%s9425_s10 + $0x6a8] sm:$0xff]  }
 0x1da   : > { %7791 = vmatprep.subr.bf16.mxu1 %v8128_v63  ;;  %v8188_v63 = vld [vmem:[%s9425_s10 + $0x5c0] sm:$0xff]  }
 0x1dc   : > { %7770 = vmatpush3.bf16.msra.mxu0 %v8129_v0  ;;  %v8189_v0 = vld [vmem:[%s9425_s10 + $0x500] sm:$0xff]  }
 0x1dd   : > { %7792 = vmatpush3.bf16.msra.mxu1 %v8130_v1  ;;  %7771 = vmatprep.subr.bf16.mxu0 %v8131_v2  ;;  %v8190_v1 = vld [vmem:[%s9425_s10 + $0x580] sm:$0xff]   ;;  %v8191_v2 = vld [vmem:[%s9425_s10 + $0x548] sm:$0xff]  }
 0x1de   : > { %7793 = vmatprep.subr.bf16.mxu1 %v8132_v3  ;;  %v8192_v3 = vld [vmem:[%s9425_s10 + $0x5c8] sm:$0xff]  }
 0x1e0   : > { %7772 = vmatpush3.bf16.msra.mxu0 %v8133_v4  ;;  %v8193_v4 = vld [vmem:[%s9425_s10 + $0x508] sm:$0xff]  }
 0x1e1   : > { %7794 = vmatpush3.bf16.msra.mxu1 %v8134_v5  ;;  %7773 = vmatprep.subr.bf16.mxu0 %v8135_v6  ;;  %v8194_v5 = vld [vmem:[%s9425_s10 + $0x588] sm:$0xff]   ;;  %v8195_v6 = vld [vmem:[%s9425_s10 + $0x550] sm:$0xff]  }
 0x1e2   : > { %7795 = vmatprep.subr.bf16.mxu1 %v8136_v7  ;;  %v8196_v7 = vld [vmem:[%s9425_s10 + $0x5d0] sm:$0xff]  }
 0x1e4   : > { %7774 = vmatpush3.bf16.msra.mxu0 %v8137_v8  ;;  %v8197_v8 = vld [vmem:[%s9425_s10 + $0x510] sm:$0xff]  }
 0x1e5   : > { %7796 = vmatpush3.bf16.msra.mxu1 %v8138_v9  ;;  %7775 = vmatprep.subr.bf16.mxu0 %v8139_v10  ;;  %v8198_v9 = vld [vmem:[%s9425_s10 + $0x590] sm:$0xff]   ;;  %v8199_v10 = vld [vmem:[%s9425_s10 + $0x558] sm:$0xff]  }
 0x1e6   : > { %7797 = vmatprep.subr.bf16.mxu1 %v8140_v11  ;;  %v8200_v11 = vld [vmem:[%s9425_s10 + $0x5d8] sm:$0xff]  }
 0x1e8   : > { %7776 = vmatpush3.bf16.msra.mxu0 %v8141_v12  ;;  %v8201_v12 = vld [vmem:[%s9425_s10 + $0x518] sm:$0xff]  }
 0x1e9   : > { %7798 = vmatpush3.bf16.msra.mxu1 %v8142_v13  ;;  %7777 = vmatprep.subr.bf16.mxu0 %v8143_v14  ;;  %v8202_v13 = vld [vmem:[%s9425_s10 + $0x598] sm:$0xff]   ;;  %v8203_v14 = vld [vmem:[%s9425_s10 + $0x560] sm:$0xff]  }
 0x1ea   : > { %7799 = vmatprep.subr.bf16.mxu1 %v8144_v15  ;;  %v8204_v15 = vld [vmem:[%s9425_s10 + $0x5e0] sm:$0xff]  }
 0x1ec   : > { %7778 = vmatpush3.bf16.msra.mxu0 %v8145_v16  ;;  %v8205_v16 = vld [vmem:[%s9425_s10 + $0x520] sm:$0xff]  }
 0x1ed   : > { %7800 = vmatpush3.bf16.msra.mxu1 %v8146_v17  ;;  %7807 = vmatprep.subr.bf16.mxu0 %v8151_v24  ;;  %v8206_v17 = vld [vmem:[%s9425_s10 + $0x5a0] sm:$0xff]   ;;  %v8213_v24 = vld [vmem:[%s9425_s10 + $0x530] sm:$0xff]  }
 0x1ee   : > { %7829 = vmatprep.subr.bf16.mxu1 %v8152_v25  ;;  %v8214_v25 = vld [vmem:[%s9425_s10 + $0x5b0] sm:$0xff]  }
 0x1ef   : > { %6837 = vmatmul.mubr.bf16.vlgmr.msra.gmra.mrb[12].mxu0 %v7353_v20  ;;  %v8209_v20 = vld [vmem:[%s9425_s10 + $0x528] sm:$0xff]  }
 0x1f0   : > { %6877 = vmatmul.mubr.bf16.vlgmr.msra.gmra.mrb[12].mxu1 %v7355_v22  ;;  %7808 = vmatpush3.bf16.msra.mxu0 %v8153_v26  ;;  %v8211_v22 = vld [vmem:[%s9425_s10 + $0x570] sm:$0xff]   ;;  %v8215_v26 = vld [vmem:[%s9425_s10 + $0x578] sm:$0xff]  }
 0x1f1   : > { %7830 = vmatpush3.bf16.msra.mxu1 %v8154_v27  ;;  %7809 = vmatprep.subr.bf16.mxu0 %v8155_v28  ;;  %v8216_v27 = vld [vmem:[%s9425_s10 + $0x5f8] sm:$0xff]  }
 0x1f2   : > { %7831 = vmatprep.subr.bf16.mxu1 %v8156_v29  ;;  %6916 = vmatprep.mubr.bf16.mxu0 %v7358_v58  ;;  %v8217_v28 = vld [vmem:[%s9425_s10 + $0x538] sm:$0xff]   ;;  %v8245_v58 = vld [vmem:[%s9425_s10 + $0x628] sm:$0xff]  }
 0x1f3   : > { %6956 = vmatprep.mubr.bf16.mxu1 %v7360_v61  ;;  %v8218_v29 = vld [vmem:[%s9425_s10 + $0x5b8] sm:$0xff]   ;;  %v8248_v61 = vld [vmem:[%s9425_s10 + $0x6f0] sm:$0xff]  }
 0x1f4   : > { %7810 = vmatpush3.bf16.msra.mxu0 %v8157_v30  ;;  %v4398_v30 = vld [vmem:[%s9776_s0 + $0x50] sm:$0xff] }
 0x1f5   : > { %7832 = vmatpush3.bf16.msra.mxu1 %v8158_v31  ;;  %7811 = vmatprep.subr.bf16.mxu0 %v8159_v32  ;;  %v4399_v31 = vld [vmem:[%s9776_s0 + $0x58] sm:$0xff]  ;;  %v7361_v32 = vcombine.low %v4398_v30, %v4398_v30 }
 0x1f6   : > { %7833 = vmatprep.subr.bf16.mxu1 %v8160_v33  ;;  %v7362_v33 = vcombine.high %v4398_v30, %v4398_v30 }
 0x1f8   : > { %7812 = vmatpush3.bf16.msra.mxu0 %v8161_v34  ;;  %v7363_v34 = vcombine.low %v4399_v31, %v4399_v31 }
 0x1f9   : > { %7834 = vmatpush3.bf16.msra.mxu1 %v8162_v35  ;;  %7813 = vmatprep.subr.bf16.mxu0 %v8163_v36  ;;  %v7364_v35 = vcombine.high %v4399_v31, %v4399_v31  ;;  %v8223_v36 = vld [vmem:[%s9425_s10 + $0x640] sm:$0xff]  }
 0x1fa   : > { %7835 = vmatprep.subr.bf16.mxu1 %v8164_v37  ;;  %v8224_v37 = vld [vmem:[%s9425_s10 + $0x6c0] sm:$0xff]  }
 0x1fc   : > { %7814 = vmatpush3.bf16.msra.mxu0 %v8165_v38  ;;  %v8225_v38 = vld [vmem:[%s9425_s10 + $0x600] sm:$0xff]  }
 0x1fd   : > { %7836 = vmatpush3.bf16.msra.mxu1 %v8166_v39  ;;  %7815 = vmatprep.subr.bf16.mxu0 %v8167_v40  ;;  %v8226_v39 = vld [vmem:[%s9425_s10 + $0x680] sm:$0xff]   ;;  %v8227_v40 = vld [vmem:[%s9425_s10 + $0x648] sm:$0xff]  }
 0x1fe   : > { %7837 = vmatprep.subr.bf16.mxu1 %v8168_v41  ;;  %v8228_v41 = vld [vmem:[%s9425_s10 + $0x6c8] sm:$0xff]  }
 0x200   : > { %7816 = vmatpush3.bf16.msra.mxu0 %v8169_v42  ;;  %v8229_v42 = vld [vmem:[%s9425_s10 + $0x608] sm:$0xff]  }
 0x201   : > { %7838 = vmatpush3.bf16.msra.mxu1 %v8170_v43  ;;  %7817 = vmatprep.subr.bf16.mxu0 %v8171_v44  ;;  %v8230_v43 = vld [vmem:[%s9425_s10 + $0x688] sm:$0xff]   ;;  %v8231_v44 = vld [vmem:[%s9425_s10 + $0x650] sm:$0xff]  }
 0x202   : > { %7839 = vmatprep.subr.bf16.mxu1 %v8172_v45  ;;  %v8232_v45 = vld [vmem:[%s9425_s10 + $0x6d0] sm:$0xff]  }
 0x204   : > { %7818 = vmatpush3.bf16.msra.mxu0 %v8173_v46  ;;  %v8233_v46 = vld [vmem:[%s9425_s10 + $0x610] sm:$0xff]  }
 0x205   : > { %7840 = vmatpush3.bf16.msra.mxu1 %v8174_v47  ;;  %7819 = vmatprep.subr.bf16.mxu0 %v8175_v48  ;;  %v8234_v47 = vld [vmem:[%s9425_s10 + $0x690] sm:$0xff]   ;;  %v8235_v48 = vld [vmem:[%s9425_s10 + $0x658] sm:$0xff]  }
 0x206   : > { %7841 = vmatprep.subr.bf16.mxu1 %v8176_v49  ;;  %v8236_v49 = vld [vmem:[%s9425_s10 + $0x6d8] sm:$0xff]  }
 0x208   : > { %7820 = vmatpush3.bf16.msra.mxu0 %v8177_v50  ;;  %v8237_v50 = vld [vmem:[%s9425_s10 + $0x618] sm:$0xff]  }
 0x209   : > { %7842 = vmatpush3.bf16.msra.mxu1 %v8178_v51  ;;  %7821 = vmatprep.subr.bf16.mxu0 %v8179_v52  ;;  %v8238_v51 = vld [vmem:[%s9425_s10 + $0x698] sm:$0xff]   ;;  %v8239_v52 = vld [vmem:[%s9425_s10 + $0x660] sm:$0xff]  }
 0x20a   : > { %7843 = vmatprep.subr.bf16.mxu1 %v8180_v53  ;;  %v8240_v53 = vld [vmem:[%s9425_s10 + $0x6e0] sm:$0xff]  }
 0x20c   : > { %7822 = vmatpush3.bf16.msra.mxu0 %v8181_v54  ;;  %v8241_v54 = vld [vmem:[%s9425_s10 + $0x620] sm:$0xff]  }
 0x20d   : > { %7844 = vmatpush3.bf16.msra.mxu1 %v8182_v55  ;;  %7851 = vmatprep.subr.bf16.mxu0 %v8187_v62  ;;  %v8242_v55 = vld [vmem:[%s9425_s10 + $0x6a0] sm:$0xff]   ;;  %v8249_v62 = vld [vmem:[%s9425_s10 + $0x630] sm:$0xff]  }
 0x20e   : > { %7873 = vmatprep.subr.bf16.mxu1 %v8188_v63  ;;  %v8250_v63 = vld [vmem:[%s9425_s10 + $0x6b0] sm:$0xff]  }
 0x20f   : > { %6917 = vmatmul.mubr.bf16.vlgmr.msra.gmra.mrb[16].mxu0 %v7357_v57  ;;  %v8244_v57 = vld [vmem:[%s9425_s10 + $0x6e8] sm:$0xff]  }
 0x210   : > { %6957 = vmatmul.mubr.bf16.vlgmr.msra.gmra.mrb[16].mxu1 %v7359_v60  ;;  %7852 = vmatpush3.bf16.msra.mxu0 %v8189_v0  ;;  %v8247_v60 = vld [vmem:[%s9425_s10 + $0x670] sm:$0xff]   ;;  %v8251_v0 = vld [vmem:[%s9425_s10 + $0x678] sm:$0xff]  }
 0x211   : > { %7874 = vmatpush3.bf16.msra.mxu1 %v8190_v1  ;;  %7853 = vmatprep.subr.bf16.mxu0 %v8191_v2  ;;  %v8252_v1 = vld [vmem:[%s9425_s10 + $0x6f8] sm:$0xff]  }
 0x212   : > { %7875 = vmatprep.subr.bf16.mxu1 %v8192_v3  ;;  %6996 = vmatprep.mubr.bf16.mxu0 %v7362_v33  ;;  %v8253_v2 = vld [vmem:[%s9425_s10 + $0x638] sm:$0xff]   ;;  %v8279_v33 = vld [vmem:[%s9425_s10 + $0x768] sm:$0xff]  }
 0x213   : > { %7036 = vmatprep.mubr.bf16.mxu1 %v7364_v35  ;;  %v8254_v3 = vld [vmem:[%s9425_s10 + $0x6b8] sm:$0xff]  }
 0x214   : > { %7854 = vmatpush3.bf16.msra.mxu0 %v8193_v4  ;;  %v4400_v4 = vld [vmem:[%s9776_s0 + $0x60] sm:$0xff] }
 0x215   : > { %7876 = vmatpush3.bf16.msra.mxu1 %v8194_v5  ;;  %7855 = vmatprep.subr.bf16.mxu0 %v8195_v6  ;;  %v4401_v5 = vld [vmem:[%s9776_s0 + $0x68] sm:$0xff]  ;;  %v7365_v6 = vcombine.low %v4400_v4, %v4400_v4 }
 0x216   : > { %7877 = vmatprep.subr.bf16.mxu1 %v8196_v7  ;;  %v7366_v7 = vcombine.high %v4400_v4, %v4400_v4 }
 0x218   : > { %7856 = vmatpush3.bf16.msra.mxu0 %v8197_v8  ;;  %v7367_v8 = vcombine.low %v4401_v5, %v4401_v5 }
 0x219   : > { %7878 = vmatpush3.bf16.msra.mxu1 %v8198_v9  ;;  %7857 = vmatprep.subr.bf16.mxu0 %v8199_v10  ;;  %v8259_v9 = vld [vmem:[%s9425_s10 + $0x740] sm:$0xff]   ;;  %v7368_v10 = vcombine.high %v4401_v5, %v4401_v5 }
 0x21a   : > { %7879 = vmatprep.subr.bf16.mxu1 %v8200_v11  ;;  %v8260_v11 = vld [vmem:[%s9425_s10 + $0x7c0] sm:$0xff]  }
 0x21c   : > { %7858 = vmatpush3.bf16.msra.mxu0 %v8201_v12  ;;  %v8261_v12 = vld [vmem:[%s9425_s10 + $0x700] sm:$0xff]  }
 0x21d   : > { %7880 = vmatpush3.bf16.msra.mxu1 %v8202_v13  ;;  %7859 = vmatprep.subr.bf16.mxu0 %v8203_v14  ;;  %v8262_v13 = vld [vmem:[%s9425_s10 + $0x780] sm:$0xff]   ;;  %v8263_v14 = vld [vmem:[%s9425_s10 + $0x748] sm:$0xff]  }
 0x21e   : > { %7881 = vmatprep.subr.bf16.mxu1 %v8204_v15  ;;  %v8264_v15 = vld [vmem:[%s9425_s10 + $0x7c8] sm:$0xff]  }
 0x220   : > { %7860 = vmatpush3.bf16.msra.mxu0 %v8205_v16  ;;  %v8265_v16 = vld [vmem:[%s9425_s10 + $0x708] sm:$0xff]  }
 0x221   : > { %7882 = vmatpush3.bf16.msra.mxu1 %v8206_v17  ;;  %7861 = vmatprep.subr.bf16.mxu0 %v8207_v18  ;;  %v8266_v17 = vld [vmem:[%s9425_s10 + $0x788] sm:$0xff]   ;;  %v8267_v18 = vld [vmem:[%s9425_s10 + $0x750] sm:$0xff]  }
 0x222   : > { %7883 = vmatprep.subr.bf16.mxu1 %v8208_v19  ;;  %v8268_v19 = vld [vmem:[%s9425_s10 + $0x7d0] sm:$0xff]  }
 0x224   : > { %7862 = vmatpush3.bf16.msra.mxu0 %v8209_v20  ;;  %v8269_v20 = vld [vmem:[%s9425_s10 + $0x710] sm:$0xff]  }
 0x225   : > { %7884 = vmatpush3.bf16.msra.mxu1 %v8210_v21  ;;  %7863 = vmatprep.subr.bf16.mxu0 %v8211_v22  ;;  %v8270_v21 = vld [vmem:[%s9425_s10 + $0x790] sm:$0xff]   ;;  %v8271_v22 = vld [vmem:[%s9425_s10 + $0x758] sm:$0xff]  }
 0x226   : > { %7885 = vmatprep.subr.bf16.mxu1 %v8212_v23  ;;  %v8272_v23 = vld [vmem:[%s9425_s10 + $0x7d8] sm:$0xff]  }
 0x228   : > { %7864 = vmatpush3.bf16.msra.mxu0 %v8213_v24  ;;  %v8273_v24 = vld [vmem:[%s9425_s10 + $0x718] sm:$0xff]  }
 0x229   : > { %7886 = vmatpush3.bf16.msra.mxu1 %v8214_v25  ;;  %7865 = vmatprep.subr.bf16.mxu0 %v8215_v26  ;;  %v8274_v25 = vld [vmem:[%s9425_s10 + $0x798] sm:$0xff]   ;;  %v8275_v26 = vld [vmem:[%s9425_s10 + $0x760] sm:$0xff]  }
 0x22a   : > { %7887 = vmatprep.subr.bf16.mxu1 %v8216_v27  ;;  %v8276_v27 = vld [vmem:[%s9425_s10 + $0x7e0] sm:$0xff]  }
 0x22c   : > { %7866 = vmatpush3.bf16.msra.mxu0 %v8217_v28  ;;  %v8277_v28 = vld [vmem:[%s9425_s10 + $0x720] sm:$0xff]  }
 0x22d   : > { %7888 = vmatpush3.bf16.msra.mxu1 %v8218_v29  ;;  %7895 = vmatprep.subr.bf16.mxu0 %v8223_v36  ;;  %v8278_v29 = vld [vmem:[%s9425_s10 + $0x7a0] sm:$0xff]  }
 0x22e   : > { %7917 = vmatprep.subr.bf16.mxu1 %v8224_v37 }
 0x22f   : > { %6997 = vmatmul.mubr.bf16.vlgmr.msra.gmra.mrb[20].mxu0 %v7361_v32 }
 0x230   : > { %7037 = vmatmul.mubr.bf16.vlgmr.msra.gmra.mrb[20].mxu1 %v7363_v34  ;;  %7896 = vmatpush3.bf16.msra.mxu0 %v8225_v38  ;;  %v8280_v34 = vld [vmem:[%s9425_s10 + $0x7e8] sm:$0xff]  }
 0x231   : > { %7918 = vmatpush3.bf16.msra.mxu1 %v8226_v39  ;;  %7897 = vmatprep.subr.bf16.mxu0 %v8227_v40  ;;  %v8281_v40 = vld [vmem:[%s9425_s10 + $0x728] sm:$0xff]  }
 0x232   : > { %7919 = vmatprep.subr.bf16.mxu1 %v8228_v41  ;;  %7076 = vmatprep.mubr.bf16.mxu0 %v7366_v7  ;;  %v8282_v41 = vld [vmem:[%s9425_s10 + $0x7a8] sm:$0xff]  }
 0x233   : > { %7116 = vmatprep.mubr.bf16.mxu1 %v7368_v10 }
 0x234   : > { %7898 = vmatpush3.bf16.msra.mxu0 %v8229_v42 }
 0x235   : > { %7920 = vmatpush3.bf16.msra.mxu1 %v8230_v43  ;;  %7899 = vmatprep.subr.bf16.mxu0 %v8231_v44 }
 0x236   : > { %7921 = vmatprep.subr.bf16.mxu1 %v8232_v45  ;;  %v8283_v45 = vld [vmem:[%s9425_s10 + $0x770] sm:$0xff]  }
 0x238   : > { %7900 = vmatpush3.bf16.msra.mxu0 %v8233_v46  ;;  %v8284_v46 = vld [vmem:[%s9425_s10 + $0x7f0] sm:$0xff]  }
 0x239   : > { %7922 = vmatpush3.bf16.msra.mxu1 %v8234_v47  ;;  %7901 = vmatprep.subr.bf16.mxu0 %v8235_v48  ;;  %v8285_v47 = vld [vmem:[%s9425_s10 + $0x730] sm:$0xff]  }
 0x23a   : > { %7923 = vmatprep.subr.bf16.mxu1 %v8236_v49  ;;  %v8286_v48 = vld [vmem:[%s9425_s10 + $0x7b0] sm:$0xff]   ;;  %v8287_v49 = vld [vmem:[%s9425_s10 + $0x778] sm:$0xff]  }
 0x23c   : > { %7902 = vmatpush3.bf16.msra.mxu0 %v8237_v50  ;;  %v8288_v50 = vld [vmem:[%s9425_s10 + $0x7f8] sm:$0xff]  }
 0x23d   : > { %7924 = vmatpush3.bf16.msra.mxu1 %v8238_v51  ;;  %7903 = vmatprep.subr.bf16.mxu0 %v8239_v52  ;;  %v8289_v51 = vld [vmem:[%s9425_s10 + $0x738] sm:$0xff]  }
 0x23e   : > { %7925 = vmatprep.subr.bf16.mxu1 %v8240_v53  ;;  %v8290_v52 = vld [vmem:[%s9425_s10 + $0x7b8] sm:$0xff]   ;;  %v4402_v53 = vld [vmem:[%s9776_s0 + $0x70] sm:$0xff] }
 0x240   : > { %7904 = vmatpush3.bf16.msra.mxu0 %v8241_v54  ;;  %v4403_v54 = vld [vmem:[%s9776_s0 + $0x78] sm:$0xff] }
 0x241   : > { %7926 = vmatpush3.bf16.msra.mxu1 %v8242_v55  ;;  %7905 = vmatprep.subr.bf16.mxu0 %v8243_v56  ;;  %v7369_v55 = vcombine.low %v4402_v53, %v4402_v53  ;;  %v7370_v56 = vcombine.high %v4402_v53, %v4402_v53 }
 0x242   : > { %7927 = vmatprep.subr.bf16.mxu1 %v8244_v57  ;;  %v7371_v57 = vcombine.low %v4403_v54, %v4403_v54 }
 0x244   : > { %7906 = vmatpush3.bf16.msra.mxu0 %v8245_v58  ;;  %v7372_v58 = vcombine.high %v4403_v54, %v4403_v54 }
 0x245   : > { %7928 = vmatpush3.bf16.msra.mxu1 %v8246_v59  ;;  %7907 = vmatprep.subr.bf16.mxu0 %v8247_v60 }
 0x246   : > { %7929 = vmatprep.subr.bf16.mxu1 %v8248_v61 }
 0x248   : > { %7908 = vmatpush3.bf16.msra.mxu0 %v8249_v62 }
 0x249   : > { %7930 = vmatpush3.bf16.msra.mxu1 %v8250_v63  ;;  %7909 = vmatprep.subr.bf16.mxu0 %v8251_v0 }
 0x24a   : > { %7931 = vmatprep.subr.bf16.mxu1 %v8252_v1 }
 0x24c   : > { %7910 = vmatpush3.bf16.msra.mxu0 %v8253_v2 }
 0x24d   : > { %7932 = vmatpush3.bf16.msra.mxu1 %v8254_v3  ;;  %7939 = vmatprep.subr.bf16.mxu0 %v8259_v9 }
 0x24e   : > { %7961 = vmatprep.subr.bf16.mxu1 %v8260_v11 }
 0x24f   : > { %7077 = vmatmul.mubr.bf16.vlgmr.msra.gmra.mrb[24].mxu0 %v7365_v6 }
 0x250   : > { %7117 = vmatmul.mubr.bf16.vlgmr.msra.gmra.mrb[24].mxu1 %v7367_v8  ;;  %7940 = vmatpush3.bf16.msra.mxu0 %v8261_v12 }
 0x251   : > { %7962 = vmatpush3.bf16.msra.mxu1 %v8262_v13  ;;  %7941 = vmatprep.subr.bf16.mxu0 %v8263_v14 }
 0x252   : > { %7963 = vmatprep.subr.bf16.mxu1 %v8264_v15  ;;  %7156 = vmatprep.mubr.bf16.mxu0 %v7370_v56 }
 0x253   : > { %7196 = vmatprep.mubr.bf16.mxu1 %v7372_v58 }
 0x254   : > { %7942 = vmatpush3.bf16.msra.mxu0 %v8265_v16 }
 0x255   : > { %7964 = vmatpush3.bf16.msra.mxu1 %v8266_v17  ;;  %7943 = vmatprep.subr.bf16.mxu0 %v8267_v18 }
 0x256   : > { %7965 = vmatprep.subr.bf16.mxu1 %v8268_v19 }
 0x258   : > { %7944 = vmatpush3.bf16.msra.mxu0 %v8269_v20 }
 0x259   : > { %7966 = vmatpush3.bf16.msra.mxu1 %v8270_v21  ;;  %7945 = vmatprep.subr.bf16.mxu0 %v8271_v22 }
 0x25a   : > { %7967 = vmatprep.subr.bf16.mxu1 %v8272_v23 }
 0x25c   : > { %7946 = vmatpush3.bf16.msra.mxu0 %v8273_v24 }
 0x25d   : > { %7968 = vmatpush3.bf16.msra.mxu1 %v8274_v25  ;;  %7947 = vmatprep.subr.bf16.mxu0 %v8275_v26 }
 0x25e   : > { %7969 = vmatprep.subr.bf16.mxu1 %v8276_v27 }
 0x260   : > { %7948 = vmatpush3.bf16.msra.mxu0 %v8277_v28 }
 0x261   : > { %7970 = vmatpush3.bf16.msra.mxu1 %v8278_v29  ;;  %7949 = vmatprep.subr.bf16.mxu0 %v8279_v33 }
 0x262   : > { %v7647_v30 = vpop.f32.mrb[0].mxu0  ;;  %7971 = vmatprep.subr.bf16.mxu1 %v8280_v34 }
 0x263   : > { %v7669_v31 = vpop.f32.mrb[0].mxu1  ;;  %v7648_v32 = vpop.f32.mrb[1].mxu0 }
 0x264   : > { %v7649_v35 = vadd.f32 %v7648_v32, %v7647_v30  ;;  %v7670_v36 = vpop.f32.mrb[1].mxu1  ;;  %v7650_v37 = vpop.f32.mrb[2].mxu0  ;;  %7950 = vmatpush3.bf16.msra.mxu0 %v8281_v40 }
 0x265   : > { %v7671_v38 = vadd.f32 %v7670_v36, %v7669_v31  ;;  %v7672_v39 = vpop.f32.mrb[2].mxu1  ;;  %v7651_v42 = vpop.f32.mrb[3].mxu0  ;;  %7972 = vmatpush3.bf16.msra.mxu1 %v8282_v41  ;;  %7951 = vmatprep.subr.bf16.mxu0 %v8283_v45 }
 0x266   : > { %v7673_v44 = vpop.f32.mrb[3].mxu1  ;;  %7973 = vmatprep.subr.bf16.mxu1 %v8284_v46 }
 0x267   : > { %v6639_v43 = vadd.f32 %v7671_v38, %v7649_v35 }
 0x268   : > { %7952 = vmatpush3.bf16.msra.mxu0 %v8285_v47 }
 0x269   : > { %7974 = vmatpush3.bf16.msra.mxu1 %v8286_v48  ;;  %7953 = vmatprep.subr.bf16.mxu0 %v8287_v49 }
 0x26a   : > { %7975 = vmatprep.subr.bf16.mxu1 %v8288_v50 }
 0x26c   : > { %7954 = vmatpush3.bf16.msra.mxu0 %v8289_v51 }
 0x26d   : > { %7976 = vmatpush3.bf16.msra.mxu1 %v8290_v52 }
 0x26f   : > { %7157 = vmatmul.mubr.bf16.vlgmr.msra.gmra.mrb[28].mxu0 %v7369_v55 }
 0x270   : > { %7197 = vmatmul.mubr.bf16.vlgmr.msra.gmra.mrb[28].mxu1 %v7371_v57 }
 0x282   : > { %v7691_v59 = vpop.f32.mrb[4].mxu0 }
 0x283   : > { %v7713_v60 = vpop.f32.mrb[4].mxu1  ;;  %v7692_v61 = vpop.f32.mrb[5].mxu0 }
 0x284   : > { %v7693_v62 = vadd.f32 %v7692_v61, %v7691_v59  ;;  %v7714_v63 = vpop.f32.mrb[5].mxu1  ;;  %v7694_v0 = vpop.f32.mrb[6].mxu0 }
 0x285   : > { %v7715_v1 = vadd.f32 %v7714_v63, %v7713_v60  ;;  %v7716_v2 = vpop.f32.mrb[6].mxu1  ;;  %v7695_v3 = vpop.f32.mrb[7].mxu0 }
 0x286   : > { %v6679_v4 = vadd.f32 %v7693_v62, %v6639_v43  ;;  %v7717_v5 = vpop.f32.mrb[7].mxu1 }
 0x288   : > { %v6719_v6 = vadd.f32 %v7715_v1, %v6679_v4 }
 0x2a2   : > { %v7735_v7 = vpop.f32.mrb[8].mxu0 }
 0x2a3   : > { %v7757_v8 = vpop.f32.mrb[8].mxu1  ;;  %v7736_v9 = vpop.f32.mrb[9].mxu0 }
 0x2a4   : > { %v7737_v10 = vadd.f32 %v7736_v9, %v7735_v7  ;;  %v7758_v11 = vpop.f32.mrb[9].mxu1  ;;  %v7738_v12 = vpop.f32.mrb[10].mxu0 }
 0x2a5   : > { %v7759_v13 = vadd.f32 %v7758_v11, %v7757_v8  ;;  %v7760_v14 = vpop.f32.mrb[10].mxu1  ;;  %v7739_v15 = vpop.f32.mrb[11].mxu0 }
 0x2a6   : > { %v6759_v16 = vadd.f32 %v7737_v10, %v6719_v6  ;;  %v7761_v17 = vpop.f32.mrb[11].mxu1 }
 0x2a8   : > { %v6799_v18 = vadd.f32 %v7759_v13, %v6759_v16 }
 0x2c2   : > { %v7779_v19 = vpop.f32.mrb[12].mxu0 }
 0x2c3   : > { %v7801_v20 = vpop.f32.mrb[12].mxu1  ;;  %v7780_v21 = vpop.f32.mrb[13].mxu0 }
 0x2c4   : > { %v7802_v22 = vpop.f32.mrb[13].mxu1  ;;  %v7781_v23 = vadd.f32 %v7780_v21, %v7779_v19  ;;  %v7782_v25 = vpop.f32.mrb[14].mxu0 }
 0x2c5   : > { %v7803_v24 = vadd.f32 %v7802_v22, %v7801_v20  ;;  %v7804_v26 = vpop.f32.mrb[14].mxu1  ;;  %v7783_v27 = vpop.f32.mrb[15].mxu0 }
 0x2c6   : > { %v7805_v28 = vpop.f32.mrb[15].mxu1  ;;  %v6839_v29 = vadd.f32 %v7781_v23, %v6799_v18 }
 0x2c8   : > { %v6879_v30 = vadd.f32 %v7803_v24, %v6839_v29 }
 0x2e2   : > { %v7823_v31 = vpop.f32.mrb[16].mxu0 }
 0x2e3   : > { %v7845_v32 = vpop.f32.mrb[16].mxu1  ;;  %v7824_v33 = vpop.f32.mrb[17].mxu0 }
 0x2e4   : > { %v7846_v34 = vpop.f32.mrb[17].mxu1  ;;  %v7825_v35 = vadd.f32 %v7824_v33, %v7823_v31  ;;  %v7826_v37 = vpop.f32.mrb[18].mxu0 }
 0x2e5   : > { %v7847_v36 = vadd.f32 %v7846_v34, %v7845_v32  ;;  %v7848_v38 = vpop.f32.mrb[18].mxu1  ;;  %v7827_v39 = vpop.f32.mrb[19].mxu0  ;;  %v7230_v34 = vlaneseq }
 0x2e6   : > { %v7849_v40 = vpop.f32.mrb[19].mxu1  ;;  %v6919_v41 = vadd.f32 %v7825_v35, %v6879_v30 }
 0x2e7   : > { %v7231_v35 = vshrl.u32 %v7230_v34, 7  ;;  %v7226_v40 = vld [vmem:[%s4382_s28] sm:$0x1] }
 0x2e8   : > { %v6959_v42 = vadd.f32 %v7847_v36, %v6919_v41  ;;  %v7222_v36 = vld [vmem:[%s4379_s25] sm:$0x1] }
 0x2e9   : > { %v7232_v37 = vsub.s32 0, %v7231_v35 }
 0x302   : > { %v7867_v43 = vpop.f32.mrb[20].mxu0 }
 0x303   : > { %v7889_v44 = vpop.f32.mrb[20].mxu1  ;;  %v7868_v45 = vpop.f32.mrb[21].mxu0 }
 0x304   : > { %v7869_v46 = vadd.f32 %v7868_v45, %v7867_v43  ;;  %v7890_v47 = vpop.f32.mrb[21].mxu1  ;;  %v7870_v48 = vpop.f32.mrb[22].mxu0 }
 0x305   : > { %v7891_v49 = vadd.f32 %v7890_v47, %v7889_v44  ;;  %v7892_v50 = vpop.f32.mrb[22].mxu1  ;;  %v7871_v51 = vpop.f32.mrb[23].mxu0 }
 0x306   : > { %v6999_v52 = vadd.f32 %v7869_v46, %v6959_v42  ;;  %v7893_v53 = vpop.f32.mrb[23].mxu1 }
 0x308   : > { %v7039_v54 = vadd.f32 %v7891_v49, %v6999_v52 }
 0x322   : > { %v7911_v55 = vpop.f32.mrb[24].mxu0 }
 0x323   : > { %v7933_v56 = vpop.f32.mrb[24].mxu1  ;;  %v7912_v57 = vpop.f32.mrb[25].mxu0 }
 0x324   : > { %v7913_v58 = vadd.f32 %v7912_v57, %v7911_v55  ;;  %v7934_v59 = vpop.f32.mrb[25].mxu1  ;;  %v7914_v60 = vpop.f32.mrb[26].mxu0 }
 0x325   : > { %v7935_v61 = vadd.f32 %v7934_v59, %v7933_v56  ;;  %v7936_v62 = vpop.f32.mrb[26].mxu1  ;;  %v7915_v63 = vpop.f32.mrb[27].mxu0 }
 0x326   : > { %v7079_v0 = vadd.f32 %v7913_v58, %v7039_v54  ;;  %v7937_v1 = vpop.f32.mrb[27].mxu1 }
 0x328   : > { %v7119_v2 = vadd.f32 %v7935_v61, %v7079_v0 }
 0x342   : > { %v7955_v3 = vpop.f32.mrb[28].mxu0 }
 0x343   : > { %v7977_v4 = vpop.f32.mrb[28].mxu1  ;;  %v7956_v5 = vpop.f32.mrb[29].mxu0 }
 0x344   : > { %v7957_v6 = vadd.f32 %v7956_v5, %v7955_v3  ;;  %v7978_v7 = vpop.f32.mrb[29].mxu1  ;;  %v7958_v8 = vpop.f32.mrb[30].mxu0 }
 0x345   : > { %v7979_v9 = vadd.f32 %v7978_v7, %v7977_v4  ;;  %v7980_v10 = vpop.f32.mrb[30].mxu1  ;;  %v7959_v11 = vpop.f32.mrb[31].mxu0 }
 0x346   : > { %v7159_v12 = vadd.f32 %v7957_v6, %v7119_v2  ;;  %v7981_v13 = vpop.f32.mrb[31].mxu1 }
 0x348   : > { %v7199_v14 = vadd.f32 %v7979_v9, %v7159_v12 }
 0x34a   : > { %v7204_v15 = vrot.slane %v7199_v14, 4  ;;  %v7211_v16 = vmul.f32 %v7199_v14, %v7199_v14 }
 0x34c   : > { %v7205_v17 = vadd.f32 %v7204_v15, %v7199_v14  ;;  %v7212_v18 = vrot.slane %v7211_v16, 4 }
 0x34e   : > { %v7206_v19 = vrot.slane %v7205_v17, 2  ;;  %v7213_v20 = vadd.f32 %v7212_v18, %v7211_v16 }
 0x350   : > { %v7207_v21 = vadd.f32 %v7206_v19, %v7205_v17  ;;  %v7214_v22 = vrot.slane %v7213_v20, 2 }
 0x352   : > { %v7208_v23 = vrot.slane %v7207_v21, 1  ;;  %v7215_v24 = vadd.f32 %v7214_v22, %v7213_v20 }
 0x354   : > { %v7209_v25 = vadd.f32 %v7208_v23, %v7207_v21  ;;  %v7216_v26 = vrot.slane %v7215_v24, 1 }
 0x356   : > { %v7210_v27 = vmul.f32 0.125, %v7209_v25  ;;  %v7217_v28 = vadd.f32 %v7216_v26, %v7215_v24 }
 0x358   : > { %v7218_v29 = vmul.f32 0.125, %v7217_v28  ;;  %v7219_v30 = vmul.f32 %v7210_v27, %v7210_v27 }
 0x35a   : > { %v7220_v31 = vsub.f32 %v7218_v29, %v7219_v30 }
 0x35c   : > { %v7221_v32 = vmax.f32 %v7220_v31, 0.0 }
 0x35e   : > { %v7223_v33 = vadd.f32 1e-05, %v7221_v32 }
 0x360   : > { %8295 = vrsqrt.f32 %v7223_v33 }
 0x36a   : > { %v8296_v38 = vpop.eup %8295 }
 0x36b   : > { %v7225_v39 = vmul.f32 %v8296_v38, %v7222_v36 }
 0x36d   : > { %v7227_v41 = vmul.f32 %v7225_v39, %v7210_v27  ;;  %v7233_v42 = vrot.slane %v7225_v39, %v7232_v37 }
 0x36f   : > { %v7228_v43 = vsub.f32 %v7226_v40, %v7227_v41  ;;  %v7235_v44 = vmul.f32 %v7233_v42, %v7199_v14 }
 0x371   : > { %v7240_v45 = vrot.slane %v7228_v43, %v7232_v37 }
 0x373   : > { %v7242_v46 = vadd.f32 %v7240_v45, %v7235_v44 }
 0x375   : > { %v7243_v47 = vmul.f32 0.2, %v7242_v46 }
 0x377   : > { %v7244_v48 = vmax.f32 %v7242_v46, %v7243_v47 }
 0x379   : > { %v7245_v49 = vpack.c.bf16 %v7244_v48, %v7244_v48 }
 0x37b   : > { %7246 = vst [vmem:[%s4386_s5] sm:$0xf] %v7245_v49 }
 0x37c PF: > { %p11_p9 = scmp.ge.s32.totalorder %s8363_s19, 6   ;;  %s9781_s15 = smov %s8315_s16 }
 0x37d   : > { %s9782_s16 = smov %s8372_s22  ;;  %s9783_s17 = smov %s8363_s19 }
 0x37e   :  { %13 = sbr.rel (!%p11_p9) target bundleno = 2 (0x2), region = 133 }

// kernel: discriminator_forward.9
= control target key start
LH: loop header
LB: loop body
LE: loop exit
PB: predicated region body
PF: predicated region fallthrough
CT: control target
= control target key end

     0   :  { %v7626_v22 = vmov 1966171168   ;;  %v1068_v24 = vlaneseq  ;;  %vm5878_vm0 = vcmask 1024   ;;  %s9327_s1 = inlined_call_operand.vmem [shape: bf16[8192,1], index: 1, kind: input, shape index: {}]   ;;  %s9328_s0 = inlined_call_operand.vmem [shape: bf16[2,8192], index: 0, kind: input, shape index: {}]   ;;  %s9329_s2 = inlined_call_operand.<no memory space> [shape: f32[1,1], index: 2, kind: input, shape index: {}]   ;;  %s9330_s3 = inlined_call_operand.vmem [shape: f32[2,1], index: 3, kind: output, shape index: {}]  }
   0x1   :  { %v7102_v0 = vld [vmem:[%s9327_s1 + $0x40] sm:$0xff]   ;;  %v7106_v4 = vld [vmem:[%s9327_s1 + $0x48] sm:$0xff]   ;;  %v7110_v8 = vld [vmem:[%s9327_s1 + $0x50] sm:$0xff]   ;;  %v1066_v23 = vunpack.c.l.s4 %v7626_v22 }
   0x2   :  { %v7103_v1 = vld [vmem:[%s9327_s1 + $0xc0] sm:$0xff]   ;;  %6397 = vmatprep.subr.bf16.mxu0 %v7102_v0  ;;  %v7107_v5 = vld [vmem:[%s9327_s1 + $0xc8] sm:$0xff]   ;;  %v7111_v9 = vld [vmem:[%s9327_s1 + $0xd0] sm:$0xff]   ;;  %v1069_v30 = vshrl.u32 %v1068_v24, 7 }
   0x3   :  { %v7104_v2 = vld [vmem:[%s9327_s1] sm:$0xff]   ;;  %6419 = vmatprep.subr.bf16.mxu1 %v7103_v1  ;;  %v7108_v6 = vld [vmem:[%s9327_s1 + $0x8] sm:$0xff]   ;;  %v7112_v10 = vld [vmem:[%s9327_s1 + $0x10] sm:$0xff]   ;;  %v1067_v29 = vunpack.c.0.s8 %v1066_v23 }
   0x4   :  { %v7105_v3 = vld [vmem:[%s9327_s1 + $0x80] sm:$0xff]   ;;  %6398 = vmatpush3.bf16.msra.mxu0 %v7104_v2  ;;  %v7109_v7 = vld [vmem:[%s9327_s1 + $0x88] sm:$0xff]   ;;  %v7113_v11 = vld [vmem:[%s9327_s1 + $0x90] sm:$0xff]  }
   0x5   :  { %6420 = vmatpush3.bf16.msra.mxu1 %v7105_v3  ;;  %6399 = vmatprep.subr.bf16.mxu0 %v7106_v4  ;;  %v7114_v12 = vld [vmem:[%s9327_s1 + $0x58] sm:$0xff]   ;;  %v7118_v16 = vld [vmem:[%s9327_s1 + $0x60] sm:$0xff]   ;;  %v7122_v20 = vld [vmem:[%s9327_s1 + $0x68] sm:$0xff]   ;;  %v7737_v35 = vsub.s32 %v1067_v29, %v1069_v30 }
   0x6   :  { %6421 = vmatprep.subr.bf16.mxu1 %v7107_v5  ;;  %v7115_v13 = vld [vmem:[%s9327_s1 + $0xd8] sm:$0xff]   ;;  %v7119_v17 = vld [vmem:[%s9327_s1 + $0xe0] sm:$0xff]   ;;  %v7123_v21 = vld [vmem:[%s9327_s1 + $0xe8] sm:$0xff]  }
   0x7   :  { %v7116_v14 = vld [vmem:[%s9327_s1 + $0x18] sm:$0xff]   ;;  %v7120_v18 = vld [vmem:[%s9327_s1 + $0x20] sm:$0xff]   ;;  %v7124_v25 = vld [vmem:[%s9327_s1 + $0x28] sm:$0xff]  }
   0x8   :  { %6400 = vmatpush3.bf16.msra.mxu0 %v7108_v6  ;;  %v7117_v15 = vld [vmem:[%s9327_s1 + $0x98] sm:$0xff]   ;;  %v7121_v19 = vld [vmem:[%s9327_s1 + $0xa0] sm:$0xff]   ;;  %v7125_v26 = vld [vmem:[%s9327_s1 + $0xa8] sm:$0xff]  }
   0x9   :  { %6422 = vmatpush3.bf16.msra.mxu1 %v7109_v7  ;;  %6401 = vmatprep.subr.bf16.mxu0 %v7110_v8  ;;  %v7126_v27 = vld [vmem:[%s9327_s1 + $0x70] sm:$0xff]   ;;  %v7130_v33 = vld [vmem:[%s9327_s1 + $0x78] sm:$0xff]   ;;  %v17_v38 = vld [vmem:[%s9328_s0] sm:$0xff] }
   0xa   :  { %6423 = vmatprep.subr.bf16.mxu1 %v7111_v9  ;;  %v7127_v28 = vld [vmem:[%s9327_s1 + $0xf0] sm:$0xff]   ;;  %v7131_v34 = vld [vmem:[%s9327_s1 + $0xf8] sm:$0xff]   ;;  %v1064_v39 = vcombine.high %v17_v38, %v17_v38  ;;  %v1071_v40 = vrot.slane %v17_v38, %v7737_v35  ;;  %v7135_v41 = vld [vmem:[%s9327_s1 + $0x140] sm:$0xff]  }
   0xb   :  { %v7128_v31 = vld [vmem:[%s9327_s1 + $0x30] sm:$0xff]   ;;  %v7132_v36 = vld [vmem:[%s9327_s1 + $0x38] sm:$0xff]   ;;  %v7136_v42 = vld [vmem:[%s9327_s1 + $0x1c0] sm:$0xff]  }
   0xc   :  { %6402 = vmatpush3.bf16.msra.mxu0 %v7112_v10  ;;  %v7129_v32 = vld [vmem:[%s9327_s1 + $0xb0] sm:$0xff]   ;;  %v7133_v37 = vld [vmem:[%s9327_s1 + $0xb8] sm:$0xff]   ;;  %v1079_v43 = vcombine.high %v1071_v40, %v1071_v40  ;;  %v1087_v44 = vrot.slane %v1071_v40, %v7737_v35  ;;  %v7757_v45 = vrot.slane %v1064_v39, %v7737_v35  ;;  %v7137_v46 = vld [vmem:[%s9327_s1 + $0x100] sm:$0xff]  }
   0xd   :  { %6424 = vmatpush3.bf16.msra.mxu1 %v7113_v11  ;;  %6403 = vmatprep.subr.bf16.mxu0 %v7114_v12  ;;  %v7138_v48 = vld [vmem:[%s9327_s1 + $0x180] sm:$0xff]   ;;  %v7139_v51 = vld [vmem:[%s9327_s1 + $0x148] sm:$0xff]   ;;  %v7143_v58 = vld [vmem:[%s9327_s1 + $0x150] sm:$0xff]  }
   0xe   :  { %6425 = vmatprep.subr.bf16.mxu1 %v7115_v13  ;;  %v1101_v47 = vrot.slane %v1079_v43, %v7737_v35  ;;  %v1080_v49 = vcombine.high %v7757_v45, %v7757_v45  ;;  %v1109_v50 = vcombine.high %v1087_v44, %v1087_v44  ;;  %v7140_v53 = vld [vmem:[%s9327_s1 + $0x1c8] sm:$0xff]   ;;  %v7144_v59 = vld [vmem:[%s9327_s1 + $0x1d0] sm:$0xff]   ;;  %v7147_v62 = vld [vmem:[%s9327_s1 + $0x158] sm:$0xff]  }
   0xf   :  { %v7141_v55 = vld [vmem:[%s9327_s1 + $0x108] sm:$0xff]   ;;  %v7145_v60 = vld [vmem:[%s9327_s1 + $0x110] sm:$0xff]   ;;  %v7148_v63 = vld [vmem:[%s9327_s1 + $0x1d8] sm:$0xff]  }
  0x10   :  { %6404 = vmatpush3.bf16.msra.mxu0 %v7116_v14  ;;  %4624 = vmatprep.mubr.bf16.mxu0 %v1101_v47  ;;  %v1111_v52 = vcombine.high %v1101_v47, %v1101_v47  ;;  %v1108_v54 = vrot.slane %v1080_v49, %v7737_v35  ;;  %v7142_v56 = vld [vmem:[%s9327_s1 + $0x188] sm:$0xff]   ;;  %v7146_v61 = vld [vmem:[%s9327_s1 + $0x190] sm:$0xff]   ;;  %v7149_v0 = vld [vmem:[%s9327_s1 + $0x118] sm:$0xff]  }
  0x11   :  { %6426 = vmatpush3.bf16.msra.mxu1 %v7117_v15  ;;  %6405 = vmatprep.subr.bf16.mxu0 %v7118_v16  ;;  %v7150_v1 = vld [vmem:[%s9327_s1 + $0x198] sm:$0xff]   ;;  %v7151_v2 = vld [vmem:[%s9327_s1 + $0x160] sm:$0xff]   ;;  %v7155_v6 = vld [vmem:[%s9327_s1 + $0x168] sm:$0xff]  }
  0x12   :  { %6427 = vmatprep.subr.bf16.mxu1 %v7119_v17  ;;  %4664 = vmatprep.mubr.bf16.mxu1 %v1111_v52  ;;  %v1112_v57 = vcombine.high %v1108_v54, %v1108_v54  ;;  %v7152_v3 = vld [vmem:[%s9327_s1 + $0x1e0] sm:$0xff]   ;;  %v7156_v7 = vld [vmem:[%s9327_s1 + $0x1e8] sm:$0xff]   ;;  %v7159_v10 = vld [vmem:[%s9327_s1 + $0x170] sm:$0xff]  }
  0x13   :  { %v7153_v4 = vld [vmem:[%s9327_s1 + $0x120] sm:$0xff]   ;;  %v7157_v8 = vld [vmem:[%s9327_s1 + $0x128] sm:$0xff]   ;;  %v7160_v11 = vld [vmem:[%s9327_s1 + $0x1f0] sm:$0xff]  }
  0x14   :  { %6406 = vmatpush3.bf16.msra.mxu0 %v7120_v18  ;;  %v7154_v5 = vld [vmem:[%s9327_s1 + $0x1a0] sm:$0xff]   ;;  %v7158_v9 = vld [vmem:[%s9327_s1 + $0x1a8] sm:$0xff]   ;;  %v7161_v12 = vld [vmem:[%s9327_s1 + $0x130] sm:$0xff]   ;;  %v1094_v18 = vrot.slane %v7757_v45, %v7737_v35 }
  0x15   :  { %6428 = vmatpush3.bf16.msra.mxu1 %v7121_v19  ;;  %6407 = vmatprep.subr.bf16.mxu0 %v7122_v20  ;;  %v7162_v13 = vld [vmem:[%s9327_s1 + $0x1b0] sm:$0xff]   ;;  %v7163_v14 = vld [vmem:[%s9327_s1 + $0x178] sm:$0xff]   ;;  %v7167_v19 = vld [vmem:[%s9327_s1 + $0x240] sm:$0xff]  }
  0x16   :  { %6429 = vmatprep.subr.bf16.mxu1 %v7123_v21  ;;  %v7164_v15 = vld [vmem:[%s9327_s1 + $0x1f8] sm:$0xff]   ;;  %v7168_v20 = vld [vmem:[%s9327_s1 + $0x2c0] sm:$0xff]   ;;  %v1110_v23 = vcombine.high %v1094_v18, %v1094_v18  ;;  %v7171_v24 = vld [vmem:[%s9327_s1 + $0x248] sm:$0xff]  }
  0x17   :  { %v7165_v16 = vld [vmem:[%s9327_s1 + $0x138] sm:$0xff]   ;;  %v7169_v21 = vld [vmem:[%s9327_s1 + $0x200] sm:$0xff]   ;;  %v7176_v29 = vld [vmem:[%s9327_s1 + $0x2d0] sm:$0xff]  }
  0x18   :  { %6408 = vmatpush3.bf16.msra.mxu0 %v7124_v25  ;;  %v7166_v17 = vld [vmem:[%s9327_s1 + $0x1b8] sm:$0xff]   ;;  %v7170_v22 = vld [vmem:[%s9327_s1 + $0x280] sm:$0xff]   ;;  %v7172_v25 = vld [vmem:[%s9327_s1 + $0x2c8] sm:$0xff]  }
  0x19   :  { %6430 = vmatpush3.bf16.msra.mxu1 %v7125_v26  ;;  %6409 = vmatprep.subr.bf16.mxu0 %v7126_v27  ;;  %v7173_v26 = vld [vmem:[%s9327_s1 + $0x208] sm:$0xff]   ;;  %v7177_v30 = vld [vmem:[%s9327_s1 + $0x210] sm:$0xff]   ;;  %v7184_v38 = vld [vmem:[%s9327_s1 + $0x2e0] sm:$0xff]  }
  0x1a   :  { %6431 = vmatprep.subr.bf16.mxu1 %v7127_v28  ;;  %v7174_v27 = vld [vmem:[%s9327_s1 + $0x288] sm:$0xff]   ;;  %v7175_v28 = vld [vmem:[%s9327_s1 + $0x250] sm:$0xff]   ;;  %v7185_v39 = vld [vmem:[%s9327_s1 + $0x220] sm:$0xff]  }
  0x1b   :  { %v7186_v40 = vld [vmem:[%s9327_s1 + $0x2a0] sm:$0xff]   ;;  %v7189_v43 = vld [vmem:[%s9327_s1 + $0x228] sm:$0xff]   ;;  %v7191_v45 = vld [vmem:[%s9327_s1 + $0x270] sm:$0xff]  }
  0x1c   :  { %6410 = vmatpush3.bf16.msra.mxu0 %v7128_v31  ;;  %v7178_v31 = vld [vmem:[%s9327_s1 + $0x290] sm:$0xff]   ;;  %v7195_v49 = vld [vmem:[%s9327_s1 + $0x278] sm:$0xff]   ;;  %v18_v52 = vld [vmem:[%s9328_s0 + $0x8] sm:$0xff] }
  0x1d   :  { %6432 = vmatpush3.bf16.msra.mxu1 %v7129_v32  ;;  %6411 = vmatprep.subr.bf16.mxu0 %v7130_v33  ;;  %v7179_v32 = vld [vmem:[%s9327_s1 + $0x258] sm:$0xff]   ;;  %v7193_v47 = vld [vmem:[%s9327_s1 + $0x230] sm:$0xff]  }
  0x1e   :  { %6433 = vmatprep.subr.bf16.mxu1 %v7131_v34  ;;  %v7180_v33 = vld [vmem:[%s9327_s1 + $0x2d8] sm:$0xff]  }
  0x1f   :  { %v7181_v34 = vld [vmem:[%s9327_s1 + $0x218] sm:$0xff]  }
  0x20   :  { %6412 = vmatpush3.bf16.msra.mxu0 %v7132_v36  ;;  %v7182_v36 = vld [vmem:[%s9327_s1 + $0x298] sm:$0xff]  }
  0x21   :  { %6434 = vmatpush3.bf16.msra.mxu1 %v7133_v37  ;;  %6441 = vmatprep.subr.bf16.mxu0 %v7135_v41  ;;  %v7183_v37 = vld [vmem:[%s9327_s1 + $0x260] sm:$0xff]   ;;  %v7187_v41 = vld [vmem:[%s9327_s1 + $0x268] sm:$0xff]  }
  0x22   :  { %6463 = vmatprep.subr.bf16.mxu1 %v7136_v42  ;;  %v7188_v42 = vld [vmem:[%s9327_s1 + $0x2e8] sm:$0xff]  }
  0x23   :  { %4625 = vmatmul.mubr.bf16.vlgmr.msra.gmra.mrb[0].mxu0 %v1087_v44  ;;  %v7190_v44 = vld [vmem:[%s9327_s1 + $0x2a8] sm:$0xff]  }
  0x24   :  { %6442 = vmatpush3.bf16.msra.mxu0 %v7137_v46  ;;  %4665 = vmatmul.mubr.bf16.vlgmr.msra.gmra.mrb[0].mxu1 %v1109_v50  ;;  %v7192_v46 = vld [vmem:[%s9327_s1 + $0x2f0] sm:$0xff]   ;;  %v7196_v50 = vld [vmem:[%s9327_s1 + $0x2f8] sm:$0xff]  }
  0x25   :  { %6443 = vmatprep.subr.bf16.mxu0 %v7139_v51  ;;  %6464 = vmatpush3.bf16.msra.mxu1 %v7138_v48  ;;  %v7194_v48 = vld [vmem:[%s9327_s1 + $0x2b0] sm:$0xff]   ;;  %v7197_v51 = vld [vmem:[%s9327_s1 + $0x238] sm:$0xff]  }
  0x26   :  { %4704 = vmatprep.mubr.bf16.mxu0 %v1108_v54  ;;  %6465 = vmatprep.subr.bf16.mxu1 %v7140_v53  ;;  %v7198_v53 = vld [vmem:[%s9327_s1 + $0x2b8] sm:$0xff]   ;;  %v1120_v54 = vrot.slane %v18_v52, %v7737_v35 }
  0x27   :  { %4744 = vmatprep.mubr.bf16.mxu1 %v1112_v57 }
  0x28   :  { %6444 = vmatpush3.bf16.msra.mxu0 %v7141_v55  ;;  %v1113_v55 = vcombine.high %v18_v52, %v18_v52  ;;  %v1128_v57 = vcombine.high %v1120_v54, %v1120_v54  ;;  %v7247_v52 = vld [vmem:[%s9327_s1 + $0x498] sm:$0xff]  }
  0x29   :  { %6445 = vmatprep.subr.bf16.mxu0 %v7143_v58  ;;  %6466 = vmatpush3.bf16.msra.mxu1 %v7142_v56  ;;  %v7199_v56 = vld [vmem:[%s9327_s1 + $0x340] sm:$0xff]   ;;  %v1136_v58 = vrot.slane %v1120_v54, %v7737_v35 }
  0x2a   :  { %6467 = vmatprep.subr.bf16.mxu1 %v7144_v59  ;;  %v7200_v59 = vld [vmem:[%s9327_s1 + $0x3c0] sm:$0xff]  }
  0x2b   :  { %v7249_v54 = vld [vmem:[%s9327_s1 + $0x4e0] sm:$0xff]  }
  0x2c   :  { %6446 = vmatpush3.bf16.msra.mxu0 %v7145_v60  ;;  %v7963_v60 = vrot.slane %v1113_v55, %v7737_v35  ;;  %v7250_v55 = vld [vmem:[%s9327_s1 + $0x420] sm:$0xff]  }
  0x2d   :  { %6447 = vmatprep.subr.bf16.mxu0 %v7147_v62  ;;  %6468 = vmatpush3.bf16.msra.mxu1 %v7146_v61  ;;  %v7201_v61 = vld [vmem:[%s9327_s1 + $0x300] sm:$0xff]   ;;  %v1150_v62 = vrot.slane %v1128_v57, %v7737_v35  ;;  %v7252_v57 = vld [vmem:[%s9327_s1 + $0x468] sm:$0xff]  }
  0x2e   :  { %6469 = vmatprep.subr.bf16.mxu1 %v7148_v63  ;;  %v7202_v63 = vld [vmem:[%s9327_s1 + $0x380] sm:$0xff]  }
  0x30   :  { %6448 = vmatpush3.bf16.msra.mxu0 %v7149_v0  ;;  %v1129_v0 = vcombine.high %v7963_v60, %v7963_v60 }
  0x31   :  { %6449 = vmatprep.subr.bf16.mxu0 %v7151_v2  ;;  %6470 = vmatpush3.bf16.msra.mxu1 %v7150_v1  ;;  %v1158_v1 = vcombine.high %v1136_v58, %v1136_v58  ;;  %v7203_v2 = vld [vmem:[%s9327_s1 + $0x348] sm:$0xff]  }
  0x32   :  { %6471 = vmatprep.subr.bf16.mxu1 %v7152_v3  ;;  %v1160_v3 = vcombine.high %v1150_v62, %v1150_v62 }
  0x34   :  { %6450 = vmatpush3.bf16.msra.mxu0 %v7153_v4  ;;  %v7204_v4 = vld [vmem:[%s9327_s1 + $0x3c8] sm:$0xff]  }
  0x35   :  { %6451 = vmatprep.subr.bf16.mxu0 %v7155_v6  ;;  %6472 = vmatpush3.bf16.msra.mxu1 %v7154_v5  ;;  %v1157_v5 = vrot.slane %v1129_v0, %v7737_v35  ;;  %v7205_v6 = vld [vmem:[%s9327_s1 + $0x308] sm:$0xff]   ;;  %v7259_v0 = vld [vmem:[%s9327_s1 + $0x4b0] sm:$0xff]  }
  0x36   :  { %6473 = vmatprep.subr.bf16.mxu1 %v7156_v7  ;;  %v7206_v7 = vld [vmem:[%s9327_s1 + $0x388] sm:$0xff]  }
  0x38   :  { %6452 = vmatpush3.bf16.msra.mxu0 %v7157_v8  ;;  %v1161_v8 = vcombine.high %v1157_v5, %v1157_v5 }
  0x39   :  { %6453 = vmatprep.subr.bf16.mxu0 %v7159_v10  ;;  %6474 = vmatpush3.bf16.msra.mxu1 %v7158_v9  ;;  %v7207_v9 = vld [vmem:[%s9327_s1 + $0x350] sm:$0xff]  }
  0x3a   :  { %6475 = vmatprep.subr.bf16.mxu1 %v7160_v11  ;;  %v7208_v10 = vld [vmem:[%s9327_s1 + $0x3d0] sm:$0xff]  }
  0x3b   :  { %v7209_v11 = vld [vmem:[%s9327_s1 + $0x310] sm:$0xff]  }
  0x3c   :  { %6454 = vmatpush3.bf16.msra.mxu0 %v7161_v12  ;;  %v7210_v12 = vld [vmem:[%s9327_s1 + $0x390] sm:$0xff]  }
  0x3d   :  { %6455 = vmatprep.subr.bf16.mxu0 %v7163_v14  ;;  %6476 = vmatpush3.bf16.msra.mxu1 %v7162_v13  ;;  %v7211_v13 = vld [vmem:[%s9327_s1 + $0x358] sm:$0xff]  }
  0x3e   :  { %6477 = vmatprep.subr.bf16.mxu1 %v7164_v15  ;;  %v7212_v14 = vld [vmem:[%s9327_s1 + $0x3d8] sm:$0xff]  }
  0x3f   :  { %v7213_v15 = vld [vmem:[%s9327_s1 + $0x318] sm:$0xff]  }
  0x40   :  { %6456 = vmatpush3.bf16.msra.mxu0 %v7165_v16  ;;  %v7214_v16 = vld [vmem:[%s9327_s1 + $0x398] sm:$0xff]  }
  0x41   :  { %6485 = vmatprep.subr.bf16.mxu0 %v7167_v19  ;;  %6478 = vmatpush3.bf16.msra.mxu1 %v7166_v17  ;;  %v7215_v17 = vld [vmem:[%s9327_s1 + $0x360] sm:$0xff]  }
  0x42   :  { %6507 = vmatprep.subr.bf16.mxu1 %v7168_v20  ;;  %v7217_v19 = vld [vmem:[%s9327_s1 + $0x320] sm:$0xff]  }
  0x43   :  { %4705 = vmatmul.mubr.bf16.vlgmr.msra.gmra.mrb[4].mxu0 %v1094_v18  ;;  %v7216_v18 = vld [vmem:[%s9327_s1 + $0x3e0] sm:$0xff]  }
  0x44   :  { %6486 = vmatpush3.bf16.msra.mxu0 %v7169_v21  ;;  %4745 = vmatmul.mubr.bf16.vlgmr.msra.gmra.mrb[4].mxu1 %v1110_v23  ;;  %v7218_v20 = vld [vmem:[%s9327_s1 + $0x3a0] sm:$0xff]   ;;  %v7219_v21 = vld [vmem:[%s9327_s1 + $0x368] sm:$0xff]  }
  0x45   :  { %6487 = vmatprep.subr.bf16.mxu0 %v7171_v24  ;;  %6508 = vmatpush3.bf16.msra.mxu1 %v7170_v22  ;;  %v7220_v22 = vld [vmem:[%s9327_s1 + $0x3e8] sm:$0xff]  }
  0x46   :  { %6509 = vmatprep.subr.bf16.mxu1 %v7172_v25  ;;  %4784 = vmatprep.mubr.bf16.mxu0 %v1150_v62  ;;  %v7221_v23 = vld [vmem:[%s9327_s1 + $0x328] sm:$0xff]   ;;  %v8_v25 = vstv %s9329_s2  ;;  %v7257_v62 = vld [vmem:[%s9327_s1 + $0x4f0] sm:$0xff]  }
  0x47   :  { %4824 = vmatprep.mubr.bf16.mxu1 %v1160_v3  ;;  %v7222_v24 = vld [vmem:[%s9327_s1 + $0x3a8] sm:$0xff]   ;;  %9 = vst [vmem:[#allocation2] sm:$0x1] %v8_v25  ;;  %v7262_v3 = vld [vmem:[%s9327_s1 + $0x438] sm:$0xff]   ;;  %v7272_v25 = vld [vmem:[%s9327_s1 + $0x550] sm:$0xff]  }
  0x48   :  { %6488 = vmatpush3.bf16.msra.mxu0 %v7173_v26  ;;  %v7223_v26 = vld [vmem:[%s9327_s1 + $0x370] sm:$0xff]  }
  0x49   :  { %6489 = vmatprep.subr.bf16.mxu0 %v7175_v28  ;;  %6510 = vmatpush3.bf16.msra.mxu1 %v7174_v27  ;;  %v7224_v27 = vld [vmem:[%s9327_s1 + $0x3f0] sm:$0xff]  }
  0x4a   :  { %6511 = vmatprep.subr.bf16.mxu1 %v7176_v29  ;;  %v7225_v28 = vld [vmem:[%s9327_s1 + $0x330] sm:$0xff]  }
  0x4b   :  { %v7226_v29 = vld [vmem:[%s9327_s1 + $0x3b0] sm:$0xff]  }
  0x4c   :  { %6490 = vmatpush3.bf16.msra.mxu0 %v7177_v30  ;;  %v7227_v30 = vld [vmem:[%s9327_s1 + $0x378] sm:$0xff]  }
  0x4d   :  { %6491 = vmatprep.subr.bf16.mxu0 %v7179_v32  ;;  %6512 = vmatpush3.bf16.msra.mxu1 %v7178_v31  ;;  %v7228_v31 = vld [vmem:[%s9327_s1 + $0x3f8] sm:$0xff]  }
  0x4e   :  { %6513 = vmatprep.subr.bf16.mxu1 %v7180_v33  ;;  %v7229_v32 = vld [vmem:[%s9327_s1 + $0x338] sm:$0xff]  }
  0x4f   :  { %v7230_v33 = vld [vmem:[%s9327_s1 + $0x3b8] sm:$0xff]  }
  0x50   :  { %6492 = vmatpush3.bf16.msra.mxu0 %v7181_v34  ;;  %v1143_v34 = vrot.slane %v7963_v60, %v7737_v35  ;;  %v7255_v60 = vld [vmem:[%s9327_s1 + $0x4a8] sm:$0xff]  }
  0x51   :  { %6493 = vmatprep.subr.bf16.mxu0 %v7183_v37  ;;  %6514 = vmatpush3.bf16.msra.mxu1 %v7182_v36  ;;  %v7232_v36 = vld [vmem:[%s9327_s1 + $0x440] sm:$0xff]  }
  0x52   :  { %6515 = vmatprep.subr.bf16.mxu1 %v7184_v38  ;;  %v7233_v37 = vld [vmem:[%s9327_s1 + $0x4c0] sm:$0xff]  }
  0x53   :  { %v7234_v38 = vld [vmem:[%s9327_s1 + $0x400] sm:$0xff]  }
  0x54   :  { %6494 = vmatpush3.bf16.msra.mxu0 %v7185_v39  ;;  %v7235_v39 = vld [vmem:[%s9327_s1 + $0x480] sm:$0xff]  }
  0x55   :  { %6495 = vmatprep.subr.bf16.mxu0 %v7187_v41  ;;  %6516 = vmatpush3.bf16.msra.mxu1 %v7186_v40  ;;  %v1159_v40 = vcombine.high %v1143_v34, %v1143_v34  ;;  %v7236_v41 = vld [vmem:[%s9327_s1 + $0x448] sm:$0xff]  }
  0x56   :  { %6517 = vmatprep.subr.bf16.mxu1 %v7188_v42  ;;  %v7237_v42 = vld [vmem:[%s9327_s1 + $0x4c8] sm:$0xff]  }
  0x58   :  { %6496 = vmatpush3.bf16.msra.mxu0 %v7189_v43  ;;  %v7238_v43 = vld [vmem:[%s9327_s1 + $0x408] sm:$0xff]  }
  0x59   :  { %6497 = vmatprep.subr.bf16.mxu0 %v7191_v45  ;;  %6518 = vmatpush3.bf16.msra.mxu1 %v7190_v44  ;;  %v7239_v44 = vld [vmem:[%s9327_s1 + $0x488] sm:$0xff]   ;;  %v7240_v45 = vld [vmem:[%s9327_s1 + $0x450] sm:$0xff]  }
  0x5a   :  { %6519 = vmatprep.subr.bf16.mxu1 %v7192_v46  ;;  %v7241_v46 = vld [vmem:[%s9327_s1 + $0x4d0] sm:$0xff]  }
  0x5c   :  { %6498 = vmatpush3.bf16.msra.mxu0 %v7193_v47  ;;  %v7242_v47 = vld [vmem:[%s9327_s1 + $0x410] sm:$0xff]  }
  0x5d   :  { %6499 = vmatprep.subr.bf16.mxu0 %v7195_v49  ;;  %6520 = vmatpush3.bf16.msra.mxu1 %v7194_v48  ;;  %v7243_v48 = vld [vmem:[%s9327_s1 + $0x490] sm:$0xff]   ;;  %v7244_v49 = vld [vmem:[%s9327_s1 + $0x458] sm:$0xff]  }
  0x5e   :  { %6521 = vmatprep.subr.bf16.mxu1 %v7196_v50  ;;  %v7245_v50 = vld [vmem:[%s9327_s1 + $0x4d8] sm:$0xff]  }
  0x60   :  { %6500 = vmatpush3.bf16.msra.mxu0 %v7197_v51  ;;  %v7246_v51 = vld [vmem:[%s9327_s1 + $0x418] sm:$0xff]  }
  0x61   :  { %6529 = vmatprep.subr.bf16.mxu0 %v7199_v56  ;;  %6522 = vmatpush3.bf16.msra.mxu1 %v7198_v53  ;;  %v7248_v53 = vld [vmem:[%s9327_s1 + $0x460] sm:$0xff]  }
  0x62   :  { %6551 = vmatprep.subr.bf16.mxu1 %v7200_v59  ;;  %v7251_v56 = vld [vmem:[%s9327_s1 + $0x4a0] sm:$0xff]   ;;  %v7254_v59 = vld [vmem:[%s9327_s1 + $0x428] sm:$0xff]  }
  0x63   :  { %4785 = vmatmul.mubr.bf16.vlgmr.msra.gmra.mrb[8].mxu0 %v1136_v58  ;;  %v7253_v58 = vld [vmem:[%s9327_s1 + $0x4e8] sm:$0xff]  }
  0x64   :  { %6530 = vmatpush3.bf16.msra.mxu0 %v7201_v61  ;;  %4825 = vmatmul.mubr.bf16.vlgmr.msra.gmra.mrb[8].mxu1 %v1158_v1  ;;  %v7256_v61 = vld [vmem:[%s9327_s1 + $0x470] sm:$0xff]   ;;  %v7260_v1 = vld [vmem:[%s9327_s1 + $0x478] sm:$0xff]  }
  0x65   :  { %6531 = vmatprep.subr.bf16.mxu0 %v7203_v2  ;;  %6552 = vmatpush3.bf16.msra.mxu1 %v7202_v63  ;;  %v7258_v63 = vld [vmem:[%s9327_s1 + $0x430] sm:$0xff]   ;;  %v7261_v2 = vld [vmem:[%s9327_s1 + $0x4f8] sm:$0xff]  }
  0x66   :  { %4864 = vmatprep.mubr.bf16.mxu0 %v1157_v5  ;;  %6553 = vmatprep.subr.bf16.mxu1 %v7204_v4  ;;  %v19_v4 = vld [vmem:[%s9328_s0 + $0x10] sm:$0xff]  ;;  %v7263_v5 = vld [vmem:[%s9327_s1 + $0x4b8] sm:$0xff]  }
  0x67   :  { %4904 = vmatprep.mubr.bf16.mxu1 %v1161_v8  ;;  %v7264_v8 = vld [vmem:[%s9327_s1 + $0x540] sm:$0xff]  }
  0x68   :  { %6532 = vmatpush3.bf16.msra.mxu0 %v7205_v6  ;;  %v1169_v6 = vrot.slane %v19_v4, %v7737_v35 }
  0x69   :  { %6533 = vmatprep.subr.bf16.mxu0 %v7207_v9  ;;  %6554 = vmatpush3.bf16.msra.mxu1 %v7206_v7  ;;  %v1162_v7 = vcombine.high %v19_v4, %v19_v4  ;;  %v7313_v4 = vld [vmem:[%s9327_s1 + $0x660] sm:$0xff]  }
  0x6a   :  { %6555 = vmatprep.subr.bf16.mxu1 %v7208_v10  ;;  %v1177_v9 = vcombine.high %v1169_v6, %v1169_v6  ;;  %v1185_v10 = vrot.slane %v1169_v6, %v7737_v35  ;;  %v7315_v6 = vld [vmem:[%s9327_s1 + $0x620] sm:$0xff]  }
  0x6c   :  { %6534 = vmatpush3.bf16.msra.mxu0 %v7209_v11  ;;  %v7265_v11 = vld [vmem:[%s9327_s1 + $0x5c0] sm:$0xff]  }
  0x6d   :  { %6535 = vmatprep.subr.bf16.mxu0 %v7211_v13  ;;  %6556 = vmatpush3.bf16.msra.mxu1 %v7210_v12  ;;  %v8172_v12 = vrot.slane %v1162_v7, %v7737_v35  ;;  %v7266_v13 = vld [vmem:[%s9327_s1 + $0x500] sm:$0xff]  }
  0x6e   :  { %6557 = vmatprep.subr.bf16.mxu1 %v7212_v14  ;;  %v1199_v14 = vrot.slane %v1177_v9, %v7737_v35  ;;  %v7316_v7 = vld [vmem:[%s9327_s1 + $0x6a0] sm:$0xff]   ;;  %v7318_v9 = vld [vmem:[%s9327_s1 + $0x6e8] sm:$0xff]  }
  0x70   :  { %6536 = vmatpush3.bf16.msra.mxu0 %v7213_v15  ;;  %v7267_v15 = vld [vmem:[%s9327_s1 + $0x580] sm:$0xff]  }
  0x71   :  { %6537 = vmatprep.subr.bf16.mxu0 %v7215_v17  ;;  %6558 = vmatpush3.bf16.msra.mxu1 %v7214_v16  ;;  %v1178_v16 = vcombine.high %v8172_v12, %v8172_v12  ;;  %v1207_v17 = vcombine.high %v1185_v10, %v1185_v10 }
  0x72   :  { %6559 = vmatprep.subr.bf16.mxu1 %v7216_v18  ;;  %v7268_v18 = vld [vmem:[%s9327_s1 + $0x548] sm:$0xff]  }
  0x74   :  { %6538 = vmatpush3.bf16.msra.mxu0 %v7217_v19  ;;  %v1209_v19 = vcombine.high %v1199_v14, %v1199_v14 }
  0x75   :  { %6539 = vmatprep.subr.bf16.mxu0 %v7219_v21  ;;  %6560 = vmatpush3.bf16.msra.mxu1 %v7218_v20  ;;  %v7269_v20 = vld [vmem:[%s9327_s1 + $0x5c8] sm:$0xff]   ;;  %v1206_v21 = vrot.slane %v1178_v16, %v7737_v35  ;;  %v7325_v16 = vld [vmem:[%s9327_s1 + $0x678] sm:$0xff]  }
  0x76   :  { %6561 = vmatprep.subr.bf16.mxu1 %v7220_v22  ;;  %v7270_v22 = vld [vmem:[%s9327_s1 + $0x508] sm:$0xff]  }
  0x78   :  { %6540 = vmatpush3.bf16.msra.mxu0 %v7221_v23  ;;  %v7271_v23 = vld [vmem:[%s9327_s1 + $0x588] sm:$0xff]  }
  0x79   :  { %6541 = vmatprep.subr.bf16.mxu0 %v7223_v26  ;;  %6562 = vmatpush3.bf16.msra.mxu1 %v7222_v24  ;;  %v1210_v24 = vcombine.high %v1206_v21, %v1206_v21  ;;  %v7273_v26 = vld [vmem:[%s9327_s1 + $0x5d0] sm:$0xff]  }
  0x7a   :  { %6563 = vmatprep.subr.bf16.mxu1 %v7224_v27  ;;  %v7274_v27 = vld [vmem:[%s9327_s1 + $0x510] sm:$0xff]  }
  0x7c   :  { %6542 = vmatpush3.bf16.msra.mxu0 %v7225_v28  ;;  %v7275_v28 = vld [vmem:[%s9327_s1 + $0x590] sm:$0xff]  }
  0x7d   :  { %6543 = vmatprep.subr.bf16.mxu0 %v7227_v30  ;;  %6564 = vmatpush3.bf16.msra.mxu1 %v7226_v29  ;;  %v7276_v29 = vld [vmem:[%s9327_s1 + $0x558] sm:$0xff]  }
  0x7e   :  { %6565 = vmatprep.subr.bf16.mxu1 %v7228_v31  ;;  %v7277_v30 = vld [vmem:[%s9327_s1 + $0x5d8] sm:$0xff]  }
  0x7f   :  { %v7278_v31 = vld [vmem:[%s9327_s1 + $0x518] sm:$0xff]  }
  0x80   :  { %6544 = vmatpush3.bf16.msra.mxu0 %v7229_v32  ;;  %v7279_v32 = vld [vmem:[%s9327_s1 + $0x598] sm:$0xff]  }
  0x81   :  { %6573 = vmatprep.subr.bf16.mxu0 %v7232_v36  ;;  %6566 = vmatpush3.bf16.msra.mxu1 %v7230_v33  ;;  %v7280_v33 = vld [vmem:[%s9327_s1 + $0x560] sm:$0xff]  }
  0x82   :  { %6595 = vmatprep.subr.bf16.mxu1 %v7233_v37  ;;  %v7282_v36 = vld [vmem:[%s9327_s1 + $0x520] sm:$0xff]  }
  0x83   :  { %4865 = vmatmul.mubr.bf16.vlgmr.msra.gmra.mrb[12].mxu0 %v1143_v34  ;;  %v7281_v34 = vld [vmem:[%s9327_s1 + $0x5e0] sm:$0xff]  }
  0x84   :  { %6574 = vmatpush3.bf16.msra.mxu0 %v7234_v38  ;;  %4905 = vmatmul.mubr.bf16.vlgmr.msra.gmra.mrb[12].mxu1 %v1159_v40  ;;  %v7283_v37 = vld [vmem:[%s9327_s1 + $0x5a0] sm:$0xff]   ;;  %v7284_v38 = vld [vmem:[%s9327_s1 + $0x568] sm:$0xff]  }
  0x85   :  { %6575 = vmatprep.subr.bf16.mxu0 %v7236_v41  ;;  %6596 = vmatpush3.bf16.msra.mxu1 %v7235_v39  ;;  %v7285_v39 = vld [vmem:[%s9327_s1 + $0x5e8] sm:$0xff]  }
  0x86   :  { %6597 = vmatprep.subr.bf16.mxu1 %v7237_v42  ;;  %4944 = vmatprep.mubr.bf16.mxu0 %v1199_v14  ;;  %v7286_v40 = vld [vmem:[%s9327_s1 + $0x528] sm:$0xff]   ;;  %v7288_v42 = vld [vmem:[%s9327_s1 + $0x570] sm:$0xff]  }
  0x87   :  { %4984 = vmatprep.mubr.bf16.mxu1 %v1209_v19  ;;  %v7287_v41 = vld [vmem:[%s9327_s1 + $0x5a8] sm:$0xff]   ;;  %v7323_v14 = vld [vmem:[%s9327_s1 + $0x630] sm:$0xff]   ;;  %v20_v19 = vld [vmem:[%s9328_s0 + $0x18] sm:$0xff] }
  0x88   :  { %6576 = vmatpush3.bf16.msra.mxu0 %v7238_v43  ;;  %v7289_v43 = vld [vmem:[%s9327_s1 + $0x5f0] sm:$0xff]  }
  0x89   :  { %6577 = vmatprep.subr.bf16.mxu0 %v7240_v45  ;;  %6598 = vmatpush3.bf16.msra.mxu1 %v7239_v44  ;;  %v7290_v44 = vld [vmem:[%s9327_s1 + $0x530] sm:$0xff]  }
  0x8a   :  { %6599 = vmatprep.subr.bf16.mxu1 %v7241_v46  ;;  %v7291_v45 = vld [vmem:[%s9327_s1 + $0x5b0] sm:$0xff]   ;;  %v7292_v46 = vld [vmem:[%s9327_s1 + $0x578] sm:$0xff]  }
  0x8c   :  { %6578 = vmatpush3.bf16.msra.mxu0 %v7242_v47  ;;  %v7293_v47 = vld [vmem:[%s9327_s1 + $0x5f8] sm:$0xff]  }
  0x8d   :  { %6579 = vmatprep.subr.bf16.mxu0 %v7244_v49  ;;  %6600 = vmatpush3.bf16.msra.mxu1 %v7243_v48  ;;  %v7294_v48 = vld [vmem:[%s9327_s1 + $0x538] sm:$0xff]  }
  0x8e   :  { %6601 = vmatprep.subr.bf16.mxu1 %v7245_v50  ;;  %v7295_v49 = vld [vmem:[%s9327_s1 + $0x5b8] sm:$0xff]   ;;  %v1192_v50 = vrot.slane %v8172_v12, %v7737_v35  ;;  %v7321_v12 = vld [vmem:[%s9327_s1 + $0x670] sm:$0xff]  }
  0x90   :  { %6580 = vmatpush3.bf16.msra.mxu0 %v7246_v51  ;;  %v7297_v51 = vld [vmem:[%s9327_s1 + $0x640] sm:$0xff]  }
  0x91   :  { %6581 = vmatprep.subr.bf16.mxu0 %v7248_v53  ;;  %6602 = vmatpush3.bf16.msra.mxu1 %v7247_v52  ;;  %v7298_v52 = vld [vmem:[%s9327_s1 + $0x6c0] sm:$0xff]  }
  0x92   :  { %6603 = vmatprep.subr.bf16.mxu1 %v7249_v54  ;;  %v7299_v53 = vld [vmem:[%s9327_s1 + $0x600] sm:$0xff]  }
  0x93   :  { %v7300_v54 = vld [vmem:[%s9327_s1 + $0x680] sm:$0xff]  }
  0x94   :  { %6582 = vmatpush3.bf16.msra.mxu0 %v7250_v55  ;;  %v1208_v55 = vcombine.high %v1192_v50, %v1192_v50 }
  0x95   :  { %6583 = vmatprep.subr.bf16.mxu0 %v7252_v57  ;;  %6604 = vmatpush3.bf16.msra.mxu1 %v7251_v56  ;;  %v7301_v56 = vld [vmem:[%s9327_s1 + $0x648] sm:$0xff]  }
  0x96   :  { %6605 = vmatprep.subr.bf16.mxu1 %v7253_v58  ;;  %v7302_v57 = vld [vmem:[%s9327_s1 + $0x6c8] sm:$0xff]  }
  0x97   :  { %v7303_v58 = vld [vmem:[%s9327_s1 + $0x608] sm:$0xff]  }
  0x98   :  { %6584 = vmatpush3.bf16.msra.mxu0 %v7254_v59  ;;  %v7304_v59 = vld [vmem:[%s9327_s1 + $0x688] sm:$0xff]  }
  0x99   :  { %6585 = vmatprep.subr.bf16.mxu0 %v7256_v61  ;;  %6606 = vmatpush3.bf16.msra.mxu1 %v7255_v60  ;;  %v7305_v60 = vld [vmem:[%s9327_s1 + $0x650] sm:$0xff]  }
  0x9a   :  { %6607 = vmatprep.subr.bf16.mxu1 %v7257_v62  ;;  %v7306_v61 = vld [vmem:[%s9327_s1 + $0x6d0] sm:$0xff]  }
  0x9b   :  { %v7307_v62 = vld [vmem:[%s9327_s1 + $0x610] sm:$0xff]  }
  0x9c   :  { %6586 = vmatpush3.bf16.msra.mxu0 %v7258_v63  ;;  %v7308_v63 = vld [vmem:[%s9327_s1 + $0x690] sm:$0xff]  }
  0x9d   :  { %6587 = vmatprep.subr.bf16.mxu0 %v7260_v1  ;;  %6608 = vmatpush3.bf16.msra.mxu1 %v7259_v0  ;;  %v7309_v0 = vld [vmem:[%s9327_s1 + $0x658] sm:$0xff]  }
  0x9e   :  { %6609 = vmatprep.subr.bf16.mxu1 %v7261_v2  ;;  %v7310_v1 = vld [vmem:[%s9327_s1 + $0x6d8] sm:$0xff]  }
  0x9f   :  { %v7311_v2 = vld [vmem:[%s9327_s1 + $0x618] sm:$0xff]  }
  0xa0   :  { %6588 = vmatpush3.bf16.msra.mxu0 %v7262_v3  ;;  %v7312_v3 = vld [vmem:[%s9327_s1 + $0x698] sm:$0xff]  }
  0xa1   :  { %6617 = vmatprep.subr.bf16.mxu0 %v7264_v8  ;;  %6610 = vmatpush3.bf16.msra.mxu1 %v7263_v5  ;;  %v7314_v5 = vld [vmem:[%s9327_s1 + $0x6e0] sm:$0xff]   ;;  %v7317_v8 = vld [vmem:[%s9327_s1 + $0x668] sm:$0xff]  }
  0xa2   :  { %6639 = vmatprep.subr.bf16.mxu1 %v7265_v11  ;;  %v7320_v11 = vld [vmem:[%s9327_s1 + $0x6a8] sm:$0xff]  }
  0xa3   :  { %4945 = vmatmul.mubr.bf16.vlgmr.msra.gmra.mrb[16].mxu0 %v1185_v10  ;;  %v7319_v10 = vld [vmem:[%s9327_s1 + $0x628] sm:$0xff]  }
  0xa4   :  { %6618 = vmatpush3.bf16.msra.mxu0 %v7266_v13  ;;  %4985 = vmatmul.mubr.bf16.vlgmr.msra.gmra.mrb[16].mxu1 %v1207_v17  ;;  %v7322_v13 = vld [vmem:[%s9327_s1 + $0x6f0] sm:$0xff]   ;;  %v7326_v17 = vld [vmem:[%s9327_s1 + $0x6f8] sm:$0xff]  }
  0xa5   :  { %6619 = vmatprep.subr.bf16.mxu0 %v7268_v18  ;;  %6640 = vmatpush3.bf16.msra.mxu1 %v7267_v15  ;;  %v7324_v15 = vld [vmem:[%s9327_s1 + $0x6b0] sm:$0xff]   ;;  %v7327_v18 = vld [vmem:[%s9327_s1 + $0x638] sm:$0xff]  }
  0xa6   :  { %5024 = vmatprep.mubr.bf16.mxu0 %v1206_v21  ;;  %6641 = vmatprep.subr.bf16.mxu1 %v7269_v20  ;;  %v1218_v20 = vrot.slane %v20_v19, %v7737_v35  ;;  %v7329_v21 = vld [vmem:[%s9327_s1 + $0x740] sm:$0xff]  }
  0xa7   :  { %5064 = vmatprep.mubr.bf16.mxu1 %v1210_v24 }
  0xa8   :  { %6620 = vmatpush3.bf16.msra.mxu0 %v7270_v22  ;;  %v1211_v22 = vcombine.high %v20_v19, %v20_v19  ;;  %v1226_v24 = vcombine.high %v1218_v20, %v1218_v20 }
  0xa9   :  { %6621 = vmatprep.subr.bf16.mxu0 %v7272_v25  ;;  %6642 = vmatpush3.bf16.msra.mxu1 %v7271_v23  ;;  %v7328_v23 = vld [vmem:[%s9327_s1 + $0x6b8] sm:$0xff]   ;;  %v1234_v25 = vrot.slane %v1218_v20, %v7737_v35  ;;  %v7366_v20 = vld [vmem:[%s9327_s1 + $0x848] sm:$0xff]  }
  0xaa   :  { %6643 = vmatprep.subr.bf16.mxu1 %v7273_v26  ;;  %v7330_v26 = vld [vmem:[%s9327_s1 + $0x7c0] sm:$0xff]  }
  0xac   :  { %6622 = vmatpush3.bf16.msra.mxu0 %v7274_v27  ;;  %v8378_v27 = vrot.slane %v1211_v22, %v7737_v35  ;;  %v7368_v22 = vld [vmem:[%s9327_s1 + $0x808] sm:$0xff]  }
  0xad   :  { %6623 = vmatprep.subr.bf16.mxu0 %v7276_v29  ;;  %6644 = vmatpush3.bf16.msra.mxu1 %v7275_v28  ;;  %v1248_v28 = vrot.slane %v1226_v24, %v7737_v35  ;;  %v7331_v29 = vld [vmem:[%s9327_s1 + $0x700] sm:$0xff]   ;;  %v7370_v24 = vld [vmem:[%s9327_s1 + $0x850] sm:$0xff]  }
  0xae   :  { %6645 = vmatprep.subr.bf16.mxu1 %v7277_v30  ;;  %v1227_v30 = vcombine.high %v8378_v27, %v8378_v27 }
  0xb0   :  { %6624 = vmatpush3.bf16.msra.mxu0 %v7278_v31  ;;  %v1256_v31 = vcombine.high %v1234_v25, %v1234_v25 }
  0xb1   :  { %6625 = vmatprep.subr.bf16.mxu0 %v7280_v33  ;;  %6646 = vmatpush3.bf16.msra.mxu1 %v7279_v32  ;;  %v7333_v32 = vld [vmem:[%s9327_s1 + $0x748] sm:$0xff]   ;;  %v1258_v33 = vcombine.high %v1248_v28, %v1248_v28 }
  0xb2   :  { %6647 = vmatprep.subr.bf16.mxu1 %v7281_v34  ;;  %v7332_v34 = vld [vmem:[%s9327_s1 + $0x780] sm:$0xff]  }
  0xb4   :  { %6626 = vmatpush3.bf16.msra.mxu0 %v7282_v36  ;;  %v1255_v36 = vrot.slane %v1227_v30, %v7737_v35  ;;  %v7376_v30 = vld [vmem:[%s9327_s1 + $0x818] sm:$0xff]  }
  0xb5   :  { %6627 = vmatprep.subr.bf16.mxu0 %v7284_v38  ;;  %6648 = vmatpush3.bf16.msra.mxu1 %v7283_v37  ;;  %v7334_v37 = vld [vmem:[%s9327_s1 + $0x7c8] sm:$0xff]  }
  0xb6   :  { %6649 = vmatprep.subr.bf16.mxu1 %v7285_v39  ;;  %v7335_v38 = vld [vmem:[%s9327_s1 + $0x708] sm:$0xff]   ;;  %v1259_v39 = vcombine.high %v1255_v36, %v1255_v36 }
  0xb8   :  { %6628 = vmatpush3.bf16.msra.mxu0 %v7286_v40  ;;  %v7337_v40 = vld [vmem:[%s9327_s1 + $0x750] sm:$0xff]  }
  0xb9   :  { %6629 = vmatprep.subr.bf16.mxu0 %v7288_v42  ;;  %6650 = vmatpush3.bf16.msra.mxu1 %v7287_v41  ;;  %v7336_v41 = vld [vmem:[%s9327_s1 + $0x788] sm:$0xff]   ;;  %v7338_v42 = vld [vmem:[%s9327_s1 + $0x7d0] sm:$0xff]  }
  0xba   :  { %6651 = vmatprep.subr.bf16.mxu1 %v7289_v43  ;;  %v7339_v43 = vld [vmem:[%s9327_s1 + $0x710] sm:$0xff]  }
  0xbc   :  { %6630 = vmatpush3.bf16.msra.mxu0 %v7290_v44  ;;  %v7341_v44 = vld [vmem:[%s9327_s1 + $0x758] sm:$0xff]  }
  0xbd   :  { %6631 = vmatprep.subr.bf16.mxu0 %v7292_v46  ;;  %6652 = vmatpush3.bf16.msra.mxu1 %v7291_v45  ;;  %v7340_v45 = vld [vmem:[%s9327_s1 + $0x790] sm:$0xff]   ;;  %v7342_v46 = vld [vmem:[%s9327_s1 + $0x7d8] sm:$0xff]  }
  0xbe   :  { %6653 = vmatprep.subr.bf16.mxu1 %v7293_v47  ;;  %v7343_v47 = vld [vmem:[%s9327_s1 + $0x718] sm:$0xff]  }
  0xc0   :  { %6632 = vmatpush3.bf16.msra.mxu0 %v7294_v48  ;;  %v7345_v48 = vld [vmem:[%s9327_s1 + $0x760] sm:$0xff]  }
  0xc1   :  { %6661 = vmatprep.subr.bf16.mxu0 %v7297_v51  ;;  %6654 = vmatpush3.bf16.msra.mxu1 %v7295_v49  ;;  %v7344_v49 = vld [vmem:[%s9327_s1 + $0x798] sm:$0xff]   ;;  %v7347_v51 = vld [vmem:[%s9327_s1 + $0x720] sm:$0xff]  }
  0xc2   :  { %6683 = vmatprep.subr.bf16.mxu1 %v7298_v52  ;;  %v7349_v52 = vld [vmem:[%s9327_s1 + $0x768] sm:$0xff]  }
  0xc3   :  { %5025 = vmatmul.mubr.bf16.vlgmr.msra.gmra.mrb[20].mxu0 %v1192_v50  ;;  %v7346_v50 = vld [vmem:[%s9327_s1 + $0x7e0] sm:$0xff]  }
  0xc4   :  { %6662 = vmatpush3.bf16.msra.mxu0 %v7299_v53  ;;  %5065 = vmatmul.mubr.bf16.vlgmr.msra.gmra.mrb[20].mxu1 %v1208_v55  ;;  %v7348_v53 = vld [vmem:[%s9327_s1 + $0x7a0] sm:$0xff]  }
  0xc5   :  { %6663 = vmatprep.subr.bf16.mxu0 %v7301_v56  ;;  %6684 = vmatpush3.bf16.msra.mxu1 %v7300_v54  ;;  %v7350_v54 = vld [vmem:[%s9327_s1 + $0x7e8] sm:$0xff]   ;;  %v5884_v55 = vld [vmem:[#allocation2] ss:$0 sm:$0xff] }
  0xc6   :  { %6685 = vmatprep.subr.bf16.mxu1 %v7302_v57  ;;  %5104 = vmatprep.mubr.bf16.mxu0 %v1248_v28  ;;  %v7351_v56 = vld [vmem:[%s9327_s1 + $0x728] sm:$0xff]   ;;  %v7374_v28 = vld [vmem:[%s9327_s1 + $0x858] sm:$0xff]  }
  0xc7   :  { %5144 = vmatprep.mubr.bf16.mxu1 %v1258_v33  ;;  %v7379_v33 = vld [vmem:[%s9327_s1 + $0x8e0] sm:$0xff]  }
  0xc8   :  { %6664 = vmatpush3.bf16.msra.mxu0 %v7303_v58  ;;  %v7353_v58 = vld [vmem:[%s9327_s1 + $0x770] sm:$0xff]  }
  0xc9   :  { %6665 = vmatprep.subr.bf16.mxu0 %v7305_v60  ;;  %6686 = vmatpush3.bf16.msra.mxu1 %v7304_v59  ;;  %v7352_v60 = vld [vmem:[%s9327_s1 + $0x7a8] sm:$0xff]  }
  0xca   :  { %6687 = vmatprep.subr.bf16.mxu1 %v7306_v61 }
  0xcc   :  { %6666 = vmatpush3.bf16.msra.mxu0 %v7307_v62 }
  0xcd   :  { %6667 = vmatprep.subr.bf16.mxu0 %v7309_v0  ;;  %6688 = vmatpush3.bf16.msra.mxu1 %v7308_v63  ;;  %v7354_v0 = vld [vmem:[%s9327_s1 + $0x7f0] sm:$0xff]  }
  0xce   :  { %6689 = vmatprep.subr.bf16.mxu1 %v7310_v1  ;;  %v7355_v1 = vld [vmem:[%s9327_s1 + $0x730] sm:$0xff]  }
  0xd0   :  { %6668 = vmatpush3.bf16.msra.mxu0 %v7311_v2 }
  0xd1   :  { %6669 = vmatprep.subr.bf16.mxu0 %v7313_v4  ;;  %6690 = vmatpush3.bf16.msra.mxu1 %v7312_v3  ;;  %v7356_v4 = vld [vmem:[%s9327_s1 + $0x7b0] sm:$0xff]  }
  0xd2   :  { %6691 = vmatprep.subr.bf16.mxu1 %v7314_v5 }
  0xd4   :  { %6670 = vmatpush3.bf16.msra.mxu0 %v7315_v6 }
  0xd5   :  { %6671 = vmatprep.subr.bf16.mxu0 %v7317_v8  ;;  %6692 = vmatpush3.bf16.msra.mxu1 %v7316_v7  ;;  %v7357_v8 = vld [vmem:[%s9327_s1 + $0x778] sm:$0xff]  }
  0xd6   :  { %6693 = vmatprep.subr.bf16.mxu1 %v7318_v9 }
  0xd8   :  { %6672 = vmatpush3.bf16.msra.mxu0 %v7319_v10  ;;  %v7358_v10 = vld [vmem:[%s9327_s1 + $0x7f8] sm:$0xff]  }
  0xd9   :  { %6673 = vmatprep.subr.bf16.mxu0 %v7321_v12  ;;  %6694 = vmatpush3.bf16.msra.mxu1 %v7320_v11  ;;  %v7359_v12 = vld [vmem:[%s9327_s1 + $0x738] sm:$0xff]  }
  0xda   :  { %6695 = vmatprep.subr.bf16.mxu1 %v7322_v13  ;;  %v7360_v13 = vld [vmem:[%s9327_s1 + $0x7b8] sm:$0xff]  }
  0xdc   :  { %6674 = vmatpush3.bf16.msra.mxu0 %v7323_v14  ;;  %v1241_v14 = vrot.slane %v8378_v27, %v7737_v35  ;;  %v7373_v27 = vld [vmem:[%s9327_s1 + $0x890] sm:$0xff]  }
  0xdd   :  { %6675 = vmatprep.subr.bf16.mxu0 %v7325_v16  ;;  %6696 = vmatpush3.bf16.msra.mxu1 %v7324_v15  ;;  %v7362_v15 = vld [vmem:[%s9327_s1 + $0x840] sm:$0xff]  }
  0xde   :  { %6697 = vmatprep.subr.bf16.mxu1 %v7326_v17  ;;  %v7363_v16 = vld [vmem:[%s9327_s1 + $0x8c0] sm:$0xff]   ;;  %v1257_v19 = vcombine.high %v1241_v14, %v1241_v14 }
  0xdf   :  { %v7364_v17 = vld [vmem:[%s9327_s1 + $0x800] sm:$0xff]  }
  0xe0   :  { %6676 = vmatpush3.bf16.msra.mxu0 %v7327_v18  ;;  %v7365_v18 = vld [vmem:[%s9327_s1 + $0x880] sm:$0xff]  }
  0xe1   :  { %6705 = vmatprep.subr.bf16.mxu0 %v7329_v21  ;;  %6698 = vmatpush3.bf16.msra.mxu1 %v7328_v23  ;;  %v7367_v21 = vld [vmem:[%s9327_s1 + $0x8c8] sm:$0xff]  }
  0xe2   :  { %6727 = vmatprep.subr.bf16.mxu1 %v7330_v26  ;;  %v7369_v23 = vld [vmem:[%s9327_s1 + $0x888] sm:$0xff]   ;;  %v7372_v26 = vld [vmem:[%s9327_s1 + $0x810] sm:$0xff]  }
  0xe3   :  { %5105 = vmatmul.mubr.bf16.vlgmr.msra.gmra.mrb[24].mxu0 %v1234_v25  ;;  %v7371_v25 = vld [vmem:[%s9327_s1 + $0x8d0] sm:$0xff]  }
  0xe4   :  { %6706 = vmatpush3.bf16.msra.mxu0 %v7331_v29  ;;  %5145 = vmatmul.mubr.bf16.vlgmr.msra.gmra.mrb[24].mxu1 %v1256_v31  ;;  %v7375_v29 = vld [vmem:[%s9327_s1 + $0x8d8] sm:$0xff]  }
  0xe5   :  { %6707 = vmatprep.subr.bf16.mxu0 %v7333_v32  ;;  %6728 = vmatpush3.bf16.msra.mxu1 %v7332_v34  ;;  %v7377_v31 = vld [vmem:[%s9327_s1 + $0x898] sm:$0xff]   ;;  %v7378_v32 = vld [vmem:[%s9327_s1 + $0x860] sm:$0xff]  }
  0xe6   :  { %5184 = vmatprep.mubr.bf16.mxu0 %v1255_v36  ;;  %6729 = vmatprep.subr.bf16.mxu1 %v7334_v37  ;;  %v7380_v34 = vld [vmem:[%s9327_s1 + $0x820] sm:$0xff]   ;;  %v7382_v37 = vld [vmem:[%s9327_s1 + $0x868] sm:$0xff]  }
  0xe7   :  { %5224 = vmatprep.mubr.bf16.mxu1 %v1259_v39  ;;  %v7381_v36 = vld [vmem:[%s9327_s1 + $0x8a0] sm:$0xff]   ;;  %v7384_v39 = vld [vmem:[%s9327_s1 + $0x828] sm:$0xff]  }
  0xe8   :  { %6708 = vmatpush3.bf16.msra.mxu0 %v7335_v38  ;;  %v7383_v38 = vld [vmem:[%s9327_s1 + $0x8e8] sm:$0xff]  }
  0xe9   :  { %6709 = vmatprep.subr.bf16.mxu0 %v7337_v40  ;;  %6730 = vmatpush3.bf16.msra.mxu1 %v7336_v41  ;;  %v7385_v40 = vld [vmem:[%s9327_s1 + $0x8a8] sm:$0xff]  }
  0xea   :  { %6731 = vmatprep.subr.bf16.mxu1 %v7338_v42  ;;  %v7386_v42 = vld [vmem:[%s9327_s1 + $0x870] sm:$0xff]  }
  0xec   :  { %6710 = vmatpush3.bf16.msra.mxu0 %v7339_v43 }
  0xed   :  { %6711 = vmatprep.subr.bf16.mxu0 %v7341_v44  ;;  %6732 = vmatpush3.bf16.msra.mxu1 %v7340_v45  ;;  %v7387_v44 = vld [vmem:[%s9327_s1 + $0x8f0] sm:$0xff]  }
  0xee   :  { %6733 = vmatprep.subr.bf16.mxu1 %v7342_v46 }
  0xf0   :  { %6712 = vmatpush3.bf16.msra.mxu0 %v7343_v47 }
  0xf1   :  { %6713 = vmatprep.subr.bf16.mxu0 %v7345_v48  ;;  %6734 = vmatpush3.bf16.msra.mxu1 %v7344_v49 }
  0xf2   :  { %6735 = vmatprep.subr.bf16.mxu1 %v7346_v50  ;;  %v7388_v50 = vld [vmem:[%s9327_s1 + $0x830] sm:$0xff]  }
  0xf4   :  { %6714 = vmatpush3.bf16.msra.mxu0 %v7347_v51  ;;  %v7389_v51 = vld [vmem:[%s9327_s1 + $0x8b0] sm:$0xff]  }
  0xf5   :  { %6715 = vmatprep.subr.bf16.mxu0 %v7349_v52  ;;  %6736 = vmatpush3.bf16.msra.mxu1 %v7348_v53 }
  0xf6   :  { %v6413_v57 = vpop.f32.mrb[0].mxu0  ;;  %6737 = vmatprep.subr.bf16.mxu1 %v7350_v54 }
  0xf7   :  { %v6414_v59 = vpop.f32.mrb[1].mxu0  ;;  %v6435_v61 = vpop.f32.mrb[0].mxu1 }
  0xf8   :  { %v6415_v62 = vadd.f32 %v6414_v59, %v6413_v57  ;;  %v6416_v63 = vpop.f32.mrb[2].mxu0  ;;  %v6436_v2 = vpop.f32.mrb[1].mxu1  ;;  %6716 = vmatpush3.bf16.msra.mxu0 %v7351_v56  ;;  %v7391_v57 = vld [vmem:[%s9327_s1 + $0x8f8] sm:$0xff]  }
  0xf9   :  { %v6417_v3 = vpop.f32.mrb[3].mxu0  ;;  %v6437_v6 = vadd.f32 %v6436_v2, %v6435_v61  ;;  %v6438_v7 = vpop.f32.mrb[2].mxu1  ;;  %6717 = vmatprep.subr.bf16.mxu0 %v7353_v58  ;;  %6738 = vmatpush3.bf16.msra.mxu1 %v7352_v60  ;;  %v7392_v59 = vld [vmem:[%s9327_s1 + $0x838] sm:$0xff]   ;;  %v21_v60 = vld [vmem:[%s9328_s0 + $0x20] sm:$0xff] }
  0xfa   :  { %v4627_v5 = vadd.f32 %v6415_v62, %v5884_v55  ;;  %v6439_v9 = vpop.f32.mrb[3].mxu1  ;;  %6739 = vmatprep.subr.bf16.mxu1 %v7354_v0  ;;  %v7390_v55 = vld [vmem:[%s9327_s1 + $0x878] sm:$0xff]   ;;  %v1267_v61 = vrot.slane %v21_v60, %v7737_v35  ;;  %v7394_v62 = vld [vmem:[%s9327_s1 + $0x940] sm:$0xff]   ;;  %v1260_v63 = vcombine.high %v21_v60, %v21_v60  ;;  %v7431_v60 = vld [vmem:[%s9327_s1 + $0xa48] sm:$0xff]  }
  0xfb   :  { %v7393_v0 = vld [vmem:[%s9327_s1 + $0x8b8] sm:$0xff]   ;;  %v7395_v3 = vld [vmem:[%s9327_s1 + $0x9c0] sm:$0xff]  }
  0xfc   :  { %v8468_v11 = vadd.f32 %v6437_v6, %v4627_v5  ;;  %6718 = vmatpush3.bf16.msra.mxu0 %v7355_v1  ;;  %v1275_v1 = vcombine.high %v1267_v61, %v1267_v61  ;;  %v1283_v2 = vrot.slane %v1267_v61, %v7737_v35  ;;  %v7396_v5 = vld [vmem:[%s9327_s1 + $0x900] sm:$0xff]   ;;  %v7432_v61 = vld [vmem:[%s9327_s1 + $0xac8] sm:$0xff]  }
  0xfd   :  { %6719 = vmatprep.subr.bf16.mxu0 %v7357_v8  ;;  %6740 = vmatpush3.bf16.msra.mxu1 %v7356_v4  ;;  %v8589_v4 = vrot.slane %v1260_v63, %v7737_v35  ;;  %v7397_v7 = vld [vmem:[%s9327_s1 + $0x980] sm:$0xff]   ;;  %v7434_v63 = vld [vmem:[%s9327_s1 + $0xa88] sm:$0xff]  }
  0xfe   :  { %6741 = vmatprep.subr.bf16.mxu1 %v7358_v10  ;;  %v1297_v6 = vrot.slane %v1275_v1, %v7737_v35  ;;  %v1305_v9 = vcombine.high %v1283_v2, %v1283_v2  ;;  %v7398_v10 = vld [vmem:[%s9327_s1 + $0x948] sm:$0xff]   ;;  %v7436_v1 = vld [vmem:[%s9327_s1 + $0xad0] sm:$0xff]  }
  0xff   :  { %v1276_v8 = vcombine.high %v8589_v4, %v8589_v4 }
 0x100   :  { %6720 = vmatpush3.bf16.msra.mxu0 %v7359_v12  ;;  %v7399_v12 = vld [vmem:[%s9327_s1 + $0x9c8] sm:$0xff]  }
 0x101   :  { %6749 = vmatprep.subr.bf16.mxu0 %v7362_v15  ;;  %6742 = vmatpush3.bf16.msra.mxu1 %v7360_v13  ;;  %v1304_v13 = vrot.slane %v1276_v8, %v7737_v35  ;;  %v7401_v15 = vld [vmem:[%s9327_s1 + $0x988] sm:$0xff]   ;;  %v7443_v8 = vld [vmem:[%s9327_s1 + $0xa60] sm:$0xff]  }
 0x102   :  { %6771 = vmatprep.subr.bf16.mxu1 %v7363_v16 }
 0x103   :  { %5185 = vmatmul.mubr.bf16.vlgmr.msra.gmra.mrb[28].mxu0 %v1241_v14  ;;  %v7400_v14 = vld [vmem:[%s9327_s1 + $0x908] sm:$0xff]   ;;  %v1308_v16 = vcombine.high %v1304_v13, %v1304_v13 }
 0x104   :  { %6750 = vmatpush3.bf16.msra.mxu0 %v7364_v17  ;;  %5225 = vmatmul.mubr.bf16.vlgmr.msra.gmra.mrb[28].mxu1 %v1257_v19  ;;  %v7402_v17 = vld [vmem:[%s9327_s1 + $0x950] sm:$0xff]  }
 0x105   :  { %6751 = vmatprep.subr.bf16.mxu0 %v7366_v20  ;;  %6772 = vmatpush3.bf16.msra.mxu1 %v7365_v18  ;;  %v7403_v18 = vld [vmem:[%s9327_s1 + $0x9d0] sm:$0xff]  }
 0x106   :  { %6773 = vmatprep.subr.bf16.mxu1 %v7367_v21  ;;  %5264 = vmatprep.mubr.bf16.mxu0 %v1297_v6  ;;  %v7404_v19 = vld [vmem:[%s9327_s1 + $0x910] sm:$0xff]   ;;  %v7406_v21 = vld [vmem:[%s9327_s1 + $0x958] sm:$0xff]  }
 0x107   :  { %v7405_v20 = vld [vmem:[%s9327_s1 + $0x990] sm:$0xff]  }
 0x108   :  { %6752 = vmatpush3.bf16.msra.mxu0 %v7368_v22  ;;  %v7407_v22 = vld [vmem:[%s9327_s1 + $0x9d8] sm:$0xff]  }
 0x109   :  { %6753 = vmatprep.subr.bf16.mxu0 %v7370_v24  ;;  %6774 = vmatpush3.bf16.msra.mxu1 %v7369_v23  ;;  %v7408_v23 = vld [vmem:[%s9327_s1 + $0x918] sm:$0xff]  }
 0x10a   :  { %6775 = vmatprep.subr.bf16.mxu1 %v7371_v25  ;;  %v7409_v24 = vld [vmem:[%s9327_s1 + $0x998] sm:$0xff]   ;;  %v7410_v25 = vld [vmem:[%s9327_s1 + $0x960] sm:$0xff]  }
 0x10c   :  { %6754 = vmatpush3.bf16.msra.mxu0 %v7372_v26  ;;  %v7411_v26 = vld [vmem:[%s9327_s1 + $0x9e0] sm:$0xff]  }
 0x10d   :  { %6755 = vmatprep.subr.bf16.mxu0 %v7374_v28  ;;  %6776 = vmatpush3.bf16.msra.mxu1 %v7373_v27  ;;  %v7412_v27 = vld [vmem:[%s9327_s1 + $0x920] sm:$0xff]  }
 0x10e   :  { %6777 = vmatprep.subr.bf16.mxu1 %v7375_v29  ;;  %v7413_v28 = vld [vmem:[%s9327_s1 + $0x9a0] sm:$0xff]   ;;  %v7414_v29 = vld [vmem:[%s9327_s1 + $0x968] sm:$0xff]  }
 0x110   :  { %6756 = vmatpush3.bf16.msra.mxu0 %v7376_v30  ;;  %v7415_v30 = vld [vmem:[%s9327_s1 + $0x9e8] sm:$0xff]  }
 0x111   :  { %6757 = vmatprep.subr.bf16.mxu0 %v7378_v32  ;;  %6778 = vmatpush3.bf16.msra.mxu1 %v7377_v31  ;;  %v7416_v31 = vld [vmem:[%s9327_s1 + $0x928] sm:$0xff]  }
 0x112   :  { %6779 = vmatprep.subr.bf16.mxu1 %v7379_v33  ;;  %v7417_v33 = vld [vmem:[%s9327_s1 + $0x9a8] sm:$0xff]  }
 0x114   :  { %6758 = vmatpush3.bf16.msra.mxu0 %v7380_v34 }
 0x115   :  { %6759 = vmatprep.subr.bf16.mxu0 %v7382_v37  ;;  %6780 = vmatpush3.bf16.msra.mxu1 %v7381_v36  ;;  %v7418_v36 = vld [vmem:[%s9327_s1 + $0x970] sm:$0xff]  }
 0x116   :  { %v6457_v41 = vpop.f32.mrb[4].mxu0  ;;  %6781 = vmatprep.subr.bf16.mxu1 %v7383_v38 }
 0x117   :  { %v6458_v43 = vpop.f32.mrb[5].mxu0  ;;  %v6479_v45 = vpop.f32.mrb[4].mxu1 }
 0x118   :  { %v6459_v46 = vadd.f32 %v6458_v43, %v6457_v41  ;;  %v6460_v47 = vpop.f32.mrb[6].mxu0  ;;  %v6480_v48 = vpop.f32.mrb[5].mxu1  ;;  %6760 = vmatpush3.bf16.msra.mxu0 %v7384_v39  ;;  %v7420_v41 = vld [vmem:[%s9327_s1 + $0x930] sm:$0xff]  }
 0x119   :  { %v6461_v49 = vpop.f32.mrb[7].mxu0  ;;  %v6481_v53 = vadd.f32 %v6480_v48, %v6479_v45  ;;  %v6482_v54 = vpop.f32.mrb[6].mxu1  ;;  %6761 = vmatprep.subr.bf16.mxu0 %v7386_v42  ;;  %6782 = vmatpush3.bf16.msra.mxu1 %v7385_v40  ;;  %v7419_v40 = vld [vmem:[%s9327_s1 + $0x9f0] sm:$0xff]  }
 0x11a   :  { %v4707_v52 = vadd.f32 %v6459_v46, %v8468_v11  ;;  %v6483_v56 = vpop.f32.mrb[7].mxu1  ;;  %6783 = vmatprep.subr.bf16.mxu1 %v7387_v44  ;;  %v1307_v11 = vcombine.high %v1297_v6, %v1297_v6  ;;  %v7421_v47 = vld [vmem:[%s9327_s1 + $0x9b0] sm:$0xff]   ;;  %v7422_v49 = vld [vmem:[%s9327_s1 + $0x978] sm:$0xff]   ;;  %v1290_v54 = vrot.slane %v8589_v4, %v7737_v35 }
 0x11b   :  { %v7428_v56 = vld [vmem:[%s9327_s1 + $0xac0] sm:$0xff]   ;;  %v7439_v4 = vld [vmem:[%s9327_s1 + $0xa58] sm:$0xff]  }
 0x11c   :  { %v8569_v58 = vadd.f32 %v6481_v53, %v4707_v52  ;;  %6762 = vmatpush3.bf16.msra.mxu0 %v7388_v50  ;;  %5304 = vmatprep.mubr.bf16.mxu1 %v1307_v11  ;;  %v7424_v52 = vld [vmem:[%s9327_s1 + $0x938] sm:$0xff]   ;;  %v7446_v11 = vld [vmem:[%s9327_s1 + $0xaa0] sm:$0xff]  }
 0x11d   :  { %6763 = vmatprep.subr.bf16.mxu0 %v7390_v55  ;;  %6784 = vmatpush3.bf16.msra.mxu1 %v7389_v51  ;;  %v7423_v51 = vld [vmem:[%s9327_s1 + $0x9f8] sm:$0xff]   ;;  %v7427_v55 = vld [vmem:[%s9327_s1 + $0xa40] sm:$0xff]  }
 0x11e   :  { %6785 = vmatprep.subr.bf16.mxu1 %v7391_v57  ;;  %v7425_v53 = vld [vmem:[%s9327_s1 + $0x9b8] sm:$0xff]   ;;  %v7429_v57 = vld [vmem:[%s9327_s1 + $0xa00] sm:$0xff]  }
 0x11f   :  { %v7441_v6 = vld [vmem:[%s9327_s1 + $0xa18] sm:$0xff]  }
 0x120   :  { %6764 = vmatpush3.bf16.msra.mxu0 %v7392_v59  ;;  %v1306_v59 = vcombine.high %v1290_v54, %v1290_v54 }
 0x121   :  { %6793 = vmatprep.subr.bf16.mxu0 %v7394_v62  ;;  %6786 = vmatpush3.bf16.msra.mxu1 %v7393_v0  ;;  %v7433_v62 = vld [vmem:[%s9327_s1 + $0xa08] sm:$0xff]   ;;  %v7435_v0 = vld [vmem:[%s9327_s1 + $0xa50] sm:$0xff]  }
 0x122   :  { %6815 = vmatprep.subr.bf16.mxu1 %v7395_v3  ;;  %v7438_v3 = vld [vmem:[%s9327_s1 + $0xa90] sm:$0xff]  }
 0x123   :  { %5265 = vmatmul.mubr.bf16.vlgmr.msra.gmra.mrb[32].mxu0 %v1283_v2  ;;  %v7437_v2 = vld [vmem:[%s9327_s1 + $0xa10] sm:$0xff]  }
 0x124   :  { %6794 = vmatpush3.bf16.msra.mxu0 %v7396_v5  ;;  %5305 = vmatmul.mubr.bf16.vlgmr.msra.gmra.mrb[32].mxu1 %v1305_v9  ;;  %v7440_v5 = vld [vmem:[%s9327_s1 + $0xad8] sm:$0xff]   ;;  %v7444_v9 = vld [vmem:[%s9327_s1 + $0xae0] sm:$0xff]  }
 0x125   :  { %6795 = vmatprep.subr.bf16.mxu0 %v7398_v10  ;;  %6816 = vmatpush3.bf16.msra.mxu1 %v7397_v7  ;;  %v7442_v7 = vld [vmem:[%s9327_s1 + $0xa98] sm:$0xff]   ;;  %v7445_v10 = vld [vmem:[%s9327_s1 + $0xa20] sm:$0xff]  }
 0x126   :  { %5344 = vmatprep.mubr.bf16.mxu0 %v1304_v13  ;;  %6817 = vmatprep.subr.bf16.mxu1 %v7399_v12  ;;  %v7447_v12 = vld [vmem:[%s9327_s1 + $0xa68] sm:$0xff]  }
 0x127   :  { %5384 = vmatprep.mubr.bf16.mxu1 %v1308_v16  ;;  %v7448_v13 = vld [vmem:[%s9327_s1 + $0xae8] sm:$0xff]  }
 0x128   :  { %6796 = vmatpush3.bf16.msra.mxu0 %v7400_v14  ;;  %v7449_v14 = vld [vmem:[%s9327_s1 + $0xa28] sm:$0xff]  }
 0x129   :  { %6797 = vmatprep.subr.bf16.mxu0 %v7402_v17  ;;  %6818 = vmatpush3.bf16.msra.mxu1 %v7401_v15  ;;  %v7450_v16 = vld [vmem:[%s9327_s1 + $0xaa8] sm:$0xff]  }
 0x12a   :  { %6819 = vmatprep.subr.bf16.mxu1 %v7403_v18  ;;  %v7451_v18 = vld [vmem:[%s9327_s1 + $0xa70] sm:$0xff]  }
 0x12c   :  { %6798 = vmatpush3.bf16.msra.mxu0 %v7404_v19 }
 0x12d   :  { %6799 = vmatprep.subr.bf16.mxu0 %v7406_v21  ;;  %6820 = vmatpush3.bf16.msra.mxu1 %v7405_v20 }
 0x12e   :  { %6821 = vmatprep.subr.bf16.mxu1 %v7407_v22 }
 0x130   :  { %6800 = vmatpush3.bf16.msra.mxu0 %v7408_v23 }
 0x131   :  { %6801 = vmatprep.subr.bf16.mxu0 %v7410_v25  ;;  %6822 = vmatpush3.bf16.msra.mxu1 %v7409_v24  ;;  %v7452_v24 = vld [vmem:[%s9327_s1 + $0xaf0] sm:$0xff]  }
 0x132   :  { %6823 = vmatprep.subr.bf16.mxu1 %v7411_v26  ;;  %v7453_v25 = vld [vmem:[%s9327_s1 + $0xa30] sm:$0xff]  }
 0x134   :  { %6802 = vmatpush3.bf16.msra.mxu0 %v7412_v27 }
 0x135   :  { %6803 = vmatprep.subr.bf16.mxu0 %v7414_v29  ;;  %6824 = vmatpush3.bf16.msra.mxu1 %v7413_v28  ;;  %v7454_v29 = vld [vmem:[%s9327_s1 + $0xab0] sm:$0xff]  }
 0x136   :  { %v6501_v32 = vpop.f32.mrb[8].mxu0  ;;  %6825 = vmatprep.subr.bf16.mxu1 %v7415_v30 }
 0x137   :  { %v6502_v34 = vpop.f32.mrb[9].mxu0  ;;  %v6523_v37 = vpop.f32.mrb[8].mxu1 }
 0x138   :  { %v6503_v38 = vadd.f32 %v6502_v34, %v6501_v32  ;;  %v6504_v39 = vpop.f32.mrb[10].mxu0  ;;  %v6524_v42 = vpop.f32.mrb[9].mxu1  ;;  %6804 = vmatpush3.bf16.msra.mxu0 %v7416_v31  ;;  %v7455_v31 = vld [vmem:[%s9327_s1 + $0xa78] sm:$0xff]  }
 0x139   :  { %v6505_v43 = vpop.f32.mrb[11].mxu0  ;;  %v6525_v45 = vadd.f32 %v6524_v42, %v6523_v37  ;;  %v6526_v46 = vpop.f32.mrb[10].mxu1  ;;  %6805 = vmatprep.subr.bf16.mxu0 %v7418_v36  ;;  %6826 = vmatpush3.bf16.msra.mxu1 %v7417_v33  ;;  %v7456_v33 = vld [vmem:[%s9327_s1 + $0xaf8] sm:$0xff]   ;;  %v22_v36 = vld [vmem:[%s9328_s0 + $0x28] sm:$0xff] }
 0x13a   :  { %v4787_v44 = vadd.f32 %v6503_v38, %v8569_v58  ;;  %v6527_v48 = vpop.f32.mrb[11].mxu1  ;;  %6827 = vmatprep.subr.bf16.mxu1 %v7419_v40  ;;  %v7430_v58 = vld [vmem:[%s9327_s1 + $0xa80] sm:$0xff]   ;;  %v7457_v34 = vld [vmem:[%s9327_s1 + $0xa38] sm:$0xff]   ;;  %v1316_v37 = vrot.slane %v22_v36, %v7737_v35  ;;  %v1309_v39 = vcombine.high %v22_v36, %v22_v36  ;;  %v7496_v36 = vld [vmem:[%s9327_s1 + $0xc48] sm:$0xff]  }
 0x13b   :  { %v7459_v38 = vld [vmem:[%s9327_s1 + $0xb40] sm:$0xff]   ;;  %v7458_v40 = vld [vmem:[%s9327_s1 + $0xab8] sm:$0xff]  }
 0x13c   :  { %v8677_v50 = vadd.f32 %v6525_v45, %v4787_v44  ;;  %6806 = vmatpush3.bf16.msra.mxu0 %v7420_v41  ;;  %v1324_v41 = vcombine.high %v1316_v37, %v1316_v37  ;;  %v1332_v42 = vrot.slane %v1316_v37, %v7737_v35  ;;  %v7460_v43 = vld [vmem:[%s9327_s1 + $0xbc0] sm:$0xff]   ;;  %v8801_v44 = vrot.slane %v1309_v39, %v7737_v35  ;;  %v7497_v37 = vld [vmem:[%s9327_s1 + $0xcc8] sm:$0xff]  }
 0x13d   :  { %6807 = vmatprep.subr.bf16.mxu0 %v7422_v49  ;;  %6828 = vmatpush3.bf16.msra.mxu1 %v7421_v47  ;;  %v7461_v45 = vld [vmem:[%s9327_s1 + $0xb00] sm:$0xff]   ;;  %v7499_v39 = vld [vmem:[%s9327_s1 + $0xc88] sm:$0xff]  }
 0x13e   :  { %6829 = vmatprep.subr.bf16.mxu1 %v7423_v51  ;;  %v1346_v46 = vrot.slane %v1324_v41, %v7737_v35  ;;  %v7462_v47 = vld [vmem:[%s9327_s1 + $0xb80] sm:$0xff]   ;;  %v1325_v48 = vcombine.high %v8801_v44, %v8801_v44  ;;  %v1354_v49 = vcombine.high %v1332_v42, %v1332_v42  ;;  %v7501_v41 = vld [vmem:[%s9327_s1 + $0xcd0] sm:$0xff]  }
 0x140   :  { %6808 = vmatpush3.bf16.msra.mxu0 %v7424_v52  ;;  %v1356_v51 = vcombine.high %v1346_v46, %v1346_v46  ;;  %v7464_v52 = vld [vmem:[%s9327_s1 + $0xbc8] sm:$0xff]  }
 0x141   :  { %6837 = vmatprep.subr.bf16.mxu0 %v7427_v55  ;;  %6830 = vmatpush3.bf16.msra.mxu1 %v7425_v53  ;;  %v1353_v53 = vrot.slane %v1325_v48, %v7737_v35  ;;  %v7466_v55 = vld [vmem:[%s9327_s1 + $0xb88] sm:$0xff]   ;;  %v7508_v48 = vld [vmem:[%s9327_s1 + $0xc60] sm:$0xff]  }
 0x142   :  { %6859 = vmatprep.subr.bf16.mxu1 %v7428_v56 }
 0x143   :  { %5345 = vmatmul.mubr.bf16.vlgmr.msra.gmra.mrb[36].mxu0 %v1290_v54  ;;  %v7465_v54 = vld [vmem:[%s9327_s1 + $0xb08] sm:$0xff]   ;;  %v1357_v56 = vcombine.high %v1353_v53, %v1353_v53 }
 0x144   :  { %6838 = vmatpush3.bf16.msra.mxu0 %v7429_v57  ;;  %5385 = vmatmul.mubr.bf16.vlgmr.msra.gmra.mrb[36].mxu1 %v1306_v59  ;;  %v7467_v57 = vld [vmem:[%s9327_s1 + $0xb50] sm:$0xff]  }
 0x145   :  { %6839 = vmatprep.subr.bf16.mxu0 %v7431_v60  ;;  %6860 = vmatpush3.bf16.msra.mxu1 %v7430_v58  ;;  %v7468_v58 = vld [vmem:[%s9327_s1 + $0xbd0] sm:$0xff]  }
 0x146   :  { %6861 = vmatprep.subr.bf16.mxu1 %v7432_v61  ;;  %5424 = vmatprep.mubr.bf16.mxu0 %v1346_v46  ;;  %v7469_v59 = vld [vmem:[%s9327_s1 + $0xb10] sm:$0xff]   ;;  %v7471_v61 = vld [vmem:[%s9327_s1 + $0xb58] sm:$0xff]  }
 0x147   :  { %5464 = vmatprep.mubr.bf16.mxu1 %v1356_v51  ;;  %v7470_v60 = vld [vmem:[%s9327_s1 + $0xb90] sm:$0xff]   ;;  %v7506_v46 = vld [vmem:[%s9327_s1 + $0xc18] sm:$0xff]   ;;  %v7511_v51 = vld [vmem:[%s9327_s1 + $0xca0] sm:$0xff]  }
 0x148   :  { %6840 = vmatpush3.bf16.msra.mxu0 %v7433_v62  ;;  %v7472_v62 = vld [vmem:[%s9327_s1 + $0xbd8] sm:$0xff]  }
 0x149   :  { %6841 = vmatprep.subr.bf16.mxu0 %v7435_v0  ;;  %6862 = vmatpush3.bf16.msra.mxu1 %v7434_v63  ;;  %v7473_v63 = vld [vmem:[%s9327_s1 + $0xb18] sm:$0xff]  }
 0x14a   :  { %6863 = vmatprep.subr.bf16.mxu1 %v7436_v1  ;;  %v7474_v0 = vld [vmem:[%s9327_s1 + $0xb98] sm:$0xff]   ;;  %v7475_v1 = vld [vmem:[%s9327_s1 + $0xb60] sm:$0xff]  }
 0x14c   :  { %6842 = vmatpush3.bf16.msra.mxu0 %v7437_v2  ;;  %v7476_v2 = vld [vmem:[%s9327_s1 + $0xbe0] sm:$0xff]  }
 0x14d   :  { %6843 = vmatprep.subr.bf16.mxu0 %v7439_v4  ;;  %6864 = vmatpush3.bf16.msra.mxu1 %v7438_v3  ;;  %v7477_v3 = vld [vmem:[%s9327_s1 + $0xb20] sm:$0xff]  }
 0x14e   :  { %6865 = vmatprep.subr.bf16.mxu1 %v7440_v5  ;;  %v7478_v4 = vld [vmem:[%s9327_s1 + $0xba0] sm:$0xff]   ;;  %v7479_v5 = vld [vmem:[%s9327_s1 + $0xb68] sm:$0xff]  }
 0x150   :  { %6844 = vmatpush3.bf16.msra.mxu0 %v7441_v6  ;;  %v7480_v6 = vld [vmem:[%s9327_s1 + $0xbe8] sm:$0xff]  }
 0x151   :  { %6845 = vmatprep.subr.bf16.mxu0 %v7443_v8  ;;  %6866 = vmatpush3.bf16.msra.mxu1 %v7442_v7  ;;  %v7481_v8 = vld [vmem:[%s9327_s1 + $0xb28] sm:$0xff]  }
 0x152   :  { %6867 = vmatprep.subr.bf16.mxu1 %v7444_v9 }
 0x154   :  { %6846 = vmatpush3.bf16.msra.mxu0 %v7445_v10  ;;  %v7482_v10 = vld [vmem:[%s9327_s1 + $0xba8] sm:$0xff]  }
 0x155   :  { %6847 = vmatprep.subr.bf16.mxu0 %v7447_v12  ;;  %6868 = vmatpush3.bf16.msra.mxu1 %v7446_v11 }
 0x156   :  { %v6545_v15 = vpop.f32.mrb[12].mxu0  ;;  %6869 = vmatprep.subr.bf16.mxu1 %v7448_v13 }
 0x157   :  { %v6546_v17 = vpop.f32.mrb[13].mxu0  ;;  %v6567_v19 = vpop.f32.mrb[12].mxu1 }
 0x158   :  { %v6547_v20 = vadd.f32 %v6546_v17, %v6545_v15  ;;  %v6548_v21 = vpop.f32.mrb[14].mxu0  ;;  %v6568_v22 = vpop.f32.mrb[13].mxu1  ;;  %6848 = vmatpush3.bf16.msra.mxu0 %v7449_v14  ;;  %v7483_v14 = vld [vmem:[%s9327_s1 + $0xb70] sm:$0xff]  }
 0x159   :  { %v6549_v23 = vpop.f32.mrb[15].mxu0  ;;  %v6569_v27 = vadd.f32 %v6568_v22, %v6567_v19  ;;  %v6570_v28 = vpop.f32.mrb[14].mxu1  ;;  %6849 = vmatprep.subr.bf16.mxu0 %v7451_v18  ;;  %6870 = vmatpush3.bf16.msra.mxu1 %v7450_v16  ;;  %v7484_v15 = vld [vmem:[%s9327_s1 + $0xbf0] sm:$0xff]  }
 0x15a   :  { %v4867_v26 = vadd.f32 %v6547_v20, %v8677_v50  ;;  %v6571_v30 = vpop.f32.mrb[15].mxu1  ;;  %6871 = vmatprep.subr.bf16.mxu1 %v7452_v24  ;;  %v7463_v50 = vld [vmem:[%s9327_s1 + $0xb48] sm:$0xff]   ;;  %v7485_v21 = vld [vmem:[%s9327_s1 + $0xb30] sm:$0xff]   ;;  %v7490_v28 = vld [vmem:[%s9327_s1 + $0xbb8] sm:$0xff]  }
 0x15b   :  { %v7486_v23 = vld [vmem:[%s9327_s1 + $0xbb0] sm:$0xff]   ;;  %v7492_v30 = vld [vmem:[%s9327_s1 + $0xc40] sm:$0xff]  }
 0x15c   :  { %v8778_v32 = vadd.f32 %v6569_v27, %v4867_v26  ;;  %6850 = vmatpush3.bf16.msra.mxu0 %v7453_v25  ;;  %v7487_v25 = vld [vmem:[%s9327_s1 + $0xb78] sm:$0xff]  }
 0x15d   :  { %6851 = vmatprep.subr.bf16.mxu0 %v7455_v31  ;;  %6872 = vmatpush3.bf16.msra.mxu1 %v7454_v29  ;;  %v7488_v26 = vld [vmem:[%s9327_s1 + $0xbf8] sm:$0xff]   ;;  %v1339_v29 = vrot.slane %v8801_v44, %v7737_v35  ;;  %v7493_v31 = vld [vmem:[%s9327_s1 + $0xcc0] sm:$0xff]  }
 0x15e   :  { %6873 = vmatprep.subr.bf16.mxu1 %v7456_v33  ;;  %v7489_v27 = vld [vmem:[%s9327_s1 + $0xb38] sm:$0xff]   ;;  %v7495_v33 = vld [vmem:[%s9327_s1 + $0xc80] sm:$0xff]  }
 0x15f   :  { %v7504_v44 = vld [vmem:[%s9327_s1 + $0xc58] sm:$0xff]  }
 0x160   :  { %6852 = vmatpush3.bf16.msra.mxu0 %v7457_v34  ;;  %v1355_v34 = vcombine.high %v1339_v29, %v1339_v29 }
 0x161   :  { %6881 = vmatprep.subr.bf16.mxu0 %v7459_v38  ;;  %6874 = vmatpush3.bf16.msra.mxu1 %v7458_v40  ;;  %v7498_v38 = vld [vmem:[%s9327_s1 + $0xc08] sm:$0xff]   ;;  %v7500_v40 = vld [vmem:[%s9327_s1 + $0xc50] sm:$0xff]  }
 0x162   :  { %6903 = vmatprep.subr.bf16.mxu1 %v7460_v43  ;;  %v7503_v43 = vld [vmem:[%s9327_s1 + $0xc90] sm:$0xff]  }
 0x163   :  { %5425 = vmatmul.mubr.bf16.vlgmr.msra.gmra.mrb[40].mxu0 %v1332_v42  ;;  %v7502_v42 = vld [vmem:[%s9327_s1 + $0xc10] sm:$0xff]  }
 0x164   :  { %6882 = vmatpush3.bf16.msra.mxu0 %v7461_v45  ;;  %5465 = vmatmul.mubr.bf16.vlgmr.msra.gmra.mrb[40].mxu1 %v1354_v49  ;;  %v7505_v45 = vld [vmem:[%s9327_s1 + $0xcd8] sm:$0xff]   ;;  %v7509_v49 = vld [vmem:[%s9327_s1 + $0xce0] sm:$0xff]  }
 0x165   :  { %6883 = vmatprep.subr.bf16.mxu0 %v7463_v50  ;;  %6904 = vmatpush3.bf16.msra.mxu1 %v7462_v47  ;;  %v7507_v47 = vld [vmem:[%s9327_s1 + $0xc98] sm:$0xff]   ;;  %v7510_v50 = vld [vmem:[%s9327_s1 + $0xc20] sm:$0xff]  }
 0x166   :  { %5504 = vmatprep.mubr.bf16.mxu0 %v1353_v53  ;;  %6905 = vmatprep.subr.bf16.mxu1 %v7464_v52  ;;  %v7512_v52 = vld [vmem:[%s9327_s1 + $0xc68] sm:$0xff]  }
 0x167   :  { %5544 = vmatprep.mubr.bf16.mxu1 %v1357_v56  ;;  %v7513_v53 = vld [vmem:[%s9327_s1 + $0xce8] sm:$0xff]  }
 0x168   :  { %6884 = vmatpush3.bf16.msra.mxu0 %v7465_v54 }
 0x169   :  { %6885 = vmatprep.subr.bf16.mxu0 %v7467_v57  ;;  %6906 = vmatpush3.bf16.msra.mxu1 %v7466_v55  ;;  %v7514_v55 = vld [vmem:[%s9327_s1 + $0xc28] sm:$0xff]   ;;  %v7516_v57 = vld [vmem:[%s9327_s1 + $0xc70] sm:$0xff]  }
 0x16a   :  { %6907 = vmatprep.subr.bf16.mxu1 %v7468_v58 }
 0x16c   :  { %6886 = vmatpush3.bf16.msra.mxu0 %v7469_v59 }
 0x16d   :  { %6887 = vmatprep.subr.bf16.mxu0 %v7471_v61  ;;  %6908 = vmatpush3.bf16.msra.mxu1 %v7470_v60 }
 0x16e   :  { %6909 = vmatprep.subr.bf16.mxu1 %v7472_v62  ;;  %v7515_v62 = vld [vmem:[%s9327_s1 + $0xca8] sm:$0xff]  }
 0x170   :  { %6888 = vmatpush3.bf16.msra.mxu0 %v7473_v63 }
 0x171   :  { %6889 = vmatprep.subr.bf16.mxu0 %v7475_v1  ;;  %6910 = vmatpush3.bf16.msra.mxu1 %v7474_v0  ;;  %v7517_v0 = vld [vmem:[%s9327_s1 + $0xcf0] sm:$0xff]  }
 0x172   :  { %6911 = vmatprep.subr.bf16.mxu1 %v7476_v2 }
 0x174   :  { %6890 = vmatpush3.bf16.msra.mxu0 %v7477_v3 }
 0x175   :  { %6891 = vmatprep.subr.bf16.mxu0 %v7479_v5  ;;  %6912 = vmatpush3.bf16.msra.mxu1 %v7478_v4  ;;  %v7518_v4 = vld [vmem:[%s9327_s1 + $0xc30] sm:$0xff]  }
 0x176   :  { %v6589_v7 = vpop.f32.mrb[16].mxu0  ;;  %6913 = vmatprep.subr.bf16.mxu1 %v7480_v6  ;;  %v7520_v6 = vld [vmem:[%s9327_s1 + $0xc78] sm:$0xff]  }
 0x177   :  { %v6590_v9 = vpop.f32.mrb[17].mxu0  ;;  %v6611_v11 = vpop.f32.mrb[16].mxu1 }
 0x178   :  { %v6591_v12 = vadd.f32 %v6590_v9, %v6589_v7  ;;  %v6592_v13 = vpop.f32.mrb[18].mxu0  ;;  %v6612_v16 = vpop.f32.mrb[17].mxu1  ;;  %6892 = vmatpush3.bf16.msra.mxu0 %v7481_v8  ;;  %v7519_v8 = vld [vmem:[%s9327_s1 + $0xcb0] sm:$0xff]   ;;  %v7521_v9 = vld [vmem:[%s9327_s1 + $0xcf8] sm:$0xff]  }
 0x179   :  { %v6593_v17 = vpop.f32.mrb[19].mxu0  ;;  %v6613_v19 = vadd.f32 %v6612_v16, %v6611_v11  ;;  %v6614_v20 = vpop.f32.mrb[18].mxu1  ;;  %6893 = vmatprep.subr.bf16.mxu0 %v7483_v14  ;;  %6914 = vmatpush3.bf16.msra.mxu1 %v7482_v10  ;;  %v7522_v10 = vld [vmem:[%s9327_s1 + $0xc38] sm:$0xff]   ;;  %v23_v11 = vld [vmem:[%s9328_s0 + $0x30] sm:$0xff]  ;;  %v7524_v13 = vld [vmem:[%s9327_s1 + $0xd40] sm:$0xff]  }
 0x17a   :  { %v4947_v18 = vadd.f32 %v6591_v12, %v8778_v32  ;;  %v6615_v22 = vpop.f32.mrb[19].mxu1  ;;  %6915 = vmatprep.subr.bf16.mxu1 %v7484_v15  ;;  %v7494_v32 = vld [vmem:[%s9327_s1 + $0xc00] sm:$0xff]   ;;  %v1365_v12 = vrot.slane %v23_v11, %v7737_v35  ;;  %v1358_v14 = vcombine.high %v23_v11, %v23_v11  ;;  %v7523_v15 = vld [vmem:[%s9327_s1 + $0xcb8] sm:$0xff]   ;;  %v7561_v11 = vld [vmem:[%s9327_s1 + $0xe48] sm:$0xff]  }
 0x17b   :  { %v7526_v20 = vld [vmem:[%s9327_s1 + $0xd00] sm:$0xff]  }
 0x17c   :  { %v8886_v24 = vadd.f32 %v6613_v19, %v4947_v18  ;;  %6894 = vmatpush3.bf16.msra.mxu0 %v7485_v21  ;;  %v1373_v16 = vcombine.high %v1365_v12, %v1365_v12  ;;  %v1381_v17 = vrot.slane %v1365_v12, %v7737_v35  ;;  %v7525_v18 = vld [vmem:[%s9327_s1 + $0xdc0] sm:$0xff]   ;;  %v9013_v19 = vrot.slane %v1358_v14, %v7737_v35  ;;  %v7562_v12 = vld [vmem:[%s9327_s1 + $0xec8] sm:$0xff]  }
 0x17d   :  { %6895 = vmatprep.subr.bf16.mxu0 %v7487_v25  ;;  %6916 = vmatpush3.bf16.msra.mxu1 %v7486_v23  ;;  %v7527_v22 = vld [vmem:[%s9327_s1 + $0xd80] sm:$0xff]   ;;  %v7528_v25 = vld [vmem:[%s9327_s1 + $0xd48] sm:$0xff]  }
 0x17e   :  { %6917 = vmatprep.subr.bf16.mxu1 %v7488_v26  ;;  %v1395_v21 = vrot.slane %v1373_v16, %v7737_v35  ;;  %v1374_v23 = vcombine.high %v9013_v19, %v9013_v19  ;;  %v7564_v14 = vld [vmem:[%s9327_s1 + $0xe88] sm:$0xff]   ;;  %v7566_v16 = vld [vmem:[%s9327_s1 + $0xed0] sm:$0xff]  }
 0x180   :  { %6896 = vmatpush3.bf16.msra.mxu0 %v7489_v27  ;;  %v1405_v26 = vcombine.high %v1395_v21, %v1395_v21  ;;  %v7529_v27 = vld [vmem:[%s9327_s1 + $0xdc8] sm:$0xff]  }
 0x181   :  { %6925 = vmatprep.subr.bf16.mxu0 %v7492_v30  ;;  %6918 = vmatpush3.bf16.msra.mxu1 %v7490_v28  ;;  %v1402_v28 = vrot.slane %v1374_v23, %v7737_v35  ;;  %v7531_v30 = vld [vmem:[%s9327_s1 + $0xd88] sm:$0xff]   ;;  %v7573_v23 = vld [vmem:[%s9327_s1 + $0xe60] sm:$0xff]  }
 0x182   :  { %6947 = vmatprep.subr.bf16.mxu1 %v7493_v31 }
 0x183   :  { %5505 = vmatmul.mubr.bf16.vlgmr.msra.gmra.mrb[44].mxu0 %v1339_v29  ;;  %v7530_v29 = vld [vmem:[%s9327_s1 + $0xd08] sm:$0xff]   ;;  %v1406_v31 = vcombine.high %v1402_v28, %v1402_v28 }
 0x184   :  { %6926 = vmatpush3.bf16.msra.mxu0 %v7494_v32  ;;  %5545 = vmatmul.mubr.bf16.vlgmr.msra.gmra.mrb[44].mxu1 %v1355_v34  ;;  %v7532_v32 = vld [vmem:[%s9327_s1 + $0xd50] sm:$0xff]  }
 0x185   :  { %6927 = vmatprep.subr.bf16.mxu0 %v7496_v36  ;;  %6948 = vmatpush3.bf16.msra.mxu1 %v7495_v33  ;;  %v7533_v33 = vld [vmem:[%s9327_s1 + $0xdd0] sm:$0xff]  }
 0x186   :  { %6949 = vmatprep.subr.bf16.mxu1 %v7497_v37  ;;  %5584 = vmatprep.mubr.bf16.mxu0 %v1395_v21  ;;  %v7534_v34 = vld [vmem:[%s9327_s1 + $0xd10] sm:$0xff]   ;;  %v7536_v37 = vld [vmem:[%s9327_s1 + $0xd58] sm:$0xff]  }
 0x187   :  { %5624 = vmatprep.mubr.bf16.mxu1 %v1405_v26  ;;  %v7535_v36 = vld [vmem:[%s9327_s1 + $0xd90] sm:$0xff]   ;;  %v7571_v21 = vld [vmem:[%s9327_s1 + $0xe18] sm:$0xff]   ;;  %v7576_v26 = vld [vmem:[%s9327_s1 + $0xea0] sm:$0xff]  }
 0x188   :  { %6928 = vmatpush3.bf16.msra.mxu0 %v7498_v38  ;;  %v7537_v38 = vld [vmem:[%s9327_s1 + $0xdd8] sm:$0xff]  }
 0x189   :  { %6929 = vmatprep.subr.bf16.mxu0 %v7500_v40  ;;  %6950 = vmatpush3.bf16.msra.mxu1 %v7499_v39  ;;  %v7538_v39 = vld [vmem:[%s9327_s1 + $0xd18] sm:$0xff]  }
 0x18a   :  { %6951 = vmatprep.subr.bf16.mxu1 %v7501_v41  ;;  %v7539_v40 = vld [vmem:[%s9327_s1 + $0xd98] sm:$0xff]   ;;  %v7540_v41 = vld [vmem:[%s9327_s1 + $0xd60] sm:$0xff]  }
 0x18c   :  { %6930 = vmatpush3.bf16.msra.mxu0 %v7502_v42  ;;  %v7541_v42 = vld [vmem:[%s9327_s1 + $0xde0] sm:$0xff]  }
 0x18d   :  { %6931 = vmatprep.subr.bf16.mxu0 %v7504_v44  ;;  %6952 = vmatpush3.bf16.msra.mxu1 %v7503_v43  ;;  %v7542_v43 = vld [vmem:[%s9327_s1 + $0xd20] sm:$0xff]  }
 0x18e   :  { %6953 = vmatprep.subr.bf16.mxu1 %v7505_v45  ;;  %v7543_v44 = vld [vmem:[%s9327_s1 + $0xda0] sm:$0xff]   ;;  %v7544_v45 = vld [vmem:[%s9327_s1 + $0xd68] sm:$0xff]  }
 0x190   :  { %6932 = vmatpush3.bf16.msra.mxu0 %v7506_v46  ;;  %v7545_v46 = vld [vmem:[%s9327_s1 + $0xde8] sm:$0xff]  }
 0x191   :  { %6933 = vmatprep.subr.bf16.mxu0 %v7508_v48  ;;  %6954 = vmatpush3.bf16.msra.mxu1 %v7507_v47  ;;  %v7546_v48 = vld [vmem:[%s9327_s1 + $0xd28] sm:$0xff]  }
 0x192   :  { %6955 = vmatprep.subr.bf16.mxu1 %v7509_v49 }
 0x194   :  { %6934 = vmatpush3.bf16.msra.mxu0 %v7510_v50  ;;  %v7547_v50 = vld [vmem:[%s9327_s1 + $0xda8] sm:$0xff]  }
 0x195   :  { %6935 = vmatprep.subr.bf16.mxu0 %v7512_v52  ;;  %6956 = vmatpush3.bf16.msra.mxu1 %v7511_v51 }
 0x196   :  { %v6633_v54 = vpop.f32.mrb[20].mxu0  ;;  %6957 = vmatprep.subr.bf16.mxu1 %v7513_v53 }
 0x197   :  { %v6634_v56 = vpop.f32.mrb[21].mxu0  ;;  %v6655_v58 = vpop.f32.mrb[20].mxu1 }
 0x198   :  { %v6635_v59 = vadd.f32 %v6634_v56, %v6633_v54  ;;  %v6636_v60 = vpop.f32.mrb[22].mxu0  ;;  %v6656_v61 = vpop.f32.mrb[21].mxu1  ;;  %6936 = vmatpush3.bf16.msra.mxu0 %v7514_v55  ;;  %v7548_v54 = vld [vmem:[%s9327_s1 + $0xd70] sm:$0xff]  }
 0x199   :  { %v6637_v63 = vpop.f32.mrb[23].mxu0  ;;  %v6657_v2 = vadd.f32 %v6656_v61, %v6655_v58  ;;  %v6658_v3 = vpop.f32.mrb[22].mxu1  ;;  %6937 = vmatprep.subr.bf16.mxu0 %v7516_v57  ;;  %6958 = vmatpush3.bf16.msra.mxu1 %v7515_v62  ;;  %v7549_v55 = vld [vmem:[%s9327_s1 + $0xdf0] sm:$0xff]  }
 0x19a   :  { %v5027_v1 = vadd.f32 %v6635_v59, %v8886_v24  ;;  %v6659_v5 = vpop.f32.mrb[23].mxu1  ;;  %6959 = vmatprep.subr.bf16.mxu1 %v7517_v0  ;;  %v1403_v24 = vcombine.high %v1381_v17, %v1381_v17  ;;  %v7550_v61 = vld [vmem:[%s9327_s1 + $0xd30] sm:$0xff]   ;;  %v7554_v3 = vld [vmem:[%s9327_s1 + $0xd38] sm:$0xff]  }
 0x19b   :  { %v7551_v63 = vld [vmem:[%s9327_s1 + $0xdb0] sm:$0xff]   ;;  %v1388_v5 = vrot.slane %v9013_v19, %v7737_v35  ;;  %v7569_v19 = vld [vmem:[%s9327_s1 + $0xe58] sm:$0xff]  }
 0x19c   :  { %v8987_v7 = vadd.f32 %v6657_v2, %v5027_v1  ;;  %6938 = vmatpush3.bf16.msra.mxu0 %v7518_v4  ;;  %v7552_v1 = vld [vmem:[%s9327_s1 + $0xd78] sm:$0xff]  }
 0x19d   :  { %6939 = vmatprep.subr.bf16.mxu0 %v7520_v6  ;;  %6960 = vmatpush3.bf16.msra.mxu1 %v7519_v8  ;;  %v7553_v2 = vld [vmem:[%s9327_s1 + $0xdf8] sm:$0xff]   ;;  %v7557_v6 = vld [vmem:[%s9327_s1 + $0xe40] sm:$0xff]  }
 0x19e   :  { %6961 = vmatprep.subr.bf16.mxu1 %v7521_v9  ;;  %v7555_v4 = vld [vmem:[%s9327_s1 + $0xdb8] sm:$0xff]   ;;  %v7559_v8 = vld [vmem:[%s9327_s1 + $0xe00] sm:$0xff]  }
 0x19f   :  { %v7560_v9 = vld [vmem:[%s9327_s1 + $0xe80] sm:$0xff]  }
 0x1a0   :  { %6940 = vmatpush3.bf16.msra.mxu0 %v7522_v10  ;;  %v1404_v10 = vcombine.high %v1388_v5, %v1388_v5 }
 0x1a1   :  { %6969 = vmatprep.subr.bf16.mxu0 %v7524_v13  ;;  %6962 = vmatpush3.bf16.msra.mxu1 %v7523_v15  ;;  %v7563_v13 = vld [vmem:[%s9327_s1 + $0xe08] sm:$0xff]   ;;  %v7565_v15 = vld [vmem:[%s9327_s1 + $0xe50] sm:$0xff]  }
 0x1a2   :  { %6991 = vmatprep.subr.bf16.mxu1 %v7525_v18  ;;  %v7568_v18 = vld [vmem:[%s9327_s1 + $0xe90] sm:$0xff]  }
 0x1a3   :  { %5585 = vmatmul.mubr.bf16.vlgmr.msra.gmra.mrb[48].mxu0 %v1381_v17  ;;  %v7567_v17 = vld [vmem:[%s9327_s1 + $0xe10] sm:$0xff]  }
 0x1a4   :  { %6970 = vmatpush3.bf16.msra.mxu0 %v7526_v20  ;;  %5625 = vmatmul.mubr.bf16.vlgmr.msra.gmra.mrb[48].mxu1 %v1403_v24  ;;  %v7570_v20 = vld [vmem:[%s9327_s1 + $0xed8] sm:$0xff]   ;;  %v7574_v24 = vld [vmem:[%s9327_s1 + $0xee0] sm:$0xff]  }
 0x1a5   :  { %6971 = vmatprep.subr.bf16.mxu0 %v7528_v25  ;;  %6992 = vmatpush3.bf16.msra.mxu1 %v7527_v22  ;;  %v7572_v22 = vld [vmem:[%s9327_s1 + $0xe98] sm:$0xff]   ;;  %v7575_v25 = vld [vmem:[%s9327_s1 + $0xe20] sm:$0xff]  }
 0x1a6   :  { %5664 = vmatprep.mubr.bf16.mxu0 %v1402_v28  ;;  %6993 = vmatprep.subr.bf16.mxu1 %v7529_v27  ;;  %v7577_v27 = vld [vmem:[%s9327_s1 + $0xe68] sm:$0xff]  }
 0x1a7   :  { %5704 = vmatprep.mubr.bf16.mxu1 %v1406_v31  ;;  %v7578_v28 = vld [vmem:[%s9327_s1 + $0xee8] sm:$0xff]  }
 0x1a8   :  { %6972 = vmatpush3.bf16.msra.mxu0 %v7530_v29 }
 0x1a9   :  { %6973 = vmatprep.subr.bf16.mxu0 %v7532_v32  ;;  %6994 = vmatpush3.bf16.msra.mxu1 %v7531_v30  ;;  %v7579_v30 = vld [vmem:[%s9327_s1 + $0xe28] sm:$0xff]   ;;  %v7581_v32 = vld [vmem:[%s9327_s1 + $0xe70] sm:$0xff]  }
 0x1aa   :  { %6995 = vmatprep.subr.bf16.mxu1 %v7533_v33 }
 0x1ac   :  { %6974 = vmatpush3.bf16.msra.mxu0 %v7534_v34 }
 0x1ad   :  { %6975 = vmatprep.subr.bf16.mxu0 %v7536_v37  ;;  %6996 = vmatpush3.bf16.msra.mxu1 %v7535_v36 }
 0x1ae   :  { %6997 = vmatprep.subr.bf16.mxu1 %v7537_v38  ;;  %v7580_v38 = vld [vmem:[%s9327_s1 + $0xea8] sm:$0xff]  }
 0x1b0   :  { %6976 = vmatpush3.bf16.msra.mxu0 %v7538_v39 }
 0x1b1   :  { %6977 = vmatprep.subr.bf16.mxu0 %v7540_v41  ;;  %6998 = vmatpush3.bf16.msra.mxu1 %v7539_v40  ;;  %v7582_v40 = vld [vmem:[%s9327_s1 + $0xef0] sm:$0xff]  }
 0x1b2   :  { %6999 = vmatprep.subr.bf16.mxu1 %v7541_v42 }
 0x1b4   :  { %6978 = vmatpush3.bf16.msra.mxu0 %v7542_v43 }
 0x1b5   :  { %6979 = vmatprep.subr.bf16.mxu0 %v7544_v45  ;;  %7000 = vmatpush3.bf16.msra.mxu1 %v7543_v44  ;;  %v7583_v44 = vld [vmem:[%s9327_s1 + $0xe30] sm:$0xff]  }
 0x1b6   :  { %v6677_v47 = vpop.f32.mrb[24].mxu0  ;;  %7001 = vmatprep.subr.bf16.mxu1 %v7545_v46  ;;  %v7585_v46 = vld [vmem:[%s9327_s1 + $0xe78] sm:$0xff]  }
 0x1b7   :  { %v6678_v49 = vpop.f32.mrb[25].mxu0  ;;  %v6699_v51 = vpop.f32.mrb[24].mxu1 }
 0x1b8   :  { %v6679_v52 = vadd.f32 %v6678_v49, %v6677_v47  ;;  %v6680_v53 = vpop.f32.mrb[26].mxu0  ;;  %v6700_v56 = vpop.f32.mrb[25].mxu1  ;;  %6980 = vmatpush3.bf16.msra.mxu0 %v7546_v48  ;;  %v7584_v48 = vld [vmem:[%s9327_s1 + $0xeb0] sm:$0xff]   ;;  %v7586_v49 = vld [vmem:[%s9327_s1 + $0xef8] sm:$0xff]  }
 0x1b9   :  { %v6681_v57 = vpop.f32.mrb[27].mxu0  ;;  %v6701_v59 = vadd.f32 %v6700_v56, %v6699_v51  ;;  %v6702_v60 = vpop.f32.mrb[26].mxu1  ;;  %6981 = vmatprep.subr.bf16.mxu0 %v7548_v54  ;;  %7002 = vmatpush3.bf16.msra.mxu1 %v7547_v50  ;;  %v7587_v50 = vld [vmem:[%s9327_s1 + $0xe38] sm:$0xff]   ;;  %v7589_v53 = vld [vmem:[%s9327_s1 + $0xf40] sm:$0xff]  }
 0x1ba   :  { %v5107_v58 = vadd.f32 %v6679_v52, %v8987_v7  ;;  %v6703_v62 = vpop.f32.mrb[27].mxu1  ;;  %7003 = vmatprep.subr.bf16.mxu1 %v7549_v55  ;;  %v7558_v7 = vld [vmem:[%s9327_s1 + $0xec0] sm:$0xff]   ;;  %v24_v51 = vld [vmem:[%s9328_s0 + $0x38] sm:$0xff] }
 0x1bb   :  { %v1414_v52 = vrot.slane %v24_v51, %v7737_v35  ;;  %v1407_v54 = vcombine.high %v24_v51, %v24_v51  ;;  %v7588_v55 = vld [vmem:[%s9327_s1 + $0xeb8] sm:$0xff]  }
 0x1bc   :  { %v9098_v0 = vadd.f32 %v6701_v59, %v5107_v58  ;;  %6982 = vmatpush3.bf16.msra.mxu0 %v7550_v61  ;;  %v7590_v58 = vld [vmem:[%s9327_s1 + $0xfc0] sm:$0xff]  }
 0x1bd   :  { %6983 = vmatprep.subr.bf16.mxu0 %v7552_v1  ;;  %7004 = vmatpush3.bf16.msra.mxu1 %v7551_v63  ;;  %v1422_v56 = vcombine.high %v1414_v52, %v1414_v52  ;;  %v1430_v57 = vrot.slane %v1414_v52, %v7737_v35  ;;  %v9225_v59 = vrot.slane %v1407_v54, %v7737_v35  ;;  %v7591_v61 = vld [vmem:[%s9327_s1 + $0xf00] sm:$0xff]  }
 0x1be   :  { %7005 = vmatprep.subr.bf16.mxu1 %v7553_v2  ;;  %v7592_v2 = vld [vmem:[%s9327_s1 + $0xf80] sm:$0xff]  }
 0x1bf   :  { %v1444_v60 = vrot.slane %v1422_v56, %v7737_v35  ;;  %v1423_v62 = vcombine.high %v9225_v59, %v9225_v59  ;;  %v1452_v63 = vcombine.high %v1430_v57, %v1430_v57 }
 0x1c0   :  { %6984 = vmatpush3.bf16.msra.mxu0 %v7554_v3 }
 0x1c1   :  { %7013 = vmatprep.subr.bf16.mxu0 %v7557_v6  ;;  %7006 = vmatpush3.bf16.msra.mxu1 %v7555_v4  ;;  %v1454_v1 = vcombine.high %v1444_v60, %v1444_v60  ;;  %v1451_v3 = vrot.slane %v1423_v62, %v7737_v35  ;;  %v7594_v4 = vld [vmem:[%s9327_s1 + $0xfc8] sm:$0xff]  }
 0x1c2   :  { %7035 = vmatprep.subr.bf16.mxu1 %v7558_v7  ;;  %v7597_v7 = vld [vmem:[%s9327_s1 + $0xf50] sm:$0xff]  }
 0x1c3   :  { %5665 = vmatmul.mubr.bf16.vlgmr.msra.gmra.mrb[52].mxu0 %v1388_v5  ;;  %v7595_v5 = vld [vmem:[%s9327_s1 + $0xf08] sm:$0xff]   ;;  %v1455_v6 = vcombine.high %v1451_v3, %v1451_v3 }
 0x1c4   :  { %7014 = vmatpush3.bf16.msra.mxu0 %v7559_v8  ;;  %5705 = vmatmul.mubr.bf16.vlgmr.msra.gmra.mrb[52].mxu1 %v1404_v10  ;;  %v7596_v8 = vld [vmem:[%s9327_s1 + $0xf88] sm:$0xff]   ;;  %v7599_v10 = vld [vmem:[%s9327_s1 + $0xf10] sm:$0xff]  }
 0x1c5   :  { %7015 = vmatprep.subr.bf16.mxu0 %v7561_v11  ;;  %7036 = vmatpush3.bf16.msra.mxu1 %v7560_v9  ;;  %v7598_v9 = vld [vmem:[%s9327_s1 + $0xfd0] sm:$0xff]   ;;  %v7601_v11 = vld [vmem:[%s9327_s1 + $0xf58] sm:$0xff]  }
 0x1c6   :  { %7037 = vmatprep.subr.bf16.mxu1 %v7562_v12  ;;  %5744 = vmatprep.mubr.bf16.mxu0 %v1444_v60  ;;  %v7600_v12 = vld [vmem:[%s9327_s1 + $0xf90] sm:$0xff]  }
 0x1c7   :  { %5784 = vmatprep.mubr.bf16.mxu1 %v1454_v1 }
 0x1c8   :  { %7016 = vmatpush3.bf16.msra.mxu0 %v7563_v13  ;;  %v7602_v13 = vld [vmem:[%s9327_s1 + $0xfd8] sm:$0xff]  }
 0x1c9   :  { %7017 = vmatprep.subr.bf16.mxu0 %v7565_v15  ;;  %7038 = vmatpush3.bf16.msra.mxu1 %v7564_v14  ;;  %v7603_v14 = vld [vmem:[%s9327_s1 + $0xf18] sm:$0xff]   ;;  %v7605_v15 = vld [vmem:[%s9327_s1 + $0xf60] sm:$0xff]  }
 0x1ca   :  { %7039 = vmatprep.subr.bf16.mxu1 %v7566_v16  ;;  %v7604_v16 = vld [vmem:[%s9327_s1 + $0xf98] sm:$0xff]  }
 0x1cc   :  { %7018 = vmatpush3.bf16.msra.mxu0 %v7567_v17  ;;  %v7606_v17 = vld [vmem:[%s9327_s1 + $0xfe0] sm:$0xff]  }
 0x1cd   :  { %7019 = vmatprep.subr.bf16.mxu0 %v7569_v19  ;;  %7040 = vmatpush3.bf16.msra.mxu1 %v7568_v18  ;;  %v7607_v18 = vld [vmem:[%s9327_s1 + $0xf20] sm:$0xff]   ;;  %v7609_v19 = vld [vmem:[%s9327_s1 + $0xf68] sm:$0xff]  }
 0x1ce   :  { %7041 = vmatprep.subr.bf16.mxu1 %v7570_v20  ;;  %v7608_v20 = vld [vmem:[%s9327_s1 + $0xfa0] sm:$0xff]  }
 0x1d0   :  { %7020 = vmatpush3.bf16.msra.mxu0 %v7571_v21 }
 0x1d1   :  { %7021 = vmatprep.subr.bf16.mxu0 %v7573_v23  ;;  %7042 = vmatpush3.bf16.msra.mxu1 %v7572_v22  ;;  %v7610_v22 = vld [vmem:[%s9327_s1 + $0xfe8] sm:$0xff]  }
 0x1d2   :  { %7043 = vmatprep.subr.bf16.mxu1 %v7574_v24  ;;  %v7611_v24 = vld [vmem:[%s9327_s1 + $0xf28] sm:$0xff]  }
 0x1d4   :  { %7022 = vmatpush3.bf16.msra.mxu0 %v7575_v25 }
 0x1d5   :  { %7023 = vmatprep.subr.bf16.mxu0 %v7577_v27  ;;  %7044 = vmatpush3.bf16.msra.mxu1 %v7576_v26 }
 0x1d6   :  { %v6721_v29 = vpop.f32.mrb[28].mxu0  ;;  %7045 = vmatprep.subr.bf16.mxu1 %v7578_v28  ;;  %v7612_v28 = vld [vmem:[%s9327_s1 + $0xfa8] sm:$0xff]  }
 0x1d7   :  { %v6722_v31 = vpop.f32.mrb[29].mxu0  ;;  %v6743_v33 = vpop.f32.mrb[28].mxu1 }
 0x1d8   :  { %v6723_v34 = vadd.f32 %v6722_v31, %v6721_v29  ;;  %v6724_v36 = vpop.f32.mrb[30].mxu0  ;;  %v6744_v37 = vpop.f32.mrb[29].mxu1  ;;  %7024 = vmatpush3.bf16.msra.mxu0 %v7579_v30  ;;  %v7613_v29 = vld [vmem:[%s9327_s1 + $0xf70] sm:$0xff]  }
 0x1d9   :  { %v6725_v39 = vpop.f32.mrb[31].mxu0  ;;  %v6745_v42 = vadd.f32 %v6744_v37, %v6743_v33  ;;  %v6746_v43 = vpop.f32.mrb[30].mxu1  ;;  %7025 = vmatprep.subr.bf16.mxu0 %v7581_v32  ;;  %7046 = vmatpush3.bf16.msra.mxu1 %v7580_v38  ;;  %v7614_v36 = vld [vmem:[%s9327_s1 + $0xff0] sm:$0xff]  }
 0x1da   :  { %v5187_v41 = vadd.f32 %v6723_v34, %v9098_v0  ;;  %v6747_v45 = vpop.f32.mrb[31].mxu1  ;;  %7047 = vmatprep.subr.bf16.mxu1 %v7582_v40  ;;  %v7593_v0 = vld [vmem:[%s9327_s1 + $0xf48] sm:$0xff]   ;;  %v7615_v38 = vld [vmem:[%s9327_s1 + $0xf30] sm:$0xff]   ;;  %v7617_v40 = vld [vmem:[%s9327_s1 + $0xf78] sm:$0xff]  }
 0x1db   :  { %v7619_v43 = vld [vmem:[%s9327_s1 + $0xf38] sm:$0xff]  }
 0x1dc   :  { %v9199_v47 = vadd.f32 %v6745_v42, %v5187_v41  ;;  %7026 = vmatpush3.bf16.msra.mxu0 %v7583_v44  ;;  %v7616_v41 = vld [vmem:[%s9327_s1 + $0xfb0] sm:$0xff]   ;;  %v7618_v42 = vld [vmem:[%s9327_s1 + $0xff8] sm:$0xff]   ;;  %v1437_v44 = vrot.slane %v9225_v59, %v7737_v35 }
 0x1dd   :  { %7027 = vmatprep.subr.bf16.mxu0 %v7585_v46  ;;  %7048 = vmatpush3.bf16.msra.mxu1 %v7584_v48  ;;  %v7620_v45 = vld [vmem:[%s9327_s1 + $0xfb8] sm:$0xff]  }
 0x1de   :  { %7049 = vmatprep.subr.bf16.mxu1 %v7586_v49  ;;  %v1453_v46 = vcombine.high %v1437_v44, %v1437_v44 }
 0x1e0   :  { %7028 = vmatpush3.bf16.msra.mxu0 %v7587_v50 }
 0x1e1   :  { %7057 = vmatprep.subr.bf16.mxu0 %v7589_v53  ;;  %7050 = vmatpush3.bf16.msra.mxu1 %v7588_v55 }
 0x1e2   :  { %7079 = vmatprep.subr.bf16.mxu1 %v7590_v58 }
 0x1e3   :  { %5745 = vmatmul.mubr.bf16.vlgmr.msra.gmra.mrb[56].mxu0 %v1430_v57 }
 0x1e4   :  { %7058 = vmatpush3.bf16.msra.mxu0 %v7591_v61  ;;  %5785 = vmatmul.mubr.bf16.vlgmr.msra.gmra.mrb[56].mxu1 %v1452_v63 }
 0x1e5   :  { %7059 = vmatprep.subr.bf16.mxu0 %v7593_v0  ;;  %7080 = vmatpush3.bf16.msra.mxu1 %v7592_v2 }
 0x1e6   :  { %5824 = vmatprep.mubr.bf16.mxu0 %v1451_v3  ;;  %7081 = vmatprep.subr.bf16.mxu1 %v7594_v4 }
 0x1e7   :  { %5864 = vmatprep.mubr.bf16.mxu1 %v1455_v6 }
 0x1e8   :  { %7060 = vmatpush3.bf16.msra.mxu0 %v7595_v5 }
 0x1e9   :  { %7061 = vmatprep.subr.bf16.mxu0 %v7597_v7  ;;  %7082 = vmatpush3.bf16.msra.mxu1 %v7596_v8 }
 0x1ea   :  { %7083 = vmatprep.subr.bf16.mxu1 %v7598_v9 }
 0x1ec   :  { %7062 = vmatpush3.bf16.msra.mxu0 %v7599_v10 }
 0x1ed   :  { %7063 = vmatprep.subr.bf16.mxu0 %v7601_v11  ;;  %7084 = vmatpush3.bf16.msra.mxu1 %v7600_v12 }
 0x1ee   :  { %7085 = vmatprep.subr.bf16.mxu1 %v7602_v13 }
 0x1f0   :  { %7064 = vmatpush3.bf16.msra.mxu0 %v7603_v14 }
 0x1f1   :  { %7065 = vmatprep.subr.bf16.mxu0 %v7605_v15  ;;  %7086 = vmatpush3.bf16.msra.mxu1 %v7604_v16 }
 0x1f2   :  { %7087 = vmatprep.subr.bf16.mxu1 %v7606_v17 }
 0x1f4   :  { %7066 = vmatpush3.bf16.msra.mxu0 %v7607_v18 }
 0x1f5   :  { %7067 = vmatprep.subr.bf16.mxu0 %v7609_v19  ;;  %7088 = vmatpush3.bf16.msra.mxu1 %v7608_v20 }
 0x1f6   :  { %v6765_v21 = vpop.f32.mrb[32].mxu0  ;;  %7089 = vmatprep.subr.bf16.mxu1 %v7610_v22 }
 0x1f7   :  { %v6766_v23 = vpop.f32.mrb[33].mxu0  ;;  %v6787_v25 = vpop.f32.mrb[32].mxu1 }
 0x1f8   :  { %v6767_v26 = vadd.f32 %v6766_v23, %v6765_v21  ;;  %v6768_v27 = vpop.f32.mrb[34].mxu0  ;;  %v6788_v30 = vpop.f32.mrb[33].mxu1  ;;  %7068 = vmatpush3.bf16.msra.mxu0 %v7611_v24 }
 0x1f9   :  { %v6769_v31 = vpop.f32.mrb[35].mxu0  ;;  %v6789_v33 = vadd.f32 %v6788_v30, %v6787_v25  ;;  %v6790_v34 = vpop.f32.mrb[34].mxu1  ;;  %7069 = vmatprep.subr.bf16.mxu0 %v7613_v29  ;;  %7090 = vmatpush3.bf16.msra.mxu1 %v7612_v28 }
 0x1fa   :  { %v5267_v32 = vadd.f32 %v6767_v26, %v9199_v47  ;;  %v6791_v37 = vpop.f32.mrb[35].mxu1  ;;  %7091 = vmatprep.subr.bf16.mxu1 %v7614_v36 }
 0x1fc   :  { %v5307_v39 = vadd.f32 %v6789_v33, %v5267_v32  ;;  %7070 = vmatpush3.bf16.msra.mxu0 %v7615_v38 }
 0x1fd   :  { %7071 = vmatprep.subr.bf16.mxu0 %v7617_v40  ;;  %7092 = vmatpush3.bf16.msra.mxu1 %v7616_v41 }
 0x1fe   :  { %7093 = vmatprep.subr.bf16.mxu1 %v7618_v42 }
 0x200   :  { %7072 = vmatpush3.bf16.msra.mxu0 %v7619_v43 }
 0x201   :  { %7094 = vmatpush3.bf16.msra.mxu1 %v7620_v45 }
 0x203   :  { %5825 = vmatmul.mubr.bf16.vlgmr.msra.gmra.mrb[60].mxu0 %v1437_v44 }
 0x204   :  { %5865 = vmatmul.mubr.bf16.vlgmr.msra.gmra.mrb[60].mxu1 %v1453_v46 }
 0x216   :  { %v6809_v47 = vpop.f32.mrb[36].mxu0 }
 0x217   :  { %v6810_v48 = vpop.f32.mrb[37].mxu0  ;;  %v6831_v49 = vpop.f32.mrb[36].mxu1 }
 0x218   :  { %v6811_v50 = vadd.f32 %v6810_v48, %v6809_v47  ;;  %v6812_v51 = vpop.f32.mrb[38].mxu0  ;;  %v6832_v52 = vpop.f32.mrb[37].mxu1 }
 0x219   :  { %v6813_v53 = vpop.f32.mrb[39].mxu0  ;;  %v6833_v35 = vadd.f32 %v6832_v52, %v6831_v49  ;;  %v6834_v55 = vpop.f32.mrb[38].mxu1 }
 0x21a   :  { %v5347_v54 = vadd.f32 %v6811_v50, %v5307_v39  ;;  %v6835_v56 = vpop.f32.mrb[39].mxu1 }
 0x21c   :  { %v5387_v57 = vadd.f32 %v6833_v35, %v5347_v54 }
 0x236   :  { %v6853_v58 = vpop.f32.mrb[40].mxu0 }
 0x237   :  { %v6854_v59 = vpop.f32.mrb[41].mxu0  ;;  %v6875_v60 = vpop.f32.mrb[40].mxu1 }
 0x238   :  { %v6855_v61 = vadd.f32 %v6854_v59, %v6853_v58  ;;  %v6856_v62 = vpop.f32.mrb[42].mxu0  ;;  %v6876_v63 = vpop.f32.mrb[41].mxu1 }
 0x239   :  { %v6857_v0 = vpop.f32.mrb[43].mxu0  ;;  %v6877_v2 = vadd.f32 %v6876_v63, %v6875_v60  ;;  %v6878_v3 = vpop.f32.mrb[42].mxu1 }
 0x23a   :  { %v5427_v1 = vadd.f32 %v6855_v61, %v5387_v57  ;;  %v6879_v4 = vpop.f32.mrb[43].mxu1 }
 0x23c   :  { %v5467_v5 = vadd.f32 %v6877_v2, %v5427_v1 }
 0x256   :  { %v6897_v6 = vpop.f32.mrb[44].mxu0 }
 0x257   :  { %v6898_v7 = vpop.f32.mrb[45].mxu0  ;;  %v6919_v8 = vpop.f32.mrb[44].mxu1 }
 0x258   :  { %v6899_v9 = vadd.f32 %v6898_v7, %v6897_v6  ;;  %v6900_v10 = vpop.f32.mrb[46].mxu0  ;;  %v6920_v11 = vpop.f32.mrb[45].mxu1 }
 0x259   :  { %v6901_v12 = vpop.f32.mrb[47].mxu0  ;;  %v6921_v14 = vadd.f32 %v6920_v11, %v6919_v8  ;;  %v6922_v15 = vpop.f32.mrb[46].mxu1 }
 0x25a   :  { %v5507_v13 = vadd.f32 %v6899_v9, %v5467_v5  ;;  %v6923_v16 = vpop.f32.mrb[47].mxu1 }
 0x25c   :  { %v5547_v17 = vadd.f32 %v6921_v14, %v5507_v13 }
 0x276   :  { %v6941_v18 = vpop.f32.mrb[48].mxu0 }
 0x277   :  { %v6942_v19 = vpop.f32.mrb[49].mxu0  ;;  %v6963_v20 = vpop.f32.mrb[48].mxu1 }
 0x278   :  { %v6943_v21 = vadd.f32 %v6942_v19, %v6941_v18  ;;  %v6944_v22 = vpop.f32.mrb[50].mxu0  ;;  %v6964_v23 = vpop.f32.mrb[49].mxu1 }
 0x279   :  { %v6945_v24 = vpop.f32.mrb[51].mxu0  ;;  %v6965_v26 = vadd.f32 %v6964_v23, %v6963_v20  ;;  %v6966_v27 = vpop.f32.mrb[50].mxu1 }
 0x27a   :  { %v5587_v25 = vadd.f32 %v6943_v21, %v5547_v17  ;;  %v6967_v28 = vpop.f32.mrb[51].mxu1 }
 0x27c   :  { %v5627_v29 = vadd.f32 %v6965_v26, %v5587_v25 }
 0x296   :  { %v6985_v30 = vpop.f32.mrb[52].mxu0 }
 0x297   :  { %v6986_v31 = vpop.f32.mrb[53].mxu0  ;;  %v7007_v32 = vpop.f32.mrb[52].mxu1 }
 0x298   :  { %v6987_v33 = vadd.f32 %v6986_v31, %v6985_v30  ;;  %v6988_v34 = vpop.f32.mrb[54].mxu0  ;;  %v7008_v36 = vpop.f32.mrb[53].mxu1 }
 0x299   :  { %v6989_v37 = vpop.f32.mrb[55].mxu0  ;;  %v7009_v39 = vadd.f32 %v7008_v36, %v7007_v32  ;;  %v7010_v40 = vpop.f32.mrb[54].mxu1 }
 0x29a   :  { %v5667_v38 = vadd.f32 %v6987_v33, %v5627_v29  ;;  %v7011_v41 = vpop.f32.mrb[55].mxu1 }
 0x29c   :  { %v5707_v42 = vadd.f32 %v7009_v39, %v5667_v38 }
 0x2b6   :  { %v7029_v43 = vpop.f32.mrb[56].mxu0 }
 0x2b7   :  { %v7030_v44 = vpop.f32.mrb[57].mxu0  ;;  %v7051_v45 = vpop.f32.mrb[56].mxu1 }
 0x2b8   :  { %v7031_v46 = vadd.f32 %v7030_v44, %v7029_v43  ;;  %v7032_v47 = vpop.f32.mrb[58].mxu0  ;;  %v7052_v48 = vpop.f32.mrb[57].mxu1 }
 0x2b9   :  { %v7033_v49 = vpop.f32.mrb[59].mxu0  ;;  %v7053_v51 = vadd.f32 %v7052_v48, %v7051_v45  ;;  %v7054_v52 = vpop.f32.mrb[58].mxu1 }
 0x2ba   :  { %v5747_v50 = vadd.f32 %v7031_v46, %v5707_v42  ;;  %v7055_v53 = vpop.f32.mrb[59].mxu1 }
 0x2bc   :  { %v5787_v54 = vadd.f32 %v7053_v51, %v5747_v50 }
 0x2d6   :  { %v7073_v35 = vpop.f32.mrb[60].mxu0 }
 0x2d7   :  { %v7074_v55 = vpop.f32.mrb[61].mxu0  ;;  %v7095_v56 = vpop.f32.mrb[60].mxu1 }
 0x2d8   :  { %v7075_v57 = vadd.f32 %v7074_v55, %v7073_v35  ;;  %v7076_v58 = vpop.f32.mrb[62].mxu0  ;;  %v7096_v59 = vpop.f32.mrb[61].mxu1 }
 0x2d9   :  { %v7077_v60 = vpop.f32.mrb[63].mxu0  ;;  %v7097_v62 = vadd.f32 %v7096_v59, %v7095_v56  ;;  %v7098_v63 = vpop.f32.mrb[62].mxu1 }
 0x2da   :  { %v5827_v61 = vadd.f32 %v7075_v57, %v5787_v54  ;;  %v7099_v0 = vpop.f32.mrb[63].mxu1 }
 0x2dc   :  { %v5867_v1 = vadd.f32 %v7097_v62, %v5827_v61 }
 0x2de   :  { %v5872_v2 = vsub.f32 0.0, %v5867_v1 }
 0x2e0   :  { %v5873_v3 = vmul.f32 1.442695, %v5872_v2 }
 0x2e2   :  { %7622 = vpow2.f32 %v5873_v3 }
 0x2ec   :  { %v7623_v4 = vpop.eup %7622 }
 0x2ed   :  { %v5875_v5 = vadd.f32 1.0, %v7623_v4 }
 0x2ef   :  { %7624 = vrcp.f32 %v5875_v5 }
 0x2f9   :  { %v7625_v6 = vpop.eup %7624 }
 0x2fa   :  { %5879 = vst.msk [vmem:[%s9330_s3] sm:$0x3] %vm5878_vm0, %v7625_v6 }

</bundles_post_ra>
